<compile_context>
chip_gen: v5e
topology: v5e:2x2
jax: 0.10.0
libtpu: 0.0.40
codegen_flags: <defaults>
</compile_context>

<pallas_src>
import math

import numpy as np
import jax
import jax.numpy as jnp
from jax import lax
from jax.experimental import pallas as pl
from jax.experimental.pallas import tpu as pltpu

_INV_SQRT2 = 0.7071067811865476


def _gelu(x):
    # exact GELU (PyTorch nn.GELU default): 0.5*x*(1+erf(x/sqrt(2)))
    return 0.5 * x * (1.0 + lax.erf(x * _INV_SQRT2))


# ---------------------------------------------------------------------------
# Padded-flat layout helpers (host side).
#   A spatial-HxH activation for B images is stored as (C, L) with
#   L = B*(H+2)*(H+2); flat index = (b*(H+2) + y)*(H+2) + x.
#   The 1-pixel border (the convs' padding=1 zeros) is kept at exactly zero.
# ---------------------------------------------------------------------------
def _flat(b, y, x, hp):
    return (b * hp + y) * hp + x


def _interior_mask(batch, h):
    hp = h + 2
    m = np.zeros((1, batch * hp * hp), np.float32)
    for b in range(batch):
        for y in range(1, h + 1):
            for x in range(1, h + 1):
                m[0, _flat(b, y, x, hp)] = 1.0
    return m


def _down_matrix(batch, hb):
    """(L_big, L_small) 0/1 matrix: small interior (ys,xs) <- big interior (2ys-1,2xs-1).

    Right-multiplying a (C, L_big) activation by it implements the subsampling of
    a stride-2 conv; its transpose implements the zero-insertion scatter of a
    stride-2 ConvTranspose (both directly in the padded-flat layout)."""
    hs = hb // 2
    hpb, hps = hb + 2, hs + 2
    d = np.zeros((batch * hpb * hpb, batch * hps * hps), np.float32)
    for b in range(batch):
        for ys in range(1, hs + 1):
            for xs in range(1, hs + 1):
                d[_flat(b, 2 * ys - 1, 2 * xs - 1, hpb), _flat(b, ys, xs, hps)] = 1.0
    return d


# ---------------------------------------------------------------------------
# Synthetic parameters (PyTorch-like init) with BatchNorm folded into weights.
# ---------------------------------------------------------------------------
def _uniform(key, shape, bound):
    return jax.random.uniform(key, shape, jnp.float32, -bound, bound)


def _init_bn(key, c):
    k1, k2, k3, k4 = jax.random.split(key, 4)
    gamma = 1.0 + 0.1 * jax.random.normal(k1, (c,), jnp.float32)
    beta = 0.1 * jax.random.normal(k2, (c,), jnp.float32)
    mean = 0.1 * jax.random.normal(k3, (c,), jnp.float32)
    var = 0.5 + jax.random.uniform(k4, (c,), jnp.float32)
    return gamma, beta, mean, var


def _fold_bn(conv_bias, gamma, beta, mean, var, eps=1e-5):
    scale = gamma / jnp.sqrt(var + eps)
    bias = (conv_bias - mean) * scale + beta
    return scale, bias


def _conv3_taps(key, cin, cout, bn_key):
    """nn.Conv2d(cin,cout,3) [+BN folded] -> taps (9, cout, cin), bias (cout, 1)."""
    k1, k2 = jax.random.split(key)
    bound = 1.0 / math.sqrt(cin * 9)
    w = _uniform(k1, (cout, cin, 3, 3), bound)          # PyTorch Conv2d layout
    b = _uniform(k2, (cout,), bound)
    taps = jnp.stack([w[:, :, t // 3, t % 3] for t in range(9)], axis=0)
    if bn_key is not None:
        scale, b = _fold_bn(b, *_init_bn(bn_key, cout))
        taps = taps * scale[None, :, None]
    return taps, b.reshape(cout, 1)


def _convT3_taps(key, cin, cout, bn_key):
    """nn.ConvTranspose2d(cin,cout,3)+BN as equivalent forward-conv taps
    (spatially flipped, in/out channels swapped), BN folded."""
    k1, k2 = jax.random.split(key)
    bound = 1.0 / math.sqrt(cin * 9)
    w = _uniform(k1, (cin, cout, 3, 3), bound)          # PyTorch ConvTranspose2d layout
    b = _uniform(k2, (cout,), bound)
    taps = jnp.stack([w[:, :, 2 - t // 3, 2 - t % 3].T for t in range(9)], axis=0)
    scale, b = _fold_bn(b, *_init_bn(bn_key, cout))
    return taps * scale[None, :, None], b.reshape(cout, 1)


def _conv1_mat(key, cin, cout, bn_key):
    k1, k2 = jax.random.split(key)
    bound = 1.0 / math.sqrt(cin)
    w = _uniform(k1, (cout, cin), bound)
    b = _uniform(k2, (cout,), bound)
    if bn_key is not None:
        scale, b = _fold_bn(b, *_init_bn(bn_key, cout))
        w = w * scale[:, None]
    return w, b.reshape(cout, 1)


def _convT1_mat(key, cin, cout, bn_key):
    k1, k2 = jax.random.split(key)
    bound = 1.0 / math.sqrt(cin)
    w = _uniform(k1, (cin, cout), bound)                # (in, out) layout
    b = _uniform(k2, (cout,), bound)
    scale, b = _fold_bn(b, *_init_bn(bn_key, cout))
    return w.T * scale[:, None], b.reshape(cout, 1)


# ---------------------------------------------------------------------------
# Model builder: returns a jitted forward(x_nchw) backed by ONE pallas_call.
# ---------------------------------------------------------------------------
def build_conv_autoencoder(key, *, batch, in_channels, channels,
                           input_resolution, final_resolution,
                           num_blocks, num_convs):
    assert num_blocks > 0
    ratio = input_resolution / final_resolution
    assert ratio > 0 and math.isclose(2 ** round(math.log2(ratio)), ratio), \
        "only the power-of-two resolution path is implemented"
    # TODO(synk): AdaptiveAvgPool2d / bilinear Upsample path (non power-of-two
    # resolution ratios) and the optional RMSNorm encode/decode_norm are not
    # implemented (they are Identity / disabled for this configuration).
    required_downsampling = int(round(math.log2(ratio)))
    assert num_blocks >= required_downsampling
    strides = [1] * num_blocks
    for i in range(num_blocks - required_downsampling, num_blocks):
        strides[i] = 2
    dec_strides = strides[::-1]

    C = channels
    has_init = in_channels != channels

    def L_of(h):
        return batch * (h + 2) * (h + 2)

    # ---- stage geometry ---------------------------------------------------
    enc_sizes, s = [], input_resolution
    for st in strides:
        enc_sizes.append(s)
        if st == 2:
            s //= 2
    assert s == final_resolution
    dec_sizes = []
    for st in dec_strides:
        dec_sizes.append(s)
        if st == 2:
            s *= 2
    out_size = s

    all_sizes = {input_resolution, out_size}
    all_sizes.update(enc_sizes)
    all_sizes.update(dec_sizes)
    all_sizes.update(sz // 2 for sz, st in zip(enc_sizes, strides) if st == 2)
    all_sizes.update(sz * 2 for sz, st in zip(dec_sizes, dec_strides) if st == 2)
    all_sizes = sorted(all_sizes, reverse=True)
    mask_index = {h: i for i, h in enumerate(all_sizes)}
    mask_arrays = tuple(jnp.asarray(_interior_mask(batch, h)) for h in all_sizes)

    down_sizes = sorted({sz for sz, st in zip(enc_sizes, strides) if st == 2},
                        reverse=True)
    up_sizes = sorted({sz for sz, st in zip(dec_sizes, dec_strides) if st == 2})
    d_np = {h: _down_matrix(batch, h) for h in down_sizes}
    for h in up_sizes:
        if 2 * h not in d_np:
            d_np[2 * h] = _down_matrix(batch, 2 * h)
    D_index = {h: i for i, h in enumerate(down_sizes)}
    U_index = {h: i for i, h in enumerate(up_sizes)}
    D_arrays = tuple(jnp.asarray(d_np[h]) for h in down_sizes)
    U_arrays = tuple(jnp.asarray(np.ascontiguousarray(d_np[2 * h].T)) for h in up_sizes)

    # ---- parameters (built in exactly the traversal order the kernel uses) --
    taps_list, b3_list, scw_list, scb_list, block_descs = [], [], [], [], []
    if has_init:
        key, k = jax.random.split(key)
        w_init, b_init = _conv1_mat(k, in_channels, C, bn_key=None)
    for st in strides:                                   # encoder blocks
        key, k1, kb1 = jax.random.split(key, 3)
        t, b = _conv3_taps(k1, C, C, kb1)
        taps_list.append(t); b3_list.append(b)
        for _ in range(num_convs - 1):
            key, k2, kb2 = jax.random.split(key, 3)
            t, b = _conv3_taps(k2, C, C, kb2)
            taps_list.append(t); b3_list.append(b)
        has_sc = st != 1                                 # in_ch == out_ch inside blocks
        if has_sc:
            key, k3, kb3 = jax.random.split(key, 3)
            w, b = _conv1_mat(k3, C, C, kb3)
            scw_list.append(w); scb_list.append(b)
        block_descs.append(("enc", st, has_sc))
    for st in dec_strides:                               # decoder blocks
        key, k1, kb1 = jax.random.split(key, 3)
        t, b = _convT3_taps(k1, C, C, kb1)
        taps_list.append(t); b3_list.append(b)
        for _ in range(num_convs - 1):
            key, k2, kb2 = jax.random.split(key, 3)
            t, b = _conv3_taps(k2, C, C, kb2)
            taps_list.append(t); b3_list.append(b)
        key, k3, kb3 = jax.random.split(key, 3)
        w, b = _convT1_mat(k3, C, C, kb3)
        scw_list.append(w); scb_list.append(b)
        block_descs.append(("dec", st, True))

    taps_all = jnp.concatenate(taps_list, axis=0)        # (n3*9, C, C), BN folded
    b3_all = jnp.stack(b3_list, axis=0)                  # (n3, C, 1)
    scw_all = jnp.stack(scw_list, axis=0)                # (nsc, C, C)
    scb_all = jnp.stack(scb_list, axis=0)                # (nsc, C, 1)

    weight_args = ((w_init, b_init) if has_init else ()) + \
                  (taps_all, b3_all, scw_all, scb_all)
    const_args = mask_arrays + D_arrays + U_arrays

    n_masks, n_D, n_U = len(mask_arrays), len(D_arrays), len(U_arrays)
    MAXL = max(L_of(h) for h in all_sizes)
    MARG = max(128, max(all_sizes) + 3)                  # >= max |tap shift| = (H+2)+1
    SW = MAXL + 2 * MARG
    out_L = L_of(out_size)

    # ---- the single fused kernel -------------------------------------------
    def kernel(*refs):
        i = 0
        x_ref = refs[i]; i += 1
        mask_refs = refs[i:i + n_masks]; i += n_masks
        d_refs = refs[i:i + n_D]; i += n_D
        u_refs = refs[i:i + n_U]; i += n_U
        if has_init:
            wi_ref, bi_ref = refs[i], refs[i + 1]; i += 2
        taps_ref, b3_ref, scw_ref, scb_ref = refs[i:i + 4]; i += 4
        out_ref, scratch = refs[i], refs[i + 1]

        # Zero the scratch once so shifted-window reads never touch
        # uninitialized VMEM (pad lanes are re-masked after every layer).
        scratch[...] = jnp.zeros((C, SW), jnp.float32)

        def mask_of(h):
            return mask_refs[mask_index[h]][...]

        def conv3x3(a, h, tap_base):
            """'same' 3x3 conv (stride 1) in padded-flat layout: in-kernel
            im2col via 9 shifted-window matmul accumulations."""
            wp = h + 2
            L = L_of(h)
            scratch[:, MARG:MARG + L] = a
            acc = None
            for t in range(9):
                ky, kx = divmod(t, 3)
                off = MARG + (ky - 1) * wp + (kx - 1)
                win = scratch[:, off:off + L]
                p = jnp.dot(taps_ref[tap_base + t], win,
                            preferred_element_type=jnp.float32)
                acc = p if acc is None else acc + p
            return acc

        counters = {"t3": 0, "sc": 0}

        def next3():
            v = counters["t3"]; counters["t3"] += 1
            return v

        def nextsc():
            v = counters["sc"]; counters["sc"] += 1
            return v

        a = x_ref[...]
        h = input_resolution
        if has_init:  # initial 1x1 conv (bias, no BN, no activation)
            a = (jnp.dot(wi_ref[...], a, preferred_element_type=jnp.float32)
                 + bi_ref[...]) * mask_of(h)

        for kind, st, has_sc in block_descs:
            block_in = a
            if kind == "enc":
                li = next3()
                acc = conv3x3(block_in, h, li * 9)
                if st == 2:
                    acc = acc * mask_of(h)
                    acc = jnp.dot(acc, d_refs[D_index[h]][...],
                                  preferred_element_type=jnp.float32)
                    h_out = h // 2
                else:
                    h_out = h
                m_out = mask_of(h_out)
                y = _gelu(acc + b3_ref[li]) * m_out
                for _ in range(num_convs - 1):
                    li = next3()
                    y = _gelu(conv3x3(y, h_out, li * 9) + b3_ref[li]) * m_out
                if has_sc:  # 1x1 stride-s conv + BN shortcut
                    si = nextsc()
                    xin = block_in
                    if st == 2:
                        xin = jnp.dot(xin, d_refs[D_index[h]][...],
                                      preferred_element_type=jnp.float32)
                    res = (jnp.dot(scw_ref[si], xin,
                                   preferred_element_type=jnp.float32)
                           + scb_ref[si]) * m_out
                else:
                    res = block_in
            else:  # decoder (residual ConvTranspose block)
                if st == 2:  # zero-insertion upsample via selection matmul
                    up = jnp.dot(block_in, u_refs[U_index[h]][...],
                                 preferred_element_type=jnp.float32)
                    h_out = h * 2
                else:
                    up = block_in
                    h_out = h
                m_out = mask_of(h_out)
                li = next3()  # ConvT 3x3 == conv of flipped taps on upsampled input
                y = _gelu(conv3x3(up, h_out, li * 9) + b3_ref[li]) * m_out
                for _ in range(num_convs - 1):
                    li = next3()
                    y = _gelu(conv3x3(y, h_out, li * 9) + b3_ref[li]) * m_out
                si = nextsc()  # ConvT 1x1 stride-s + BN shortcut
                res = (jnp.dot(scw_ref[si], up,
                               preferred_element_type=jnp.float32)
                       + scb_ref[si]) * m_out
            a = y + res                                  # fused residual add
            h = h_out

        out_ref[...] = a                                 # lane-dense (C, L) store

    fused = pl.pallas_call(
        kernel,
        out_shape=jax.ShapeDtypeStruct((C, out_L), jnp.float32),
        scratch_shapes=[pltpu.VMEM((C, SW), jnp.float32)],
    )

    hp_in, hp_out = input_resolution + 2, out_size + 2

    @jax.jit
    def _fwd(x_nchw, consts, weights):
        # NCHW -> channel-major padded-flat layout (host-side layout plumbing only)
        xc = jnp.transpose(x_nchw, (1, 0, 2, 3))
        xp = jnp.pad(xc, ((0, 0), (0, 0), (1, 1), (1, 1)))
        xf = xp.reshape(xc.shape[0], batch * hp_in * hp_in)
        of = fused(xf, *consts, *weights)                # ONE Pallas launch
        of = of.reshape(C, batch, hp_out, hp_out)[:, :, 1:out_size + 1, 1:out_size + 1]
        return jnp.transpose(of, (1, 0, 2, 3))           # back to NCHW

    def forward(x_nchw):
        return _fwd(x_nchw, const_args, weight_args)

    return forward


# ---------------------------------------------------------------------------
if __name__ == "__main__":
    # Config consistent with the module: in_channels=4, channels=8,
    # input_resolution=16, final_resolution=4, num_blocks=2, num_convs=2,
    # encode_norm=False, decode_norm=False, activation='gelu'.
    batch = 2
    in_channels, channels = 4, 8
    input_resolution, final_resolution = 16, 4
    num_blocks, num_convs = 2, 2

    key = jax.random.PRNGKey(0)
    key, kx, kp = jax.random.split(key, 3)
    x = jax.random.normal(
        kx, (batch, in_channels, input_resolution, input_resolution), jnp.float32)

    forward = build_conv_autoencoder(
        kp, batch=batch, in_channels=in_channels, channels=channels,
        input_resolution=input_resolution, final_resolution=final_resolution,
        num_blocks=num_blocks, num_convs=num_convs)

    out = jax.block_until_ready(forward(x))
    assert out.shape == (batch, channels, input_resolution, input_resolution), out.shape
    assert bool(jnp.isfinite(out).all()), "non-finite values in output"
    print("KERNEL_OK")
</pallas_src>

<mosaic_0001>
module attributes {stable_mosaic.version = 11 : i64} {
  func.func @kernel(%arg0: memref<4x648xf32, #tpu.memory_space<vmem>>, %arg1: memref<1x648xf32, #tpu.memory_space<vmem>>, %arg2: memref<1x200xf32, #tpu.memory_space<vmem>>, %arg3: memref<1x72xf32, #tpu.memory_space<vmem>>, %arg4: memref<648x200xf32, #tpu.memory_space<vmem>>, %arg5: memref<200x72xf32, #tpu.memory_space<vmem>>, %arg6: memref<72x200xf32, #tpu.memory_space<vmem>>, %arg7: memref<200x648xf32, #tpu.memory_space<vmem>>, %arg8: memref<8x4xf32, #tpu.memory_space<vmem>>, %arg9: memref<8x1xf32, #tpu.memory_space<vmem>>, %arg10: memref<72x8x8xf32, #tpu.memory_space<vmem>>, %arg11: memref<8x8x1xf32, #tpu.memory_space<vmem>>, %arg12: memref<4x8x8xf32, #tpu.memory_space<vmem>>, %arg13: memref<4x8x1xf32, #tpu.memory_space<vmem>>, %arg14: memref<8x648xf32, #tpu.memory_space<vmem>>, %arg15: memref<8x904xf32, #tpu.memory_space<vmem>>) attributes {dimension_semantics = [], scalar_prefetch = 0 : i64, scratch_operands = 1 : i64, tpu.core_type = #tpu.core_type<tc>} {
    %cst = arith.constant 0.000000e+00 : f32
    %0 = vector.broadcast %cst : f32 to vector<8x904xf32>
    %c0 = arith.constant 0 : index
    %c0_0 = arith.constant 0 : index
    %1 = vector.load %arg15[%c0, %c0_0] : memref<8x904xf32, #tpu.memory_space<vmem>>, vector<8x904xf32>
    tpu.vector_store %arg15[%c0, %c0_0], %0 {strides = array<i32>} : memref<8x904xf32, #tpu.memory_space<vmem>>, vector<8x904xf32>,
    %c0_1 = arith.constant 0 : index
    %c0_2 = arith.constant 0 : index
    %2 = vector.load %arg0[%c0_1, %c0_2] : memref<4x648xf32, #tpu.memory_space<vmem>>, vector<4x648xf32>
    %c0_3 = arith.constant 0 : index
    %c0_4 = arith.constant 0 : index
    %3 = vector.load %arg8[%c0_3, %c0_4] : memref<8x4xf32, #tpu.memory_space<vmem>>, vector<8x4xf32>
    %cst_5 = arith.constant dense<0.000000e+00> : vector<8x648xf32>
    %4 = tpu.matmul %3, %2, %cst_5 {dimension_numbers = #tpu.dot_dimension_numbers<[1], [0], [0], [1], [0, 0, 1, 1], [], []>} : vector<8x4xf32>, vector<4x648xf32>, vector<8x648xf32> -> vector<8x648xf32>
    %c0_6 = arith.constant 0 : index
    %c0_7 = arith.constant 0 : index
    %5 = vector.load %arg9[%c0_6, %c0_7] : memref<8x1xf32, #tpu.memory_space<vmem>>, vector<8x1xf32>
    %6 = vector.broadcast %5 : vector<8x1xf32> to vector<8x648xf32>
    %7 = arith.addf %4, %6 : vector<8x648xf32>
    %c0_8 = arith.constant 0 : index
    %c0_9 = arith.constant 0 : index
    %8 = vector.load %arg1[%c0_8, %c0_9] : memref<1x648xf32, #tpu.memory_space<vmem>>, vector<1x648xf32>
    %9 = vector.broadcast %8 : vector<1x648xf32> to vector<8x648xf32>
    %10 = arith.mulf %7, %9 : vector<8x648xf32>
    %c0_10 = arith.constant 0 : index
    %c128 = arith.constant 128 : index
    %11 = vector.load %arg15[%c0_10, %c128] : memref<8x904xf32, #tpu.memory_space<vmem>>, vector<8x648xf32>
    tpu.vector_store %arg15[%c0_10, %c128], %10 {strides = array<i32>} : memref<8x904xf32, #tpu.memory_space<vmem>>, vector<8x648xf32>,
    %c0_11 = arith.constant 0 : index
    %c109 = arith.constant 109 : index
    %12 = vector.load %arg15[%c0_11, %c109] : memref<8x904xf32, #tpu.memory_space<vmem>>, vector<8x648xf32>
    %c0_12 = arith.constant 0 : index
    %c0_13 = arith.constant 0 : index
    %c0_14 = arith.constant 0 : index
    %13 = vector.load %arg10[%c0_12, %c0_13, %c0_14] : memref<72x8x8xf32, #tpu.memory_space<vmem>>, vector<1x8x8xf32>
    %14 = vector.shape_cast %13 : vector<1x8x8xf32> to vector<8x8xf32>
    %cst_15 = arith.constant dense<0.000000e+00> : vector<8x648xf32>
    %15 = tpu.matmul %14, %12, %cst_15 {dimension_numbers = #tpu.dot_dimension_numbers<[1], [0], [0], [1], [0, 0, 1, 1], [], []>} : vector<8x8xf32>, vector<8x648xf32>, vector<8x648xf32> -> vector<8x648xf32>
    %c0_16 = arith.constant 0 : index
    %c110 = arith.constant 110 : index
    %16 = vector.load %arg15[%c0_16, %c110] : memref<8x904xf32, #tpu.memory_space<vmem>>, vector<8x648xf32>
    %c1 = arith.constant 1 : index
    %c0_17 = arith.constant 0 : index
    %c0_18 = arith.constant 0 : index
    %17 = vector.load %arg10[%c1, %c0_17, %c0_18] : memref<72x8x8xf32, #tpu.memory_space<vmem>>, vector<1x8x8xf32>
    %18 = vector.shape_cast %17 : vector<1x8x8xf32> to vector<8x8xf32>
    %cst_19 = arith.constant dense<0.000000e+00> : vector<8x648xf32>
    %19 = tpu.matmul %18, %16, %cst_19 {dimension_numbers = #tpu.dot_dimension_numbers<[1], [0], [0], [1], [0, 0, 1, 1], [], []>} : vector<8x8xf32>, vector<8x648xf32>, vector<8x648xf32> -> vector<8x648xf32>
    %20 = arith.addf %15, %19 : vector<8x648xf32>
    %c0_20 = arith.constant 0 : index
    %c111 = arith.constant 111 : index
    %21 = vector.load %arg15[%c0_20, %c111] : memref<8x904xf32, #tpu.memory_space<vmem>>, vector<8x648xf32>
    %c2 = arith.constant 2 : index
    %c0_21 = arith.constant 0 : index
    %c0_22 = arith.constant 0 : index
    %22 = vector.load %arg10[%c2, %c0_21, %c0_22] : memref<72x8x8xf32, #tpu.memory_space<vmem>>, vector<1x8x8xf32>
    %23 = vector.shape_cast %22 : vector<1x8x8xf32> to vector<8x8xf32>
    %cst_23 = arith.constant dense<0.000000e+00> : vector<8x648xf32>
    %24 = tpu.matmul %23, %21, %cst_23 {dimension_numbers = #tpu.dot_dimension_numbers<[1], [0], [0], [1], [0, 0, 1, 1], [], []>} : vector<8x8xf32>, vector<8x648xf32>, vector<8x648xf32> -> vector<8x648xf32>
    %25 = arith.addf %20, %24 : vector<8x648xf32>
    %c0_24 = arith.constant 0 : index
    %c127 = arith.constant 127 : index
    %26 = vector.load %arg15[%c0_24, %c127] : memref<8x904xf32, #tpu.memory_space<vmem>>, vector<8x648xf32>
    %c3 = arith.constant 3 : index
    %c0_25 = arith.constant 0 : index
    %c0_26 = arith.constant 0 : index
    %27 = vector.load %arg10[%c3, %c0_25, %c0_26] : memref<72x8x8xf32, #tpu.memory_space<vmem>>, vector<1x8x8xf32>
    %28 = vector.shape_cast %27 : vector<1x8x8xf32> to vector<8x8xf32>
    %cst_27 = arith.constant dense<0.000000e+00> : vector<8x648xf32>
    %29 = tpu.matmul %28, %26, %cst_27 {dimension_numbers = #tpu.dot_dimension_numbers<[1], [0], [0], [1], [0, 0, 1, 1], [], []>} : vector<8x8xf32>, vector<8x648xf32>, vector<8x648xf32> -> vector<8x648xf32>
    %30 = arith.addf %25, %29 : vector<8x648xf32>
    %c0_28 = arith.constant 0 : index
    %c128_29 = arith.constant 128 : index
    %31 = vector.load %arg15[%c0_28, %c128_29] : memref<8x904xf32, #tpu.memory_space<vmem>>, vector<8x648xf32>
    %c4 = arith.constant 4 : index
    %c0_30 = arith.constant 0 : index
    %c0_31 = arith.constant 0 : index
    %32 = vector.load %arg10[%c4, %c0_30, %c0_31] : memref<72x8x8xf32, #tpu.memory_space<vmem>>, vector<1x8x8xf32>
    %33 = vector.shape_cast %32 : vector<1x8x8xf32> to vector<8x8xf32>
    %cst_32 = arith.constant dense<0.000000e+00> : vector<8x648xf32>
    %34 = tpu.matmul %33, %31, %cst_32 {dimension_numbers = #tpu.dot_dimension_numbers<[1], [0], [0], [1], [0, 0, 1, 1], [], []>} : vector<8x8xf32>, vector<8x648xf32>, vector<8x648xf32> -> vector<8x648xf32>
    %35 = arith.addf %30, %34 : vector<8x648xf32>
    %c0_33 = arith.constant 0 : index
    %c129 = arith.constant 129 : index
    %36 = vector.load %arg15[%c0_33, %c129] : memref<8x904xf32, #tpu.memory_space<vmem>>, vector<8x648xf32>
    %c5 = arith.constant 5 : index
    %c0_34 = arith.constant 0 : index
    %c0_35 = arith.constant 0 : index
    %37 = vector.load %arg10[%c5, %c0_34, %c0_35] : memref<72x8x8xf32, #tpu.memory_space<vmem>>, vector<1x8x8xf32>
    %38 = vector.shape_cast %37 : vector<1x8x8xf32> to vector<8x8xf32>
    %cst_36 = arith.constant dense<0.000000e+00> : vector<8x648xf32>
    %39 = tpu.matmul %38, %36, %cst_36 {dimension_numbers = #tpu.dot_dimension_numbers<[1], [0], [0], [1], [0, 0, 1, 1], [], []>} : vector<8x8xf32>, vector<8x648xf32>, vector<8x648xf32> -> vector<8x648xf32>
    %40 = arith.addf %35, %39 : vector<8x648xf32>
    %c0_37 = arith.constant 0 : index
    %c145 = arith.constant 145 : index
    %41 = vector.load %arg15[%c0_37, %c145] : memref<8x904xf32, #tpu.memory_space<vmem>>, vector<8x648xf32>
    %c6 = arith.constant 6 : index
    %c0_38 = arith.constant 0 : index
    %c0_39 = arith.constant 0 : index
    %42 = vector.load %arg10[%c6, %c0_38, %c0_39] : memref<72x8x8xf32, #tpu.memory_space<vmem>>, vector<1x8x8xf32>
    %43 = vector.shape_cast %42 : vector<1x8x8xf32> to vector<8x8xf32>
    %cst_40 = arith.constant dense<0.000000e+00> : vector<8x648xf32>
    %44 = tpu.matmul %43, %41, %cst_40 {dimension_numbers = #tpu.dot_dimension_numbers<[1], [0], [0], [1], [0, 0, 1, 1], [], []>} : vector<8x8xf32>, vector<8x648xf32>, vector<8x648xf32> -> vector<8x648xf32>
    %45 = arith.addf %40, %44 : vector<8x648xf32>
    %c0_41 = arith.constant 0 : index
    %c146 = arith.constant 146 : index
    %46 = vector.load %arg15[%c0_41, %c146] : memref<8x904xf32, #tpu.memory_space<vmem>>, vector<8x648xf32>
    %c7 = arith.constant 7 : index
    %c0_42 = arith.constant 0 : index
    %c0_43 = arith.constant 0 : index
    %47 = vector.load %arg10[%c7, %c0_42, %c0_43] : memref<72x8x8xf32, #tpu.memory_space<vmem>>, vector<1x8x8xf32>
    %48 = vector.shape_cast %47 : vector<1x8x8xf32> to vector<8x8xf32>
    %cst_44 = arith.constant dense<0.000000e+00> : vector<8x648xf32>
    %49 = tpu.matmul %48, %46, %cst_44 {dimension_numbers = #tpu.dot_dimension_numbers<[1], [0], [0], [1], [0, 0, 1, 1], [], []>} : vector<8x8xf32>, vector<8x648xf32>, vector<8x648xf32> -> vector<8x648xf32>
    %50 = arith.addf %45, %49 : vector<8x648xf32>
    %c0_45 = arith.constant 0 : index
    %c147 = arith.constant 147 : index
    %51 = vector.load %arg15[%c0_45, %c147] : memref<8x904xf32, #tpu.memory_space<vmem>>, vector<8x648xf32>
    %c8 = arith.constant 8 : index
    %c0_46 = arith.constant 0 : index
    %c0_47 = arith.constant 0 : index
    %52 = vector.load %arg10[%c8, %c0_46, %c0_47] : memref<72x8x8xf32, #tpu.memory_space<vmem>>, vector<1x8x8xf32>
    %53 = vector.shape_cast %52 : vector<1x8x8xf32> to vector<8x8xf32>
    %cst_48 = arith.constant dense<0.000000e+00> : vector<8x648xf32>
    %54 = tpu.matmul %53, %51, %cst_48 {dimension_numbers = #tpu.dot_dimension_numbers<[1], [0], [0], [1], [0, 0, 1, 1], [], []>} : vector<8x8xf32>, vector<8x648xf32>, vector<8x648xf32> -> vector<8x648xf32>
    %55 = arith.addf %50, %54 : vector<8x648xf32>
    %c0_49 = arith.constant 0 : index
    %c0_50 = arith.constant 0 : index
    %56 = vector.load %arg1[%c0_49, %c0_50] : memref<1x648xf32, #tpu.memory_space<vmem>>, vector<1x648xf32>
    %57 = vector.broadcast %56 : vector<1x648xf32> to vector<8x648xf32>
    %58 = arith.mulf %55, %57 : vector<8x648xf32>
    %c0_51 = arith.constant 0 : index
    %c0_52 = arith.constant 0 : index
    %59 = vector.load %arg4[%c0_51, %c0_52] : memref<648x200xf32, #tpu.memory_space<vmem>>, vector<648x200xf32>
    %cst_53 = arith.constant dense<0.000000e+00> : vector<8x200xf32>
    %60 = tpu.matmul %58, %59, %cst_53 {dimension_numbers = #tpu.dot_dimension_numbers<[1], [0], [0], [1], [0, 0, 1, 1], [], []>} : vector<8x648xf32>, vector<648x200xf32>, vector<8x200xf32> -> vector<8x200xf32>
    %c0_54 = arith.constant 0 : index
    %c0_55 = arith.constant 0 : index
    %61 = vector.load %arg2[%c0_54, %c0_55] : memref<1x200xf32, #tpu.memory_space<vmem>>, vector<1x200xf32>
    %c0_56 = arith.constant 0 : index
    %c0_57 = arith.constant 0 : index
    %c0_58 = arith.constant 0 : index
    %62 = vector.load %arg11[%c0_56, %c0_57, %c0_58] : memref<8x8x1xf32, #tpu.memory_space<vmem>>, vector<1x8x1xf32>
    %63 = vector.shape_cast %62 : vector<1x8x1xf32> to vector<8x1xf32>
    %64 = vector.broadcast %63 : vector<8x1xf32> to vector<8x200xf32>
    %65 = arith.addf %60, %64 : vector<8x200xf32>
    %cst_59 = arith.constant 5.000000e-01 : f32
    %66 = vector.broadcast %cst_59 : f32 to vector<8x200xf32>
    %67 = arith.mulf %66, %65 : vector<8x200xf32>
    %cst_60 = arith.constant 0.707106769 : f32
    %68 = vector.broadcast %cst_60 : f32 to vector<8x200xf32>
    %69 = arith.mulf %65, %68 : vector<8x200xf32>
    %70 = math.erf %69 : vector<8x200xf32>
    %cst_61 = arith.constant 1.000000e+00 : f32
    %71 = vector.broadcast %cst_61 : f32 to vector<8x200xf32>
    %72 = arith.addf %71, %70 : vector<8x200xf32>
    %73 = arith.mulf %67, %72 : vector<8x200xf32>
    %74 = vector.broadcast %61 : vector<1x200xf32> to vector<8x200xf32>
    %75 = arith.mulf %73, %74 : vector<8x200xf32>
    %c0_62 = arith.constant 0 : index
    %c128_63 = arith.constant 128 : index
    %76 = vector.load %arg15[%c0_62, %c128_63] : memref<8x904xf32, #tpu.memory_space<vmem>>, vector<8x200xf32>
    tpu.vector_store %arg15[%c0_62, %c128_63], %75 {strides = array<i32>} : memref<8x904xf32, #tpu.memory_space<vmem>>, vector<8x200xf32>,
    %c0_64 = arith.constant 0 : index
    %c117 = arith.constant 117 : index
    %77 = vector.load %arg15[%c0_64, %c117] : memref<8x904xf32, #tpu.memory_space<vmem>>, vector<8x200xf32>
    %c9 = arith.constant 9 : index
    %c0_65 = arith.constant 0 : index
    %c0_66 = arith.constant 0 : index
    %78 = vector.load %arg10[%c9, %c0_65, %c0_66] : memref<72x8x8xf32, #tpu.memory_space<vmem>>, vector<1x8x8xf32>
    %79 = vector.shape_cast %78 : vector<1x8x8xf32> to vector<8x8xf32>
    %cst_67 = arith.constant dense<0.000000e+00> : vector<8x200xf32>
    %80 = tpu.matmul %79, %77, %cst_67 {dimension_numbers = #tpu.dot_dimension_numbers<[1], [0], [0], [1], [0, 0, 1, 1], [], []>} : vector<8x8xf32>, vector<8x200xf32>, vector<8x200xf32> -> vector<8x200xf32>
    %c0_68 = arith.constant 0 : index
    %c118 = arith.constant 118 : index
    %81 = vector.load %arg15[%c0_68, %c118] : memref<8x904xf32, #tpu.memory_space<vmem>>, vector<8x200xf32>
    %c10 = arith.constant 10 : index
    %c0_69 = arith.constant 0 : index
    %c0_70 = arith.constant 0 : index
    %82 = vector.load %arg10[%c10, %c0_69, %c0_70] : memref<72x8x8xf32, #tpu.memory_space<vmem>>, vector<1x8x8xf32>
    %83 = vector.shape_cast %82 : vector<1x8x8xf32> to vector<8x8xf32>
    %cst_71 = arith.constant dense<0.000000e+00> : vector<8x200xf32>
    %84 = tpu.matmul %83, %81, %cst_71 {dimension_numbers = #tpu.dot_dimension_numbers<[1], [0], [0], [1], [0, 0, 1, 1], [], []>} : vector<8x8xf32>, vector<8x200xf32>, vector<8x200xf32> -> vector<8x200xf32>
    %85 = arith.addf %80, %84 : vector<8x200xf32>
    %c0_72 = arith.constant 0 : index
    %c119 = arith.constant 119 : index
    %86 = vector.load %arg15[%c0_72, %c119] : memref<8x904xf32, #tpu.memory_space<vmem>>, vector<8x200xf32>
    %c11 = arith.constant 11 : index
    %c0_73 = arith.constant 0 : index
    %c0_74 = arith.constant 0 : index
    %87 = vector.load %arg10[%c11, %c0_73, %c0_74] : memref<72x8x8xf32, #tpu.memory_space<vmem>>, vector<1x8x8xf32>
    %88 = vector.shape_cast %87 : vector<1x8x8xf32> to vector<8x8xf32>
    %cst_75 = arith.constant dense<0.000000e+00> : vector<8x200xf32>
    %89 = tpu.matmul %88, %86, %cst_75 {dimension_numbers = #tpu.dot_dimension_numbers<[1], [0], [0], [1], [0, 0, 1, 1], [], []>} : vector<8x8xf32>, vector<8x200xf32>, vector<8x200xf32> -> vector<8x200xf32>
    %90 = arith.addf %85, %89 : vector<8x200xf32>
    %c0_76 = arith.constant 0 : index
    %c127_77 = arith.constant 127 : index
    %91 = vector.load %arg15[%c0_76, %c127_77] : memref<8x904xf32, #tpu.memory_space<vmem>>, vector<8x200xf32>
    %c12 = arith.constant 12 : index
    %c0_78 = arith.constant 0 : index
    %c0_79 = arith.constant 0 : index
    %92 = vector.load %arg10[%c12, %c0_78, %c0_79] : memref<72x8x8xf32, #tpu.memory_space<vmem>>, vector<1x8x8xf32>
    %93 = vector.shape_cast %92 : vector<1x8x8xf32> to vector<8x8xf32>
    %cst_80 = arith.constant dense<0.000000e+00> : vector<8x200xf32>
    %94 = tpu.matmul %93, %91, %cst_80 {dimension_numbers = #tpu.dot_dimension_numbers<[1], [0], [0], [1], [0, 0, 1, 1], [], []>} : vector<8x8xf32>, vector<8x200xf32>, vector<8x200xf32> -> vector<8x200xf32>
    %95 = arith.addf %90, %94 : vector<8x200xf32>
    %c0_81 = arith.constant 0 : index
    %c128_82 = arith.constant 128 : index
    %96 = vector.load %arg15[%c0_81, %c128_82] : memref<8x904xf32, #tpu.memory_space<vmem>>, vector<8x200xf32>
    %c13 = arith.constant 13 : index
    %c0_83 = arith.constant 0 : index
    %c0_84 = arith.constant 0 : index
    %97 = vector.load %arg10[%c13, %c0_83, %c0_84] : memref<72x8x8xf32, #tpu.memory_space<vmem>>, vector<1x8x8xf32>
    %98 = vector.shape_cast %97 : vector<1x8x8xf32> to vector<8x8xf32>
    %cst_85 = arith.constant dense<0.000000e+00> : vector<8x200xf32>
    %99 = tpu.matmul %98, %96, %cst_85 {dimension_numbers = #tpu.dot_dimension_numbers<[1], [0], [0], [1], [0, 0, 1, 1], [], []>} : vector<8x8xf32>, vector<8x200xf32>, vector<8x200xf32> -> vector<8x200xf32>
    %100 = arith.addf %95, %99 : vector<8x200xf32>
    %c0_86 = arith.constant 0 : index
    %c129_87 = arith.constant 129 : index
    %101 = vector.load %arg15[%c0_86, %c129_87] : memref<8x904xf32, #tpu.memory_space<vmem>>, vector<8x200xf32>
    %c14 = arith.constant 14 : index
    %c0_88 = arith.constant 0 : index
    %c0_89 = arith.constant 0 : index
    %102 = vector.load %arg10[%c14, %c0_88, %c0_89] : memref<72x8x8xf32, #tpu.memory_space<vmem>>, vector<1x8x8xf32>
    %103 = vector.shape_cast %102 : vector<1x8x8xf32> to vector<8x8xf32>
    %cst_90 = arith.constant dense<0.000000e+00> : vector<8x200xf32>
    %104 = tpu.matmul %103, %101, %cst_90 {dimension_numbers = #tpu.dot_dimension_numbers<[1], [0], [0], [1], [0, 0, 1, 1], [], []>} : vector<8x8xf32>, vector<8x200xf32>, vector<8x200xf32> -> vector<8x200xf32>
    %105 = arith.addf %100, %104 : vector<8x200xf32>
    %c0_91 = arith.constant 0 : index
    %c137 = arith.constant 137 : index
    %106 = vector.load %arg15[%c0_91, %c137] : memref<8x904xf32, #tpu.memory_space<vmem>>, vector<8x200xf32>
    %c15 = arith.constant 15 : index
    %c0_92 = arith.constant 0 : index
    %c0_93 = arith.constant 0 : index
    %107 = vector.load %arg10[%c15, %c0_92, %c0_93] : memref<72x8x8xf32, #tpu.memory_space<vmem>>, vector<1x8x8xf32>
    %108 = vector.shape_cast %107 : vector<1x8x8xf32> to vector<8x8xf32>
    %cst_94 = arith.constant dense<0.000000e+00> : vector<8x200xf32>
    %109 = tpu.matmul %108, %106, %cst_94 {dimension_numbers = #tpu.dot_dimension_numbers<[1], [0], [0], [1], [0, 0, 1, 1], [], []>} : vector<8x8xf32>, vector<8x200xf32>, vector<8x200xf32> -> vector<8x200xf32>
    %110 = arith.addf %105, %109 : vector<8x200xf32>
    %c0_95 = arith.constant 0 : index
    %c138 = arith.constant 138 : index
    %111 = vector.load %arg15[%c0_95, %c138] : memref<8x904xf32, #tpu.memory_space<vmem>>, vector<8x200xf32>
    %c16 = arith.constant 16 : index
    %c0_96 = arith.constant 0 : index
    %c0_97 = arith.constant 0 : index
    %112 = vector.load %arg10[%c16, %c0_96, %c0_97] : memref<72x8x8xf32, #tpu.memory_space<vmem>>, vector<1x8x8xf32>
    %113 = vector.shape_cast %112 : vector<1x8x8xf32> to vector<8x8xf32>
    %cst_98 = arith.constant dense<0.000000e+00> : vector<8x200xf32>
    %114 = tpu.matmul %113, %111, %cst_98 {dimension_numbers = #tpu.dot_dimension_numbers<[1], [0], [0], [1], [0, 0, 1, 1], [], []>} : vector<8x8xf32>, vector<8x200xf32>, vector<8x200xf32> -> vector<8x200xf32>
    %115 = arith.addf %110, %114 : vector<8x200xf32>
    %c0_99 = arith.constant 0 : index
    %c139 = arith.constant 139 : index
    %116 = vector.load %arg15[%c0_99, %c139] : memref<8x904xf32, #tpu.memory_space<vmem>>, vector<8x200xf32>
    %c17 = arith.constant 17 : index
    %c0_100 = arith.constant 0 : index
    %c0_101 = arith.constant 0 : index
    %117 = vector.load %arg10[%c17, %c0_100, %c0_101] : memref<72x8x8xf32, #tpu.memory_space<vmem>>, vector<1x8x8xf32>
    %118 = vector.shape_cast %117 : vector<1x8x8xf32> to vector<8x8xf32>
    %cst_102 = arith.constant dense<0.000000e+00> : vector<8x200xf32>
    %119 = tpu.matmul %118, %116, %cst_102 {dimension_numbers = #tpu.dot_dimension_numbers<[1], [0], [0], [1], [0, 0, 1, 1], [], []>} : vector<8x8xf32>, vector<8x200xf32>, vector<8x200xf32> -> vector<8x200xf32>
    %120 = arith.addf %115, %119 : vector<8x200xf32>
    %c1_103 = arith.constant 1 : index
    %c0_104 = arith.constant 0 : index
    %c0_105 = arith.constant 0 : index
    %121 = vector.load %arg11[%c1_103, %c0_104, %c0_105] : memref<8x8x1xf32, #tpu.memory_space<vmem>>, vector<1x8x1xf32>
    %122 = vector.shape_cast %121 : vector<1x8x1xf32> to vector<8x1xf32>
    %123 = vector.broadcast %122 : vector<8x1xf32> to vector<8x200xf32>
    %124 = arith.addf %120, %123 : vector<8x200xf32>
    %cst_106 = arith.constant 5.000000e-01 : f32
    %125 = vector.broadcast %cst_106 : f32 to vector<8x200xf32>
    %126 = arith.mulf %125, %124 : vector<8x200xf32>
    %cst_107 = arith.constant 0.707106769 : f32
    %127 = vector.broadcast %cst_107 : f32 to vector<8x200xf32>
    %128 = arith.mulf %124, %127 : vector<8x200xf32>
    %129 = math.erf %128 : vector<8x200xf32>
    %cst_108 = arith.constant 1.000000e+00 : f32
    %130 = vector.broadcast %cst_108 : f32 to vector<8x200xf32>
    %131 = arith.addf %130, %129 : vector<8x200xf32>
    %132 = arith.mulf %126, %131 : vector<8x200xf32>
    %133 = vector.broadcast %61 : vector<1x200xf32> to vector<8x200xf32>
    %134 = arith.mulf %132, %133 : vector<8x200xf32>
    %c0_109 = arith.constant 0 : index
    %c0_110 = arith.constant 0 : index
    %135 = vector.load %arg4[%c0_109, %c0_110] : memref<648x200xf32, #tpu.memory_space<vmem>>, vector<648x200xf32>
    %cst_111 = arith.constant dense<0.000000e+00> : vector<8x200xf32>
    %136 = tpu.matmul %10, %135, %cst_111 {dimension_numbers = #tpu.dot_dimension_numbers<[1], [0], [0], [1], [0, 0, 1, 1], [], []>} : vector<8x648xf32>, vector<648x200xf32>, vector<8x200xf32> -> vector<8x200xf32>
    %c0_112 = arith.constant 0 : index
    %c0_113 = arith.constant 0 : index
    %c0_114 = arith.constant 0 : index
    %137 = vector.load %arg12[%c0_112, %c0_113, %c0_114] : memref<4x8x8xf32, #tpu.memory_space<vmem>>, vector<1x8x8xf32>
    %138 = vector.shape_cast %137 : vector<1x8x8xf32> to vector<8x8xf32>
    %cst_115 = arith.constant dense<0.000000e+00> : vector<8x200xf32>
    %139 = tpu.matmul %138, %136, %cst_115 {dimension_numbers = #tpu.dot_dimension_numbers<[1], [0], [0], [1], [0, 0, 1, 1], [], []>} : vector<8x8xf32>, vector<8x200xf32>, vector<8x200xf32> -> vector<8x200xf32>
    %c0_116 = arith.constant 0 : index
    %c0_117 = arith.constant 0 : index
    %c0_118 = arith.constant 0 : index
    %140 = vector.load %arg13[%c0_116, %c0_117, %c0_118] : memref<4x8x1xf32, #tpu.memory_space<vmem>>, vector<1x8x1xf32>
    %141 = vector.shape_cast %140 : vector<1x8x1xf32> to vector<8x1xf32>
    %142 = vector.broadcast %141 : vector<8x1xf32> to vector<8x200xf32>
    %143 = arith.addf %139, %142 : vector<8x200xf32>
    %144 = vector.broadcast %61 : vector<1x200xf32> to vector<8x200xf32>
    %145 = arith.mulf %143, %144 : vector<8x200xf32>
    %146 = arith.addf %134, %145 : vector<8x200xf32>
    %c0_119 = arith.constant 0 : index
    %c128_120 = arith.constant 128 : index
    %147 = vector.load %arg15[%c0_119, %c128_120] : memref<8x904xf32, #tpu.memory_space<vmem>>, vector<8x200xf32>
    tpu.vector_store %arg15[%c0_119, %c128_120], %146 {strides = array<i32>} : memref<8x904xf32, #tpu.memory_space<vmem>>, vector<8x200xf32>,
    %c0_121 = arith.constant 0 : index
    %c117_122 = arith.constant 117 : index
    %148 = vector.load %arg15[%c0_121, %c117_122] : memref<8x904xf32, #tpu.memory_space<vmem>>, vector<8x200xf32>
    %c18 = arith.constant 18 : index
    %c0_123 = arith.constant 0 : index
    %c0_124 = arith.constant 0 : index
    %149 = vector.load %arg10[%c18, %c0_123, %c0_124] : memref<72x8x8xf32, #tpu.memory_space<vmem>>, vector<1x8x8xf32>
    %150 = vector.shape_cast %149 : vector<1x8x8xf32> to vector<8x8xf32>
    %cst_125 = arith.constant dense<0.000000e+00> : vector<8x200xf32>
    %151 = tpu.matmul %150, %148, %cst_125 {dimension_numbers = #tpu.dot_dimension_numbers<[1], [0], [0], [1], [0, 0, 1, 1], [], []>} : vector<8x8xf32>, vector<8x200xf32>, vector<8x200xf32> -> vector<8x200xf32>
    %c0_126 = arith.constant 0 : index
    %c118_127 = arith.constant 118 : index
    %152 = vector.load %arg15[%c0_126, %c118_127] : memref<8x904xf32, #tpu.memory_space<vmem>>, vector<8x200xf32>
    %c19 = arith.constant 19 : index
    %c0_128 = arith.constant 0 : index
    %c0_129 = arith.constant 0 : index
    %153 = vector.load %arg10[%c19, %c0_128, %c0_129] : memref<72x8x8xf32, #tpu.memory_space<vmem>>, vector<1x8x8xf32>
    %154 = vector.shape_cast %153 : vector<1x8x8xf32> to vector<8x8xf32>
    %cst_130 = arith.constant dense<0.000000e+00> : vector<8x200xf32>
    %155 = tpu.matmul %154, %152, %cst_130 {dimension_numbers = #tpu.dot_dimension_numbers<[1], [0], [0], [1], [0, 0, 1, 1], [], []>} : vector<8x8xf32>, vector<8x200xf32>, vector<8x200xf32> -> vector<8x200xf32>
    %156 = arith.addf %151, %155 : vector<8x200xf32>
    %c0_131 = arith.constant 0 : index
    %c119_132 = arith.constant 119 : index
    %157 = vector.load %arg15[%c0_131, %c119_132] : memref<8x904xf32, #tpu.memory_space<vmem>>, vector<8x200xf32>
    %c20 = arith.constant 20 : index
    %c0_133 = arith.constant 0 : index
    %c0_134 = arith.constant 0 : index
    %158 = vector.load %arg10[%c20, %c0_133, %c0_134] : memref<72x8x8xf32, #tpu.memory_space<vmem>>, vector<1x8x8xf32>
    %159 = vector.shape_cast %158 : vector<1x8x8xf32> to vector<8x8xf32>
    %cst_135 = arith.constant dense<0.000000e+00> : vector<8x200xf32>
    %160 = tpu.matmul %159, %157, %cst_135 {dimension_numbers = #tpu.dot_dimension_numbers<[1], [0], [0], [1], [0, 0, 1, 1], [], []>} : vector<8x8xf32>, vector<8x200xf32>, vector<8x200xf32> -> vector<8x200xf32>
    %161 = arith.addf %156, %160 : vector<8x200xf32>
    %c0_136 = arith.constant 0 : index
    %c127_137 = arith.constant 127 : index
    %162 = vector.load %arg15[%c0_136, %c127_137] : memref<8x904xf32, #tpu.memory_space<vmem>>, vector<8x200xf32>
    %c21 = arith.constant 21 : index
    %c0_138 = arith.constant 0 : index
    %c0_139 = arith.constant 0 : index
    %163 = vector.load %arg10[%c21, %c0_138, %c0_139] : memref<72x8x8xf32, #tpu.memory_space<vmem>>, vector<1x8x8xf32>
    %164 = vector.shape_cast %163 : vector<1x8x8xf32> to vector<8x8xf32>
    %cst_140 = arith.constant dense<0.000000e+00> : vector<8x200xf32>
    %165 = tpu.matmul %164, %162, %cst_140 {dimension_numbers = #tpu.dot_dimension_numbers<[1], [0], [0], [1], [0, 0, 1, 1], [], []>} : vector<8x8xf32>, vector<8x200xf32>, vector<8x200xf32> -> vector<8x200xf32>
    %166 = arith.addf %161, %165 : vector<8x200xf32>
    %c0_141 = arith.constant 0 : index
    %c128_142 = arith.constant 128 : index
    %167 = vector.load %arg15[%c0_141, %c128_142] : memref<8x904xf32, #tpu.memory_space<vmem>>, vector<8x200xf32>
    %c22 = arith.constant 22 : index
    %c0_143 = arith.constant 0 : index
    %c0_144 = arith.constant 0 : index
    %168 = vector.load %arg10[%c22, %c0_143, %c0_144] : memref<72x8x8xf32, #tpu.memory_space<vmem>>, vector<1x8x8xf32>
    %169 = vector.shape_cast %168 : vector<1x8x8xf32> to vector<8x8xf32>
    %cst_145 = arith.constant dense<0.000000e+00> : vector<8x200xf32>
    %170 = tpu.matmul %169, %167, %cst_145 {dimension_numbers = #tpu.dot_dimension_numbers<[1], [0], [0], [1], [0, 0, 1, 1], [], []>} : vector<8x8xf32>, vector<8x200xf32>, vector<8x200xf32> -> vector<8x200xf32>
    %171 = arith.addf %166, %170 : vector<8x200xf32>
    %c0_146 = arith.constant 0 : index
    %c129_147 = arith.constant 129 : index
    %172 = vector.load %arg15[%c0_146, %c129_147] : memref<8x904xf32, #tpu.memory_space<vmem>>, vector<8x200xf32>
    %c23 = arith.constant 23 : index
    %c0_148 = arith.constant 0 : index
    %c0_149 = arith.constant 0 : index
    %173 = vector.load %arg10[%c23, %c0_148, %c0_149] : memref<72x8x8xf32, #tpu.memory_space<vmem>>, vector<1x8x8xf32>
    %174 = vector.shape_cast %173 : vector<1x8x8xf32> to vector<8x8xf32>
    %cst_150 = arith.constant dense<0.000000e+00> : vector<8x200xf32>
    %175 = tpu.matmul %174, %172, %cst_150 {dimension_numbers = #tpu.dot_dimension_numbers<[1], [0], [0], [1], [0, 0, 1, 1], [], []>} : vector<8x8xf32>, vector<8x200xf32>, vector<8x200xf32> -> vector<8x200xf32>
    %176 = arith.addf %171, %175 : vector<8x200xf32>
    %c0_151 = arith.constant 0 : index
    %c137_152 = arith.constant 137 : index
    %177 = vector.load %arg15[%c0_151, %c137_152] : memref<8x904xf32, #tpu.memory_space<vmem>>, vector<8x200xf32>
    %c24 = arith.constant 24 : index
    %c0_153 = arith.constant 0 : index
    %c0_154 = arith.constant 0 : index
    %178 = vector.load %arg10[%c24, %c0_153, %c0_154] : memref<72x8x8xf32, #tpu.memory_space<vmem>>, vector<1x8x8xf32>
    %179 = vector.shape_cast %178 : vector<1x8x8xf32> to vector<8x8xf32>
    %cst_155 = arith.constant dense<0.000000e+00> : vector<8x200xf32>
    %180 = tpu.matmul %179, %177, %cst_155 {dimension_numbers = #tpu.dot_dimension_numbers<[1], [0], [0], [1], [0, 0, 1, 1], [], []>} : vector<8x8xf32>, vector<8x200xf32>, vector<8x200xf32> -> vector<8x200xf32>
    %181 = arith.addf %176, %180 : vector<8x200xf32>
    %c0_156 = arith.constant 0 : index
    %c138_157 = arith.constant 138 : index
    %182 = vector.load %arg15[%c0_156, %c138_157] : memref<8x904xf32, #tpu.memory_space<vmem>>, vector<8x200xf32>
    %c25 = arith.constant 25 : index
    %c0_158 = arith.constant 0 : index
    %c0_159 = arith.constant 0 : index
    %183 = vector.load %arg10[%c25, %c0_158, %c0_159] : memref<72x8x8xf32, #tpu.memory_space<vmem>>, vector<1x8x8xf32>
    %184 = vector.shape_cast %183 : vector<1x8x8xf32> to vector<8x8xf32>
    %cst_160 = arith.constant dense<0.000000e+00> : vector<8x200xf32>
    %185 = tpu.matmul %184, %182, %cst_160 {dimension_numbers = #tpu.dot_dimension_numbers<[1], [0], [0], [1], [0, 0, 1, 1], [], []>} : vector<8x8xf32>, vector<8x200xf32>, vector<8x200xf32> -> vector<8x200xf32>
    %186 = arith.addf %181, %185 : vector<8x200xf32>
    %c0_161 = arith.constant 0 : index
    %c139_162 = arith.constant 139 : index
    %187 = vector.load %arg15[%c0_161, %c139_162] : memref<8x904xf32, #tpu.memory_space<vmem>>, vector<8x200xf32>
    %c26 = arith.constant 26 : index
    %c0_163 = arith.constant 0 : index
    %c0_164 = arith.constant 0 : index
    %188 = vector.load %arg10[%c26, %c0_163, %c0_164] : memref<72x8x8xf32, #tpu.memory_space<vmem>>, vector<1x8x8xf32>
    %189 = vector.shape_cast %188 : vector<1x8x8xf32> to vector<8x8xf32>
    %cst_165 = arith.constant dense<0.000000e+00> : vector<8x200xf32>
    %190 = tpu.matmul %189, %187, %cst_165 {dimension_numbers = #tpu.dot_dimension_numbers<[1], [0], [0], [1], [0, 0, 1, 1], [], []>} : vector<8x8xf32>, vector<8x200xf32>, vector<8x200xf32> -> vector<8x200xf32>
    %191 = arith.addf %186, %190 : vector<8x200xf32>
    %c0_166 = arith.constant 0 : index
    %c0_167 = arith.constant 0 : index
    %192 = vector.load %arg2[%c0_166, %c0_167] : memref<1x200xf32, #tpu.memory_space<vmem>>, vector<1x200xf32>
    %193 = vector.broadcast %192 : vector<1x200xf32> to vector<8x200xf32>
    %194 = arith.mulf %191, %193 : vector<8x200xf32>
    %c0_168 = arith.constant 0 : index
    %c0_169 = arith.constant 0 : index
    %195 = vector.load %arg5[%c0_168, %c0_169] : memref<200x72xf32, #tpu.memory_space<vmem>>, vector<200x72xf32>
    %cst_170 = arith.constant dense<0.000000e+00> : vector<8x72xf32>
    %196 = tpu.matmul %194, %195, %cst_170 {dimension_numbers = #tpu.dot_dimension_numbers<[1], [0], [0], [1], [0, 0, 1, 1], [], []>} : vector<8x200xf32>, vector<200x72xf32>, vector<8x72xf32> -> vector<8x72xf32>
    %c0_171 = arith.constant 0 : index
    %c0_172 = arith.constant 0 : index
    %197 = vector.load %arg3[%c0_171, %c0_172] : memref<1x72xf32, #tpu.memory_space<vmem>>, vector<1x72xf32>
    %c2_173 = arith.constant 2 : index
    %c0_174 = arith.constant 0 : index
    %c0_175 = arith.constant 0 : index
    %198 = vector.load %arg11[%c2_173, %c0_174, %c0_175] : memref<8x8x1xf32, #tpu.memory_space<vmem>>, vector<1x8x1xf32>
    %199 = vector.shape_cast %198 : vector<1x8x1xf32> to vector<8x1xf32>
    %200 = vector.broadcast %199 : vector<8x1xf32> to vector<8x72xf32>
    %201 = arith.addf %196, %200 : vector<8x72xf32>
    %cst_176 = arith.constant 5.000000e-01 : f32
    %202 = vector.broadcast %cst_176 : f32 to vector<8x72xf32>
    %203 = arith.mulf %202, %201 : vector<8x72xf32>
    %cst_177 = arith.constant 0.707106769 : f32
    %204 = vector.broadcast %cst_177 : f32 to vector<8x72xf32>
    %205 = arith.mulf %201, %204 : vector<8x72xf32>
    %206 = math.erf %205 : vector<8x72xf32>
    %cst_178 = arith.constant 1.000000e+00 : f32
    %207 = vector.broadcast %cst_178 : f32 to vector<8x72xf32>
    %208 = arith.addf %207, %206 : vector<8x72xf32>
    %209 = arith.mulf %203, %208 : vector<8x72xf32>
    %210 = vector.broadcast %197 : vector<1x72xf32> to vector<8x72xf32>
    %211 = arith.mulf %209, %210 : vector<8x72xf32>
    %c0_179 = arith.constant 0 : index
    %c128_180 = arith.constant 128 : index
    %212 = vector.load %arg15[%c0_179, %c128_180] : memref<8x904xf32, #tpu.memory_space<vmem>>, vector<8x72xf32>
    tpu.vector_store %arg15[%c0_179, %c128_180], %211 {strides = array<i32>} : memref<8x904xf32, #tpu.memory_space<vmem>>, vector<8x72xf32>,
    %c0_181 = arith.constant 0 : index
    %c121 = arith.constant 121 : index
    %213 = vector.load %arg15[%c0_181, %c121] : memref<8x904xf32, #tpu.memory_space<vmem>>, vector<8x72xf32>
    %c27 = arith.constant 27 : index
    %c0_182 = arith.constant 0 : index
    %c0_183 = arith.constant 0 : index
    %214 = vector.load %arg10[%c27, %c0_182, %c0_183] : memref<72x8x8xf32, #tpu.memory_space<vmem>>, vector<1x8x8xf32>
    %215 = vector.shape_cast %214 : vector<1x8x8xf32> to vector<8x8xf32>
    %cst_184 = arith.constant dense<0.000000e+00> : vector<8x72xf32>
    %216 = tpu.matmul %215, %213, %cst_184 {dimension_numbers = #tpu.dot_dimension_numbers<[1], [0], [0], [1], [0, 0, 1, 1], [], []>} : vector<8x8xf32>, vector<8x72xf32>, vector<8x72xf32> -> vector<8x72xf32>
    %c0_185 = arith.constant 0 : index
    %c122 = arith.constant 122 : index
    %217 = vector.load %arg15[%c0_185, %c122] : memref<8x904xf32, #tpu.memory_space<vmem>>, vector<8x72xf32>
    %c28 = arith.constant 28 : index
    %c0_186 = arith.constant 0 : index
    %c0_187 = arith.constant 0 : index
    %218 = vector.load %arg10[%c28, %c0_186, %c0_187] : memref<72x8x8xf32, #tpu.memory_space<vmem>>, vector<1x8x8xf32>
    %219 = vector.shape_cast %218 : vector<1x8x8xf32> to vector<8x8xf32>
    %cst_188 = arith.constant dense<0.000000e+00> : vector<8x72xf32>
    %220 = tpu.matmul %219, %217, %cst_188 {dimension_numbers = #tpu.dot_dimension_numbers<[1], [0], [0], [1], [0, 0, 1, 1], [], []>} : vector<8x8xf32>, vector<8x72xf32>, vector<8x72xf32> -> vector<8x72xf32>
    %221 = arith.addf %216, %220 : vector<8x72xf32>
    %c0_189 = arith.constant 0 : index
    %c123 = arith.constant 123 : index
    %222 = vector.load %arg15[%c0_189, %c123] : memref<8x904xf32, #tpu.memory_space<vmem>>, vector<8x72xf32>
    %c29 = arith.constant 29 : index
    %c0_190 = arith.constant 0 : index
    %c0_191 = arith.constant 0 : index
    %223 = vector.load %arg10[%c29, %c0_190, %c0_191] : memref<72x8x8xf32, #tpu.memory_space<vmem>>, vector<1x8x8xf32>
    %224 = vector.shape_cast %223 : vector<1x8x8xf32> to vector<8x8xf32>
    %cst_192 = arith.constant dense<0.000000e+00> : vector<8x72xf32>
    %225 = tpu.matmul %224, %222, %cst_192 {dimension_numbers = #tpu.dot_dimension_numbers<[1], [0], [0], [1], [0, 0, 1, 1], [], []>} : vector<8x8xf32>, vector<8x72xf32>, vector<8x72xf32> -> vector<8x72xf32>
    %226 = arith.addf %221, %225 : vector<8x72xf32>
    %c0_193 = arith.constant 0 : index
    %c127_194 = arith.constant 127 : index
    %227 = vector.load %arg15[%c0_193, %c127_194] : memref<8x904xf32, #tpu.memory_space<vmem>>, vector<8x72xf32>
    %c30 = arith.constant 30 : index
    %c0_195 = arith.constant 0 : index
    %c0_196 = arith.constant 0 : index
    %228 = vector.load %arg10[%c30, %c0_195, %c0_196] : memref<72x8x8xf32, #tpu.memory_space<vmem>>, vector<1x8x8xf32>
    %229 = vector.shape_cast %228 : vector<1x8x8xf32> to vector<8x8xf32>
    %cst_197 = arith.constant dense<0.000000e+00> : vector<8x72xf32>
    %230 = tpu.matmul %229, %227, %cst_197 {dimension_numbers = #tpu.dot_dimension_numbers<[1], [0], [0], [1], [0, 0, 1, 1], [], []>} : vector<8x8xf32>, vector<8x72xf32>, vector<8x72xf32> -> vector<8x72xf32>
    %231 = arith.addf %226, %230 : vector<8x72xf32>
    %c0_198 = arith.constant 0 : index
    %c128_199 = arith.constant 128 : index
    %232 = vector.load %arg15[%c0_198, %c128_199] : memref<8x904xf32, #tpu.memory_space<vmem>>, vector<8x72xf32>
    %c31 = arith.constant 31 : index
    %c0_200 = arith.constant 0 : index
    %c0_201 = arith.constant 0 : index
    %233 = vector.load %arg10[%c31, %c0_200, %c0_201] : memref<72x8x8xf32, #tpu.memory_space<vmem>>, vector<1x8x8xf32>
    %234 = vector.shape_cast %233 : vector<1x8x8xf32> to vector<8x8xf32>
    %cst_202 = arith.constant dense<0.000000e+00> : vector<8x72xf32>
    %235 = tpu.matmul %234, %232, %cst_202 {dimension_numbers = #tpu.dot_dimension_numbers<[1], [0], [0], [1], [0, 0, 1, 1], [], []>} : vector<8x8xf32>, vector<8x72xf32>, vector<8x72xf32> -> vector<8x72xf32>
    %236 = arith.addf %231, %235 : vector<8x72xf32>
    %c0_203 = arith.constant 0 : index
    %c129_204 = arith.constant 129 : index
    %237 = vector.load %arg15[%c0_203, %c129_204] : memref<8x904xf32, #tpu.memory_space<vmem>>, vector<8x72xf32>
    %c32 = arith.constant 32 : index
    %c0_205 = arith.constant 0 : index
    %c0_206 = arith.constant 0 : index
    %238 = vector.load %arg10[%c32, %c0_205, %c0_206] : memref<72x8x8xf32, #tpu.memory_space<vmem>>, vector<1x8x8xf32>
    %239 = vector.shape_cast %238 : vector<1x8x8xf32> to vector<8x8xf32>
    %cst_207 = arith.constant dense<0.000000e+00> : vector<8x72xf32>
    %240 = tpu.matmul %239, %237, %cst_207 {dimension_numbers = #tpu.dot_dimension_numbers<[1], [0], [0], [1], [0, 0, 1, 1], [], []>} : vector<8x8xf32>, vector<8x72xf32>, vector<8x72xf32> -> vector<8x72xf32>
    %241 = arith.addf %236, %240 : vector<8x72xf32>
    %c0_208 = arith.constant 0 : index
    %c133 = arith.constant 133 : index
    %242 = vector.load %arg15[%c0_208, %c133] : memref<8x904xf32, #tpu.memory_space<vmem>>, vector<8x72xf32>
    %c33 = arith.constant 33 : index
    %c0_209 = arith.constant 0 : index
    %c0_210 = arith.constant 0 : index
    %243 = vector.load %arg10[%c33, %c0_209, %c0_210] : memref<72x8x8xf32, #tpu.memory_space<vmem>>, vector<1x8x8xf32>
    %244 = vector.shape_cast %243 : vector<1x8x8xf32> to vector<8x8xf32>
    %cst_211 = arith.constant dense<0.000000e+00> : vector<8x72xf32>
    %245 = tpu.matmul %244, %242, %cst_211 {dimension_numbers = #tpu.dot_dimension_numbers<[1], [0], [0], [1], [0, 0, 1, 1], [], []>} : vector<8x8xf32>, vector<8x72xf32>, vector<8x72xf32> -> vector<8x72xf32>
    %246 = arith.addf %241, %245 : vector<8x72xf32>
    %c0_212 = arith.constant 0 : index
    %c134 = arith.constant 134 : index
    %247 = vector.load %arg15[%c0_212, %c134] : memref<8x904xf32, #tpu.memory_space<vmem>>, vector<8x72xf32>
    %c34 = arith.constant 34 : index
    %c0_213 = arith.constant 0 : index
    %c0_214 = arith.constant 0 : index
    %248 = vector.load %arg10[%c34, %c0_213, %c0_214] : memref<72x8x8xf32, #tpu.memory_space<vmem>>, vector<1x8x8xf32>
    %249 = vector.shape_cast %248 : vector<1x8x8xf32> to vector<8x8xf32>
    %cst_215 = arith.constant dense<0.000000e+00> : vector<8x72xf32>
    %250 = tpu.matmul %249, %247, %cst_215 {dimension_numbers = #tpu.dot_dimension_numbers<[1], [0], [0], [1], [0, 0, 1, 1], [], []>} : vector<8x8xf32>, vector<8x72xf32>, vector<8x72xf32> -> vector<8x72xf32>
    %251 = arith.addf %246, %250 : vector<8x72xf32>
    %c0_216 = arith.constant 0 : index
    %c135 = arith.constant 135 : index
    %252 = vector.load %arg15[%c0_216, %c135] : memref<8x904xf32, #tpu.memory_space<vmem>>, vector<8x72xf32>
    %c35 = arith.constant 35 : index
    %c0_217 = arith.constant 0 : index
    %c0_218 = arith.constant 0 : index
    %253 = vector.load %arg10[%c35, %c0_217, %c0_218] : memref<72x8x8xf32, #tpu.memory_space<vmem>>, vector<1x8x8xf32>
    %254 = vector.shape_cast %253 : vector<1x8x8xf32> to vector<8x8xf32>
    %cst_219 = arith.constant dense<0.000000e+00> : vector<8x72xf32>
    %255 = tpu.matmul %254, %252, %cst_219 {dimension_numbers = #tpu.dot_dimension_numbers<[1], [0], [0], [1], [0, 0, 1, 1], [], []>} : vector<8x8xf32>, vector<8x72xf32>, vector<8x72xf32> -> vector<8x72xf32>
    %256 = arith.addf %251, %255 : vector<8x72xf32>
    %c3_220 = arith.constant 3 : index
    %c0_221 = arith.constant 0 : index
    %c0_222 = arith.constant 0 : index
    %257 = vector.load %arg11[%c3_220, %c0_221, %c0_222] : memref<8x8x1xf32, #tpu.memory_space<vmem>>, vector<1x8x1xf32>
    %258 = vector.shape_cast %257 : vector<1x8x1xf32> to vector<8x1xf32>
    %259 = vector.broadcast %258 : vector<8x1xf32> to vector<8x72xf32>
    %260 = arith.addf %256, %259 : vector<8x72xf32>
    %cst_223 = arith.constant 5.000000e-01 : f32
    %261 = vector.broadcast %cst_223 : f32 to vector<8x72xf32>
    %262 = arith.mulf %261, %260 : vector<8x72xf32>
    %cst_224 = arith.constant 0.707106769 : f32
    %263 = vector.broadcast %cst_224 : f32 to vector<8x72xf32>
    %264 = arith.mulf %260, %263 : vector<8x72xf32>
    %265 = math.erf %264 : vector<8x72xf32>
    %cst_225 = arith.constant 1.000000e+00 : f32
    %266 = vector.broadcast %cst_225 : f32 to vector<8x72xf32>
    %267 = arith.addf %266, %265 : vector<8x72xf32>
    %268 = arith.mulf %262, %267 : vector<8x72xf32>
    %269 = vector.broadcast %197 : vector<1x72xf32> to vector<8x72xf32>
    %270 = arith.mulf %268, %269 : vector<8x72xf32>
    %c0_226 = arith.constant 0 : index
    %c0_227 = arith.constant 0 : index
    %271 = vector.load %arg5[%c0_226, %c0_227] : memref<200x72xf32, #tpu.memory_space<vmem>>, vector<200x72xf32>
    %cst_228 = arith.constant dense<0.000000e+00> : vector<8x72xf32>
    %272 = tpu.matmul %146, %271, %cst_228 {dimension_numbers = #tpu.dot_dimension_numbers<[1], [0], [0], [1], [0, 0, 1, 1], [], []>} : vector<8x200xf32>, vector<200x72xf32>, vector<8x72xf32> -> vector<8x72xf32>
    %c1_229 = arith.constant 1 : index
    %c0_230 = arith.constant 0 : index
    %c0_231 = arith.constant 0 : index
    %273 = vector.load %arg12[%c1_229, %c0_230, %c0_231] : memref<4x8x8xf32, #tpu.memory_space<vmem>>, vector<1x8x8xf32>
    %274 = vector.shape_cast %273 : vector<1x8x8xf32> to vector<8x8xf32>
    %cst_232 = arith.constant dense<0.000000e+00> : vector<8x72xf32>
    %275 = tpu.matmul %274, %272, %cst_232 {dimension_numbers = #tpu.dot_dimension_numbers<[1], [0], [0], [1], [0, 0, 1, 1], [], []>} : vector<8x8xf32>, vector<8x72xf32>, vector<8x72xf32> -> vector<8x72xf32>
    %c1_233 = arith.constant 1 : index
    %c0_234 = arith.constant 0 : index
    %c0_235 = arith.constant 0 : index
    %276 = vector.load %arg13[%c1_233, %c0_234, %c0_235] : memref<4x8x1xf32, #tpu.memory_space<vmem>>, vector<1x8x1xf32>
    %277 = vector.shape_cast %276 : vector<1x8x1xf32> to vector<8x1xf32>
    %278 = vector.broadcast %277 : vector<8x1xf32> to vector<8x72xf32>
    %279 = arith.addf %275, %278 : vector<8x72xf32>
    %280 = vector.broadcast %197 : vector<1x72xf32> to vector<8x72xf32>
    %281 = arith.mulf %279, %280 : vector<8x72xf32>
    %282 = arith.addf %270, %281 : vector<8x72xf32>
    %c0_236 = arith.constant 0 : index
    %c0_237 = arith.constant 0 : index
    %283 = vector.load %arg6[%c0_236, %c0_237] : memref<72x200xf32, #tpu.memory_space<vmem>>, vector<72x200xf32>
    %cst_238 = arith.constant dense<0.000000e+00> : vector<8x200xf32>
    %284 = tpu.matmul %282, %283, %cst_238 {dimension_numbers = #tpu.dot_dimension_numbers<[1], [0], [0], [1], [0, 0, 1, 1], [], []>} : vector<8x72xf32>, vector<72x200xf32>, vector<8x200xf32> -> vector<8x200xf32>
    %c0_239 = arith.constant 0 : index
    %c0_240 = arith.constant 0 : index
    %285 = vector.load %arg2[%c0_239, %c0_240] : memref<1x200xf32, #tpu.memory_space<vmem>>, vector<1x200xf32>
    %c0_241 = arith.constant 0 : index
    %c128_242 = arith.constant 128 : index
    %286 = vector.load %arg15[%c0_241, %c128_242] : memref<8x904xf32, #tpu.memory_space<vmem>>, vector<8x200xf32>
    tpu.vector_store %arg15[%c0_241, %c128_242], %284 {strides = array<i32>} : memref<8x904xf32, #tpu.memory_space<vmem>>, vector<8x200xf32>,
    %c0_243 = arith.constant 0 : index
    %c117_244 = arith.constant 117 : index
    %287 = vector.load %arg15[%c0_243, %c117_244] : memref<8x904xf32, #tpu.memory_space<vmem>>, vector<8x200xf32>
    %c36 = arith.constant 36 : index
    %c0_245 = arith.constant 0 : index
    %c0_246 = arith.constant 0 : index
    %288 = vector.load %arg10[%c36, %c0_245, %c0_246] : memref<72x8x8xf32, #tpu.memory_space<vmem>>, vector<1x8x8xf32>
    %289 = vector.shape_cast %288 : vector<1x8x8xf32> to vector<8x8xf32>
    %cst_247 = arith.constant dense<0.000000e+00> : vector<8x200xf32>
    %290 = tpu.matmul %289, %287, %cst_247 {dimension_numbers = #tpu.dot_dimension_numbers<[1], [0], [0], [1], [0, 0, 1, 1], [], []>} : vector<8x8xf32>, vector<8x200xf32>, vector<8x200xf32> -> vector<8x200xf32>
    %c0_248 = arith.constant 0 : index
    %c118_249 = arith.constant 118 : index
    %291 = vector.load %arg15[%c0_248, %c118_249] : memref<8x904xf32, #tpu.memory_space<vmem>>, vector<8x200xf32>
    %c37 = arith.constant 37 : index
    %c0_250 = arith.constant 0 : index
    %c0_251 = arith.constant 0 : index
    %292 = vector.load %arg10[%c37, %c0_250, %c0_251] : memref<72x8x8xf32, #tpu.memory_space<vmem>>, vector<1x8x8xf32>
    %293 = vector.shape_cast %292 : vector<1x8x8xf32> to vector<8x8xf32>
    %cst_252 = arith.constant dense<0.000000e+00> : vector<8x200xf32>
    %294 = tpu.matmul %293, %291, %cst_252 {dimension_numbers = #tpu.dot_dimension_numbers<[1], [0], [0], [1], [0, 0, 1, 1], [], []>} : vector<8x8xf32>, vector<8x200xf32>, vector<8x200xf32> -> vector<8x200xf32>
    %295 = arith.addf %290, %294 : vector<8x200xf32>
    %c0_253 = arith.constant 0 : index
    %c119_254 = arith.constant 119 : index
    %296 = vector.load %arg15[%c0_253, %c119_254] : memref<8x904xf32, #tpu.memory_space<vmem>>, vector<8x200xf32>
    %c38 = arith.constant 38 : index
    %c0_255 = arith.constant 0 : index
    %c0_256 = arith.constant 0 : index
    %297 = vector.load %arg10[%c38, %c0_255, %c0_256] : memref<72x8x8xf32, #tpu.memory_space<vmem>>, vector<1x8x8xf32>
    %298 = vector.shape_cast %297 : vector<1x8x8xf32> to vector<8x8xf32>
    %cst_257 = arith.constant dense<0.000000e+00> : vector<8x200xf32>
    %299 = tpu.matmul %298, %296, %cst_257 {dimension_numbers = #tpu.dot_dimension_numbers<[1], [0], [0], [1], [0, 0, 1, 1], [], []>} : vector<8x8xf32>, vector<8x200xf32>, vector<8x200xf32> -> vector<8x200xf32>
    %300 = arith.addf %295, %299 : vector<8x200xf32>
    %c0_258 = arith.constant 0 : index
    %c127_259 = arith.constant 127 : index
    %301 = vector.load %arg15[%c0_258, %c127_259] : memref<8x904xf32, #tpu.memory_space<vmem>>, vector<8x200xf32>
    %c39 = arith.constant 39 : index
    %c0_260 = arith.constant 0 : index
    %c0_261 = arith.constant 0 : index
    %302 = vector.load %arg10[%c39, %c0_260, %c0_261] : memref<72x8x8xf32, #tpu.memory_space<vmem>>, vector<1x8x8xf32>
    %303 = vector.shape_cast %302 : vector<1x8x8xf32> to vector<8x8xf32>
    %cst_262 = arith.constant dense<0.000000e+00> : vector<8x200xf32>
    %304 = tpu.matmul %303, %301, %cst_262 {dimension_numbers = #tpu.dot_dimension_numbers<[1], [0], [0], [1], [0, 0, 1, 1], [], []>} : vector<8x8xf32>, vector<8x200xf32>, vector<8x200xf32> -> vector<8x200xf32>
    %305 = arith.addf %300, %304 : vector<8x200xf32>
    %c0_263 = arith.constant 0 : index
    %c128_264 = arith.constant 128 : index
    %306 = vector.load %arg15[%c0_263, %c128_264] : memref<8x904xf32, #tpu.memory_space<vmem>>, vector<8x200xf32>
    %c40 = arith.constant 40 : index
    %c0_265 = arith.constant 0 : index
    %c0_266 = arith.constant 0 : index
    %307 = vector.load %arg10[%c40, %c0_265, %c0_266] : memref<72x8x8xf32, #tpu.memory_space<vmem>>, vector<1x8x8xf32>
    %308 = vector.shape_cast %307 : vector<1x8x8xf32> to vector<8x8xf32>
    %cst_267 = arith.constant dense<0.000000e+00> : vector<8x200xf32>
    %309 = tpu.matmul %308, %306, %cst_267 {dimension_numbers = #tpu.dot_dimension_numbers<[1], [0], [0], [1], [0, 0, 1, 1], [], []>} : vector<8x8xf32>, vector<8x200xf32>, vector<8x200xf32> -> vector<8x200xf32>
    %310 = arith.addf %305, %309 : vector<8x200xf32>
    %c0_268 = arith.constant 0 : index
    %c129_269 = arith.constant 129 : index
    %311 = vector.load %arg15[%c0_268, %c129_269] : memref<8x904xf32, #tpu.memory_space<vmem>>, vector<8x200xf32>
    %c41 = arith.constant 41 : index
    %c0_270 = arith.constant 0 : index
    %c0_271 = arith.constant 0 : index
    %312 = vector.load %arg10[%c41, %c0_270, %c0_271] : memref<72x8x8xf32, #tpu.memory_space<vmem>>, vector<1x8x8xf32>
    %313 = vector.shape_cast %312 : vector<1x8x8xf32> to vector<8x8xf32>
    %cst_272 = arith.constant dense<0.000000e+00> : vector<8x200xf32>
    %314 = tpu.matmul %313, %311, %cst_272 {dimension_numbers = #tpu.dot_dimension_numbers<[1], [0], [0], [1], [0, 0, 1, 1], [], []>} : vector<8x8xf32>, vector<8x200xf32>, vector<8x200xf32> -> vector<8x200xf32>
    %315 = arith.addf %310, %314 : vector<8x200xf32>
    %c0_273 = arith.constant 0 : index
    %c137_274 = arith.constant 137 : index
    %316 = vector.load %arg15[%c0_273, %c137_274] : memref<8x904xf32, #tpu.memory_space<vmem>>, vector<8x200xf32>
    %c42 = arith.constant 42 : index
    %c0_275 = arith.constant 0 : index
    %c0_276 = arith.constant 0 : index
    %317 = vector.load %arg10[%c42, %c0_275, %c0_276] : memref<72x8x8xf32, #tpu.memory_space<vmem>>, vector<1x8x8xf32>
    %318 = vector.shape_cast %317 : vector<1x8x8xf32> to vector<8x8xf32>
    %cst_277 = arith.constant dense<0.000000e+00> : vector<8x200xf32>
    %319 = tpu.matmul %318, %316, %cst_277 {dimension_numbers = #tpu.dot_dimension_numbers<[1], [0], [0], [1], [0, 0, 1, 1], [], []>} : vector<8x8xf32>, vector<8x200xf32>, vector<8x200xf32> -> vector<8x200xf32>
    %320 = arith.addf %315, %319 : vector<8x200xf32>
    %c0_278 = arith.constant 0 : index
    %c138_279 = arith.constant 138 : index
    %321 = vector.load %arg15[%c0_278, %c138_279] : memref<8x904xf32, #tpu.memory_space<vmem>>, vector<8x200xf32>
    %c43 = arith.constant 43 : index
    %c0_280 = arith.constant 0 : index
    %c0_281 = arith.constant 0 : index
    %322 = vector.load %arg10[%c43, %c0_280, %c0_281] : memref<72x8x8xf32, #tpu.memory_space<vmem>>, vector<1x8x8xf32>
    %323 = vector.shape_cast %322 : vector<1x8x8xf32> to vector<8x8xf32>
    %cst_282 = arith.constant dense<0.000000e+00> : vector<8x200xf32>
    %324 = tpu.matmul %323, %321, %cst_282 {dimension_numbers = #tpu.dot_dimension_numbers<[1], [0], [0], [1], [0, 0, 1, 1], [], []>} : vector<8x8xf32>, vector<8x200xf32>, vector<8x200xf32> -> vector<8x200xf32>
    %325 = arith.addf %320, %324 : vector<8x200xf32>
    %c0_283 = arith.constant 0 : index
    %c139_284 = arith.constant 139 : index
    %326 = vector.load %arg15[%c0_283, %c139_284] : memref<8x904xf32, #tpu.memory_space<vmem>>, vector<8x200xf32>
    %c44 = arith.constant 44 : index
    %c0_285 = arith.constant 0 : index
    %c0_286 = arith.constant 0 : index
    %327 = vector.load %arg10[%c44, %c0_285, %c0_286] : memref<72x8x8xf32, #tpu.memory_space<vmem>>, vector<1x8x8xf32>
    %328 = vector.shape_cast %327 : vector<1x8x8xf32> to vector<8x8xf32>
    %cst_287 = arith.constant dense<0.000000e+00> : vector<8x200xf32>
    %329 = tpu.matmul %328, %326, %cst_287 {dimension_numbers = #tpu.dot_dimension_numbers<[1], [0], [0], [1], [0, 0, 1, 1], [], []>} : vector<8x8xf32>, vector<8x200xf32>, vector<8x200xf32> -> vector<8x200xf32>
    %330 = arith.addf %325, %329 : vector<8x200xf32>
    %c4_288 = arith.constant 4 : index
    %c0_289 = arith.constant 0 : index
    %c0_290 = arith.constant 0 : index
    %331 = vector.load %arg11[%c4_288, %c0_289, %c0_290] : memref<8x8x1xf32, #tpu.memory_space<vmem>>, vector<1x8x1xf32>
    %332 = vector.shape_cast %331 : vector<1x8x1xf32> to vector<8x1xf32>
    %333 = vector.broadcast %332 : vector<8x1xf32> to vector<8x200xf32>
    %334 = arith.addf %330, %333 : vector<8x200xf32>
    %cst_291 = arith.constant 5.000000e-01 : f32
    %335 = vector.broadcast %cst_291 : f32 to vector<8x200xf32>
    %336 = arith.mulf %335, %334 : vector<8x200xf32>
    %cst_292 = arith.constant 0.707106769 : f32
    %337 = vector.broadcast %cst_292 : f32 to vector<8x200xf32>
    %338 = arith.mulf %334, %337 : vector<8x200xf32>
    %339 = math.erf %338 : vector<8x200xf32>
    %cst_293 = arith.constant 1.000000e+00 : f32
    %340 = vector.broadcast %cst_293 : f32 to vector<8x200xf32>
    %341 = arith.addf %340, %339 : vector<8x200xf32>
    %342 = arith.mulf %336, %341 : vector<8x200xf32>
    %343 = vector.broadcast %285 : vector<1x200xf32> to vector<8x200xf32>
    %344 = arith.mulf %342, %343 : vector<8x200xf32>
    %c0_294 = arith.constant 0 : index
    %c128_295 = arith.constant 128 : index
    %345 = vector.load %arg15[%c0_294, %c128_295] : memref<8x904xf32, #tpu.memory_space<vmem>>, vector<8x200xf32>
    tpu.vector_store %arg15[%c0_294, %c128_295], %344 {strides = array<i32>} : memref<8x904xf32, #tpu.memory_space<vmem>>, vector<8x200xf32>,
    %c0_296 = arith.constant 0 : index
    %c117_297 = arith.constant 117 : index
    %346 = vector.load %arg15[%c0_296, %c117_297] : memref<8x904xf32, #tpu.memory_space<vmem>>, vector<8x200xf32>
    %c45 = arith.constant 45 : index
    %c0_298 = arith.constant 0 : index
    %c0_299 = arith.constant 0 : index
    %347 = vector.load %arg10[%c45, %c0_298, %c0_299] : memref<72x8x8xf32, #tpu.memory_space<vmem>>, vector<1x8x8xf32>
    %348 = vector.shape_cast %347 : vector<1x8x8xf32> to vector<8x8xf32>
    %cst_300 = arith.constant dense<0.000000e+00> : vector<8x200xf32>
    %349 = tpu.matmul %348, %346, %cst_300 {dimension_numbers = #tpu.dot_dimension_numbers<[1], [0], [0], [1], [0, 0, 1, 1], [], []>} : vector<8x8xf32>, vector<8x200xf32>, vector<8x200xf32> -> vector<8x200xf32>
    %c0_301 = arith.constant 0 : index
    %c118_302 = arith.constant 118 : index
    %350 = vector.load %arg15[%c0_301, %c118_302] : memref<8x904xf32, #tpu.memory_space<vmem>>, vector<8x200xf32>
    %c46 = arith.constant 46 : index
    %c0_303 = arith.constant 0 : index
    %c0_304 = arith.constant 0 : index
    %351 = vector.load %arg10[%c46, %c0_303, %c0_304] : memref<72x8x8xf32, #tpu.memory_space<vmem>>, vector<1x8x8xf32>
    %352 = vector.shape_cast %351 : vector<1x8x8xf32> to vector<8x8xf32>
    %cst_305 = arith.constant dense<0.000000e+00> : vector<8x200xf32>
    %353 = tpu.matmul %352, %350, %cst_305 {dimension_numbers = #tpu.dot_dimension_numbers<[1], [0], [0], [1], [0, 0, 1, 1], [], []>} : vector<8x8xf32>, vector<8x200xf32>, vector<8x200xf32> -> vector<8x200xf32>
    %354 = arith.addf %349, %353 : vector<8x200xf32>
    %c0_306 = arith.constant 0 : index
    %c119_307 = arith.constant 119 : index
    %355 = vector.load %arg15[%c0_306, %c119_307] : memref<8x904xf32, #tpu.memory_space<vmem>>, vector<8x200xf32>
    %c47 = arith.constant 47 : index
    %c0_308 = arith.constant 0 : index
    %c0_309 = arith.constant 0 : index
    %356 = vector.load %arg10[%c47, %c0_308, %c0_309] : memref<72x8x8xf32, #tpu.memory_space<vmem>>, vector<1x8x8xf32>
    %357 = vector.shape_cast %356 : vector<1x8x8xf32> to vector<8x8xf32>
    %cst_310 = arith.constant dense<0.000000e+00> : vector<8x200xf32>
    %358 = tpu.matmul %357, %355, %cst_310 {dimension_numbers = #tpu.dot_dimension_numbers<[1], [0], [0], [1], [0, 0, 1, 1], [], []>} : vector<8x8xf32>, vector<8x200xf32>, vector<8x200xf32> -> vector<8x200xf32>
    %359 = arith.addf %354, %358 : vector<8x200xf32>
    %c0_311 = arith.constant 0 : index
    %c127_312 = arith.constant 127 : index
    %360 = vector.load %arg15[%c0_311, %c127_312] : memref<8x904xf32, #tpu.memory_space<vmem>>, vector<8x200xf32>
    %c48 = arith.constant 48 : index
    %c0_313 = arith.constant 0 : index
    %c0_314 = arith.constant 0 : index
    %361 = vector.load %arg10[%c48, %c0_313, %c0_314] : memref<72x8x8xf32, #tpu.memory_space<vmem>>, vector<1x8x8xf32>
    %362 = vector.shape_cast %361 : vector<1x8x8xf32> to vector<8x8xf32>
    %cst_315 = arith.constant dense<0.000000e+00> : vector<8x200xf32>
    %363 = tpu.matmul %362, %360, %cst_315 {dimension_numbers = #tpu.dot_dimension_numbers<[1], [0], [0], [1], [0, 0, 1, 1], [], []>} : vector<8x8xf32>, vector<8x200xf32>, vector<8x200xf32> -> vector<8x200xf32>
    %364 = arith.addf %359, %363 : vector<8x200xf32>
    %c0_316 = arith.constant 0 : index
    %c128_317 = arith.constant 128 : index
    %365 = vector.load %arg15[%c0_316, %c128_317] : memref<8x904xf32, #tpu.memory_space<vmem>>, vector<8x200xf32>
    %c49 = arith.constant 49 : index
    %c0_318 = arith.constant 0 : index
    %c0_319 = arith.constant 0 : index
    %366 = vector.load %arg10[%c49, %c0_318, %c0_319] : memref<72x8x8xf32, #tpu.memory_space<vmem>>, vector<1x8x8xf32>
    %367 = vector.shape_cast %366 : vector<1x8x8xf32> to vector<8x8xf32>
    %cst_320 = arith.constant dense<0.000000e+00> : vector<8x200xf32>
    %368 = tpu.matmul %367, %365, %cst_320 {dimension_numbers = #tpu.dot_dimension_numbers<[1], [0], [0], [1], [0, 0, 1, 1], [], []>} : vector<8x8xf32>, vector<8x200xf32>, vector<8x200xf32> -> vector<8x200xf32>
    %369 = arith.addf %364, %368 : vector<8x200xf32>
    %c0_321 = arith.constant 0 : index
    %c129_322 = arith.constant 129 : index
    %370 = vector.load %arg15[%c0_321, %c129_322] : memref<8x904xf32, #tpu.memory_space<vmem>>, vector<8x200xf32>
    %c50 = arith.constant 50 : index
    %c0_323 = arith.constant 0 : index
    %c0_324 = arith.constant 0 : index
    %371 = vector.load %arg10[%c50, %c0_323, %c0_324] : memref<72x8x8xf32, #tpu.memory_space<vmem>>, vector<1x8x8xf32>
    %372 = vector.shape_cast %371 : vector<1x8x8xf32> to vector<8x8xf32>
    %cst_325 = arith.constant dense<0.000000e+00> : vector<8x200xf32>
    %373 = tpu.matmul %372, %370, %cst_325 {dimension_numbers = #tpu.dot_dimension_numbers<[1], [0], [0], [1], [0, 0, 1, 1], [], []>} : vector<8x8xf32>, vector<8x200xf32>, vector<8x200xf32> -> vector<8x200xf32>
    %374 = arith.addf %369, %373 : vector<8x200xf32>
    %c0_326 = arith.constant 0 : index
    %c137_327 = arith.constant 137 : index
    %375 = vector.load %arg15[%c0_326, %c137_327] : memref<8x904xf32, #tpu.memory_space<vmem>>, vector<8x200xf32>
    %c51 = arith.constant 51 : index
    %c0_328 = arith.constant 0 : index
    %c0_329 = arith.constant 0 : index
    %376 = vector.load %arg10[%c51, %c0_328, %c0_329] : memref<72x8x8xf32, #tpu.memory_space<vmem>>, vector<1x8x8xf32>
    %377 = vector.shape_cast %376 : vector<1x8x8xf32> to vector<8x8xf32>
    %cst_330 = arith.constant dense<0.000000e+00> : vector<8x200xf32>
    %378 = tpu.matmul %377, %375, %cst_330 {dimension_numbers = #tpu.dot_dimension_numbers<[1], [0], [0], [1], [0, 0, 1, 1], [], []>} : vector<8x8xf32>, vector<8x200xf32>, vector<8x200xf32> -> vector<8x200xf32>
    %379 = arith.addf %374, %378 : vector<8x200xf32>
    %c0_331 = arith.constant 0 : index
    %c138_332 = arith.constant 138 : index
    %380 = vector.load %arg15[%c0_331, %c138_332] : memref<8x904xf32, #tpu.memory_space<vmem>>, vector<8x200xf32>
    %c52 = arith.constant 52 : index
    %c0_333 = arith.constant 0 : index
    %c0_334 = arith.constant 0 : index
    %381 = vector.load %arg10[%c52, %c0_333, %c0_334] : memref<72x8x8xf32, #tpu.memory_space<vmem>>, vector<1x8x8xf32>
    %382 = vector.shape_cast %381 : vector<1x8x8xf32> to vector<8x8xf32>
    %cst_335 = arith.constant dense<0.000000e+00> : vector<8x200xf32>
    %383 = tpu.matmul %382, %380, %cst_335 {dimension_numbers = #tpu.dot_dimension_numbers<[1], [0], [0], [1], [0, 0, 1, 1], [], []>} : vector<8x8xf32>, vector<8x200xf32>, vector<8x200xf32> -> vector<8x200xf32>
    %384 = arith.addf %379, %383 : vector<8x200xf32>
    %c0_336 = arith.constant 0 : index
    %c139_337 = arith.constant 139 : index
    %385 = vector.load %arg15[%c0_336, %c139_337] : memref<8x904xf32, #tpu.memory_space<vmem>>, vector<8x200xf32>
    %c53 = arith.constant 53 : index
    %c0_338 = arith.constant 0 : index
    %c0_339 = arith.constant 0 : index
    %386 = vector.load %arg10[%c53, %c0_338, %c0_339] : memref<72x8x8xf32, #tpu.memory_space<vmem>>, vector<1x8x8xf32>
    %387 = vector.shape_cast %386 : vector<1x8x8xf32> to vector<8x8xf32>
    %cst_340 = arith.constant dense<0.000000e+00> : vector<8x200xf32>
    %388 = tpu.matmul %387, %385, %cst_340 {dimension_numbers = #tpu.dot_dimension_numbers<[1], [0], [0], [1], [0, 0, 1, 1], [], []>} : vector<8x8xf32>, vector<8x200xf32>, vector<8x200xf32> -> vector<8x200xf32>
    %389 = arith.addf %384, %388 : vector<8x200xf32>
    %c5_341 = arith.constant 5 : index
    %c0_342 = arith.constant 0 : index
    %c0_343 = arith.constant 0 : index
    %390 = vector.load %arg11[%c5_341, %c0_342, %c0_343] : memref<8x8x1xf32, #tpu.memory_space<vmem>>, vector<1x8x1xf32>
    %391 = vector.shape_cast %390 : vector<1x8x1xf32> to vector<8x1xf32>
    %392 = vector.broadcast %391 : vector<8x1xf32> to vector<8x200xf32>
    %393 = arith.addf %389, %392 : vector<8x200xf32>
    %cst_344 = arith.constant 5.000000e-01 : f32
    %394 = vector.broadcast %cst_344 : f32 to vector<8x200xf32>
    %395 = arith.mulf %394, %393 : vector<8x200xf32>
    %cst_345 = arith.constant 0.707106769 : f32
    %396 = vector.broadcast %cst_345 : f32 to vector<8x200xf32>
    %397 = arith.mulf %393, %396 : vector<8x200xf32>
    %398 = math.erf %397 : vector<8x200xf32>
    %cst_346 = arith.constant 1.000000e+00 : f32
    %399 = vector.broadcast %cst_346 : f32 to vector<8x200xf32>
    %400 = arith.addf %399, %398 : vector<8x200xf32>
    %401 = arith.mulf %395, %400 : vector<8x200xf32>
    %402 = vector.broadcast %285 : vector<1x200xf32> to vector<8x200xf32>
    %403 = arith.mulf %401, %402 : vector<8x200xf32>
    %c2_347 = arith.constant 2 : index
    %c0_348 = arith.constant 0 : index
    %c0_349 = arith.constant 0 : index
    %404 = vector.load %arg12[%c2_347, %c0_348, %c0_349] : memref<4x8x8xf32, #tpu.memory_space<vmem>>, vector<1x8x8xf32>
    %405 = vector.shape_cast %404 : vector<1x8x8xf32> to vector<8x8xf32>
    %cst_350 = arith.constant dense<0.000000e+00> : vector<8x200xf32>
    %406 = tpu.matmul %405, %284, %cst_350 {dimension_numbers = #tpu.dot_dimension_numbers<[1], [0], [0], [1], [0, 0, 1, 1], [], []>} : vector<8x8xf32>, vector<8x200xf32>, vector<8x200xf32> -> vector<8x200xf32>
    %c2_351 = arith.constant 2 : index
    %c0_352 = arith.constant 0 : index
    %c0_353 = arith.constant 0 : index
    %407 = vector.load %arg13[%c2_351, %c0_352, %c0_353] : memref<4x8x1xf32, #tpu.memory_space<vmem>>, vector<1x8x1xf32>
    %408 = vector.shape_cast %407 : vector<1x8x1xf32> to vector<8x1xf32>
    %409 = vector.broadcast %408 : vector<8x1xf32> to vector<8x200xf32>
    %410 = arith.addf %406, %409 : vector<8x200xf32>
    %411 = vector.broadcast %285 : vector<1x200xf32> to vector<8x200xf32>
    %412 = arith.mulf %410, %411 : vector<8x200xf32>
    %413 = arith.addf %403, %412 : vector<8x200xf32>
    %c0_354 = arith.constant 0 : index
    %c0_355 = arith.constant 0 : index
    %414 = vector.load %arg7[%c0_354, %c0_355] : memref<200x648xf32, #tpu.memory_space<vmem>>, vector<200x648xf32>
    %cst_356 = arith.constant dense<0.000000e+00> : vector<8x648xf32>
    %415 = tpu.matmul %413, %414, %cst_356 {dimension_numbers = #tpu.dot_dimension_numbers<[1], [0], [0], [1], [0, 0, 1, 1], [], []>} : vector<8x200xf32>, vector<200x648xf32>, vector<8x648xf32> -> vector<8x648xf32>
    %c0_357 = arith.constant 0 : index
    %c0_358 = arith.constant 0 : index
    %416 = vector.load %arg1[%c0_357, %c0_358] : memref<1x648xf32, #tpu.memory_space<vmem>>, vector<1x648xf32>
    %c0_359 = arith.constant 0 : index
    %c128_360 = arith.constant 128 : index
    %417 = vector.load %arg15[%c0_359, %c128_360] : memref<8x904xf32, #tpu.memory_space<vmem>>, vector<8x648xf32>
    tpu.vector_store %arg15[%c0_359, %c128_360], %415 {strides = array<i32>} : memref<8x904xf32, #tpu.memory_space<vmem>>, vector<8x648xf32>,
    %c0_361 = arith.constant 0 : index
    %c109_362 = arith.constant 109 : index
    %418 = vector.load %arg15[%c0_361, %c109_362] : memref<8x904xf32, #tpu.memory_space<vmem>>, vector<8x648xf32>
    %c54 = arith.constant 54 : index
    %c0_363 = arith.constant 0 : index
    %c0_364 = arith.constant 0 : index
    %419 = vector.load %arg10[%c54, %c0_363, %c0_364] : memref<72x8x8xf32, #tpu.memory_space<vmem>>, vector<1x8x8xf32>
    %420 = vector.shape_cast %419 : vector<1x8x8xf32> to vector<8x8xf32>
    %cst_365 = arith.constant dense<0.000000e+00> : vector<8x648xf32>
    %421 = tpu.matmul %420, %418, %cst_365 {dimension_numbers = #tpu.dot_dimension_numbers<[1], [0], [0], [1], [0, 0, 1, 1], [], []>} : vector<8x8xf32>, vector<8x648xf32>, vector<8x648xf32> -> vector<8x648xf32>
    %c0_366 = arith.constant 0 : index
    %c110_367 = arith.constant 110 : index
    %422 = vector.load %arg15[%c0_366, %c110_367] : memref<8x904xf32, #tpu.memory_space<vmem>>, vector<8x648xf32>
    %c55 = arith.constant 55 : index
    %c0_368 = arith.constant 0 : index
    %c0_369 = arith.constant 0 : index
    %423 = vector.load %arg10[%c55, %c0_368, %c0_369] : memref<72x8x8xf32, #tpu.memory_space<vmem>>, vector<1x8x8xf32>
    %424 = vector.shape_cast %423 : vector<1x8x8xf32> to vector<8x8xf32>
    %cst_370 = arith.constant dense<0.000000e+00> : vector<8x648xf32>
    %425 = tpu.matmul %424, %422, %cst_370 {dimension_numbers = #tpu.dot_dimension_numbers<[1], [0], [0], [1], [0, 0, 1, 1], [], []>} : vector<8x8xf32>, vector<8x648xf32>, vector<8x648xf32> -> vector<8x648xf32>
    %426 = arith.addf %421, %425 : vector<8x648xf32>
    %c0_371 = arith.constant 0 : index
    %c111_372 = arith.constant 111 : index
    %427 = vector.load %arg15[%c0_371, %c111_372] : memref<8x904xf32, #tpu.memory_space<vmem>>, vector<8x648xf32>
    %c56 = arith.constant 56 : index
    %c0_373 = arith.constant 0 : index
    %c0_374 = arith.constant 0 : index
    %428 = vector.load %arg10[%c56, %c0_373, %c0_374] : memref<72x8x8xf32, #tpu.memory_space<vmem>>, vector<1x8x8xf32>
    %429 = vector.shape_cast %428 : vector<1x8x8xf32> to vector<8x8xf32>
    %cst_375 = arith.constant dense<0.000000e+00> : vector<8x648xf32>
    %430 = tpu.matmul %429, %427, %cst_375 {dimension_numbers = #tpu.dot_dimension_numbers<[1], [0], [0], [1], [0, 0, 1, 1], [], []>} : vector<8x8xf32>, vector<8x648xf32>, vector<8x648xf32> -> vector<8x648xf32>
    %431 = arith.addf %426, %430 : vector<8x648xf32>
    %c0_376 = arith.constant 0 : index
    %c127_377 = arith.constant 127 : index
    %432 = vector.load %arg15[%c0_376, %c127_377] : memref<8x904xf32, #tpu.memory_space<vmem>>, vector<8x648xf32>
    %c57 = arith.constant 57 : index
    %c0_378 = arith.constant 0 : index
    %c0_379 = arith.constant 0 : index
    %433 = vector.load %arg10[%c57, %c0_378, %c0_379] : memref<72x8x8xf32, #tpu.memory_space<vmem>>, vector<1x8x8xf32>
    %434 = vector.shape_cast %433 : vector<1x8x8xf32> to vector<8x8xf32>
    %cst_380 = arith.constant dense<0.000000e+00> : vector<8x648xf32>
    %435 = tpu.matmul %434, %432, %cst_380 {dimension_numbers = #tpu.dot_dimension_numbers<[1], [0], [0], [1], [0, 0, 1, 1], [], []>} : vector<8x8xf32>, vector<8x648xf32>, vector<8x648xf32> -> vector<8x648xf32>
    %436 = arith.addf %431, %435 : vector<8x648xf32>
    %c0_381 = arith.constant 0 : index
    %c128_382 = arith.constant 128 : index
    %437 = vector.load %arg15[%c0_381, %c128_382] : memref<8x904xf32, #tpu.memory_space<vmem>>, vector<8x648xf32>
    %c58 = arith.constant 58 : index
    %c0_383 = arith.constant 0 : index
    %c0_384 = arith.constant 0 : index
    %438 = vector.load %arg10[%c58, %c0_383, %c0_384] : memref<72x8x8xf32, #tpu.memory_space<vmem>>, vector<1x8x8xf32>
    %439 = vector.shape_cast %438 : vector<1x8x8xf32> to vector<8x8xf32>
    %cst_385 = arith.constant dense<0.000000e+00> : vector<8x648xf32>
    %440 = tpu.matmul %439, %437, %cst_385 {dimension_numbers = #tpu.dot_dimension_numbers<[1], [0], [0], [1], [0, 0, 1, 1], [], []>} : vector<8x8xf32>, vector<8x648xf32>, vector<8x648xf32> -> vector<8x648xf32>
    %441 = arith.addf %436, %440 : vector<8x648xf32>
    %c0_386 = arith.constant 0 : index
    %c129_387 = arith.constant 129 : index
    %442 = vector.load %arg15[%c0_386, %c129_387] : memref<8x904xf32, #tpu.memory_space<vmem>>, vector<8x648xf32>
    %c59 = arith.constant 59 : index
    %c0_388 = arith.constant 0 : index
    %c0_389 = arith.constant 0 : index
    %443 = vector.load %arg10[%c59, %c0_388, %c0_389] : memref<72x8x8xf32, #tpu.memory_space<vmem>>, vector<1x8x8xf32>
    %444 = vector.shape_cast %443 : vector<1x8x8xf32> to vector<8x8xf32>
    %cst_390 = arith.constant dense<0.000000e+00> : vector<8x648xf32>
    %445 = tpu.matmul %444, %442, %cst_390 {dimension_numbers = #tpu.dot_dimension_numbers<[1], [0], [0], [1], [0, 0, 1, 1], [], []>} : vector<8x8xf32>, vector<8x648xf32>, vector<8x648xf32> -> vector<8x648xf32>
    %446 = arith.addf %441, %445 : vector<8x648xf32>
    %c0_391 = arith.constant 0 : index
    %c145_392 = arith.constant 145 : index
    %447 = vector.load %arg15[%c0_391, %c145_392] : memref<8x904xf32, #tpu.memory_space<vmem>>, vector<8x648xf32>
    %c60 = arith.constant 60 : index
    %c0_393 = arith.constant 0 : index
    %c0_394 = arith.constant 0 : index
    %448 = vector.load %arg10[%c60, %c0_393, %c0_394] : memref<72x8x8xf32, #tpu.memory_space<vmem>>, vector<1x8x8xf32>
    %449 = vector.shape_cast %448 : vector<1x8x8xf32> to vector<8x8xf32>
    %cst_395 = arith.constant dense<0.000000e+00> : vector<8x648xf32>
    %450 = tpu.matmul %449, %447, %cst_395 {dimension_numbers = #tpu.dot_dimension_numbers<[1], [0], [0], [1], [0, 0, 1, 1], [], []>} : vector<8x8xf32>, vector<8x648xf32>, vector<8x648xf32> -> vector<8x648xf32>
    %451 = arith.addf %446, %450 : vector<8x648xf32>
    %c0_396 = arith.constant 0 : index
    %c146_397 = arith.constant 146 : index
    %452 = vector.load %arg15[%c0_396, %c146_397] : memref<8x904xf32, #tpu.memory_space<vmem>>, vector<8x648xf32>
    %c61 = arith.constant 61 : index
    %c0_398 = arith.constant 0 : index
    %c0_399 = arith.constant 0 : index
    %453 = vector.load %arg10[%c61, %c0_398, %c0_399] : memref<72x8x8xf32, #tpu.memory_space<vmem>>, vector<1x8x8xf32>
    %454 = vector.shape_cast %453 : vector<1x8x8xf32> to vector<8x8xf32>
    %cst_400 = arith.constant dense<0.000000e+00> : vector<8x648xf32>
    %455 = tpu.matmul %454, %452, %cst_400 {dimension_numbers = #tpu.dot_dimension_numbers<[1], [0], [0], [1], [0, 0, 1, 1], [], []>} : vector<8x8xf32>, vector<8x648xf32>, vector<8x648xf32> -> vector<8x648xf32>
    %456 = arith.addf %451, %455 : vector<8x648xf32>
    %c0_401 = arith.constant 0 : index
    %c147_402 = arith.constant 147 : index
    %457 = vector.load %arg15[%c0_401, %c147_402] : memref<8x904xf32, #tpu.memory_space<vmem>>, vector<8x648xf32>
    %c62 = arith.constant 62 : index
    %c0_403 = arith.constant 0 : index
    %c0_404 = arith.constant 0 : index
    %458 = vector.load %arg10[%c62, %c0_403, %c0_404] : memref<72x8x8xf32, #tpu.memory_space<vmem>>, vector<1x8x8xf32>
    %459 = vector.shape_cast %458 : vector<1x8x8xf32> to vector<8x8xf32>
    %cst_405 = arith.constant dense<0.000000e+00> : vector<8x648xf32>
    %460 = tpu.matmul %459, %457, %cst_405 {dimension_numbers = #tpu.dot_dimension_numbers<[1], [0], [0], [1], [0, 0, 1, 1], [], []>} : vector<8x8xf32>, vector<8x648xf32>, vector<8x648xf32> -> vector<8x648xf32>
    %461 = arith.addf %456, %460 : vector<8x648xf32>
    %c6_406 = arith.constant 6 : index
    %c0_407 = arith.constant 0 : index
    %c0_408 = arith.constant 0 : index
    %462 = vector.load %arg11[%c6_406, %c0_407, %c0_408] : memref<8x8x1xf32, #tpu.memory_space<vmem>>, vector<1x8x1xf32>
    %463 = vector.shape_cast %462 : vector<1x8x1xf32> to vector<8x1xf32>
    %464 = vector.broadcast %463 : vector<8x1xf32> to vector<8x648xf32>
    %465 = arith.addf %461, %464 : vector<8x648xf32>
    %cst_409 = arith.constant 5.000000e-01 : f32
    %466 = vector.broadcast %cst_409 : f32 to vector<8x648xf32>
    %467 = arith.mulf %466, %465 : vector<8x648xf32>
    %cst_410 = arith.constant 0.707106769 : f32
    %468 = vector.broadcast %cst_410 : f32 to vector<8x648xf32>
    %469 = arith.mulf %465, %468 : vector<8x648xf32>
    %470 = math.erf %469 : vector<8x648xf32>
    %cst_411 = arith.constant 1.000000e+00 : f32
    %471 = vector.broadcast %cst_411 : f32 to vector<8x648xf32>
    %472 = arith.addf %471, %470 : vector<8x648xf32>
    %473 = arith.mulf %467, %472 : vector<8x648xf32>
    %474 = vector.broadcast %416 : vector<1x648xf32> to vector<8x648xf32>
    %475 = arith.mulf %473, %474 : vector<8x648xf32>
    %c0_412 = arith.constant 0 : index
    %c128_413 = arith.constant 128 : index
    %476 = vector.load %arg15[%c0_412, %c128_413] : memref<8x904xf32, #tpu.memory_space<vmem>>, vector<8x648xf32>
    tpu.vector_store %arg15[%c0_412, %c128_413], %475 {strides = array<i32>} : memref<8x904xf32, #tpu.memory_space<vmem>>, vector<8x648xf32>,
    %c0_414 = arith.constant 0 : index
    %c109_415 = arith.constant 109 : index
    %477 = vector.load %arg15[%c0_414, %c109_415] : memref<8x904xf32, #tpu.memory_space<vmem>>, vector<8x648xf32>
    %c63 = arith.constant 63 : index
    %c0_416 = arith.constant 0 : index
    %c0_417 = arith.constant 0 : index
    %478 = vector.load %arg10[%c63, %c0_416, %c0_417] : memref<72x8x8xf32, #tpu.memory_space<vmem>>, vector<1x8x8xf32>
    %479 = vector.shape_cast %478 : vector<1x8x8xf32> to vector<8x8xf32>
    %cst_418 = arith.constant dense<0.000000e+00> : vector<8x648xf32>
    %480 = tpu.matmul %479, %477, %cst_418 {dimension_numbers = #tpu.dot_dimension_numbers<[1], [0], [0], [1], [0, 0, 1, 1], [], []>} : vector<8x8xf32>, vector<8x648xf32>, vector<8x648xf32> -> vector<8x648xf32>
    %c0_419 = arith.constant 0 : index
    %c110_420 = arith.constant 110 : index
    %481 = vector.load %arg15[%c0_419, %c110_420] : memref<8x904xf32, #tpu.memory_space<vmem>>, vector<8x648xf32>
    %c64 = arith.constant 64 : index
    %c0_421 = arith.constant 0 : index
    %c0_422 = arith.constant 0 : index
    %482 = vector.load %arg10[%c64, %c0_421, %c0_422] : memref<72x8x8xf32, #tpu.memory_space<vmem>>, vector<1x8x8xf32>
    %483 = vector.shape_cast %482 : vector<1x8x8xf32> to vector<8x8xf32>
    %cst_423 = arith.constant dense<0.000000e+00> : vector<8x648xf32>
    %484 = tpu.matmul %483, %481, %cst_423 {dimension_numbers = #tpu.dot_dimension_numbers<[1], [0], [0], [1], [0, 0, 1, 1], [], []>} : vector<8x8xf32>, vector<8x648xf32>, vector<8x648xf32> -> vector<8x648xf32>
    %485 = arith.addf %480, %484 : vector<8x648xf32>
    %c0_424 = arith.constant 0 : index
    %c111_425 = arith.constant 111 : index
    %486 = vector.load %arg15[%c0_424, %c111_425] : memref<8x904xf32, #tpu.memory_space<vmem>>, vector<8x648xf32>
    %c65 = arith.constant 65 : index
    %c0_426 = arith.constant 0 : index
    %c0_427 = arith.constant 0 : index
    %487 = vector.load %arg10[%c65, %c0_426, %c0_427] : memref<72x8x8xf32, #tpu.memory_space<vmem>>, vector<1x8x8xf32>
    %488 = vector.shape_cast %487 : vector<1x8x8xf32> to vector<8x8xf32>
    %cst_428 = arith.constant dense<0.000000e+00> : vector<8x648xf32>
    %489 = tpu.matmul %488, %486, %cst_428 {dimension_numbers = #tpu.dot_dimension_numbers<[1], [0], [0], [1], [0, 0, 1, 1], [], []>} : vector<8x8xf32>, vector<8x648xf32>, vector<8x648xf32> -> vector<8x648xf32>
    %490 = arith.addf %485, %489 : vector<8x648xf32>
    %c0_429 = arith.constant 0 : index
    %c127_430 = arith.constant 127 : index
    %491 = vector.load %arg15[%c0_429, %c127_430] : memref<8x904xf32, #tpu.memory_space<vmem>>, vector<8x648xf32>
    %c66 = arith.constant 66 : index
    %c0_431 = arith.constant 0 : index
    %c0_432 = arith.constant 0 : index
    %492 = vector.load %arg10[%c66, %c0_431, %c0_432] : memref<72x8x8xf32, #tpu.memory_space<vmem>>, vector<1x8x8xf32>
    %493 = vector.shape_cast %492 : vector<1x8x8xf32> to vector<8x8xf32>
    %cst_433 = arith.constant dense<0.000000e+00> : vector<8x648xf32>
    %494 = tpu.matmul %493, %491, %cst_433 {dimension_numbers = #tpu.dot_dimension_numbers<[1], [0], [0], [1], [0, 0, 1, 1], [], []>} : vector<8x8xf32>, vector<8x648xf32>, vector<8x648xf32> -> vector<8x648xf32>
    %495 = arith.addf %490, %494 : vector<8x648xf32>
    %c0_434 = arith.constant 0 : index
    %c128_435 = arith.constant 128 : index
    %496 = vector.load %arg15[%c0_434, %c128_435] : memref<8x904xf32, #tpu.memory_space<vmem>>, vector<8x648xf32>
    %c67 = arith.constant 67 : index
    %c0_436 = arith.constant 0 : index
    %c0_437 = arith.constant 0 : index
    %497 = vector.load %arg10[%c67, %c0_436, %c0_437] : memref<72x8x8xf32, #tpu.memory_space<vmem>>, vector<1x8x8xf32>
    %498 = vector.shape_cast %497 : vector<1x8x8xf32> to vector<8x8xf32>
    %cst_438 = arith.constant dense<0.000000e+00> : vector<8x648xf32>
    %499 = tpu.matmul %498, %496, %cst_438 {dimension_numbers = #tpu.dot_dimension_numbers<[1], [0], [0], [1], [0, 0, 1, 1], [], []>} : vector<8x8xf32>, vector<8x648xf32>, vector<8x648xf32> -> vector<8x648xf32>
    %500 = arith.addf %495, %499 : vector<8x648xf32>
    %c0_439 = arith.constant 0 : index
    %c129_440 = arith.constant 129 : index
    %501 = vector.load %arg15[%c0_439, %c129_440] : memref<8x904xf32, #tpu.memory_space<vmem>>, vector<8x648xf32>
    %c68 = arith.constant 68 : index
    %c0_441 = arith.constant 0 : index
    %c0_442 = arith.constant 0 : index
    %502 = vector.load %arg10[%c68, %c0_441, %c0_442] : memref<72x8x8xf32, #tpu.memory_space<vmem>>, vector<1x8x8xf32>
    %503 = vector.shape_cast %502 : vector<1x8x8xf32> to vector<8x8xf32>
    %cst_443 = arith.constant dense<0.000000e+00> : vector<8x648xf32>
    %504 = tpu.matmul %503, %501, %cst_443 {dimension_numbers = #tpu.dot_dimension_numbers<[1], [0], [0], [1], [0, 0, 1, 1], [], []>} : vector<8x8xf32>, vector<8x648xf32>, vector<8x648xf32> -> vector<8x648xf32>
    %505 = arith.addf %500, %504 : vector<8x648xf32>
    %c0_444 = arith.constant 0 : index
    %c145_445 = arith.constant 145 : index
    %506 = vector.load %arg15[%c0_444, %c145_445] : memref<8x904xf32, #tpu.memory_space<vmem>>, vector<8x648xf32>
    %c69 = arith.constant 69 : index
    %c0_446 = arith.constant 0 : index
    %c0_447 = arith.constant 0 : index
    %507 = vector.load %arg10[%c69, %c0_446, %c0_447] : memref<72x8x8xf32, #tpu.memory_space<vmem>>, vector<1x8x8xf32>
    %508 = vector.shape_cast %507 : vector<1x8x8xf32> to vector<8x8xf32>
    %cst_448 = arith.constant dense<0.000000e+00> : vector<8x648xf32>
    %509 = tpu.matmul %508, %506, %cst_448 {dimension_numbers = #tpu.dot_dimension_numbers<[1], [0], [0], [1], [0, 0, 1, 1], [], []>} : vector<8x8xf32>, vector<8x648xf32>, vector<8x648xf32> -> vector<8x648xf32>
    %510 = arith.addf %505, %509 : vector<8x648xf32>
    %c0_449 = arith.constant 0 : index
    %c146_450 = arith.constant 146 : index
    %511 = vector.load %arg15[%c0_449, %c146_450] : memref<8x904xf32, #tpu.memory_space<vmem>>, vector<8x648xf32>
    %c70 = arith.constant 70 : index
    %c0_451 = arith.constant 0 : index
    %c0_452 = arith.constant 0 : index
    %512 = vector.load %arg10[%c70, %c0_451, %c0_452] : memref<72x8x8xf32, #tpu.memory_space<vmem>>, vector<1x8x8xf32>
    %513 = vector.shape_cast %512 : vector<1x8x8xf32> to vector<8x8xf32>
    %cst_453 = arith.constant dense<0.000000e+00> : vector<8x648xf32>
    %514 = tpu.matmul %513, %511, %cst_453 {dimension_numbers = #tpu.dot_dimension_numbers<[1], [0], [0], [1], [0, 0, 1, 1], [], []>} : vector<8x8xf32>, vector<8x648xf32>, vector<8x648xf32> -> vector<8x648xf32>
    %515 = arith.addf %510, %514 : vector<8x648xf32>
    %c0_454 = arith.constant 0 : index
    %c147_455 = arith.constant 147 : index
    %516 = vector.load %arg15[%c0_454, %c147_455] : memref<8x904xf32, #tpu.memory_space<vmem>>, vector<8x648xf32>
    %c71 = arith.constant 71 : index
    %c0_456 = arith.constant 0 : index
    %c0_457 = arith.constant 0 : index
    %517 = vector.load %arg10[%c71, %c0_456, %c0_457] : memref<72x8x8xf32, #tpu.memory_space<vmem>>, vector<1x8x8xf32>
    %518 = vector.shape_cast %517 : vector<1x8x8xf32> to vector<8x8xf32>
    %cst_458 = arith.constant dense<0.000000e+00> : vector<8x648xf32>
    %519 = tpu.matmul %518, %516, %cst_458 {dimension_numbers = #tpu.dot_dimension_numbers<[1], [0], [0], [1], [0, 0, 1, 1], [], []>} : vector<8x8xf32>, vector<8x648xf32>, vector<8x648xf32> -> vector<8x648xf32>
    %520 = arith.addf %515, %519 : vector<8x648xf32>
    %c7_459 = arith.constant 7 : index
    %c0_460 = arith.constant 0 : index
    %c0_461 = arith.constant 0 : index
    %521 = vector.load %arg11[%c7_459, %c0_460, %c0_461] : memref<8x8x1xf32, #tpu.memory_space<vmem>>, vector<1x8x1xf32>
    %522 = vector.shape_cast %521 : vector<1x8x1xf32> to vector<8x1xf32>
    %523 = vector.broadcast %522 : vector<8x1xf32> to vector<8x648xf32>
    %524 = arith.addf %520, %523 : vector<8x648xf32>
    %cst_462 = arith.constant 5.000000e-01 : f32
    %525 = vector.broadcast %cst_462 : f32 to vector<8x648xf32>
    %526 = arith.mulf %525, %524 : vector<8x648xf32>
    %cst_463 = arith.constant 0.707106769 : f32
    %527 = vector.broadcast %cst_463 : f32 to vector<8x648xf32>
    %528 = arith.mulf %524, %527 : vector<8x648xf32>
    %529 = math.erf %528 : vector<8x648xf32>
    %cst_464 = arith.constant 1.000000e+00 : f32
    %530 = vector.broadcast %cst_464 : f32 to vector<8x648xf32>
    %531 = arith.addf %530, %529 : vector<8x648xf32>
    %532 = arith.mulf %526, %531 : vector<8x648xf32>
    %533 = vector.broadcast %416 : vector<1x648xf32> to vector<8x648xf32>
    %534 = arith.mulf %532, %533 : vector<8x648xf32>
    %c3_465 = arith.constant 3 : index
    %c0_466 = arith.constant 0 : index
    %c0_467 = arith.constant 0 : index
    %535 = vector.load %arg12[%c3_465, %c0_466, %c0_467] : memref<4x8x8xf32, #tpu.memory_space<vmem>>, vector<1x8x8xf32>
    %536 = vector.shape_cast %535 : vector<1x8x8xf32> to vector<8x8xf32>
    %cst_468 = arith.constant dense<0.000000e+00> : vector<8x648xf32>
    %537 = tpu.matmul %536, %415, %cst_468 {dimension_numbers = #tpu.dot_dimension_numbers<[1], [0], [0], [1], [0, 0, 1, 1], [], []>} : vector<8x8xf32>, vector<8x648xf32>, vector<8x648xf32> -> vector<8x648xf32>
    %c3_469 = arith.constant 3 : index
    %c0_470 = arith.constant 0 : index
    %c0_471 = arith.constant 0 : index
    %538 = vector.load %arg13[%c3_469, %c0_470, %c0_471] : memref<4x8x1xf32, #tpu.memory_space<vmem>>, vector<1x8x1xf32>
    %539 = vector.shape_cast %538 : vector<1x8x1xf32> to vector<8x1xf32>
    %540 = vector.broadcast %539 : vector<8x1xf32> to vector<8x648xf32>
    %541 = arith.addf %537, %540 : vector<8x648xf32>
    %542 = vector.broadcast %416 : vector<1x648xf32> to vector<8x648xf32>
    %543 = arith.mulf %541, %542 : vector<8x648xf32>
    %544 = arith.addf %534, %543 : vector<8x648xf32>
    %c0_472 = arith.constant 0 : index
    %c0_473 = arith.constant 0 : index
    %545 = vector.load %arg14[%c0_472, %c0_473] : memref<8x648xf32, #tpu.memory_space<vmem>>, vector<8x648xf32>
    tpu.vector_store %arg14[%c0_472, %c0_473], %544 {strides = array<i32>} : memref<8x648xf32, #tpu.memory_space<vmem>>, vector<8x648xf32>,
    return
  }
}

</mosaic_0001>

<bundles_post_ra>
// kernel: _fwd.1
= control target key start
LH: loop header
LB: loop body
LE: loop exit
PB: predicated region body
PF: predicated region fallthrough
CT: control target
= control target key end

     0   :  { %v10467_v2 = vmov 0   ;;  %vm84_vm0 = vcmask 1043456   ;;  %vm80_vm1 = vcmask 31744   ;;  %vm54_vm2 = vcmask 64512   ;;  %s10470_s23 = smov 18   ;;  %s14107_s24 = smov 17   ;;  %s14086_s0 = inlined_call_operand.vmem [shape: f32[4,648], index: 0, kind: input, shape index: {}]   ;;  %s14087_s9 = inlined_call_operand.vmem [shape: f32[8,1], index: 9, kind: input, shape index: {}]   ;;  %s14088_s8 = inlined_call_operand.vmem [shape: f32[8,4], index: 8, kind: input, shape index: {}]   ;;  %s14089_s1 = inlined_call_operand.vmem [shape: f32[1,648], index: 1, kind: input, shape index: {}]   ;;  %s14090_s10 = inlined_call_operand.vmem [shape: f32[72,8,8], index: 10, kind: input, shape index: {}]   ;;  %s14091_s4 = inlined_call_operand.vmem [shape: f32[648,200], index: 4, kind: input, shape index: {}]   ;;  %s14092_s11 = inlined_call_operand.vmem [shape: f32[8,8,1], index: 11, kind: input, shape index: {}]   ;;  %s14093_s2 = inlined_call_operand.vmem [shape: f32[1,200], index: 2, kind: input, shape index: {}]   ;;  %s14094_s13 = inlined_call_operand.vmem [shape: f32[4,8,1], index: 13, kind: input, shape index: {}]   ;;  %s14095_s12 = inlined_call_operand.vmem [shape: f32[4,8,8], index: 12, kind: input, shape index: {}]   ;;  %s14096_s5 = inlined_call_operand.vmem [shape: f32[200,72], index: 5, kind: input, shape index: {}]   ;;  %s14097_s3 = inlined_call_operand.vmem [shape: f32[1,72], index: 3, kind: input, shape index: {}]   ;;  %s14098_s6 = inlined_call_operand.vmem [shape: f32[72,200], index: 6, kind: input, shape index: {}]   ;;  %s14099_s7 = inlined_call_operand.vmem [shape: f32[200,648], index: 7, kind: input, shape index: {}]   ;;  %s14100_s14 = inlined_call_operand.vmem [shape: f32[8,648], index: 14, kind: output, shape index: {}]  }
   0x1   :  { %v56_v0 = vld [vmem:[%s14086_s0] sm:$0xff]  ;;  %v57_v1 = vld [vmem:[%s14086_s0 + $0x8] sm:$0xff]  ;;  %9893 = vset.pattern.permute.xlu0 %v10467_v2  ;;  %10014 = vset.pattern.permute.xlu2 %v10467_v2  ;;  %v58_v3 = vld [vmem:[%s14086_s0 + $0x10] sm:$0xff]  ;;  %v10468_v12 = vmov 0.0   ;;  %s10472_s25 = smov 1   ;;  %s10473_s26 = smov 127  }
   0x2   :  { %69 = vst [vmem:[#allocation1] ss:$2 sm:$0xff] %v56_v0  ;;  %v60_v4 = vld [vmem:[%s14087_s9] sm:$0xff]  ;;  %10055 = vset.pattern.permute.xlu1 %v10467_v2  ;;  %s14109_s9 = smov 19   ;;  %s14105_s27 = smov 111   ;;  %vm14116_vm3 = vcmask 146432  }
   0x3   :  { %71 = vst [vmem:[#allocation1 + $0x10] ss:$2 sm:$0xff] %v57_v1  ;;  %63 = vperm.xlu0 %9893, %v60_v4   ;;  %v59_v5 = vld [vmem:[%s14088_s8] sm:$0xff]  ;;  %s14103_s28 = smov 110   ;;  %s14101_s29 = smov 109   ;;  %v9497_v56 = vld [vmem:[%s14090_s10 + $0x8] sm:$0xff] }
   0x4   :  { %73 = vst [vmem:[#allocation1 + $0x20] ss:$2 sm:$0xff] %v58_v3  ;;  %v217_v13 = vld [vmem:[%s14089_s1] sm:$0x3f]  ;;  %vm14115_vm4 = vcmask 154624   ;;  %vm14114_vm5 = vcmask 138240  }
   0x5   :  { %47 = vst [vmem:[#allocation2] sm:$0xff] %v10468_v12  ;;  %v219_v15 = vperm.slane %v217_v13, 0  ;;  %v220_v16 = vperm.slane %v217_v13, 1  ;;  %v221_v25 = vperm.slane %v217_v13, 2  ;;  %v222_v26 = vperm.slane %v217_v13, 3  ;;  %s10477_s21 = smov 11  }
   0x6   :  { %53 = vst [vmem:[#allocation2 + $0x30] sm:$0xff] %v10468_v12  ;;  %v223_v29 = vperm.slane %v217_v13, 4  ;;  %v224_v30 = vperm.slane %v217_v13, 5  ;;  %vm737_vm6 = vcmask 7168   ;;  %vm1024_vm7 = vcmask 1039360   ;;  %s10478_s22 = smov 10  }
   0x7   :  { %vm14113_vm8 = vcmask 908288   ;;  %vm14112_vm9 = vcmask 900096   ;;  %vm14111_vm10 = vcmask 891904   ;;  %s10479_s0 = smov 9   ;;  %s10480_s15 = smov 119  }
   0x8   :  { %s10481_s16 = smov 117   ;;  %s10482_s17 = smov 118  }
   0x9   :  { %v74_v6 = vld.sshfl [vmem:[#allocation1] sm:$0xff pattern:$0x75316420]  ;;  %v75_v7 = vld.sshfl [vmem:[#allocation1 + $0x8] sm:$0xff pattern:$0x75316420] }
   0xa   :  { %9485 = vmatpush.msk.msra.mxu0 %vm84_vm0, %v74_v6  ;;  %9487 = vmatpush.msk.msra.mxu1 %vm84_vm0, %v75_v7  ;;  %v76_v8 = vld.sshfl [vmem:[#allocation1 + $0x10] sm:$0xff pattern:$0x75316420]  ;;  %v77_v9 = vld.sshfl [vmem:[#allocation1 + $0x18] sm:$0xff pattern:$0x75316420] }
   0xb   :  { %9489 = vmatpush.msk.msra.mxu2 %vm84_vm0, %v76_v8  ;;  %9491 = vmatpush.msk.msra.mxu3 %vm84_vm0, %v77_v9  ;;  %v78_v10 = vld.sshfl [vmem:[#allocation1 + $0x20] sm:$0xff pattern:$0x75316420]  ;;  %v79_v11 = vld.sshfl [vmem:[#allocation1 + $0x28] sm:$0xff pattern:$0x75316420] }
   0xc   :  { %9486 = vmatmul.msk.f32.vlgmr.msra.gmra.mxu0 %vm80_vm1, %v59_v5  ;;  %9488 = vmatmul.msk.f32.vlgmr.msra.gmra.mxu1 %vm80_vm1, %v59_v5  ;;  %s10484_s8 = smov 7   ;;  %s10487_s19 = smov 121  }
   0xd   :  { %9490 = vmatmul.msk.f32.vlgmr.msra.gmra.mxu2 %vm80_vm1, %v59_v5  ;;  %9492 = vmatmul.msk.f32.vlgmr.msra.gmra.mxu3 %vm80_vm1, %v59_v5  ;;  %s14124_s20 = smov 110  }
   0xe   :  { %9493 = vmatpush.msk.msrb.mxu0 %vm84_vm0, %v78_v10  ;;  %9495 = vmatpush.msk.msrb.mxu1 %vm84_vm0, %v79_v11 }
  0x14   :  { %9494 = vmatmul.msk.f32.vlgmr.msrb.gmra.mxu0 %vm80_vm1, %v59_v5  ;;  %9496 = vmatmul.msk.f32.vlgmr.msrb.gmra.mxu1 %vm80_vm1, %v59_v5 }
  0x75   :  { %v64_v14 = vpop.permute.xlu0 %63 }
  0x89   :  { %v114_v17 = vpop.f32.mrf.mxu0  ;;  %v134_v18 = vpop.f32.mrf.mxu1 }
  0x8a   :  { %v115_v19 = vadd.f32 %v114_v17, %v64_v14  ;;  %v135_v20 = vadd.f32 %v134_v18, %v64_v14 }
  0x8c   :  { %v10594_v21 = vmul.f32 %v219_v15, %v115_v19  ;;  %v10596_v22 = vmul.f32 %v220_v16, %v135_v20  ;;  %v249_v15 = vld [vmem:[%s14090_s10] sm:$0xff] }
  0x8e   :  { %238 = vst [vmem:[#allocation2 + $0x10] sm:$0xff] %v10596_v22  ;;  %v9909_v23 = vpack.i.bf16 %v10594_v21, %v10468_v12  ;;  %v9894_v24 = vpack.i.bf16 %v10596_v22, %v10594_v21 }
  0x90   :  { %v154_v27 = vpop.f32.mrf.mxu2  ;;  %v174_v28 = vpop.f32.mrf.mxu3  ;;  %9910 = vrot.lane.b32.xlu2 %v9909_v23, %s14109_s9  ;;  %9895 = vrot.lane.b32.xlu0 %v9894_v24, %s10470_s23 }
  0x91   :  { %v155_v31 = vadd.f32 %v154_v27, %v64_v14  ;;  %v175_v32 = vadd.f32 %v174_v28, %v64_v14  ;;  %v194_v33 = vpop.f32.mrf.mxu0  ;;  %v214_v34 = vpop.f32.mrf.mxu1 }
  0x92   :  { %v195_v35 = vadd.f32 %v194_v33, %v64_v14  ;;  %v215_v36 = vadd.f32 %v214_v34, %v64_v14 }
  0x93   :  { %v10604_v37 = vmul.f32 %v221_v25, %v155_v31  ;;  %v10606_v38 = vmul.f32 %v222_v26, %v175_v32 }
  0x94   :  { %v10608_v39 = vmul.f32 %v223_v29, %v195_v35  ;;  %v10610_v40 = vmul.f32 %v224_v30, %v215_v36 }
  0x95   :  { %v9899_v41 = vpack.i.bf16 %v10604_v37, %v10468_v12  ;;  %v9914_v42 = vpack.i.bf16 %v10606_v38, %v10604_v37  ;;  %v9969_v47 = vpack.i.bf16 %v10604_v37, %v10596_v22  ;;  %v9974_v48 = vpack.i.bf16 %v10606_v38, %v10594_v21 }
  0x96   :  { %242 = vst.msk [vmem:[#allocation2 + $0x30] sm:$0xff] %vm54_vm2, %v10610_v40  ;;  %v9919_v43 = vpack.i.bf16 %v10608_v39, %v10596_v22  ;;  %v9904_v44 = vpack.i.bf16 %v10606_v38, %v10608_v39  ;;  %v9959_v45 = vpack.i.bf16 %v10608_v39, %v10606_v38 }
  0x97   :  { %9900 = vrot.lane.b32.xlu1 %v9899_v41, %s10470_s23 }
  0x98   :  { %9915 = vrot.lane.b32.xlu2 %v9914_v42, %s14109_s9  ;;  %9920 = vrot.lane.b32.xlu0 %v9919_v43, %s14109_s9 }
  0x9d   :  { %v10635_v46 = vld [vmem:[#allocation2 + $0x30] sm:$0xff] }
  0x9e   :  { %v9964_v49 = vpack.i.bf16 %v10635_v46, %v10604_v37  ;;  %v9979_v50 = vpack.i.bf16 %v10608_v39, %v10635_v46  ;;  %v10009_v51 = vpack.i.bf16 %v10635_v46, %v10608_v39 }
  0x9f   :  { %9905 = vrot.lane.b32.xlu1 %v9904_v44, %s10470_s23 }
  0xa0   :  { %9930 = vrot.lane.b32.xlu2 %v9899_v41, %s14107_s24  ;;  %9935 = vrot.lane.b32.xlu0 %v9904_v44, %s14107_s24 }
  0xa7   :  { %9925 = vrot.lane.b32.xlu1 %v9894_v24, %s14107_s24  ;;  %s14122_s24 = smov 17  }
  0xa8   :  { %9945 = vrot.lane.b32.xlu2 %v9914_v42, %s10472_s25  ;;  %9950 = vrot.lane.b32.xlu0 %v9919_v43, %s10472_s25 }
  0xaf   :  { %9940 = vrot.lane.b32.xlu1 %v9909_v23, %s10472_s25 }
  0xb0   :  { %9955 = vrot.lane.b32.xlu2 %v9894_v24, %s10473_s26  ;;  %9960 = vrot.lane.b32.xlu0 %v9959_v45, %s10473_s26 }
  0xb7   :  { %735 = vrot.lane.b32.xlu1 %v10635_v46, %s10472_s25 }
  0xb8   :  { %9970 = vrot.lane.b32.xlu2 %v9969_v47, %s14105_s27  ;;  %9975 = vrot.lane.b32.xlu0 %v9974_v48, %s14105_s27 }
  0xbf   :  { %9965 = vrot.lane.b32.xlu1 %v9964_v49, %s10473_s26 }
  0xc0   :  { %9985 = vrot.lane.b32.xlu2 %v9894_v24, %s14103_s28  ;;  %9990 = vrot.lane.b32.xlu0 %v9959_v45, %s14103_s28  ;;  %v9510_v45 = vld [vmem:[%s14090_s10 + $0x10] sm:$0xff] }
  0xc7   :  { %9980 = vrot.lane.b32.xlu1 %v9979_v50, %s14105_s27  ;;  %s10488_s27 = smov 122  }
  0xc8   :  { %10000 = vrot.lane.b32.xlu2 %v9969_v47, %s14101_s29  ;;  %10005 = vrot.lane.b32.xlu0 %v9974_v48, %s14101_s29 }
  0xcf   :  { %9995 = vrot.lane.b32.xlu1 %v9964_v49, %s14103_s28  ;;  %s14123_s28 = smov 111  }
  0xd7   :  { %10010 = vrot.lane.b32.xlu1 %v10009_v51, %s14101_s29  ;;  %s10485_s29 = smov 5  }
  0xea   :  { %v9911_v52 = vpop.permute.xlu2 %9910 }
  0xeb   :  { %v9913_v60 = vunpack.i.h.bf16 %v9911_v52  ;;  %v9912_v61 = vunpack.i.l.bf16 %v9911_v52 }
  0xed   :  { %v418_v6 = vsel %vm14115_vm4, %v9912_v61, %v9913_v60 }
  0xf2   :  { %v9916_v58 = vpop.permute.xlu2 %9915 }
  0xf3   :  { %v9918_v1 = vunpack.i.h.bf16 %v9916_v58  ;;  %v9917_v8 = vunpack.i.l.bf16 %v9916_v58 }
  0xf5   :  { %v421_v16 = vsel %vm14115_vm4, %v9917_v8, %v9918_v1 }
  0xfa   :  { %v9931_v14 = vpop.permute.xlu2 %9930 }
  0xfb   :  { %v9933_v23 = vunpack.i.h.bf16 %v9931_v14  ;;  %v9932_v24 = vunpack.i.l.bf16 %v9931_v14 }
 0x102   :  { %v9896_v53 = vpop.permute.xlu0 %9895  ;;  %v9946_v32 = vpop.permute.xlu2 %9945 }
 0x103   :  { %v9898_v54 = vunpack.i.h.bf16 %v9896_v53  ;;  %v9897_v55 = vunpack.i.l.bf16 %v9896_v53  ;;  %v9948_v41 = vunpack.i.h.bf16 %v9946_v32  ;;  %v9947_v42 = vunpack.i.l.bf16 %v9946_v32  ;;  %v9538_v32 = vld [vmem:[%s14090_s10 + $0x30] sm:$0xff] }
 0x105   :  { %v272_v57 = vsel %vm14116_vm3, %v9897_v55, %v9898_v54  ;;  %v741_v50 = vsel %vm737_vm6, %v9947_v42, %v9948_v41 }
 0x106   :  { %320 = vmatpush.msrb.mxu3 %v272_v57 }
 0x107   :  { %9499 = vmatmul.msk.f32.vlgmr.msrb.gmra.mxu3 %vm54_vm2, %v9497_v56 }
 0x109   :  { %v9901_v59 = vpop.permute.xlu1 %9900 }
 0x10a   :  { %v9903_v62 = vunpack.i.h.bf16 %v9901_v59  ;;  %v9902_v63 = vunpack.i.l.bf16 %v9901_v59  ;;  %v9921_v0 = vpop.permute.xlu0 %9920  ;;  %v9956_v57 = vpop.permute.xlu2 %9955 }
 0x10b   :  { %v9923_v2 = vunpack.i.h.bf16 %v9921_v0  ;;  %v9922_v11 = vunpack.i.l.bf16 %v9921_v0  ;;  %v9958_v58 = vunpack.i.h.bf16 %v9956_v57  ;;  %v9957_v59 = vunpack.i.l.bf16 %v9956_v57 }
 0x10c   :  { %v271_v3 = vsel %vm14116_vm3, %v9902_v63, %v9897_v55  ;;  %v273_v4 = vsel %vm14116_vm3, %v9898_v54, %v9903_v62  ;;  %v9517_v55 = vld [vmem:[%s14090_s10 + $0x18] sm:$0xff] }
 0x10d   :  { %300 = vmatpush.msrb.mxu2 %v271_v3  ;;  %340 = vmatpush.msra.mxu0 %v273_v4  ;;  %v422_v5 = vsel %vm14115_vm4, %v9918_v1, %v9923_v2  ;;  %v419_v18 = vsel %vm14115_vm4, %v9913_v60, %v9922_v11  ;;  %v420_v19 = vsel %vm14115_vm4, %v9922_v11, %v9917_v8 }
 0x10e   :  { %9498 = vmatmul.msk.f32.vlgmr.msrb.gmra.mxu2 %vm54_vm2, %v9497_v56  ;;  %9500 = vmatmul.msk.f32.vlgmr.msra.gmra.mxu0 %vm54_vm2, %v9497_v56 }
 0x10f   :  { %447 = vmatpush.msrb.mxu0 %v418_v6 }
 0x111   :  { %527 = vmatpush.msra.mxu0 %v422_v5  ;;  %v9906_v7 = vpop.permute.xlu1 %9905 }
 0x112   :  { %v9908_v9 = vunpack.i.h.bf16 %v9906_v7  ;;  %v9907_v10 = vunpack.i.l.bf16 %v9906_v7  ;;  %v9936_v17 = vpop.permute.xlu0 %9935  ;;  %v9971_v4 = vpop.permute.xlu2 %9970 }
 0x113   :  { %v9938_v27 = vunpack.i.h.bf16 %v9936_v17  ;;  %v9937_v28 = vunpack.i.l.bf16 %v9936_v17 }
 0x114   :  { %400 = vmatpush.msra.mxu3 %v9907_v10  ;;  %v274_v12 = vsel %vm14116_vm3, %v9903_v62, %v9908_v9  ;;  %v275_v13 = vsel %vm14116_vm3, %v9908_v9, %v9907_v10  ;;  %v1025_v62 = vsel %vm1024_vm7, %v9957_v59, %v9958_v58  ;;  %v9973_v9 = vunpack.i.h.bf16 %v9971_v4  ;;  %v9552_v59 = vld [vmem:[%s14090_s10 + $0x40] sm:$0xff] }
 0x115   :  { %360 = vmatpush.msra.mxu1 %v274_v12  ;;  %380 = vmatpush.msra.mxu2 %v275_v13  ;;  %v570_v33 = vsel %vm14114_vm5, %v9933_v23, %v9938_v27  ;;  %v571_v34 = vsel %vm14114_vm5, %v9938_v27, %v9937_v28  ;;  %v9972_v10 = vunpack.i.l.bf16 %v9971_v4  ;;  %v9531_v13 = vld [vmem:[%s14090_s10 + $0x28] sm:$0xff] }
 0x116   :  { %9503 = vmatmul.msk.f32.vlgmr.msra.gmra.mxu3 %vm54_vm2, %v9497_v56  ;;  %9501 = vmatmul.msk.f32.vlgmr.msra.gmra.mxu1 %vm54_vm2, %v9497_v56 }
 0x117   :  { %507 = vmatpush.msrb.mxu3 %v421_v16  ;;  %9502 = vmatmul.msk.f32.vlgmr.msra.gmra.mxu2 %vm54_vm2, %v9497_v56  ;;  %v1181_v14 = vsel %vm14113_vm8, %v9972_v10, %v9973_v9 }
 0x118   :  { %9504 = vmatmul.msk.f32.vlgmr.msrb.gmra.mxu0 %vm54_vm2, %v249_v15  ;;  %467 = vmatpush.msrb.mxu1 %v419_v18 }
 0x119   :  { %487 = vmatpush.msrb.mxu2 %v420_v19  ;;  %v9926_v20 = vpop.permute.xlu1 %9925 }
 0x11a   :  { %547 = vmatpush.msra.mxu1 %v9923_v2  ;;  %v9928_v25 = vunpack.i.h.bf16 %v9926_v20  ;;  %v9927_v26 = vunpack.i.l.bf16 %v9926_v20  ;;  %v9951_v35 = vpop.permute.xlu0 %9950  ;;  %v9986_v18 = vpop.permute.xlu2 %9985 }
 0x11b   :  { %v9952_v47 = vunpack.i.l.bf16 %v9951_v35  ;;  %v9953_v49 = vunpack.i.h.bf16 %v9951_v35 }
 0x11c   :  { %v567_v29 = vsel %vm14114_vm5, %v9932_v24, %v9927_v26  ;;  %v568_v30 = vsel %vm14114_vm5, %v9927_v26, %v9928_v25  ;;  %v569_v31 = vsel %vm14114_vm5, %v9928_v25, %v9933_v23  ;;  %v9988_v23 = vunpack.i.h.bf16 %v9986_v18 }
 0x11d   :  { %596 = vmatpush.msra.mxu2 %v567_v29  ;;  %616 = vmatpush.msra.mxu3 %v568_v30  ;;  %v740_v52 = vsel %vm737_vm6, %v9952_v47, %v9947_v42  ;;  %v742_v53 = vsel %vm737_vm6, %v9948_v41, %v9953_v49  ;;  %v9987_v24 = vunpack.i.l.bf16 %v9986_v18  ;;  %v1730_v18 = vld [vmem:[%s14091_s4 + $0x280] sm:$0xff] }
 0x11e   :  { %9507 = vmatmul.msk.f32.vlgmr.msrb.gmra.mxu3 %vm54_vm2, %v249_v15  ;;  %636 = vmatpush.msrb.mxu0 %v569_v31 }
 0x11f   :  { %9505 = vmatmul.msk.f32.vlgmr.msrb.gmra.mxu1 %vm54_vm2, %v249_v15  ;;  %9506 = vmatmul.msk.f32.vlgmr.msrb.gmra.mxu2 %vm54_vm2, %v249_v15  ;;  %v1335_v29 = vsel %vm14112_vm9, %v9987_v24, %v9988_v23  ;;  %v1776_v24 = vld [vmem:[%s14091_s4 + $0x3f0] sm:$0xff] }
 0x120   :  { %9508 = vmatmul.msk.f32.vlgmr.msra.gmra.mxu0 %vm54_vm2, %v249_v15  ;;  %656 = vmatpush.msrb.mxu1 %v570_v33 }
 0x121   :  { %676 = vmatpush.msrb.mxu2 %v571_v34  ;;  %696 = vmatpush.msrb.mxu3 %v9937_v28  ;;  %v9941_v36 = vpop.permute.xlu1 %9940 }
 0x122   :  { %v9943_v43 = vunpack.i.h.bf16 %v9941_v36  ;;  %v9942_v44 = vunpack.i.l.bf16 %v9941_v36  ;;  %v9961_v60 = vpop.permute.xlu0 %9960  ;;  %v10001_v36 = vpop.permute.xlu2 %10000 }
 0x123   :  { %v9963_v63 = vunpack.i.h.bf16 %v9961_v60  ;;  %v9962_v0 = vunpack.i.l.bf16 %v9961_v60 }
 0x124   :  { %v738_v48 = vsel %vm737_vm6, %v9942_v44, %v9943_v43  ;;  %v739_v51 = vsel %vm737_vm6, %v9943_v43, %v9952_v47  ;;  %v10002_v47 = vunpack.i.l.bf16 %v10001_v36 }
 0x125   :  { %768 = vmatpush.msra.mxu0 %v738_v48  ;;  %v1028_v3 = vsel %vm1024_vm7, %v9962_v0, %v9963_v63 }
 0x126   :  { %9512 = vmatmul.msk.f32.vlgmr.msra.gmra.mxu3 %vm54_vm2, %v9510_v45 }
 0x127   :  { %828 = vmatpush.msra.mxu3 %v741_v50  ;;  %9509 = vmatmul.msk.f32.vlgmr.msra.gmra.mxu1 %vm54_vm2, %v249_v15  ;;  %v9545_v50 = vld [vmem:[%s14090_s10 + $0x38] sm:$0xff] }
 0x128   :  { %9511 = vmatmul.msk.f32.vlgmr.msra.gmra.mxu2 %vm54_vm2, %v9510_v45  ;;  %9513 = vmatmul.msk.f32.vlgmr.msrb.gmra.mxu0 %vm54_vm2, %v9510_v45 }
 0x129   :  { %788 = vmatpush.msra.mxu1 %v739_v51  ;;  %808 = vmatpush.msra.mxu2 %v740_v52  ;;  %v736_v54 = vpop.permute.xlu1 %735 }
 0x12a   :  { %848 = vmatpush.msrb.mxu0 %v742_v53  ;;  %v743_v56 = vsel %vm737_vm6, %v9953_v49, %v736_v54  ;;  %v9976_v7 = vpop.permute.xlu0 %9975 }
 0x12b   :  { %v9977_v11 = vunpack.i.l.bf16 %v9976_v7  ;;  %v9978_v12 = vunpack.i.h.bf16 %v9976_v7 }
 0x12d   :  { %v1180_v16 = vsel %vm14113_vm8, %v9977_v11, %v9972_v10  ;;  %v1182_v17 = vsel %vm14113_vm8, %v9973_v9, %v9978_v12  ;;  %v1736_v9 = vld [vmem:[%s14091_s4 + $0x2b0] sm:$0xff] }
 0x12e   :  { %9516 = vmatmul.msk.f32.vlgmr.msrb.gmra.mxu3 %vm54_vm2, %v9510_v45  ;;  %v1676_v11 = vld [vmem:[%s14091_s4 + $0xd0] sm:$0xff] }
 0x12f   :  { %919 = vmatpush.msrb.mxu3 %v10596_v22  ;;  %9514 = vmatmul.msk.f32.vlgmr.msrb.gmra.mxu1 %vm54_vm2, %v9510_v45 }
 0x130   :  { %9515 = vmatmul.msk.f32.vlgmr.msrb.gmra.mxu2 %vm54_vm2, %v9510_v45  ;;  %9518 = vmatmul.msk.f32.vlgmr.msra.gmra.mxu0 %vm54_vm2, %v9517_v55  ;;  %v10003_v45 = vunpack.i.h.bf16 %v10001_v36 }
 0x131   :  { %868 = vmatpush.msrb.mxu1 %v743_v56  ;;  %899 = vmatpush.msrb.mxu2 %v10594_v21  ;;  %v9966_v61 = vpop.permute.xlu1 %9965 }
 0x132   :  { %939 = vmatpush.msra.mxu0 %v10604_v37  ;;  %v9967_v1 = vunpack.i.l.bf16 %v9966_v61  ;;  %v9968_v2 = vunpack.i.h.bf16 %v9966_v61  ;;  %v9991_v25 = vpop.permute.xlu0 %9990  ;;  %v1491_v51 = vsel %vm14111_vm10, %v10002_v47, %v10003_v45 }
 0x133   :  { %v9993_v30 = vunpack.i.h.bf16 %v9991_v25  ;;  %v9992_v31 = vunpack.i.l.bf16 %v9991_v25 }
 0x134   :  { %v1026_v5 = vsel %vm1024_vm7, %v9958_v58, %v9967_v1  ;;  %v1027_v6 = vsel %vm1024_vm7, %v9967_v1, %v9962_v0  ;;  %v1029_v8 = vsel %vm1024_vm7, %v9963_v63, %v9968_v2  ;;  %v1744_v0 = vld [vmem:[%s14091_s4 + $0x2f0] sm:$0xff]  ;;  %v1742_v1 = vld [vmem:[%s14091_s4 + $0x2e0] sm:$0xff] }
 0x135   :  { %v1338_v35 = vsel %vm14112_vm9, %v9992_v31, %v9993_v30 }
 0x136   :  { %9521 = vmatmul.msk.f32.vlgmr.msra.gmra.mxu3 %vm54_vm2, %v9517_v55 }
 0x137   :  { %999 = vmatpush.msra.mxu3 %v10635_v46  ;;  %9519 = vmatmul.msk.f32.vlgmr.msra.gmra.mxu1 %vm54_vm2, %v9517_v55  ;;  %v9524_v46 = vld [vmem:[%s14090_s10 + $0x20] sm:$0xff] }
 0x138   :  { %9520 = vmatmul.msk.f32.vlgmr.msra.gmra.mxu2 %vm54_vm2, %v9517_v55  ;;  %9522 = vmatmul.msk.f32.vlgmr.msrb.gmra.mxu0 %vm54_vm2, %v9517_v55 }
 0x139   :  { %959 = vmatpush.msra.mxu1 %v10606_v38  ;;  %979 = vmatpush.msra.mxu2 %v10608_v39  ;;  %v9981_v15 = vpop.permute.xlu1 %9980 }
 0x13a   :  { %1054 = vmatpush.msrb.mxu0 %v1025_v62  ;;  %v9983_v19 = vunpack.i.h.bf16 %v9981_v15  ;;  %v9982_v20 = vunpack.i.l.bf16 %v9981_v15  ;;  %v10006_v43 = vpop.permute.xlu0 %10005 }
 0x13b   :  { %v10007_v48 = vunpack.i.l.bf16 %v10006_v43  ;;  %v10008_v49 = vunpack.i.h.bf16 %v10006_v43  ;;  %v1720_v43 = vld [vmem:[%s14091_s4 + $0x230] sm:$0xff] }
 0x13c   :  { %v1183_v26 = vsel %vm14113_vm8, %v9978_v12, %v9983_v19  ;;  %v1184_v27 = vsel %vm14113_vm8, %v9983_v19, %v9982_v20  ;;  %v1734_v12 = vld [vmem:[%s14091_s4 + $0x2a0] sm:$0xff] }
 0x13d   :  { %v1490_v52 = vsel %vm14111_vm10, %v10007_v48, %v10002_v47  ;;  %v1492_v54 = vsel %vm14111_vm10, %v10003_v45, %v10008_v49  ;;  %v1660_v47 = vld [vmem:[%s14091_s4 + $0x50] sm:$0xff]  ;;  %v1718_v48 = vld [vmem:[%s14091_s4 + $0x220] sm:$0xff] }
 0x13e   :  { %9526 = vmatmul.msk.f32.vlgmr.msrb.gmra.mxu3 %vm54_vm2, %v9524_v46 }
 0x13f   :  { %1114 = vmatpush.msrb.mxu3 %v1028_v3  ;;  %9523 = vmatmul.msk.f32.vlgmr.msrb.gmra.mxu1 %vm54_vm2, %v9517_v55 }
 0x140   :  { %9525 = vmatmul.msk.f32.vlgmr.msrb.gmra.mxu2 %vm54_vm2, %v9524_v46  ;;  %9527 = vmatmul.msk.f32.vlgmr.msra.gmra.mxu0 %vm54_vm2, %v9524_v46 }
 0x141   :  { %1074 = vmatpush.msrb.mxu1 %v1026_v5  ;;  %1094 = vmatpush.msrb.mxu2 %v1027_v6  ;;  %v9996_v28 = vpop.permute.xlu1 %9995  ;;  %v1680_v5 = vld [vmem:[%s14091_s4 + $0xf0] sm:$0xff]  ;;  %v1738_v6 = vld [vmem:[%s14091_s4 + $0x2c0] sm:$0xff] }
 0x142   :  { %1134 = vmatpush.msra.mxu0 %v1029_v8  ;;  %v9997_v33 = vunpack.i.l.bf16 %v9996_v28  ;;  %v9998_v34 = vunpack.i.h.bf16 %v9996_v28  ;;  %v1678_v8 = vld [vmem:[%s14091_s4 + $0xe0] sm:$0xff] }
 0x143   :  { %v1774_v28 = vld [vmem:[%s14091_s4 + $0x3e0] sm:$0xff] }
 0x144   :  { %v1336_v41 = vsel %vm14112_vm9, %v9988_v23, %v9997_v33  ;;  %v1337_v42 = vsel %vm14112_vm9, %v9997_v33, %v9992_v31  ;;  %v1339_v44 = vsel %vm14112_vm9, %v9993_v30, %v9998_v34  ;;  %v1728_v23 = vld [vmem:[%s14091_s4 + $0x270] sm:$0xff] }
 0x145   :  { %v1724_v30 = vld [vmem:[%s14091_s4 + $0x250] sm:$0xff] }
 0x146   :  { %9530 = vmatmul.msk.f32.vlgmr.msra.gmra.mxu3 %vm54_vm2, %v9524_v46  ;;  %v1772_v31 = vld [vmem:[%s14091_s4 + $0x3d0] sm:$0xff] }
 0x147   :  { %1229 = vmatpush.msra.mxu3 %v1181_v14  ;;  %9528 = vmatmul.msk.f32.vlgmr.msra.gmra.mxu1 %vm54_vm2, %v9524_v46  ;;  %v1732_v14 = vld [vmem:[%s14091_s4 + $0x290] sm:$0xff] }
 0x148   :  { %9529 = vmatmul.msk.f32.vlgmr.msra.gmra.mxu2 %vm54_vm2, %v9524_v46  ;;  %9532 = vmatmul.msk.f32.vlgmr.msrb.gmra.mxu0 %vm54_vm2, %v9531_v13  ;;  %v1664_v33 = vld [vmem:[%s14091_s4 + $0x70] sm:$0xff] }
 0x149   :  { %1154 = vmatpush.msra.mxu1 %v9968_v2  ;;  %1209 = vmatpush.msra.mxu2 %v1180_v16  ;;  %v10011_v53 = vpop.permute.xlu1 %10010  ;;  %v1740_v2 = vld [vmem:[%s14091_s4 + $0x2d0] sm:$0xff] }
 0x14a   :  { %1249 = vmatpush.msrb.mxu0 %v1182_v17  ;;  %v10013_v55 = vunpack.i.h.bf16 %v10011_v53  ;;  %v10012_v56 = vunpack.i.l.bf16 %v10011_v53  ;;  %v1672_v17 = vld [vmem:[%s14091_s4 + $0xb0] sm:$0xff] }
 0x14c   :  { %v1493_v57 = vsel %vm14111_vm10, %v10008_v49, %v10012_v56  ;;  %v1494_v58 = vsel %vm14111_vm10, %v10012_v56, %v10013_v55  ;;  %v1766_v49 = vld [vmem:[%s14091_s4 + $0x3a0] sm:$0xff] }
 0x14d   :  { %v1762_v56 = vld [vmem:[%s14091_s4 + $0x380] sm:$0xff] }
 0x14e   :  { %9535 = vmatmul.msk.f32.vlgmr.msrb.gmra.mxu3 %vm54_vm2, %v9531_v13 }
 0x14f   :  { %1309 = vmatpush.msrb.mxu3 %v9982_v20  ;;  %9533 = vmatmul.msk.f32.vlgmr.msrb.gmra.mxu1 %vm54_vm2, %v9531_v13  ;;  %v1670_v20 = vld [vmem:[%s14091_s4 + $0xa0] sm:$0xff] }
 0x150   :  { %9534 = vmatmul.msk.f32.vlgmr.msrb.gmra.mxu2 %vm54_vm2, %v9531_v13  ;;  %9536 = vmatmul.msk.f32.vlgmr.msra.gmra.mxu0 %vm54_vm2, %v9531_v13 }
 0x151   :  { %1269 = vmatpush.msrb.mxu1 %v1183_v26  ;;  %1289 = vmatpush.msrb.mxu2 %v1184_v27  ;;  %v1668_v26 = vld [vmem:[%s14091_s4 + $0x90] sm:$0xff]  ;;  %v1726_v27 = vld [vmem:[%s14091_s4 + $0x260] sm:$0xff] }
 0x152   :  { %1364 = vmatpush.msra.mxu0 %v1335_v29  ;;  %v1666_v29 = vld [vmem:[%s14091_s4 + $0x80] sm:$0xff] }
 0x156   :  { %9540 = vmatmul.msk.f32.vlgmr.msra.gmra.mxu3 %vm54_vm2, %v9538_v32 }
 0x157   :  { %1424 = vmatpush.msra.mxu3 %v1338_v35  ;;  %9537 = vmatmul.msk.f32.vlgmr.msra.gmra.mxu1 %vm54_vm2, %v9531_v13  ;;  %v1674_v13 = vld [vmem:[%s14091_s4 + $0xc0] sm:$0xff] }
 0x158   :  { %9539 = vmatmul.msk.f32.vlgmr.msra.gmra.mxu2 %vm54_vm2, %v9538_v32  ;;  %9541 = vmatmul.msk.f32.vlgmr.msrb.gmra.mxu0 %vm54_vm2, %v9538_v32  ;;  %v1770_v35 = vld [vmem:[%s14091_s4 + $0x3c0] sm:$0xff] }
 0x159   :  { %1384 = vmatpush.msra.mxu1 %v1336_v41  ;;  %1404 = vmatpush.msra.mxu2 %v1337_v42  ;;  %v1662_v42 = vld [vmem:[%s14091_s4 + $0x60] sm:$0xff] }
 0x15a   :  { %1444 = vmatpush.msrb.mxu0 %v1339_v44  ;;  %v1768_v44 = vld [vmem:[%s14091_s4 + $0x3b0] sm:$0xff] }
 0x15e   :  { %9544 = vmatmul.msk.f32.vlgmr.msrb.gmra.mxu3 %vm54_vm2, %v9538_v32 }
 0x15f   :  { %1539 = vmatpush.msrb.mxu3 %v1491_v51  ;;  %9542 = vmatmul.msk.f32.vlgmr.msrb.gmra.mxu1 %vm54_vm2, %v9538_v32  ;;  %v1716_v51 = vld [vmem:[%s14091_s4 + $0x210] sm:$0xff] }
 0x160   :  { %9543 = vmatmul.msk.f32.vlgmr.msrb.gmra.mxu2 %vm54_vm2, %v9538_v32  ;;  %9546 = vmatmul.msk.f32.vlgmr.msra.gmra.mxu0 %vm54_vm2, %v9545_v50 }
 0x161   :  { %1464 = vmatpush.msrb.mxu1 %v9998_v34  ;;  %1519 = vmatpush.msrb.mxu2 %v1490_v52  ;;  %v1722_v34 = vld [vmem:[%s14091_s4 + $0x240] sm:$0xff]  ;;  %v1764_v52 = vld [vmem:[%s14091_s4 + $0x390] sm:$0xff] }
 0x162   :  { %1559 = vmatpush.msra.mxu0 %v1492_v54  ;;  %v1656_v54 = vld [vmem:[%s14091_s4 + $0x30] sm:$0xff] }
 0x166   :  { %9549 = vmatmul.msk.f32.vlgmr.msra.gmra.mxu3 %vm54_vm2, %v9545_v50 }
 0x167   :  { %1619 = vmatpush.msra.mxu3 %v10013_v55  ;;  %9547 = vmatmul.msk.f32.vlgmr.msra.gmra.mxu1 %vm54_vm2, %v9545_v50  ;;  %v1714_v55 = vld [vmem:[%s14091_s4 + $0x200] sm:$0xff] }
 0x168   :  { %9548 = vmatmul.msk.f32.vlgmr.msra.gmra.mxu2 %vm54_vm2, %v9545_v50  ;;  %9550 = vmatmul.msk.f32.vlgmr.msrb.gmra.mxu0 %vm54_vm2, %v9545_v50 }
 0x169   :  { %1579 = vmatpush.msra.mxu1 %v1493_v57  ;;  %1599 = vmatpush.msra.mxu2 %v1494_v58 }
 0x16a   :  { %1822 = vmatpush.msrb.mxu0 %v1680_v5  ;;  %v1679_v5 = vld [vmem:[%s14091_s4 + $0xe8] sm:$0xff] }
 0x16c   :  { %1823 = vmatpush.msrb.mxu0 %v1678_v8  ;;  %v1758_v8 = vld [vmem:[%s14091_s4 + $0x360] sm:$0xff] }
 0x16e   :  { %9554 = vmatmul.msk.f32.vlgmr.msrb.gmra.mxu3 %vm54_vm2, %v9552_v59  ;;  %1824 = vmatpush.msrb.mxu0 %v1676_v11  ;;  %v1677_v11 = vld [vmem:[%s14091_s4 + $0xd8] sm:$0xff] }
 0x16f   :  { %9551 = vmatmul.msk.f32.vlgmr.msrb.gmra.mxu1 %vm54_vm2, %v9545_v50  ;;  %1882 = vmatpush.msrb.mxu3 %v1776_v24  ;;  %v1658_v50 = vld [vmem:[%s14091_s4 + $0x40] sm:$0xff] }
 0x170   :  { %9553 = vmatmul.msk.f32.vlgmr.msrb.gmra.mxu2 %vm54_vm2, %v9552_v59  ;;  %9555 = vmatmul.msk.f32.vlgmr.msra.gmra.mxu0 %vm54_vm2, %v9552_v59 }
 0x171   :  { %1862 = vmatpush.msrb.mxu2 %v1744_v0  ;;  %1825 = vmatpush.msrb.mxu0 %v1674_v13  ;;  %v1654_v0 = vld [vmem:[%s14091_s4 + $0x20] sm:$0xff]  ;;  %v1756_v13 = vld [vmem:[%s14091_s4 + $0x350] sm:$0xff] }
 0x172   :  { %1883 = vmatpush.msrb.mxu3 %v1774_v28  ;;  %v1806_v28 = vld [vmem:[%s14091_s4 + $0x4e0] sm:$0xff] }
 0x173   :  { %1863 = vmatpush.msrb.mxu2 %v1742_v1  ;;  %1826 = vmatpush.msrb.mxu0 %v1672_v17  ;;  %v1760_v1 = vld [vmem:[%s14091_s4 + $0x370] sm:$0xff] }
 0x174   :  { %1884 = vmatpush.msrb.mxu3 %v1772_v31  ;;  %v1808_v17 = vld [vmem:[%s14091_s4 + $0x4f0] sm:$0xff] }
 0x175   :  { %1864 = vmatpush.msrb.mxu2 %v1740_v2  ;;  %1827 = vmatpush.msrb.mxu0 %v1670_v20  ;;  %v1675_v20 = vld [vmem:[%s14091_s4 + $0xc8] sm:$0xff]  ;;  %v1752_v31 = vld [vmem:[%s14091_s4 + $0x330] sm:$0xff] }
 0x176   :  { %9558 = vmatmul.msk.f32.vlgmr.msra.gmra.mxu3 %vm54_vm2, %v9552_v59 }
 0x177   :  { %9556 = vmatmul.msk.f32.vlgmr.msra.gmra.mxu1 %vm54_vm2, %v9552_v59  ;;  %1865 = vmatpush.msrb.mxu2 %v1738_v6  ;;  %v1652_v6 = vld [vmem:[%s14091_s4 + $0x10] sm:$0xff] }
 0x178   :  { %9557 = vmatmul.msk.f32.vlgmr.msra.gmra.mxu2 %vm54_vm2, %v9552_v59  ;;  %1828 = vmatpush.msrb.mxu0 %v1668_v26  ;;  %v1681_v59 = vld [vmem:[%s14091_s4 + $0xf8] sm:$0xff] }
 0x179   :  { %1866 = vmatpush.msrb.mxu2 %v1736_v9  ;;  %1885 = vmatpush.msrb.mxu3 %v1770_v35  ;;  %v1712_v9 = vld [vmem:[%s14091_s4 + $0x1f0] sm:$0xff]  ;;  %v1671_v35 = vld [vmem:[%s14091_s4 + $0xa8] sm:$0xff] }
 0x17a   :  { %1829 = vmatpush.msrb.mxu0 %v1666_v29  ;;  %1842 = vmatpush.msrb.mxu1 %v1712_v9  ;;  %v1673_v29 = vld [vmem:[%s14091_s4 + $0xb8] sm:$0xff]  ;;  %v1796_v9 = vld [vmem:[%s14091_s4 + $0x490] sm:$0xff] }
 0x17b   :  { %1867 = vmatpush.msrb.mxu2 %v1734_v12  ;;  %1886 = vmatpush.msrb.mxu3 %v1768_v44  ;;  %v1650_v12 = vld [vmem:[%s14091_s4] sm:$0xff] }
 0x17c   :  { %1830 = vmatpush.msrb.mxu0 %v1664_v33  ;;  %v1706_v33 = vld [vmem:[%s14091_s4 + $0x1c0] sm:$0xff] }
 0x17d   :  { %1868 = vmatpush.msrb.mxu2 %v1732_v14  ;;  %1887 = vmatpush.msrb.mxu3 %v1766_v49  ;;  %v1710_v14 = vld [vmem:[%s14091_s4 + $0x1e0] sm:$0xff] }
 0x17e   :  { %1831 = vmatpush.msrb.mxu0 %v1662_v42  ;;  %1843 = vmatpush.msrb.mxu1 %v1710_v14  ;;  %v1750_v42 = vld [vmem:[%s14091_s4 + $0x320] sm:$0xff] }
 0x17f   :  { %1869 = vmatpush.msrb.mxu2 %v1730_v18  ;;  %1888 = vmatpush.msrb.mxu3 %v1764_v52  ;;  %v1802_v44 = vld [vmem:[%s14091_s4 + $0x4c0] sm:$0xff]  ;;  %v1667_v52 = vld [vmem:[%s14091_s4 + $0x88] sm:$0xff] }
 0x180   :  { %1832 = vmatpush.msrb.mxu0 %v1660_v47  ;;  %v1669_v47 = vld [vmem:[%s14091_s4 + $0x98] sm:$0xff]  ;;  %v1702_v49 = vld [vmem:[%s14091_s4 + $0x1a0] sm:$0xff] }
 0x181   :  { %1870 = vmatpush.msrb.mxu2 %v1728_v23  ;;  %1889 = vmatpush.msrb.mxu3 %v1762_v56  ;;  %v1754_v23 = vld [vmem:[%s14091_s4 + $0x340] sm:$0xff] }
 0x182   :  { %1833 = vmatpush.msrb.mxu0 %v1658_v50  ;;  %v1794_v14 = vld [vmem:[%s14091_s4 + $0x480] sm:$0xff] }
 0x183   :  { %1871 = vmatpush.msrb.mxu2 %v1726_v27  ;;  %1890 = vmatpush.msrb.mxu3 %v1760_v1  ;;  %v1708_v27 = vld [vmem:[%s14091_s4 + $0x1d0] sm:$0xff]  ;;  %v1665_v1 = vld [vmem:[%s14091_s4 + $0x78] sm:$0xff] }
 0x184   :  { %1834 = vmatpush.msrb.mxu0 %v1656_v54  ;;  %1844 = vmatpush.msrb.mxu1 %v1708_v27  ;;  %v1746_v54 = vld [vmem:[%s14091_s4 + $0x300] sm:$0xff] }
 0x185   :  { %1872 = vmatpush.msrb.mxu2 %v1724_v30  ;;  %1891 = vmatpush.msrb.mxu3 %v1758_v8  ;;  %v1698_v8 = vld [vmem:[%s14091_s4 + $0x180] sm:$0xff] }
 0x186   :  { %1835 = vmatpush.msrb.mxu0 %v1654_v0  ;;  %1845 = vmatpush.msrb.mxu1 %v1706_v33  ;;  %v1798_v0 = vld [vmem:[%s14091_s4 + $0x4a0] sm:$0xff] }
 0x187   :  { %1873 = vmatpush.msrb.mxu2 %v1722_v34  ;;  %1892 = vmatpush.msrb.mxu3 %v1756_v13  ;;  %v1804_v34 = vld [vmem:[%s14091_s4 + $0x4d0] sm:$0xff] }
 0x188   :  { %1836 = vmatpush.msrb.mxu0 %v1652_v6  ;;  %v1713_v6 = vld [vmem:[%s14091_s4 + $0x1f8] sm:$0xff]  ;;  %v1696_v13 = vld [vmem:[%s14091_s4 + $0x170] sm:$0xff] }
 0x189   :  { %1874 = vmatpush.msrb.mxu2 %v1720_v43  ;;  %1893 = vmatpush.msrb.mxu3 %v1754_v23  ;;  %v1704_v43 = vld [vmem:[%s14091_s4 + $0x1b0] sm:$0xff]  ;;  %v1694_v23 = vld [vmem:[%s14091_s4 + $0x160] sm:$0xff] }
 0x18a   :  { %v10789_v61 = vpop.f32.mrf.mxu3  ;;  %1837 = vmatpush.msrb.mxu0 %v1650_v12  ;;  %1846 = vmatpush.msrb.mxu1 %v1704_v43  ;;  %v1711_v12 = vld [vmem:[%s14091_s4 + $0x1e8] sm:$0xff]  ;;  %v1657_v43 = vld [vmem:[%s14091_s4 + $0x38] sm:$0xff] }
 0x18b   :  { %v10787_v60 = vpop.f32.mrf.mxu0  ;;  %1875 = vmatpush.msrb.mxu2 %v1718_v48  ;;  %1894 = vmatpush.msrb.mxu3 %v1752_v31  ;;  %v1748_v48 = vld [vmem:[%s14091_s4 + $0x310] sm:$0xff]  ;;  %v1707_v31 = vld [vmem:[%s14091_s4 + $0x1c8] sm:$0xff] }
 0x18c   :  { %1902 = vmatpush.msra.mxu0 %v1808_v17  ;;  %1847 = vmatpush.msrb.mxu1 %v1702_v49  ;;  %v1661_v17 = vld [vmem:[%s14091_s4 + $0x58] sm:$0xff]  ;;  %v1788_v49 = vld [vmem:[%s14091_s4 + $0x450] sm:$0xff] }
 0x18d   :  { %1876 = vmatpush.msrb.mxu2 %v1716_v51  ;;  %1895 = vmatpush.msrb.mxu3 %v1750_v42  ;;  %v1800_v51 = vld [vmem:[%s14091_s4 + $0x4b0] sm:$0xff]  ;;  %v1790_v42 = vld [vmem:[%s14091_s4 + $0x460] sm:$0xff] }
 0x18e   :  { %1903 = vmatpush.msra.mxu0 %v1806_v28  ;;  %v1792_v28 = vld [vmem:[%s14091_s4 + $0x470] sm:$0xff] }
 0x18f   :  { %1877 = vmatpush.msrb.mxu2 %v1714_v55  ;;  %1896 = vmatpush.msrb.mxu3 %v1748_v48  ;;  %v1690_v48 = vld [vmem:[%s14091_s4 + $0x140] sm:$0xff] }
 0x190   :  { %1904 = vmatpush.msra.mxu0 %v1804_v34 }
 0x191   :  { %v10791_v62 = vpop.f32.mrf.mxu2  ;;  %1942 = vmatpush.msra.mxu2 %v1681_v59  ;;  %1897 = vmatpush.msrb.mxu3 %v1746_v54  ;;  %v1700_v59 = vld [vmem:[%s14091_s4 + $0x190] sm:$0xff] }
 0x192   :  { %1905 = vmatpush.msra.mxu0 %v1802_v44  ;;  %1848 = vmatpush.msrb.mxu1 %v1700_v59  ;;  %v1688_v54 = vld [vmem:[%s14091_s4 + $0x130] sm:$0xff]  ;;  %v1786_v59 = vld [vmem:[%s14091_s4 + $0x440] sm:$0xff] }
 0x193   :  { %v10793_v63 = vpop.f32.mrf.mxu1  ;;  %1943 = vmatpush.msra.mxu2 %v1679_v5  ;;  %1962 = vmatpush.msra.mxu3 %v1713_v6  ;;  %v1701_v6 = vld [vmem:[%s14091_s4 + $0x198] sm:$0xff] }
 0x194   :  { %1906 = vmatpush.msra.mxu0 %v1800_v51  ;;  %1849 = vmatpush.msrb.mxu1 %v1698_v8  ;;  %v1655_v51 = vld [vmem:[%s14091_s4 + $0x28] sm:$0xff]  ;;  %v1686_v8 = vld [vmem:[%s14091_s4 + $0x120] sm:$0xff] }
 0x195   :  { %v10798_v46 = vpop.f32.mrf.mxu0  ;;  %1944 = vmatpush.msra.mxu2 %v1677_v11  ;;  %v1663_v11 = vld [vmem:[%s14091_s4 + $0x68] sm:$0xff]  ;;  %1963 = vmatpush.msra.mxu3 %v1711_v12 }
 0x196   :  { %1907 = vmatpush.msra.mxu0 %v1798_v0  ;;  %1850 = vmatpush.msrb.mxu1 %v1696_v13  ;;  %v1653_v0 = vld [vmem:[%s14091_s4 + $0x18] sm:$0xff]  ;;  %v1699_v12 = vld [vmem:[%s14091_s4 + $0x188] sm:$0xff] }
 0x197   :  { %1945 = vmatpush.msra.mxu2 %v1675_v20  ;;  %v1709_v20 = vld [vmem:[%s14091_s4 + $0x1d8] sm:$0xff] }
 0x198   :  { %1908 = vmatpush.msra.mxu0 %v1796_v9  ;;  %1964 = vmatpush.msra.mxu3 %v1709_v20  ;;  %v1784_v9 = vld [vmem:[%s14091_s4 + $0x430] sm:$0xff]  ;;  %v1782_v20 = vld [vmem:[%s14091_s4 + $0x420] sm:$0xff] }
 0x199   :  { %v10806_v3 = vpop.f32.mrf.mxu3  ;;  %1946 = vmatpush.msra.mxu2 %v1673_v29  ;;  %v1659_v29 = vld [vmem:[%s14091_s4 + $0x48] sm:$0xff]  ;;  %1851 = vmatpush.msrb.mxu1 %v1694_v23  ;;  %v1697_v23 = vld [vmem:[%s14091_s4 + $0x178] sm:$0xff] }
 0x19a   :  { %v10808_v4 = vpop.f32.mrf.mxu2  ;;  %1909 = vmatpush.msra.mxu0 %v1794_v14  ;;  %1965 = vmatpush.msra.mxu3 %v1707_v31  ;;  %v1780_v31 = vld [vmem:[%s14091_s4 + $0x410] sm:$0xff] }
 0x19b   :  { %1947 = vmatpush.msra.mxu2 %v1671_v35  ;;  %v1692_v35 = vld [vmem:[%s14091_s4 + $0x150] sm:$0xff] }
 0x19c   :  { %v10816_v7 = vpop.f32.mrf.mxu1  ;;  %1910 = vmatpush.msra.mxu0 %v1792_v28  ;;  %1852 = vmatpush.msrb.mxu1 %v1692_v35  ;;  %v1695_v35 = vld [vmem:[%s14091_s4 + $0x168] sm:$0xff] }
 0x19d   :  { %v10824_v10 = vpop.f32.mrf.mxu0  ;;  %1948 = vmatpush.msra.mxu2 %v1669_v47  ;;  %v1705_v47 = vld [vmem:[%s14091_s4 + $0x1b8] sm:$0xff] }
 0x19e   :  { %1911 = vmatpush.msra.mxu0 %v1790_v42  ;;  %1966 = vmatpush.msra.mxu3 %v1705_v47  ;;  %v1810_v42 = vld [vmem:[%s14091_s4 + $0x500] sm:$0xff]  ;;  %v1693_v47 = vld [vmem:[%s14091_s4 + $0x158] sm:$0xff] }
 0x19f   :  { %1949 = vmatpush.msra.mxu2 %v1667_v52  ;;  %1853 = vmatpush.msrb.mxu1 %v1690_v48  ;;  %v1703_v52 = vld [vmem:[%s14091_s4 + $0x1a8] sm:$0xff] }
 0x1a0   :  { %1912 = vmatpush.msra.mxu0 %v1788_v49  ;;  %1967 = vmatpush.msra.mxu3 %v1703_v52  ;;  %v1691_v49 = vld [vmem:[%s14091_s4 + $0x148] sm:$0xff] }
 0x1a1   :  { %v10838_v15 = vpop.f32.mrf.mxu3  ;;  %1950 = vmatpush.msra.mxu2 %v1665_v1  ;;  %1854 = vmatpush.msrb.mxu1 %v1688_v54 }
 0x1a2   :  { %v10840_v16 = vpop.f32.mrf.mxu2  ;;  %1913 = vmatpush.msra.mxu0 %v1786_v59  ;;  %1968 = vmatpush.msra.mxu3 %v1701_v6  ;;  %v1689_v59 = vld [vmem:[%s14091_s4 + $0x138] sm:$0xff] }
 0x1a3   :  { %1951 = vmatpush.msra.mxu2 %v1663_v11  ;;  %v1651_v11 = vld [vmem:[%s14091_s4 + $0x8] sm:$0xff]  ;;  %1855 = vmatpush.msrb.mxu1 %v1686_v8 }
 0x1a4   :  { %v10848_v19 = vpop.f32.mrf.mxu1  ;;  %1914 = vmatpush.msra.mxu0 %v1784_v9  ;;  %1969 = vmatpush.msra.mxu3 %v1699_v12  ;;  %v1687_v8 = vld [vmem:[%s14091_s4 + $0x128] sm:$0xff]  ;;  %v450_v9 = vadd.f32 %v10798_v46, %v10791_v62  ;;  %v470_v62 = vadd.f32 %v10816_v7, %v10789_v61 }
 0x1a5   :  { %v10859_v25 = vpop.f32.mrf.mxu0  ;;  %1952 = vmatpush.msra.mxu2 %v1661_v17  ;;  %v1684_v17 = vld [vmem:[%s14091_s4 + $0x110] sm:$0xff] }
 0x1a6   :  { %1856 = vmatpush.msrb.mxu1 %v1684_v17  ;;  %1915 = vmatpush.msra.mxu0 %v1782_v20 }
 0x1a7   :  { %1953 = vmatpush.msra.mxu2 %v1659_v29  ;;  %1970 = vmatpush.msra.mxu3 %v1697_v23  ;;  %v1682_v29 = vld [vmem:[%s14091_s4 + $0x100] sm:$0xff] }
 0x1a8   :  { %1857 = vmatpush.msrb.mxu1 %v1682_v29  ;;  %1916 = vmatpush.msra.mxu0 %v1780_v31  ;;  %v510_v31 = vadd.f32 %v10838_v15, %v10793_v63 }
 0x1a9   :  { %v10879_v32 = vpop.f32.mrf.mxu3  ;;  %1954 = vmatpush.msra.mxu2 %v1657_v43  ;;  %v1778_v43 = vld [vmem:[%s14091_s4 + $0x400] sm:$0xff]  ;;  %1971 = vmatpush.msra.mxu3 %v1695_v35  ;;  %v530_v35 = vadd.f32 %v10824_v10, %v10808_v4  ;;  %v550_v4 = vadd.f32 %v10848_v19, %v10806_v3 }
 0x1aa   :  { %1937 = vmatpush.msra.mxu1 %v1810_v42  ;;  %1917 = vmatpush.msra.mxu0 %v1778_v43  ;;  %v702_v23 = vadd.f32 %v10879_v32, %v470_v62  ;;  %v11224_v32 = vld [vmem:[%s14089_s1] sm:$0x3f]  ;;  %v1805_v62 = vld [vmem:[%s14091_s4 + $0x4d8] sm:$0xff] }
 0x1ab   :  { %v10890_v36 = vpop.f32.mrf.mxu2  ;;  %1955 = vmatpush.msra.mxu2 %v1655_v51  ;;  %v490_v51 = vadd.f32 %v10840_v16, %v10787_v60  ;;  %1972 = vmatpush.msra.mxu3 %v1693_v47  ;;  %v1685_v16 = vld [vmem:[%s14091_s4 + $0x118] sm:$0xff]  ;;  %v1634_v47 = vperm.slane %v11224_v32, 2 }
 0x1ac   :  { %v10892_v41 = vpop.f32.mrf.mxu1  ;;  %v701_v12 = vadd.f32 %v10890_v36, %v450_v9 }
 0x1ad   :  { %v10903_v45 = vpop.f32.mrf.mxu0  ;;  %1956 = vmatpush.msra.mxu2 %v1653_v0  ;;  %1973 = vmatpush.msra.mxu3 %v1691_v49  ;;  %v703_v6 = vadd.f32 %v10859_v25, %v490_v51  ;;  %v1683_v25 = vld [vmem:[%s14091_s4 + $0x108] sm:$0xff]  ;;  %v704_v7 = vadd.f32 %v10892_v41, %v510_v31 }
 0x1ae   :  { %v873_v36 = vadd.f32 %v10903_v45, %v701_v12 }
 0x1af   :  { %1957 = vmatpush.msra.mxu2 %v1651_v11  ;;  %1974 = vmatpush.msra.mxu3 %v1689_v59 }
 0x1b1   :  { %v10923_v53 = vpop.f32.mrf.mxu3  ;;  %1975 = vmatpush.msra.mxu3 %v1687_v8  ;;  %v1633_v8 = vperm.slane %v11224_v32, 1 }
 0x1b2   :  { %v706_v49 = vadd.f32 %v10923_v53, %v550_v4  ;;  %v1809_v53 = vld [vmem:[%s14091_s4 + $0x4f8] sm:$0xff] }
 0x1b3   :  { %v10934_v57 = vpop.f32.mrf.mxu2  ;;  %1976 = vmatpush.msra.mxu3 %v1685_v16  ;;  %v1635_v16 = vperm.slane %v11224_v32, 3  ;;  %v1773_v4 = vld [vmem:[%s14091_s4 + $0x3d8] sm:$0xff] }
 0x1b4   :  { %v10936_v58 = vpop.f32.mrf.mxu1  ;;  %v705_v45 = vadd.f32 %v10934_v57, %v530_v35  ;;  %v1637_v35 = vperm.slane %v11224_v32, 5 }
 0x1b5   :  { %v10947_v2 = vpop.f32.mrf.mxu0  ;;  %1977 = vmatpush.msra.mxu3 %v1683_v25  ;;  %v874_v42 = vadd.f32 %v10936_v58, %v702_v23 }
 0x1b9   :  { %v10976_v18 = vpop.f32.mrf.mxu3 }
 0x1ba   :  { %v876_v10 = vadd.f32 %v10976_v18, %v704_v7  ;;  %v1801_v7 = vld [vmem:[%s14091_s4 + $0x4b8] sm:$0xff] }
 0x1bb   :  { %v10984_v24 = vpop.f32.mrf.mxu2 }
 0x1bc   :  { %v10986_v26 = vpop.f32.mrf.mxu1  ;;  %v875_v60 = vadd.f32 %v10984_v24, %v703_v6 }
 0x1bd   :  { %v10997_v30 = vpop.f32.mrf.mxu0  ;;  %v878_v18 = vadd.f32 %v10986_v26, %v706_v49  ;;  %v1632_v26 = vperm.slane %v11224_v32, 0 }
 0x1be   :  { %v1006_v46 = vadd.f32 %v10997_v30, %v875_v60 }
 0x1c1   :  { %v11029_v50 = vpop.f32.mrf.mxu3 }
 0x1c3   :  { %v11040_v55 = vpop.f32.mrf.mxu2 }
 0x1c4   :  { %v11042_v56 = vpop.f32.mrf.mxu1  ;;  %v1004_v61 = vadd.f32 %v11040_v55, %v873_v36  ;;  %v1777_v36 = vld [vmem:[%s14091_s4 + $0x3f8] sm:$0xff] }
 0x1c5   :  { %v11053_v5 = vpop.f32.mrf.mxu0  ;;  %v1007_v57 = vadd.f32 %v11042_v56, %v876_v10  ;;  %v1811_v10 = vld [vmem:[%s14091_s4 + $0x508] sm:$0xff] }
 0x1c6   :  { %v1159_v58 = vadd.f32 %v11053_v5, %v1004_v61 }
 0x1c9   :  { %v11085_v27 = vpop.f32.mrf.mxu3 }
 0x1cb   :  { %v11096_v33 = vpop.f32.mrf.mxu2 }
 0x1cc   :  { %v11098_v34 = vpop.f32.mrf.mxu1 }
 0x1cd   :  { %v11109_v44 = vpop.f32.mrf.mxu0 }
 0x1d1   :  { %v11135_v1 = vpop.f32.mrf.mxu3 }
 0x1d2   :  { %v1162_v5 = vadd.f32 %v11135_v1, %v1007_v57  ;;  %v1813_v57 = vld [vmem:[%s14092_s11] sm:$0xff] }
 0x1d3   :  { %v1096_v13 = vpop.f32.mrf.mxu2  ;;  %1816 = vperm.xlu2 %10014, %v1813_v57  }
 0x1d4   :  { %v11152_v14 = vpop.f32.mrf.mxu1  ;;  %v1161_v29 = vadd.f32 %v1096_v13, %v1006_v46  ;;  %v1005_v13 = vadd.f32 %v11029_v50, %v874_v42  ;;  %v11263_v46 = vld [vmem:[%s14091_s4 + $0x2f8] sm:$0xff]  ;;  %v1775_v42 = vld [vmem:[%s14091_s4 + $0x3e8] sm:$0xff] }
 0x1d5   :  { %v1251_v28 = vpop.f32.mrf.mxu0 }
 0x1d6   :  { %v1316_v63 = vadd.f32 %v1251_v28, %v1161_v29  ;;  %v1160_v41 = vadd.f32 %v11098_v34, %v1005_v13  ;;  %v877_v28 = vadd.f32 %v10947_v2, %v705_v45  ;;  %v1803_v29 = vld [vmem:[%s14091_s4 + $0x4c8] sm:$0xff] }
 0x1d8   :  { %v1008_v34 = vadd.f32 %v11096_v33, %v877_v28  ;;  %v1807_v33 = vld [vmem:[%s14091_s4 + $0x4e8] sm:$0xff] }
 0x1d9   :  { %v1231_v48 = vpop.f32.mrf.mxu3  ;;  %v1795_v28 = vld [vmem:[%s14091_s4 + $0x488] sm:$0xff] }
 0x1da   :  { %v1315_v51 = vadd.f32 %v1231_v48, %v1160_v41  ;;  %v1009_v48 = vadd.f32 %v11085_v27, %v878_v18  ;;  %v11353_v18 = vld [vmem:[%s14091_s4 + $0x298] sm:$0xff] }
 0x1db   :  { %v1211_v52 = vpop.f32.mrf.mxu2 }
 0x1dc   :  { %v1271_v54 = vpop.f32.mrf.mxu1  ;;  %v1314_v3 = vadd.f32 %v1211_v52, %v1159_v58  ;;  %v1164_v12 = vadd.f32 %v11152_v14, %v1009_v48  ;;  %v11310_v58 = vld [vmem:[%s14091_s4 + $0x2c8] sm:$0xff] }
 0x1dd   :  { %v1366_v0 = vpop.f32.mrf.mxu0  ;;  %v1317_v56 = vadd.f32 %v1271_v54, %v1162_v5  ;;  %v1163_v54 = vadd.f32 %v11109_v44, %v1008_v34  ;;  %v1765_v5 = vld [vmem:[%s14091_s4 + $0x398] sm:$0xff]  ;;  %v1791_v34 = vld [vmem:[%s14091_s4 + $0x468] sm:$0xff] }
 0x1de   :  { %v1469_v52 = vadd.f32 %v1366_v0, %v1314_v3  ;;  %v1767_v3 = vld [vmem:[%s14091_s4 + $0x3a8] sm:$0xff] }
 0x1df   :  { %v1787_v48 = vld [vmem:[%s14091_s4 + $0x448] sm:$0xff] }
 0x1e1   :  { %v11199_v11 = vpop.f32.mrf.mxu3 }
 0x1e2   :  { %v1319_v23 = vadd.f32 %v11199_v11, %v1164_v12  ;;  %v11280_v11 = vld [vmem:[%s14091_s4 + $0x2e8] sm:$0xff]  ;;  %v1781_v12 = vld [vmem:[%s14091_s4 + $0x418] sm:$0xff] }
 0x1e3   :  { %v11205_v17 = vpop.f32.mrf.mxu2 }
 0x1e4   :  { %v1386_v24 = vpop.f32.mrf.mxu1  ;;  %v1318_v44 = vadd.f32 %v11205_v17, %v1163_v54  ;;  %v1755_v54 = vld [vmem:[%s14091_s4 + $0x348] sm:$0xff] }
 0x1e5   :  { %v11210_v20 = vpop.f32.mrf.mxu0  ;;  %v1470_v59 = vadd.f32 %v1386_v24, %v1315_v51  ;;  %v11341_v51 = vld [vmem:[%s14091_s4 + $0x2a8] sm:$0xff] }
 0x1e6   :  { %v1473_v45 = vadd.f32 %v11210_v20, %v1318_v44  ;;  %v1799_v20 = vld [vmem:[%s14091_s4 + $0x4a8] sm:$0xff]  ;;  %v1749_v44 = vld [vmem:[%s14091_s4 + $0x318] sm:$0xff] }
 0x1e9   :  { %v1426_v30 = vpop.f32.mrf.mxu3 }
 0x1ea   :  { %v1472_v1 = vadd.f32 %v1426_v30, %v1317_v56  ;;  %v11292_v30 = vld [vmem:[%s14091_s4 + $0x2d8] sm:$0xff] }
 0x1eb   :  { %v1406_v15 = vpop.f32.mrf.mxu2  ;;  %v11378_v56 = vld [vmem:[%s14091_s4 + $0x278] sm:$0xff] }
 0x1ec   :  { %v1471_v55 = vadd.f32 %v1406_v15, %v1316_v63  ;;  %v1466_v43 = vpop.f32.mrf.mxu1  ;;  %v1636_v63 = vperm.slane %v11224_v32, 4 }
 0x1ed   :  { %v1561_v50 = vpop.f32.mrf.mxu0  ;;  %v1474_v17 = vadd.f32 %v1466_v43, %v1319_v23  ;;  %v1797_v43 = vld [vmem:[%s14091_s4 + $0x498] sm:$0xff] }
 0x1ee   :  { %v1626_v19 = vadd.f32 %v1561_v50, %v1471_v55  ;;  %v1771_v55 = vld [vmem:[%s14091_s4 + $0x3c8] sm:$0xff]  ;;  %v1769_v50 = vld [vmem:[%s14091_s4 + $0x3b8] sm:$0xff] }
 0x1ef   :  { %v11448_v23 = vld [vmem:[%s14091_s4 + $0x218] sm:$0xff] }
 0x1f0   :  { %v11240_v6 = vmul.f32 %v1634_v47, %v1626_v19  ;;  %v11322_v47 = vld [vmem:[%s14091_s4 + $0x2b8] sm:$0xff] }
 0x1f1   :  { %v1541_v2 = vpop.f32.mrf.mxu3  ;;  %v1793_v19 = vld [vmem:[%s14091_s4 + $0x478] sm:$0xff] }
 0x1f2   :  { %v1625_v9 = vadd.f32 %v1541_v2, %v1470_v59  ;;  %1878 = vmatmul.f32.vlgmr.msrb.gmra.mxu2 %v11240_v6  ;;  %v11366_v59 = vld [vmem:[%s14091_s4 + $0x288] sm:$0xff]  ;;  %v1761_v2 = vld [vmem:[%s14091_s4 + $0x378] sm:$0xff] }
 0x1f3   :  { %2022 = vmatpush.msrb.mxu2 %v1809_v53  ;;  %v1521_v60 = vpop.f32.mrf.mxu2  ;;  %v1789_v53 = vld [vmem:[%s14091_s4 + $0x458] sm:$0xff] }
 0x1f4   :  { %v11255_v27 = vmul.f32 %v1633_v8, %v1625_v9  ;;  %v1624_v0 = vadd.f32 %v1521_v60, %v1469_v52  ;;  %v1581_v25 = vpop.f32.mrf.mxu1  ;;  %v1763_v8 = vld [vmem:[%s14091_s4 + $0x388] sm:$0xff] }
 0x1f5   :  { %2023 = vmatpush.msrb.mxu2 %v1807_v33  ;;  %v1627_v24 = vadd.f32 %v1581_v25, %v1472_v1  ;;  %v11390_v52 = vld [vmem:[%s14091_s4 + $0x268] sm:$0xff]  ;;  %v11402_v33 = vld [vmem:[%s14091_s4 + $0x258] sm:$0xff] }
 0x1f6   :  { %v1644_v14 = vmul.f32 %v1632_v26, %v1624_v0  ;;  %1858 = vmatmul.f32.vlgmr.msrb.gmra.mxu1 %v11255_v27  ;;  %v1759_v9 = vld [vmem:[%s14091_s4 + $0x368] sm:$0xff]  ;;  %v1785_v26 = vld [vmem:[%s14091_s4 + $0x438] sm:$0xff] }
 0x1f7   :  { %v11274_v31 = vmul.f32 %v1635_v16, %v1627_v24  ;;  %2024 = vmatpush.msrb.mxu2 %v1805_v62  ;;  %1982 = vmatpush.msrb.mxu1 %v11263_v46  ;;  %v1757_v1 = vld [vmem:[%s14091_s4 + $0x358] sm:$0xff]  ;;  %v1783_v60 = vld [vmem:[%s14091_s4 + $0x428] sm:$0xff] }
 0x1f8   :  { %1838 = vmatmul.f32.vlgmr.msrb.gmra.mxu0 %v1644_v14  ;;  %v11415_v16 = vld [vmem:[%s14091_s4 + $0x248] sm:$0xff]  ;;  %v1753_v0 = vld [vmem:[%s14091_s4 + $0x338] sm:$0xff] }
 0x1f9   :  { %2002 = vmatpush.msrb.mxu0 %v1777_v36  ;;  %2025 = vmatpush.msrb.mxu2 %v1803_v29  ;;  %v1621_v61 = vpop.f32.mrf.mxu3  ;;  %v1779_v25 = vld [vmem:[%s14091_s4 + $0x408] sm:$0xff] }
 0x1fa   :  { %1983 = vmatpush.msrb.mxu1 %v11280_v11  ;;  %v1629_v13 = vadd.f32 %v1621_v61, %v1474_v17  ;;  %1898 = vmatmul.f32.vlgmr.msrb.gmra.mxu3 %v11274_v31  ;;  %v11439_v62 = vld [vmem:[%s14091_s4 + $0x228] sm:$0xff] }
 0x1fb   :  { %1958 = vmatmul.f32.vlgmr.msra.gmra.mxu2 %v1644_v14  ;;  %2003 = vmatpush.msrb.mxu0 %v1775_v42  ;;  %v1601_v15 = vpop.f32.mrf.mxu2  ;;  %v1751_v24 = vld [vmem:[%s14091_s4 + $0x328] sm:$0xff] }
 0x1fc   :  { %v1649_v32 = vmul.f32 %v1637_v35, %v1629_v13  ;;  %2026 = vmatpush.msrb.mxu2 %v1801_v7  ;;  %v1628_v41 = vadd.f32 %v1601_v15, %v1473_v45  ;;  %1984 = vmatpush.msrb.mxu1 %v11292_v30  ;;  %v11458_v14 = vld [vmem:[%s14091_s4 + $0x208] sm:$0xff] }
 0x1fd   :  { %2004 = vmatpush.msrb.mxu0 %v1773_v4  ;;  %2057 = vmatpush.msrb.mxu3 %v1811_v10  ;;  %v1747_v36 = vld [vmem:[%s14091_s4 + $0x308] sm:$0xff] }
 0x1fe   :  { %v11324_v49 = vmul.f32 %v1636_v63, %v1628_v41  ;;  %2027 = vmatpush.msrb.mxu2 %v1799_v20  ;;  %1985 = vmatpush.msrb.mxu1 %v11310_v58 }
 0x1ff   :  { %2005 = vmatpush.msrb.mxu0 %v1771_v55  ;;  %9559 = vmatmul.msk.f32.vlgmr.msra.gmra.mxu1 %vm54_vm2, %v1649_v32 }
 0x200   :  { %2028 = vmatpush.msrb.mxu2 %v1797_v43  ;;  %1986 = vmatpush.msrb.mxu1 %v11322_v47 }
 0x201   :  { %1918 = vmatmul.f32.vlgmr.msra.gmra.mxu0 %v11324_v49 }
 0x202   :  { %2006 = vmatpush.msrb.mxu0 %v1769_v50  ;;  %2029 = vmatpush.msrb.mxu2 %v1795_v28 }
 0x203   :  { %1987 = vmatpush.msrb.mxu1 %v11341_v51  ;;  %1978 = vmatmul.f32.vlgmr.msra.gmra.mxu3 %v11255_v27  ;;  %v11427_v27 = vld [vmem:[%s14091_s4 + $0x238] sm:$0xff] }
 0x204   :  { %2007 = vmatpush.msrb.mxu0 %v1767_v3  ;;  %2030 = vmatpush.msrb.mxu2 %v1793_v19 }
 0x205   :  { %1988 = vmatpush.msrb.mxu1 %v11353_v18 }
 0x206   :  { %2008 = vmatpush.msrb.mxu0 %v1765_v5  ;;  %2031 = vmatpush.msrb.mxu2 %v1791_v34 }
 0x207   :  { %1989 = vmatpush.msrb.mxu1 %v11366_v59 }
 0x208   :  { %2009 = vmatpush.msrb.mxu0 %v1763_v8  ;;  %2032 = vmatpush.msrb.mxu2 %v1789_v53 }
 0x209   :  { %1990 = vmatpush.msrb.mxu1 %v11378_v56 }
 0x20a   :  { %2010 = vmatpush.msrb.mxu0 %v1761_v2  ;;  %2033 = vmatpush.msrb.mxu2 %v1787_v48 }
 0x20b   :  { %1991 = vmatpush.msrb.mxu1 %v11390_v52  ;;  %9560 = vmatmul.msk.f32.vlgmr.msrb.gmra.mxu3 %vm54_vm2, %v1649_v32 }
 0x20c   :  { %2011 = vmatpush.msrb.mxu0 %v1759_v9  ;;  %2034 = vmatpush.msrb.mxu2 %v1785_v26 }
 0x20d   :  { %1992 = vmatpush.msrb.mxu1 %v11402_v33 }
 0x20e   :  { %2012 = vmatpush.msrb.mxu0 %v1757_v1  ;;  %2035 = vmatpush.msrb.mxu2 %v1783_v60 }
 0x20f   :  { %1993 = vmatpush.msrb.mxu1 %v11415_v16 }
 0x210   :  { %2013 = vmatpush.msrb.mxu0 %v1755_v54  ;;  %2036 = vmatpush.msrb.mxu2 %v1781_v12 }
 0x211   :  { %1994 = vmatpush.msrb.mxu1 %v11427_v27 }
 0x212   :  { %2014 = vmatpush.msrb.mxu0 %v1753_v0  ;;  %2037 = vmatpush.msrb.mxu2 %v1779_v25 }
 0x213   :  { %1995 = vmatpush.msrb.mxu1 %v11439_v62  ;;  %2038 = vmatmul.f32.vlgmr.msrb.gmra.mxu2 %v11324_v49 }
 0x214   :  { %2015 = vmatpush.msrb.mxu0 %v1751_v24 }
 0x215   :  { %1996 = vmatpush.msrb.mxu1 %v11448_v23 }
 0x216   :  { %2016 = vmatpush.msrb.mxu0 %v1749_v44 }
 0x217   :  { %1997 = vmatpush.msrb.mxu1 %v11458_v14 }
 0x218   :  { %1998 = vmatmul.f32.vlgmr.msrb.gmra.mxu1 %v11240_v6  ;;  %2017 = vmatpush.msrb.mxu0 %v1747_v36 }
 0x219   :  { %2018 = vmatmul.f32.vlgmr.msrb.gmra.mxu0 %v11274_v31 }
 0x22d   :  { %v1817_v29 = vpop.permute.xlu2 %1816 }
 0x273   :  { %v1859_v42 = vpop.f32.mrf.mxu1 }
 0x275   :  { %v1839_v17 = vpop.f32.mrf.mxu0  ;;  %v1879_v7 = vpop.f32.mrf.mxu2 }
 0x276   :  { %v1840_v35 = vadd.f32 %v1839_v17, %v1817_v29 }
 0x278   :  { %v1860_v61 = vadd.f32 %v1859_v42, %v1840_v35 }
 0x27a   :  { %v1880_v45 = vadd.f32 %v1879_v7, %v1860_v61 }
 0x27c   :  { %v1939_v15 = vpop.f32.mrf.mxu1 }
 0x27d   :  { %v1899_v13 = vpop.f32.mrf.mxu3 }
 0x27e   :  { %v1900_v63 = vadd.f32 %v1899_v13, %v1880_v45  ;;  %v1919_v4 = vpop.f32.mrf.mxu0  ;;  %v1959_v28 = vpop.f32.mrf.mxu2 }
 0x27f   :  { %v1960_v8 = vadd.f32 %v1959_v28, %v1817_v29 }
 0x280   :  { %v1920_v10 = vadd.f32 %v1919_v4, %v1900_v63 }
 0x282   :  { %v11467_v20 = vadd.f32 %v1939_v15, %v1920_v10 }
 0x284   :  { %v2064_v32 = vmul.f32 0.70710677, %v11467_v20 }
 0x286   :  { %v2066_v6 = vmul.f32 %v2064_v32, %v2064_v32  ;;  %v1979_v5 = vpop.f32.mrf.mxu3 }
 0x287   :  { %v1980_v48 = vadd.f32 %v1979_v5, %v1960_v8 }
 0x288   :  { %v2067_v41 = vmin.f32 %v2066_v6, 16.0 }
 0x28a   :  { %v2068_v55 = vmul.f32 2.1237322e-06, %v2067_v41  ;;  %v2079_v31 = vmul.f32 3.8918573e-05, %v2067_v41 }
 0x28c   :  { %v2069_v43 = vadd.f32 0.00028619796, %v2068_v55  ;;  %v2080_v49 = vadd.f32 0.001143296, %v2079_v31 }
 0x28e   :  { %v2070_v57 = vmul.f32 %v2069_v43, %v2067_v41  ;;  %v2081_v50 = vmul.f32 %v2080_v49, %v2067_v41  ;;  %v2059_v36 = vpop.f32.mrf.mxu3 }
 0x290   :  { %v2071_v3 = vadd.f32 0.0036580483, %v2070_v57  ;;  %v2082_v19 = vadd.f32 0.014752088, %v2081_v50 }
 0x292   :  { %v2083_v34 = vmul.f32 %v2082_v19, %v2067_v41  ;;  %v2072_v53 = vmul.f32 %v2071_v3, %v2067_v41 }
 0x294   :  { %v2084_v2 = vadd.f32 0.112945676, %v2083_v34  ;;  %v2073_v54 = vadd.f32 0.05243302, %v2072_v53 }
 0x295   :  { %v1999_v9 = vpop.f32.mrf.mxu1 }
 0x296   :  { %v2085_v26 = vmul.f32 %v2084_v2, %v2067_v41  ;;  %v2000_v1 = vadd.f32 %v1999_v9, %v1980_v48  ;;  %v2019_v60 = vpop.f32.mrf.mxu0  ;;  %v2039_v25 = vpop.f32.mrf.mxu2  ;;  %v2074_v17 = vmul.f32 %v2073_v54, %v2067_v41 }
 0x298   :  { %v2086_v12 = vadd.f32 0.4994258, %v2085_v26  ;;  %v2020_v0 = vadd.f32 %v2019_v60, %v2000_v1  ;;  %v2075_v61 = vadd.f32 0.18741608, %v2074_v17  ;;  %v1812_v1 = vld [vmem:[%s14093_s2] sm:$0x3] }
 0x29a   :  { %v2087_v24 = vmul.f32 %v2086_v12, %v2067_v41  ;;  %v2040_v44 = vadd.f32 %v2039_v25, %v2020_v0  ;;  %v2076_v63 = vmul.f32 %v2075_v61, %v2067_v41  ;;  %v2062_v0 = vmul.f32 0.5, %v11467_v20 }
 0x29c   :  { %v2088_v35 = vadd.f32 1.0, %v2087_v24  ;;  %v11470_v42 = vadd.f32 %v2059_v36, %v2040_v44  ;;  %v2077_v43 = vadd.f32 1.1283791, %v2076_v63  ;;  %v11481_v24 = vperm.slane %v1812_v1, 0 }
 0x29e   :  { %10412 = vrcp.f32 %v2088_v35  ;;  %v11473_v29 = vmul.f32 0.70710677, %v11470_v42  ;;  %v2098_v49 = vand.u32 2147483647, %v2088_v35  ;;  %v2100_v57 = vand.u32 2147483648, %v2088_v35 }
 0x29f   :  { %vm2094_vm12 = vweird.f32 %v2088_v35  ;;  %v2078_v41 = vmul.f32 %v2077_v43, %v2064_v32 }
 0x2a0   :  { %v2106_v7 = vmul.f32 %v11473_v29, %v11473_v29  ;;  %v2101_v34 = vor.u32 1.1754944e-38, %v2100_v57  ;;  %vm2099_vm14 = vcmp.eq.f32.partialorder %v2098_v49, 8.507059e+37 }
 0x2a2   :  { %v2107_v45 = vmin.f32 %v2106_v7, 16.0 }
 0x2a4   :  { %v10413_v13 = vpop.eup %10412  ;;  %v2108_v10 = vmul.f32 2.1237322e-06, %v2107_v45  ;;  %v2119_v15 = vmul.f32 3.8918573e-05, %v2107_v45 }
 0x2a5   :  { %v2090_v4 = vmul.f32 %v10413_v13, %v2088_v35  ;;  %vm2095_vm11 = vweird.f32 %v10413_v13 }
 0x2a6   :  { %v2109_v55 = vadd.f32 0.00028619796, %v2108_v10  ;;  %v2120_v31 = vadd.f32 0.001143296, %v2119_v15  ;;  %vm2096_vm13 = vmor %vm2094_vm12, %vm2095_vm11  ;;  %vm2158_vm12 = vcmask 588800  }
 0x2a7   :  { %v2091_v6 = vsub.f32 1.0, %v2090_v4 }
 0x2a8   :  { %v2110_v28 = vmul.f32 %v2109_v55, %v2107_v45  ;;  %v2121_v3 = vmul.f32 %v2120_v31, %v2107_v45 }
 0x2a9   :  { %v2092_v50 = vmul.f32 %v10413_v13, %v2091_v6 }
 0x2aa   :  { %v2122_v5 = vadd.f32 0.014752088, %v2121_v3  ;;  %v2111_v8 = vadd.f32 0.0036580483, %v2110_v28 }
 0x2ab   :  { %v2093_v19 = vadd.f32 %v10413_v13, %v2092_v50 }
 0x2ac   :  { %v2123_v2 = vmul.f32 %v2122_v5, %v2107_v45  ;;  %v2112_v60 = vmul.f32 %v2111_v8, %v2107_v45 }
 0x2ad   :  { %v2097_v53 = vsel %vm2096_vm13, %v10413_v13, %v2093_v19  ;;  %v10456_v13 = vld [vmem:[#allocation2] sm:$0xff]  ;;  %vm2176_vm13 = vcmask 80896  }
 0x2ae   :  { %v2102_v48 = vsel %vm2099_vm14, %v2101_v34, %v2097_v53  ;;  %v2124_v26 = vadd.f32 0.112945676, %v2123_v2  ;;  %v2113_v32 = vadd.f32 0.05243302, %v2112_v60  ;;  %v2063_v34 = vmul.f32 0.5, %v11470_v42 }
 0x2af   :  { %v2103_v9 = vmul.f32 %v2102_v48, %v2078_v41  ;;  %v11490_v41 = vperm.slane %v1812_v1, 1  ;;  %vm2230_vm14 = vcmask 89088  }
 0x2b0   :  { %v2125_v12 = vmul.f32 %v2124_v26, %v2107_v45  ;;  %v2114_v7 = vmul.f32 %v2113_v32, %v2107_v45 }
 0x2b1   :  { %v9561_v54 = vclamps-f32 %v2103_v9, 1.0  ;;  %v9590_v9 = vld [vmem:[%s14092_s11 + $0x8] sm:$0xff] }
 0x2b2   :  { %v2126_v44 = vadd.f32 0.4994258, %v2125_v12  ;;  %v2115_v4 = vadd.f32 0.18741608, %v2114_v7 }
 0x2b3   :  { %v2146_v25 = vadd.f32 1.0, %v9561_v54 }
 0x2b4   :  { %v2127_v17 = vmul.f32 %v2126_v44, %v2107_v45  ;;  %v2116_v10 = vmul.f32 %v2115_v4, %v2107_v45 }
 0x2b5   :  { %v2148_v36 = vmul.f32 %v2146_v25, %v2062_v0  ;;  %v9564_v25 = vld [vmem:[%s14090_s10 + $0x50] sm:$0xff] }
 0x2b6   :  { %v2128_v61 = vadd.f32 1.0, %v2127_v17  ;;  %v2117_v31 = vadd.f32 1.1283791, %v2116_v10 }
 0x2b7   :  { %v2155_v35 = vmul.f32 %v11481_v24, %v2148_v36  ;;  %v11521_v36 = vld [vmem:[%s14090_s10 + $0x68] sm:$0xff] }
 0x2b8   :  { %10414 = vrcp.f32 %v2128_v61  ;;  %v2140_v55 = vand.u32 2147483648, %v2128_v61  ;;  %v2138_v49 = vand.u32 2147483647, %v2128_v61  ;;  %vm2134_vm0 = vweird.f32 %v2128_v61 }
 0x2b9   :  { %2413 = vmatpush.msra.mxu2 %v2155_v35  ;;  %v10020_v63 = vpack.i.bf16 %v2155_v35, %v10456_v13  ;;  %v2118_v28 = vmul.f32 %v2117_v31, %v11473_v29  ;;  %v9572_v31 = vld [vmem:[%s14090_s10 + $0x60] sm:$0xff] }
 0x2ba   :  { %v2141_v50 = vor.u32 1.1754944e-38, %v2140_v55  ;;  %vm2139_vm11 = vcmp.eq.f32.partialorder %v2138_v49, 8.507059e+37  ;;  %9576 = vmatmul.msk.f32.vlgmr.msra.gmra.mxu2 %vm54_vm2, %v11521_v36  ;;  %v9569_v55 = vld [vmem:[%s14090_s10 + $0x58] sm:$0xff] }
 0x2bb   :  { %10021 = vrot.lane.b32.xlu1 %v10020_v63, %s10477_s21  ;;  %10016 = vrot.lane.b32.xlu0 %v10020_v63, %s10478_s22 }
 0x2be   :  { %v10415_v20 = vpop.eup %10414 }
 0x2bf   :  { %v2130_v15 = vmul.f32 %v10415_v20, %v2128_v61  ;;  %vm2135_vm15 = vweird.f32 %v10415_v20 }
 0x2c0   :  { %vm2136_vm1 = vmor %vm2134_vm0, %vm2135_vm15  ;;  %vm2286_vm15 = vcmask 72704   ;;  %vm14118_vm0 = vcmask 965632  }
 0x2c1   :  { %v2131_v6 = vsub.f32 1.0, %v2130_v15 }
 0x2c3   :  { %v2132_v43 = vmul.f32 %v10415_v20, %v2131_v6  ;;  %10026 = vrot.lane.b32.xlu0 %v10020_v63, %s10479_s0  ;;  %v9563_v63 = vld [vmem:[%s14090_s10 + $0x48] sm:$0xff] }
 0x2c5   :  { %v2133_v57 = vadd.f32 %v10415_v20, %v2132_v43 }
 0x2c7   :  { %v2137_v3 = vsel %vm2136_vm1, %v10415_v20, %v2133_v57  ;;  %vm2500_vm1 = vcmask 973824  }
 0x2c8   :  { %v2142_v19 = vsel %vm2139_vm11, %v2141_v50, %v2137_v3  ;;  %vm14117_vm11 = vcmask 957440  }
 0x2c9   :  { %v2143_v45 = vmul.f32 %v2142_v19, %v2118_v28 }
 0x2cb   :  { %v9562_v5 = vclamps-f32 %v2143_v45, 1.0  ;;  %2338 = vrot.lane.b32.xlu0 %v10456_v13, %s10472_s25 }
 0x2cd   :  { %v2147_v8 = vadd.f32 1.0, %v9562_v5 }
 0x2cf   :  { %v2149_v53 = vmul.f32 %v2147_v8, %v2063_v34 }
 0x2d1   :  { %v2156_v2 = vmul.f32 %v11490_v41, %v2149_v53 }
 0x2d3   :  { %2159 = vst.msk [vmem:[#allocation2 + $0x10] sm:$0xff] %vm2158_vm12, %v2156_v2  ;;  %v9578_v2 = vld [vmem:[%s14090_s10 + $0x70] sm:$0xff] }
 0x2da   :  { %v11494_v48 = vld [vmem:[#allocation2 + $0x10] sm:$0xff] }
 0x2db   :  { %2174 = vrot.lane.b32.xlu2 %v11494_v48, %s10478_s22  ;;  %2228 = vrot.lane.b32.xlu1 %v11494_v48, %s10477_s21  ;;  %v10040_v29 = vpack.i.bf16 %v2155_v35, %v11494_v48  ;;  %v10030_v42 = vpack.i.bf16 %v11494_v48, %v2155_v35 }
 0x2dd   :  { %10041 = vrot.lane.b32.xlu0 %v10040_v29, %s10473_s26 }
 0x2e3   :  { %10031 = vrot.lane.b32.xlu2 %v10030_v42, %s10472_s25  ;;  %10036 = vrot.lane.b32.xlu1 %v10030_v42, %s10480_s15 }
 0x2e5   :  { %2663 = vperm.xlu0 %9893, %v9590_v9  }
 0x2eb   :  { %2284 = vrot.lane.b32.xlu2 %v11494_v48, %s10479_s0  ;;  %10046 = vrot.lane.b32.xlu1 %v10030_v42, %s10481_s16 }
 0x2f3   :  { %10051 = vrot.lane.b32.xlu2 %v10030_v42, %s10482_s17  ;;  %v2820_v42 = vld [vmem:[%s14091_s4 + $0x1f0] sm:$0xff] }
 0x32d   :  { %v10022_v26 = vpop.permute.xlu1 %10021  ;;  %v10017_v1 = vpop.permute.xlu0 %10016 }
 0x32e   :  { %v10024_v60 = vunpack.i.h.bf16 %v10022_v26  ;;  %v10023_v54 = vunpack.i.l.bf16 %v10022_v26  ;;  %v10019_v12 = vunpack.i.h.bf16 %v10017_v1  ;;  %v10018_v0 = vunpack.i.l.bf16 %v10017_v1  ;;  %v2788_v26 = vld [vmem:[%s14091_s4 + $0xf0] sm:$0xff] }
 0x330   :  { %v2177_v44 = vsel %vm2176_vm13, %v10018_v0, %v10019_v12  ;;  %v2231_v32 = vsel %vm2230_vm14, %v10023_v54, %v10024_v60  ;;  %v2784_v0 = vld [vmem:[%s14091_s4 + $0xd0] sm:$0xff] }
 0x331   :  { %2199 = vmatpush.msra.mxu1 %v2177_v44 }
 0x332   :  { %9565 = vmatmul.msk.f32.vlgmr.msra.gmra.mxu1 %vm54_vm2, %v9564_v25 }
 0x333   :  { %2253 = vmatpush.msrb.mxu1 %v2231_v32  ;;  %v2816_v32 = vld [vmem:[%s14091_s4 + $0x1d0] sm:$0xff] }
 0x335   :  { %v2175_v17 = vpop.permute.xlu2 %2174  ;;  %v10027_v35 = vpop.permute.xlu0 %10026 }
 0x336   :  { %v2178_v61 = vsel %vm2176_vm13, %v10019_v12, %v2175_v17  ;;  %v10029_v7 = vunpack.i.h.bf16 %v10027_v35  ;;  %v10028_v13 = vunpack.i.l.bf16 %v10027_v35  ;;  %v2782_v17 = vld [vmem:[%s14091_s4 + $0xc0] sm:$0xff] }
 0x337   :  { %2219 = vmatpush.msra.mxu3 %v2178_v61  ;;  %v2814_v35 = vld [vmem:[%s14091_s4 + $0x1c0] sm:$0xff] }
 0x338   :  { %v2287_v4 = vsel %vm2286_vm15, %v10028_v13, %v10029_v7  ;;  %9566 = vmatmul.msk.f32.vlgmr.msra.gmra.mxu3 %vm54_vm2, %v9564_v25  ;;  %v9581_v25 = vld [vmem:[%s14090_s10 + $0x78] sm:$0xff]  ;;  %v9584_v61 = vld [vmem:[%s14090_s10 + $0x80] sm:$0xff]  ;;  %v2812_v13 = vld [vmem:[%s14091_s4 + $0x1b0] sm:$0xff] }
 0x339   :  { %2309 = vmatpush.msra.mxu1 %v2287_v4  ;;  %v2778_v4 = vld [vmem:[%s14091_s4 + $0xa0] sm:$0xff] }
 0x33a   :  { %9567 = vmatmul.msk.f32.vlgmr.msrb.gmra.mxu1 %vm54_vm2, %v9563_v63 }
 0x33d   :  { %v10032_v20 = vpop.permute.xlu2 %10031  ;;  %v2339_v10 = vpop.permute.xlu0 %2338 }
 0x33e   :  { %v10034_v15 = vunpack.i.h.bf16 %v10032_v20  ;;  %v10033_v6 = vunpack.i.l.bf16 %v10032_v20 }
 0x340   :  { %v2345_v43 = vsel %vm737_vm6, %v10033_v6, %v10034_v15  ;;  %v2344_v49 = vsel %vm737_vm6, %v2339_v10, %v10033_v6  ;;  %v2776_v15 = vld [vmem:[%s14091_s4 + $0x90] sm:$0xff]  ;;  %v9587_v6 = vld [vmem:[%s14090_s10 + $0x88] sm:$0xff] }
 0x341   :  { %2386 = vmatpush.msrb.mxu1 %v2345_v43  ;;  %2366 = vmatpush.msra.mxu0 %v2344_v49  ;;  %v2810_v43 = vld [vmem:[%s14091_s4 + $0x1a0] sm:$0xff] }
 0x342   :  { %9570 = vmatmul.msk.f32.vlgmr.msra.gmra.mxu1 %vm54_vm2, %v9569_v55  ;;  %9573 = vmatmul.msk.f32.vlgmr.msra.gmra.mxu0 %vm54_vm2, %v9572_v31  ;;  %v2774_v49 = vld [vmem:[%s14091_s4 + $0x80] sm:$0xff] }
 0x345   :  { %v2285_v57 = vpop.permute.xlu2 %2284 }
 0x346   :  { %v2288_v34 = vsel %vm2286_vm15, %v10029_v7, %v2285_v57  ;;  %v2780_v7 = vld [vmem:[%s14091_s4 + $0xb0] sm:$0xff] }
 0x347   :  { %v2808_v57 = vld [vmem:[%s14091_s4 + $0x190] sm:$0xff] }
 0x34a   :  { %9574 = vmatmul.msk.f32.vlgmr.msrb.gmra.mxu1 %vm54_vm2, %v9572_v31  ;;  %v2852_v31 = vld [vmem:[%s14091_s4 + $0x2f0] sm:$0xff] }
 0x34d   :  { %v10052_v50 = vpop.permute.xlu2 %10051  ;;  %v2229_v28 = vpop.permute.xlu1 %2228 }
 0x34e   :  { %v2232_v3 = vsel %vm2230_vm14, %v10024_v60, %v2229_v28  ;;  %v10054_v19 = vunpack.i.h.bf16 %v10052_v50  ;;  %v10053_v45 = vunpack.i.l.bf16 %v10052_v50  ;;  %v2786_v60 = vld [vmem:[%s14091_s4 + $0xe0] sm:$0xff]  ;;  %v2772_v50 = vld [vmem:[%s14091_s4 + $0x70] sm:$0xff] }
 0x34f   :  { %v10042_v5 = vpop.permute.xlu0 %10041  ;;  %2273 = vmatpush.msrb.mxu3 %v2232_v3  ;;  %v2848_v28 = vld [vmem:[%s14091_s4 + $0x2d0] sm:$0xff]  ;;  %v2806_v3 = vld [vmem:[%s14091_s4 + $0x180] sm:$0xff] }
 0x350   :  { %v10044_v8 = vunpack.i.h.bf16 %v10042_v5  ;;  %v10043_v53 = vunpack.i.l.bf16 %v10042_v5  ;;  %9568 = vmatmul.msk.f32.vlgmr.msrb.gmra.mxu3 %vm54_vm2, %v9563_v63  ;;  %v2556_v9 = vsel %vm14118_vm0, %v10053_v45, %v10054_v19  ;;  %v2846_v45 = vld [vmem:[%s14091_s4 + $0x2c0] sm:$0xff]  ;;  %v2884_v5 = vld [vmem:[%s14091_s4 + $0x3f0] sm:$0xff] }
 0x351   :  { %2329 = vmatpush.msra.mxu3 %v2288_v34  ;;  %v2768_v34 = vld [vmem:[%s14091_s4 + $0x50] sm:$0xff] }
 0x352   :  { %2487 = vmatpush.msra.mxu1 %v10043_v53  ;;  %v2446_v29 = vsel %vm1024_vm7, %v10044_v8, %v10043_v53  ;;  %v2804_v8 = vld [vmem:[%s14091_s4 + $0x170] sm:$0xff] }
 0x353   :  { %2433 = vmatpush.msrb.mxu3 %v11494_v48  ;;  %2467 = vmatpush.msrb.mxu0 %v2446_v29  ;;  %v2818_v48 = vld [vmem:[%s14091_s4 + $0x1e0] sm:$0xff]  ;;  %v2844_v53 = vld [vmem:[%s14091_s4 + $0x2b0] sm:$0xff] }
 0x354   :  { %2597 = vmatpush.msrb.mxu1 %v10054_v19  ;;  %9579 = vmatmul.msk.f32.vlgmr.msrb.gmra.mxu0 %vm54_vm2, %v9578_v2  ;;  %v2770_v19 = vld [vmem:[%s14091_s4 + $0x60] sm:$0xff] }
 0x355   :  { %2577 = vmatpush.msra.mxu0 %v2556_v9  ;;  %9580 = vmatmul.msk.f32.vlgmr.msra.gmra.mxu1 %vm54_vm2, %v9578_v2  ;;  %v10037_v1 = vpop.permute.xlu1 %10036  ;;  %v2882_v2 = vld [vmem:[%s14091_s4 + $0x3e0] sm:$0xff] }
 0x356   :  { %2943 = vmatpush.msra.mxu1 %v2820_v42  ;;  %v10039_v54 = vunpack.i.h.bf16 %v10037_v1  ;;  %v10038_v12 = vunpack.i.l.bf16 %v10037_v1  ;;  %v2766_v29 = vld [vmem:[%s14091_s4 + $0x40] sm:$0xff]  ;;  %v2800_v1 = vld [vmem:[%s14091_s4 + $0x150] sm:$0xff] }
 0x357   :  { %2923 = vmatpush.msrb.mxu0 %v2788_v26  ;;  %v2802_v42 = vld [vmem:[%s14091_s4 + $0x160] sm:$0xff]  ;;  %v2880_v26 = vld [vmem:[%s14091_s4 + $0x3d0] sm:$0xff] }
 0x358   :  { %2944 = vmatpush.msra.mxu1 %v2818_v48  ;;  %9571 = vmatmul.msk.f32.vlgmr.msra.gmra.mxu3 %vm54_vm2, %v9569_v55  ;;  %v2501_v44 = vsel %vm2500_vm1, %v10038_v12, %v10039_v54  ;;  %v2842_v9 = vld [vmem:[%s14091_s4 + $0x2a0] sm:$0xff]  ;;  %v2764_v48 = vld [vmem:[%s14091_s4 + $0x30] sm:$0xff] }
 0x359   :  { %2924 = vmatpush.msrb.mxu0 %v2786_v60  ;;  %2542 = vmatpush.msra.mxu3 %v10039_v54  ;;  %v2840_v60 = vld [vmem:[%s14091_s4 + $0x290] sm:$0xff]  ;;  %v2878_v54 = vld [vmem:[%s14091_s4 + $0x3c0] sm:$0xff] }
 0x35a   :  { %2522 = vmatpush.msrb.mxu2 %v2501_v44  ;;  %2945 = vmatpush.msra.mxu1 %v2816_v32  ;;  %v2762_v12 = vld [vmem:[%s14091_s4 + $0x20] sm:$0xff]  ;;  %v2760_v44 = vld [vmem:[%s14091_s4 + $0x10] sm:$0xff] }
 0x35b   :  { %2925 = vmatpush.msrb.mxu0 %v2784_v0  ;;  %9582 = vmatmul.msk.f32.vlgmr.msrb.gmra.mxu2 %vm54_vm2, %v9581_v25  ;;  %v2838_v0 = vld [vmem:[%s14091_s4 + $0x280] sm:$0xff]  ;;  %v2836_v32 = vld [vmem:[%s14091_s4 + $0x270] sm:$0xff] }
 0x35c   :  { %2946 = vmatpush.msra.mxu1 %v2814_v35  ;;  %9585 = vmatmul.msk.f32.vlgmr.msra.gmra.mxu0 %vm54_vm2, %v9584_v61  ;;  %v2758_v35 = vld [vmem:[%s14091_s4] sm:$0xff] }
 0x35d   :  { %2926 = vmatpush.msrb.mxu0 %v2782_v17  ;;  %9586 = vmatmul.msk.f32.vlgmr.msrb.gmra.mxu1 %vm54_vm2, %v9584_v61  ;;  %v10047_v63 = vpop.permute.xlu1 %10046  ;;  %v2874_v17 = vld [vmem:[%s14091_s4 + $0x3a0] sm:$0xff] }
 0x35e   :  { %v10049_v20 = vunpack.i.h.bf16 %v10047_v63  ;;  %v10048_v10 = vunpack.i.l.bf16 %v10047_v63  ;;  %2947 = vmatpush.msra.mxu1 %v2812_v13  ;;  %v10457_v61 = vld [vmem:[%s14091_s4 + $0x140] sm:$0xff]  ;;  %v2872_v13 = vld [vmem:[%s14091_s4 + $0x390] sm:$0xff] }
 0x35f   :  { %2927 = vmatpush.msrb.mxu0 %v2780_v7  ;;  %v2834_v7 = vld [vmem:[%s14091_s4 + $0x260] sm:$0xff]  ;;  %v2916_v63 = vld [vmem:[%s14091_s4 + $0x4f0] sm:$0xff] }
 0x360   :  { %9577 = vmatmul.msk.f32.vlgmr.msrb.gmra.mxu3 %vm54_vm2, %v11521_v36  ;;  %v2611_v55 = vsel %vm14117_vm11, %v10048_v10, %v10049_v20  ;;  %v2850_v36 = vld [vmem:[%s14091_s4 + $0x2e0] sm:$0xff]  ;;  %2948 = vmatpush.msra.mxu1 %v2810_v43  ;;  %v2912_v43 = vld [vmem:[%s14091_s4 + $0x4d0] sm:$0xff] }
 0x361   :  { %2928 = vmatpush.msrb.mxu0 %v2778_v4  ;;  %2652 = vmatpush.msrb.mxu3 %v10049_v20  ;;  %v10458_v4 = vld [vmem:[%s14091_s4 + $0x130] sm:$0xff]  ;;  %v2870_v10 = vld [vmem:[%s14091_s4 + $0x380] sm:$0xff] }
 0x362   :  { %2632 = vmatpush.msra.mxu2 %v2611_v55  ;;  %2949 = vmatpush.msra.mxu1 %v2808_v57  ;;  %v2832_v20 = vld [vmem:[%s14091_s4 + $0x250] sm:$0xff]  ;;  %v10459_v55 = vld [vmem:[%s14091_s4 + $0x120] sm:$0xff] }
 0x363   :  { %2929 = vmatpush.msrb.mxu0 %v2776_v15  ;;  %9588 = vmatmul.msk.f32.vlgmr.msra.gmra.mxu2 %vm54_vm2, %v9587_v6  ;;  %v2914_v15 = vld [vmem:[%s14091_s4 + $0x4e0] sm:$0xff] }
 0x364   :  { %2963 = vmatpush.msrb.mxu2 %v2852_v31  ;;  %2950 = vmatpush.msra.mxu1 %v2806_v3  ;;  %v2868_v31 = vld [vmem:[%s14091_s4 + $0x370] sm:$0xff]  ;;  %v2866_v57 = vld [vmem:[%s14091_s4 + $0x360] sm:$0xff] }
 0x365   :  { %2930 = vmatpush.msrb.mxu0 %v2774_v49  ;;  %v2828_v49 = vld [vmem:[%s14091_s4 + $0x230] sm:$0xff]  ;;  %v10461_v3 = vld [vmem:[%s14091_s4 + $0x100] sm:$0xff] }
 0x366   :  { %2964 = vmatpush.msrb.mxu2 %v2850_v36  ;;  %2951 = vmatpush.msra.mxu1 %v2804_v8  ;;  %v10460_v36 = vld [vmem:[%s14091_s4 + $0x110] sm:$0xff]  ;;  %v10462_v8 = vld [vmem:[%s14091_s4 + $0x500] sm:$0xff] }
 0x367   :  { %2931 = vmatpush.msrb.mxu0 %v2772_v50  ;;  %v2910_v50 = vld [vmem:[%s14091_s4 + $0x4c0] sm:$0xff] }
 0x368   :  { %2965 = vmatpush.msrb.mxu2 %v2848_v28  ;;  %9583 = vmatmul.msk.f32.vlgmr.msra.gmra.mxu3 %vm54_vm2, %v9581_v25  ;;  %v2876_v25 = vld [vmem:[%s14091_s4 + $0x3b0] sm:$0xff]  ;;  %v2826_v28 = vld [vmem:[%s14091_s4 + $0x220] sm:$0xff] }
 0x369   :  { %2932 = vmatpush.msrb.mxu0 %v2770_v19  ;;  %2983 = vmatpush.msra.mxu3 %v2884_v5  ;;  %v2864_v19 = vld [vmem:[%s14091_s4 + $0x350] sm:$0xff] }
 0x36a   :  { %2966 = vmatpush.msrb.mxu2 %v2846_v45  ;;  %2952 = vmatpush.msra.mxu1 %v2802_v42  ;;  %v2908_v45 = vld [vmem:[%s14091_s4 + $0x4b0] sm:$0xff] }
 0x36b   :  { %2933 = vmatpush.msrb.mxu0 %v2768_v34  ;;  %2984 = vmatpush.msra.mxu3 %v2882_v2  ;;  %v2824_v5 = vld [vmem:[%s14091_s4 + $0x210] sm:$0xff]  ;;  %v2862_v34 = vld [vmem:[%s14091_s4 + $0x340] sm:$0xff] }
 0x36c   :  { %2967 = vmatpush.msrb.mxu2 %v2844_v53  ;;  %2953 = vmatpush.msra.mxu1 %v2800_v1  ;;  %v2906_v53 = vld [vmem:[%s14091_s4 + $0x4a0] sm:$0xff]  ;;  %v2904_v42 = vld [vmem:[%s14091_s4 + $0x490] sm:$0xff] }
 0x36d   :  { %2934 = vmatpush.msrb.mxu0 %v2766_v29  ;;  %2985 = vmatpush.msra.mxu3 %v2880_v26  ;;  %v2822_v2 = vld [vmem:[%s14091_s4 + $0x200] sm:$0xff]  ;;  %v2860_v29 = vld [vmem:[%s14091_s4 + $0x330] sm:$0xff] }
 0x36e   :  { %2968 = vmatpush.msrb.mxu2 %v2842_v9  ;;  %2954 = vmatpush.msra.mxu1 %v10457_v61  ;;  %v2789_v9 = vld [vmem:[%s14091_s4 + $0xf8] sm:$0xff]  ;;  %v2902_v26 = vld [vmem:[%s14091_s4 + $0x480] sm:$0xff]  ;;  %v2900_v1 = vld [vmem:[%s14091_s4 + $0x470] sm:$0xff] }
 0x36f   :  { %2935 = vmatpush.msrb.mxu0 %v2764_v48  ;;  %2986 = vmatpush.msra.mxu3 %v2878_v54  ;;  %v2787_v48 = vld [vmem:[%s14091_s4 + $0xe8] sm:$0xff]  ;;  %v2898_v54 = vld [vmem:[%s14091_s4 + $0x460] sm:$0xff] }
 0x370   :  { %2969 = vmatpush.msrb.mxu2 %v2840_v60  ;;  %9589 = vmatmul.msk.f32.vlgmr.msrb.gmra.mxu3 %vm54_vm2, %v9587_v6  ;;  %v2830_v6 = vld [vmem:[%s14091_s4 + $0x240] sm:$0xff] }
 0x371   :  { %2936 = vmatpush.msrb.mxu0 %v2762_v12  ;;  %2987 = vmatpush.msra.mxu3 %v2876_v25  ;;  %v2854_v60 = vld [vmem:[%s14091_s4 + $0x300] sm:$0xff]  ;;  %v2821_v12 = vld [vmem:[%s14091_s4 + $0x1f8] sm:$0xff]  ;;  %v2819_v25 = vld [vmem:[%s14091_s4 + $0x1e8] sm:$0xff] }
 0x372   :  { %2970 = vmatpush.msrb.mxu2 %v2838_v0  ;;  %2955 = vmatpush.msra.mxu1 %v10458_v4  ;;  %v2896_v0 = vld [vmem:[%s14091_s4 + $0x450] sm:$0xff]  ;;  %v2890_v61 = vld [vmem:[%s14091_s4 + $0x420] sm:$0xff] }
 0x373   :  { %2937 = vmatpush.msrb.mxu0 %v2760_v44  ;;  %2988 = vmatpush.msra.mxu3 %v2874_v17  ;;  %v2894_v44 = vld [vmem:[%s14091_s4 + $0x440] sm:$0xff]  ;;  %v2892_v17 = vld [vmem:[%s14091_s4 + $0x430] sm:$0xff] }
 0x374   :  { %2971 = vmatpush.msrb.mxu2 %v2836_v32  ;;  %2956 = vmatpush.msra.mxu1 %v10459_v55  ;;  %v2817_v32 = vld [vmem:[%s14091_s4 + $0x1d8] sm:$0xff]  ;;  %v2886_v4 = vld [vmem:[%s14091_s4 + $0x400] sm:$0xff] }
 0x375   :  { %2938 = vmatpush.msrb.mxu0 %v2758_v35  ;;  %2989 = vmatpush.msra.mxu3 %v2872_v13  ;;  %v2777_v35 = vld [vmem:[%s14091_s4 + $0x98] sm:$0xff]  ;;  %v2888_v13 = vld [vmem:[%s14091_s4 + $0x410] sm:$0xff] }
 0x376   :  { %2939 = vmatmul.f32.vlgmr.msrb.gmra.mxu0 %v10594_v21  ;;  %2972 = vmatpush.msrb.mxu2 %v2834_v7  ;;  %v2775_v7 = vld [vmem:[%s14091_s4 + $0x88] sm:$0xff]  ;;  %v2805_v55 = vld [vmem:[%s14091_s4 + $0x178] sm:$0xff] }
 0x377   :  { %3003 = vmatpush.msra.mxu0 %v2916_v63  ;;  %2990 = vmatpush.msra.mxu3 %v2870_v10  ;;  %v2773_v63 = vld [vmem:[%s14091_s4 + $0x78] sm:$0xff] }
 0x378   :  { %2973 = vmatpush.msrb.mxu2 %v2832_v20  ;;  %2957 = vmatpush.msra.mxu1 %v10460_v36  ;;  %v2771_v20 = vld [vmem:[%s14091_s4 + $0x68] sm:$0xff]  ;;  %v2885_v10 = vld [vmem:[%s14091_s4 + $0x3f8] sm:$0xff] }
 0x379   :  { %3004 = vmatpush.msra.mxu0 %v2914_v15  ;;  %2991 = vmatpush.msra.mxu3 %v2868_v31  ;;  %v2807_v15 = vld [vmem:[%s14091_s4 + $0x188] sm:$0xff]  ;;  %v2881_v31 = vld [vmem:[%s14091_s4 + $0x3d8] sm:$0xff] }
 0x37a   :  { %2974 = vmatpush.msrb.mxu2 %v2830_v6  ;;  %2958 = vmatpush.msra.mxu1 %v10461_v3  ;;  %v2883_v6 = vld [vmem:[%s14091_s4 + $0x3e8] sm:$0xff]  ;;  %v2801_v36 = vld [vmem:[%s14091_s4 + $0x158] sm:$0xff] }
 0x37b   :  { %3005 = vmatpush.msra.mxu0 %v2912_v43  ;;  %2992 = vmatpush.msra.mxu3 %v2866_v57  ;;  %v2803_v43 = vld [vmem:[%s14091_s4 + $0x168] sm:$0xff]  ;;  %v2877_v57 = vld [vmem:[%s14091_s4 + $0x3b8] sm:$0xff] }
 0x37c   :  { %2975 = vmatpush.msrb.mxu2 %v2828_v49  ;;  %2959 = vmatmul.f32.vlgmr.msra.gmra.mxu1 %v10596_v22  ;;  %v2879_v49 = vld [vmem:[%s14091_s4 + $0x3c8] sm:$0xff]  ;;  %v2797_v3 = vld [vmem:[%s14091_s4 + $0x138] sm:$0xff] }
 0x37d   :  { %3006 = vmatpush.msra.mxu0 %v2910_v50  ;;  %3038 = vmatpush.msrb.mxu1 %v10462_v8  ;;  %v2799_v50 = vld [vmem:[%s14091_s4 + $0x148] sm:$0xff]  ;;  %v2793_v8 = vld [vmem:[%s14091_s4 + $0x118] sm:$0xff] }
 0x37e   :  { %2976 = vmatpush.msrb.mxu2 %v2826_v28  ;;  %2993 = vmatpush.msra.mxu3 %v2864_v19  ;;  %v2875_v28 = vld [vmem:[%s14091_s4 + $0x3a8] sm:$0xff]  ;;  %v2873_v19 = vld [vmem:[%s14091_s4 + $0x398] sm:$0xff] }
 0x37f   :  { %3007 = vmatpush.msra.mxu0 %v2908_v45  ;;  %3083 = vmatpush.msra.mxu1 %v11263_v46  ;;  %v2858_v46 = vld [vmem:[%s14091_s4 + $0x320] sm:$0xff]  ;;  %v2795_v45 = vld [vmem:[%s14091_s4 + $0x128] sm:$0xff] }
 0x380   :  { %2977 = vmatpush.msrb.mxu2 %v2824_v5  ;;  %2994 = vmatpush.msra.mxu3 %v2862_v34  ;;  %v2871_v5 = vld [vmem:[%s14091_s4 + $0x388] sm:$0xff] }
 0x381   :  { %3008 = vmatpush.msra.mxu0 %v2906_v53  ;;  %3084 = vmatpush.msra.mxu1 %v11280_v11  ;;  %v2856_v11 = vld [vmem:[%s14091_s4 + $0x310] sm:$0xff]  ;;  %v2915_v34 = vld [vmem:[%s14091_s4 + $0x4e8] sm:$0xff]  ;;  %v2869_v53 = vld [vmem:[%s14091_s4 + $0x378] sm:$0xff] }
 0x382   :  { %2978 = vmatpush.msrb.mxu2 %v2822_v2  ;;  %2995 = vmatpush.msra.mxu3 %v2860_v29  ;;  %v2913_v2 = vld [vmem:[%s14091_s4 + $0x4d8] sm:$0xff]  ;;  %v2867_v29 = vld [vmem:[%s14091_s4 + $0x368] sm:$0xff] }
 0x383   :  { %3009 = vmatpush.msra.mxu0 %v2904_v42  ;;  %3085 = vmatpush.msra.mxu1 %v11292_v30  ;;  %v2785_v30 = vld [vmem:[%s14091_s4 + $0xd8] sm:$0xff]  ;;  %v2911_v42 = vld [vmem:[%s14091_s4 + $0x4c8] sm:$0xff] }
 0x384   :  { %2979 = vmatmul.f32.vlgmr.msrb.gmra.mxu2 %v10604_v37  ;;  %2996 = vmatpush.msra.mxu3 %v2858_v46  ;;  %v2919_v46 = vld [vmem:[%s14091_s4 + $0x508] sm:$0xff] }
 0x385   :  { %3043 = vmatpush.msra.mxu2 %v2789_v9  ;;  %3010 = vmatpush.msra.mxu0 %v2902_v26  ;;  %v2865_v9 = vld [vmem:[%s14091_s4 + $0x358] sm:$0xff] }
 0x386   :  { %3086 = vmatpush.msra.mxu1 %v11310_v58  ;;  %2997 = vmatpush.msra.mxu3 %v2856_v11  ;;  %v2783_v58 = vld [vmem:[%s14091_s4 + $0xc8] sm:$0xff]  ;;  %v2909_v26 = vld [vmem:[%s14091_s4 + $0x4b8] sm:$0xff] }
 0x387   :  { %9593 = vmatmul.msk.f32.vlgmr.msrb.gmra.mxu1 %vm54_vm2, %v10610_v40  ;;  %3044 = vmatpush.msra.mxu2 %v2787_v48  ;;  %v2863_v11 = vld [vmem:[%s14091_s4 + $0x348] sm:$0xff] }
 0x388   :  { %3011 = vmatpush.msra.mxu0 %v2900_v1  ;;  %3087 = vmatpush.msra.mxu1 %v11322_v47  ;;  %v2781_v47 = vld [vmem:[%s14091_s4 + $0xb8] sm:$0xff]  ;;  %v2907_v48 = vld [vmem:[%s14091_s4 + $0x4a8] sm:$0xff] }
 0x389   :  { %3045 = vmatpush.msra.mxu2 %v2785_v30  ;;  %2998 = vmatpush.msra.mxu3 %v2854_v60  ;;  %v2905_v1 = vld [vmem:[%s14091_s4 + $0x498] sm:$0xff]  ;;  %v2859_v30 = vld [vmem:[%s14091_s4 + $0x328] sm:$0xff] }
 0x38a   :  { %3012 = vmatpush.msra.mxu0 %v2898_v54  ;;  %3088 = vmatpush.msra.mxu1 %v11341_v51  ;;  %v2779_v51 = vld [vmem:[%s14091_s4 + $0xa8] sm:$0xff]  ;;  %v2857_v54 = vld [vmem:[%s14091_s4 + $0x318] sm:$0xff] }
 0x38b   :  { %2999 = vmatmul.f32.vlgmr.msra.gmra.mxu3 %v10606_v38  ;;  %3046 = vmatpush.msra.mxu2 %v2783_v58  ;;  %v2903_v60 = vld [vmem:[%s14091_s4 + $0x488] sm:$0xff]  ;;  %v2901_v58 = vld [vmem:[%s14091_s4 + $0x478] sm:$0xff] }
 0x38c   :  { %3063 = vmatpush.msrb.mxu3 %v2821_v12  ;;  %3013 = vmatpush.msra.mxu0 %v2896_v0  ;;  %v2855_v12 = vld [vmem:[%s14091_s4 + $0x308] sm:$0xff] }
 0x38d   :  { %3089 = vmatpush.msra.mxu1 %v11353_v18  ;;  %3047 = vmatpush.msra.mxu2 %v2781_v47  ;;  %v2815_v18 = vld [vmem:[%s14091_s4 + $0x1c8] sm:$0xff] }
 0x38e   :  { %3064 = vmatpush.msrb.mxu3 %v2819_v25  ;;  %3014 = vmatpush.msra.mxu0 %v2894_v44  ;;  %v2899_v0 = vld [vmem:[%s14091_s4 + $0x468] sm:$0xff]  ;;  %v2893_v25 = vld [vmem:[%s14091_s4 + $0x438] sm:$0xff] }
 0x38f   :  { %3090 = vmatpush.msra.mxu1 %v11366_v59  ;;  %3048 = vmatpush.msra.mxu2 %v2779_v51  ;;  %v2813_v59 = vld [vmem:[%s14091_s4 + $0x1b8] sm:$0xff]  ;;  %v2895_v47 = vld [vmem:[%s14091_s4 + $0x448] sm:$0xff] }
 0x390   :  { %3065 = vmatpush.msrb.mxu3 %v2817_v32  ;;  %3015 = vmatpush.msra.mxu0 %v2892_v17  ;;  %v2891_v44 = vld [vmem:[%s14091_s4 + $0x428] sm:$0xff] }
 0x391   :  { %3091 = vmatpush.msra.mxu1 %v11378_v56  ;;  %3049 = vmatpush.msra.mxu2 %v2777_v35  ;;  %v2811_v56 = vld [vmem:[%s14091_s4 + $0x1a8] sm:$0xff] }
 0x392   :  { %3066 = vmatpush.msrb.mxu3 %v2815_v18  ;;  %3016 = vmatpush.msra.mxu0 %v2890_v61  ;;  %v2887_v51 = vld [vmem:[%s14091_s4 + $0x408] sm:$0xff] }
 0x393   :  { %3092 = vmatpush.msra.mxu1 %v11390_v52  ;;  %3050 = vmatpush.msra.mxu2 %v2775_v7  ;;  %v2809_v52 = vld [vmem:[%s14091_s4 + $0x198] sm:$0xff] }
 0x394   :  { %3067 = vmatpush.msrb.mxu3 %v2813_v59  ;;  %3017 = vmatpush.msra.mxu0 %v2888_v13 }
 0x395   :  { %3093 = vmatpush.msra.mxu1 %v11402_v33  ;;  %3051 = vmatpush.msra.mxu2 %v2773_v63  ;;  %v2769_v33 = vld [vmem:[%s14091_s4 + $0x58] sm:$0xff]  ;;  %v2415_v63 = vpop.f32.mrf.mxu2 }
 0x396   :  { %3068 = vmatpush.msrb.mxu3 %v2811_v56  ;;  %3018 = vmatpush.msra.mxu0 %v2886_v4 }
 0x397   :  { %3094 = vmatpush.msra.mxu1 %v11415_v16  ;;  %3019 = vmatmul.f32.vlgmr.msra.gmra.mxu0 %v10608_v39  ;;  %v2767_v16 = vld [vmem:[%s14091_s4 + $0x48] sm:$0xff] }
 0x398   :  { %3052 = vmatpush.msra.mxu2 %v2771_v20  ;;  %3069 = vmatpush.msrb.mxu3 %v2809_v52 }
 0x399   :  { %3103 = vmatpush.msrb.mxu0 %v2885_v10  ;;  %3095 = vmatpush.msra.mxu1 %v11427_v27  ;;  %v2765_v27 = vld [vmem:[%s14091_s4 + $0x38] sm:$0xff] }
 0x39a   :  { %3053 = vmatpush.msra.mxu2 %v2769_v33  ;;  %3070 = vmatpush.msrb.mxu3 %v2807_v15 }
 0x39b   :  { %3104 = vmatpush.msrb.mxu0 %v2883_v6  ;;  %3096 = vmatpush.msra.mxu1 %v11439_v62  ;;  %v2763_v62 = vld [vmem:[%s14091_s4 + $0x28] sm:$0xff] }
 0x39c   :  { %3054 = vmatpush.msra.mxu2 %v2767_v16  ;;  %3071 = vmatpush.msrb.mxu3 %v2805_v55  ;;  %v3164_v16 = vld [vmem:[%s14094_s13] sm:$0xff] }
 0x39d   :  { %3105 = vmatpush.msrb.mxu0 %v2881_v31  ;;  %3097 = vmatpush.msra.mxu1 %v11448_v23  ;;  %v2761_v23 = vld [vmem:[%s14091_s4 + $0x18] sm:$0xff] }
 0x39e   :  { %3055 = vmatpush.msra.mxu2 %v2765_v27  ;;  %3072 = vmatpush.msrb.mxu3 %v2803_v43 }
 0x39f   :  { %3106 = vmatpush.msrb.mxu0 %v2879_v49  ;;  %3098 = vmatpush.msra.mxu1 %v11458_v14  ;;  %v2759_v14 = vld [vmem:[%s14091_s4 + $0x8] sm:$0xff] }
 0x3a0   :  { %3056 = vmatpush.msra.mxu2 %v2763_v62  ;;  %3073 = vmatpush.msrb.mxu3 %v2801_v36 }
 0x3a1   :  { %3099 = vmatmul.f32.vlgmr.msra.gmra.mxu1 %v10604_v37  ;;  %3107 = vmatpush.msrb.mxu0 %v2877_v57  ;;  %v2917_v37 = vld [vmem:[%s14091_s4 + $0x4f8] sm:$0xff] }
 0x3a2   :  { %3057 = vmatpush.msra.mxu2 %v2761_v23  ;;  %3074 = vmatpush.msrb.mxu3 %v2799_v50 }
 0x3a3   :  { %3108 = vmatpush.msrb.mxu0 %v2875_v28  ;;  %3167 = vperm.xlu1 %10055, %v3164_v16  }
 0x3a4   :  { %3058 = vmatpush.msra.mxu2 %v2759_v14  ;;  %3075 = vmatpush.msrb.mxu3 %v2797_v3 }
 0x3a5   :  { %3109 = vmatpush.msrb.mxu0 %v2873_v19  ;;  %3059 = vmatmul.f32.vlgmr.msra.gmra.mxu2 %v10594_v21  ;;  %v2791_v21 = vld [vmem:[%s14091_s4 + $0x108] sm:$0xff]  ;;  %v3163_v19 = vld [vmem:[%s14095_s12] sm:$0xff] }
 0x3a6   :  { %3123 = vmatpush.msrb.mxu2 %v2917_v37  ;;  %3076 = vmatpush.msrb.mxu3 %v2795_v45 }
 0x3a7   :  { %3110 = vmatpush.msrb.mxu0 %v2871_v5 }
 0x3a8   :  { %3124 = vmatpush.msrb.mxu2 %v2915_v34  ;;  %3077 = vmatpush.msrb.mxu3 %v2793_v8 }
 0x3a9   :  { %3111 = vmatpush.msrb.mxu0 %v2869_v53 }
 0x3aa   :  { %3125 = vmatpush.msrb.mxu2 %v2913_v2  ;;  %3078 = vmatpush.msrb.mxu3 %v2791_v21  ;;  %v2664_v2 = vpop.permute.xlu0 %2663 }
 0x3ab   :  { %3112 = vmatpush.msrb.mxu0 %v2867_v29  ;;  %3079 = vmatmul.f32.vlgmr.msrb.gmra.mxu3 %v10596_v22  ;;  %v2861_v22 = vld [vmem:[%s14091_s4 + $0x338] sm:$0xff] }
 0x3ac   :  { %3126 = vmatpush.msrb.mxu2 %v2911_v42  ;;  %3158 = vmatpush.msra.mxu3 %v2919_v46 }
 0x3ad   :  { %3113 = vmatpush.msrb.mxu0 %v2865_v9 }
 0x3ae   :  { %3127 = vmatpush.msrb.mxu2 %v2909_v26 }
 0x3af   :  { %3114 = vmatpush.msrb.mxu0 %v2863_v11  ;;  %v2201_v32 = vpop.f32.mrf.mxu1 }
 0x3b0   :  { %3128 = vmatpush.msrb.mxu2 %v2907_v48 }
 0x3b1   :  { %3115 = vmatpush.msrb.mxu0 %v2861_v22 }
 0x3b2   :  { %3129 = vmatpush.msrb.mxu2 %v2905_v1 }
 0x3b3   :  { %3116 = vmatpush.msrb.mxu0 %v2859_v30  ;;  %9594 = vmatmul.msk.f32.vlgmr.msra.gmra.mxu3 %vm54_vm2, %v10610_v40  ;;  %v2897_v40 = vld [vmem:[%s14091_s4 + $0x458] sm:$0xff] }
 0x3b4   :  { %3130 = vmatpush.msrb.mxu2 %v2903_v60 }
 0x3b5   :  { %3117 = vmatpush.msrb.mxu0 %v2857_v54 }
 0x3b6   :  { %3131 = vmatpush.msrb.mxu2 %v2901_v58 }
 0x3b7   :  { %3118 = vmatpush.msrb.mxu0 %v2855_v12  ;;  %v2255_v35 = vpop.f32.mrf.mxu1 }
 0x3b8   :  { %3119 = vmatmul.f32.vlgmr.msrb.gmra.mxu0 %v10606_v38  ;;  %3132 = vmatpush.msrb.mxu2 %v2899_v0  ;;  %v2889_v38 = vld [vmem:[%s14091_s4 + $0x418] sm:$0xff]  ;;  %v2256_v36 = vadd.f32 %v2255_v35, %v2201_v32  ;;  %s10483_s4 = smov 123  }
 0x3ba   :  { %3133 = vmatpush.msrb.mxu2 %v2897_v40 }
 0x3bb   :  { %v12042_v17 = vpop.f32.mrf.mxu3 }
 0x3bc   :  { %3134 = vmatpush.msrb.mxu2 %v2895_v47 }
 0x3be   :  { %3135 = vmatpush.msrb.mxu2 %v2893_v25 }
 0x3bf   :  { %v2311_v61 = vpop.f32.mrf.mxu1  ;;  %v2368_v13 = vpop.f32.mrf.mxu0 }
 0x3c0   :  { %3136 = vmatpush.msrb.mxu2 %v2891_v44  ;;  %v2334_v14 = vadd.f32 %v2311_v61, %v2256_v36 }
 0x3c2   :  { %3137 = vmatpush.msrb.mxu2 %v2889_v38  ;;  %v2391_v37 = vadd.f32 %v2368_v13, %v2334_v14 }
 0x3c4   :  { %3138 = vmatpush.msrb.mxu2 %v2887_v51  ;;  %v2438_v45 = vadd.f32 %v2415_v63, %v2391_v37 }
 0x3c5   :  { %3139 = vmatmul.f32.vlgmr.msrb.gmra.mxu2 %v10608_v39 }
 0x3c7   :  { %v12048_v59 = vpop.f32.mrf.mxu1 }
 0x3d1   :  { %v2469_v20 = vpop.f32.mrf.mxu0 }
 0x3d2   :  { %v12052_v4 = vpop.f32.mrf.mxu1  ;;  %v2492_v5 = vadd.f32 %v2469_v20, %v2438_v45 }
 0x3d3   :  { %v12044_v18 = vpop.f32.mrf.mxu3 }
 0x3d4   :  { %v2276_v44 = vadd.f32 %v12044_v18, %v12042_v17 }
 0x3d9   :  { %v2579_v33 = vpop.f32.mrf.mxu0 }
 0x3da   :  { %v12056_v10 = vpop.f32.mrf.mxu1 }
 0x3db   :  { %v12046_v7 = vpop.f32.mrf.mxu3 }
 0x3dc   :  { %v2335_v51 = vadd.f32 %v12046_v7, %v2276_v44  ;;  %v12098_v44 = vld [vmem:[#allocation2] sm:$0xff] }
 0x3de   :  { %v2524_v52 = vpop.f32.mrf.mxu2  ;;  %v2392_v35 = vadd.f32 %v12048_v59, %v2335_v51 }
 0x3df   :  { %v2547_v34 = vadd.f32 %v2524_v52, %v2492_v5 }
 0x3e1   :  { %v2602_v8 = vadd.f32 %v2579_v33, %v2547_v34 }
 0x3e3   :  { %v12050_v56 = vpop.f32.mrf.mxu3 }
 0x3e4   :  { %v2439_v13 = vadd.f32 %v12050_v56, %v2392_v35 }
 0x3e6   :  { %v2634_v15 = vpop.f32.mrf.mxu2  ;;  %v2493_v52 = vadd.f32 %v12052_v4, %v2439_v13 }
 0x3e7   :  { %v2657_v53 = vadd.f32 %v2634_v15, %v2602_v8 }
 0x3e9   :  { %v12067_v21 = vadd.f32 %v2664_v2, %v2657_v53 }
 0x3eb   :  { %v12054_v39 = vpop.f32.mrf.mxu3  ;;  %v12070_v29 = vmul.f32 0.70710677, %v12067_v21 }
 0x3ec   :  { %v2548_v15 = vadd.f32 %v12054_v39, %v2493_v52 }
 0x3ed   :  { %v2672_v42 = vmul.f32 %v12070_v29, %v12070_v29 }
 0x3ee   :  { %v2603_v17 = vadd.f32 %v12056_v10, %v2548_v15 }
 0x3ef   :  { %v2673_v9 = vmin.f32 %v2672_v42, 16.0 }
 0x3f1   :  { %v2685_v48 = vmul.f32 3.8918573e-05, %v2673_v9  ;;  %v2674_v20 = vmul.f32 2.1237322e-06, %v2673_v9 }
 0x3f3   :  { %v12058_v6 = vpop.f32.mrf.mxu3  ;;  %v2940_v55 = vpop.f32.mrf.mxu0  ;;  %v2686_v60 = vadd.f32 0.001143296, %v2685_v48  ;;  %v2675_v16 = vadd.f32 0.00028619796, %v2674_v20  ;;  %v2668_v48 = vmul.f32 0.5, %v12067_v21 }
 0x3f4   :  { %v2658_v7 = vadd.f32 %v12058_v6, %v2603_v17 }
 0x3f5   :  { %v2687_v40 = vmul.f32 %v2686_v60, %v2673_v9  ;;  %v2676_v18 = vmul.f32 %v2675_v16, %v2673_v9 }
 0x3f6   :  { %v12084_v59 = vadd.f32 %v2664_v2, %v2658_v7 }
 0x3f7   :  { %v2688_v25 = vadd.f32 0.014752088, %v2687_v40 }
 0x3f9   :  { %v2960_v31 = vpop.f32.mrf.mxu1  ;;  %v2689_v38 = vmul.f32 %v2688_v25, %v2673_v9 }
 0x3fa   :  { %v2961_v43 = vadd.f32 %v2960_v31, %v2940_v55  ;;  %v2677_v31 = vadd.f32 0.0036580483, %v2676_v18 }
 0x3fb   :  { %v2690_v32 = vadd.f32 0.112945676, %v2689_v38 }
 0x3fd   :  { %v2691_v61 = vmul.f32 %v2690_v32, %v2673_v9 }
 0x3ff   :  { %v2692_v63 = vadd.f32 0.4994258, %v2691_v61 }
 0x401   :  { %v2693_v33 = vmul.f32 %v2692_v63, %v2673_v9 }
 0x403   :  { %v2694_v55 = vadd.f32 1.0, %v2693_v33 }
 0x404   :  { %v3040_v28 = vpop.f32.mrf.mxu1 }
 0x405   :  { %10416 = vrcp.f32 %v2694_v55  ;;  %v2706_v14 = vand.u32 2147483648, %v2694_v55  ;;  %vm2700_vm9 = vweird.f32 %v2694_v55 }
 0x407   :  { %v2980_v27 = vpop.f32.mrf.mxu2  ;;  %v2707_v5 = vor.u32 1.1754944e-38, %v2706_v14 }
 0x408   :  { %v2981_v62 = vadd.f32 %v2980_v27, %v2961_v43  ;;  %v2678_v27 = vmul.f32 %v2677_v31, %v2673_v9  ;;  %v12087_v43 = vmul.f32 0.70710677, %v12084_v59 }
 0x40a   :  { %v2679_v4 = vadd.f32 0.05243302, %v2678_v27  ;;  %v2712_v39 = vmul.f32 %v12087_v43, %v12087_v43 }
 0x40b   :  { %v10417_v56 = vpop.eup %10416 }
 0x40c   :  { %v2713_v10 = vmin.f32 %v2712_v39, 16.0  ;;  %vm2701_vm10 = vweird.f32 %v10417_v56 }
 0x40d   :  { %vm2702_vm8 = vmor %vm2700_vm9, %vm2701_vm10 }
 0x40e   :  { %v3000_v49 = vpop.f32.mrf.mxu3  ;;  %v2725_v6 = vmul.f32 3.8918573e-05, %v2713_v10 }
 0x40f   :  { %v3001_v57 = vadd.f32 %v3000_v49, %v2981_v62  ;;  %v2696_v49 = vmul.f32 %v10417_v56, %v2694_v55  ;;  %v2680_v62 = vmul.f32 %v2679_v4, %v2673_v9 }
 0x411   :  { %v2697_v36 = vsub.f32 1.0, %v2696_v49 }
 0x414   :  { %v3020_v23 = vpop.f32.mrf.mxu0 }
 0x415   :  { %v3021_v50 = vadd.f32 %v3020_v23, %v3001_v57  ;;  %v2681_v57 = vadd.f32 0.18741608, %v2680_v62  ;;  %v2698_v23 = vmul.f32 %v10417_v56, %v2697_v36  ;;  %v2669_v62 = vmul.f32 0.5, %v12084_v59 }
 0x417   :  { %v3041_v3 = vadd.f32 %v3040_v28, %v3021_v50  ;;  %v2682_v50 = vmul.f32 %v2681_v57, %v2673_v9  ;;  %v2699_v28 = vadd.f32 %v10417_v56, %v2698_v23 }
 0x419   :  { %3188 = vmatpush.msrb.mxu1 %v3041_v3  ;;  %v2726_v3 = vadd.f32 0.001143296, %v2725_v6  ;;  %v2683_v37 = vadd.f32 1.1283791, %v2682_v50  ;;  %v2703_v45 = vsel %vm2702_vm8, %v10417_v56, %v2699_v28 }
 0x41a   :  { %9595 = vmatmul.msk.f32.vlgmr.msrb.gmra.mxu1 %vm54_vm2, %v3163_v19 }
 0x41b   :  { %v2727_v34 = vmul.f32 %v2726_v3, %v2713_v10  ;;  %v2684_v53 = vmul.f32 %v2683_v37, %v12070_v29 }
 0x41d   :  { %v2728_v2 = vadd.f32 0.014752088, %v2727_v34 }
 0x41e   :  { %v3100_v22 = vpop.f32.mrf.mxu1 }
 0x428   :  { %v3060_v26 = vpop.f32.mrf.mxu2 }
 0x42e   :  { %v3080_v46 = vpop.f32.mrf.mxu3 }
 0x42f   :  { %v3081_v11 = vadd.f32 %v3080_v46, %v3060_v26  ;;  %v2729_v46 = vmul.f32 %v2728_v2, %v2713_v10 }
 0x431   :  { %v3101_v30 = vadd.f32 %v3100_v22, %v3081_v11  ;;  %v2730_v9 = vadd.f32 0.112945676, %v2729_v46  ;;  %v9598_v46 = vld [vmem:[%s14090_s10 + $0x98] sm:$0xff] }
 0x433   :  { %v2731_v22 = vmul.f32 %v2730_v9, %v2713_v10  ;;  %v9606_v9 = vld [vmem:[%s14090_s10 + $0xa8] sm:$0xff] }
 0x435   :  { %v3120_v1 = vpop.f32.mrf.mxu0 }
 0x436   :  { %v3121_v54 = vadd.f32 %v3120_v1, %v3101_v30  ;;  %v3160_v0 = vpop.f32.mrf.mxu3  ;;  %v3168_v1 = vpop.permute.xlu1 %3167 }
 0x448   :  { %v3140_v58 = vpop.f32.mrf.mxu2 }
 0x449   :  { %v3141_v12 = vadd.f32 %v3140_v58, %v3121_v54  ;;  %v2732_v58 = vadd.f32 0.4994258, %v2731_v22 }
 0x44b   :  { %v3161_v47 = vadd.f32 %v3160_v0, %v3141_v12  ;;  %v2714_v12 = vmul.f32 2.1237322e-06, %v2713_v10 }
 0x44d   :  { %3208 = vmatpush.msrb.mxu3 %v3161_v47  ;;  %v2733_v47 = vmul.f32 %v2732_v58, %v2713_v10  ;;  %v2715_v25 = vadd.f32 0.00028619796, %v2714_v12  ;;  %v9612_v12 = vld [vmem:[%s14090_s10 + $0xb8] sm:$0xff] }
 0x44e   :  { %9596 = vmatmul.msk.f32.vlgmr.msrb.gmra.mxu3 %vm54_vm2, %v3163_v19  ;;  %v2704_v19 = vand.u32 2147483647, %v2694_v55 }
 0x44f   :  { %v2734_v38 = vadd.f32 1.0, %v2733_v47  ;;  %v2716_v51 = vmul.f32 %v2715_v25, %v2713_v10 }
 0x450   :  { %vm2705_vm5 = vcmp.eq.f32.partialorder %v2704_v19, 8.507059e+37 }
 0x451   :  { %v2708_v8 = vsel %vm2705_vm5, %v2707_v5, %v2703_v45  ;;  %10418 = vrcp.f32 %v2734_v38  ;;  %v2717_v32 = vadd.f32 0.0036580483, %v2716_v51  ;;  %v2746_v55 = vand.u32 2147483648, %v2734_v38 }
 0x452   :  { %v2709_v42 = vmul.f32 %v2708_v8, %v2684_v53  ;;  %vm2740_vm8 = vweird.f32 %v2734_v38  ;;  %v2744_v17 = vand.u32 2147483647, %v2734_v38 }
 0x453   :  { %v2747_v31 = vor.u32 1.1754944e-38, %v2746_v55 }
 0x454   :  { %v9591_v26 = vclamps-f32 %v2709_v42, 1.0  ;;  %vm2745_vm10 = vcmp.eq.f32.partialorder %v2744_v17, 8.507059e+37 }
 0x456   :  { %v2752_v11 = vadd.f32 1.0, %v9591_v26  ;;  %v9597_v26 = vld [vmem:[%s14090_s10 + $0x90] sm:$0xff] }
 0x457   :  { %v10419_v35 = vpop.eup %10418 }
 0x458   :  { %v2754_v30 = vmul.f32 %v2752_v11, %v2668_v48  ;;  %v2736_v13 = vmul.f32 %v10419_v35, %v2734_v38  ;;  %vm2741_vm5 = vweird.f32 %v10419_v35 }
 0x459   :  { %vm2742_vm9 = vmor %vm2740_vm8, %vm2741_vm5 }
 0x45a   :  { %v2756_v0 = vmul.f32 %v2754_v30, %v11481_v24  ;;  %v2737_v20 = vsub.f32 1.0, %v2736_v13 }
 0x45c   :  { %v2738_v33 = vmul.f32 %v10419_v35, %v2737_v20 }
 0x45e   :  { %v2739_v16 = vadd.f32 %v10419_v35, %v2738_v33 }
 0x460   :  { %v2743_v7 = vsel %vm2742_vm9, %v10419_v35, %v2739_v16 }
 0x461   :  { %v2748_v27 = vsel %vm2745_vm10, %v2747_v31, %v2743_v7  ;;  %v9615_v7 = vld [vmem:[%s14090_s10 + $0xc0] sm:$0xff]  ;;  %v9618_v31 = vld [vmem:[%s14090_s10 + $0xc8] sm:$0xff] }
 0x497   :  { %v3190_v60 = vpop.f32.mrf.mxu1 }
 0x498   :  { %v3191_v54 = vadd.f32 %v3190_v60, %v3168_v1 }
 0x49a   :  { %v3213_v40 = vmul.f32 %v3191_v54, %v11481_v24  ;;  %v2718_v24 = vmul.f32 %v2717_v32, %v2713_v10  ;;  %v9603_v32 = vld [vmem:[%s14090_s10 + $0xa0] sm:$0xff] }
 0x49c   :  { %v12095_v29 = vadd.f32 %v3213_v40, %v2756_v0  ;;  %v2719_v61 = vadd.f32 0.05243302, %v2718_v24 }
 0x49e   :  { %3217 = vst [vmem:[#allocation2 + $0x8] sm:$0xff] %v12095_v29  ;;  %v10061_v21 = vpack.i.bf16 %v12095_v29, %v12098_v44  ;;  %v2720_v63 = vmul.f32 %v2719_v61, %v2713_v10 }
 0x4a0   :  { %10062 = vrot.lane.b32.xlu1 %v10061_v21, %s10477_s21  ;;  %10057 = vrot.lane.b32.xlu2 %v10061_v21, %s10478_s22  ;;  %v2721_v52 = vadd.f32 0.18741608, %v2720_v63 }
 0x4a2   :  { %v2722_v15 = vmul.f32 %v2721_v52, %v2713_v10 }
 0x4a4   :  { %v2723_v18 = vadd.f32 1.1283791, %v2722_v15  ;;  %v9609_v15 = vld [vmem:[%s14090_s10 + $0xb0] sm:$0xff] }
 0x4a6   :  { %v2724_v56 = vmul.f32 %v2723_v18, %v12087_v43 }
 0x4a8   :  { %10072 = vrot.lane.b32.xlu1 %v10061_v21, %s10472_s25  ;;  %v2749_v4 = vmul.f32 %v2748_v27, %v2724_v56  ;;  %v9621_v56 = vld [vmem:[%s14090_s10 + $0xd0] sm:$0xff] }
 0x4aa   :  { %v9592_v49 = vclamps-f32 %v2749_v4, 1.0  ;;  %v12195_v4 = vld [vmem:[%s14096_s5 + $0x78] sm:$0xff] }
 0x4ac   :  { %v2753_v39 = vadd.f32 1.0, %v9592_v49  ;;  %v12201_v49 = vld [vmem:[%s14096_s5 + $0x70] sm:$0xff] }
 0x4ae   :  { %v2755_v36 = vmul.f32 %v2753_v39, %v2669_v62  ;;  %v12206_v39 = vld [vmem:[%s14096_s5 + $0x68] sm:$0xff]  ;;  %v12212_v62 = vld [vmem:[%s14096_s5 + $0x60] sm:$0xff] }
 0x4b0   :  { %v2757_v23 = vmul.f32 %v2755_v36, %v11490_v41  ;;  %v12219_v36 = vld [vmem:[%s14096_s5 + $0x58] sm:$0xff] }
 0x4d1   :  { %v3210_v10 = vpop.f32.mrf.mxu3 }
 0x4d2   :  { %v3211_v57 = vadd.f32 %v3210_v10, %v3168_v1  ;;  %v12224_v10 = vld [vmem:[%s14096_s5 + $0x50] sm:$0xff] }
 0x4d4   :  { %v3214_v6 = vmul.f32 %v3211_v57, %v11490_v41  ;;  %v9624_v41 = vld [vmem:[%s14092_s11 + $0x10] sm:$0xff]  ;;  %v12231_v57 = vld [vmem:[%s14096_s5 + $0x48] sm:$0xff] }
 0x4d6   :  { %v12109_v50 = vadd.f32 %v3214_v6, %v2757_v23  ;;  %v12237_v23 = vld [vmem:[%s14096_s5 + $0x40] sm:$0xff]  ;;  %v12243_v6 = vld [vmem:[%s14096_s5 + $0x38] sm:$0xff] }
 0x4d8   :  { %3218 = vst.msk [vmem:[#allocation2 + $0x10] sm:$0xff] %vm2158_vm12, %v12109_v50 }
 0x4df   :  { %v12113_v28 = vld [vmem:[#allocation2 + $0x10] sm:$0xff] }
 0x4e0   :  { %3233 = vrot.lane.b32.xlu0 %v12113_v28, %s10478_s22  ;;  %3286 = vrot.lane.b32.xlu2 %v12113_v28, %s10477_s21  ;;  %v10076_v59 = vpack.i.bf16 %v12113_v28, %v12095_v29 }
 0x4e2   :  { %10077 = vrot.lane.b32.xlu1 %v10076_v59, %s10473_s26 }
 0x4e8   :  { %10067 = vrot.lane.b32.xlu0 %v10061_v21, %s10479_s0  ;;  %3341 = vrot.lane.b32.xlu2 %v12113_v28, %s10479_s0 }
 0x4ea   :  { %10092 = vrot.lane.b32.xlu1 %v10076_v59, %s10481_s16 }
 0x4f0   :  { %3398 = vrot.lane.b32.xlu0 %v12113_v28, %s10472_s25  ;;  %10082 = vrot.lane.b32.xlu2 %v10076_v59, %s10480_s15 }
 0x4f8   :  { %10087 = vrot.lane.b32.xlu0 %v10076_v59, %s10482_s17  ;;  %3750 = vperm.xlu2 %10014, %v9624_v41   ;;  %v12255_v59 = vld [vmem:[%s14096_s5 + $0x28] sm:$0xff]  ;;  %v12261_v41 = vld [vmem:[%s14096_s5 + $0x20] sm:$0xff] }
 0x4fa   :  { %v10058_v43 = vpop.permute.xlu2 %10057 }
 0x4fb   :  { %v10060_v14 = vunpack.i.h.bf16 %v10058_v43  ;;  %v10059_v3 = vunpack.i.l.bf16 %v10058_v43  ;;  %v12267_v43 = vld [vmem:[%s14096_s5 + $0x18] sm:$0xff] }
 0x4fd   :  { %v3235_v19 = vsel %vm2176_vm13, %v10059_v3, %v10060_v14  ;;  %v12273_v3 = vld [vmem:[%s14096_s5 + $0x10] sm:$0xff] }
 0x4fe   :  { %3257 = vmatpush.msra.mxu1 %v3235_v19  ;;  %v12279_v19 = vld [vmem:[%s14096_s5 + $0x8] sm:$0xff] }
 0x4ff   :  { %9599 = vmatmul.msk.f32.vlgmr.msra.gmra.mxu1 %vm54_vm2, %v9598_v46 }
 0x512   :  { %v10063_v37 = vpop.permute.xlu1 %10062 }
 0x513   :  { %v10065_v45 = vunpack.i.h.bf16 %v10063_v37  ;;  %v10064_v5 = vunpack.i.l.bf16 %v10063_v37  ;;  %v3744_v37 = vld [vmem:[%s14096_s5 + $0xc0] sm:$0xff] }
 0x515   :  { %v3288_v34 = vsel %vm2230_vm14, %v10064_v5, %v10065_v45  ;;  %v3743_v5 = vld [vmem:[%s14096_s5 + $0xb8] sm:$0xff] }
 0x516   :  { %3310 = vmatpush.msrb.mxu1 %v3288_v34  ;;  %v3742_v34 = vld [vmem:[%s14096_s5 + $0xb0] sm:$0xff] }
 0x517   :  { %9601 = vmatmul.msk.f32.vlgmr.msrb.gmra.mxu1 %vm54_vm2, %v9597_v26 }
 0x51a   :  { %v10073_v8 = vpop.permute.xlu1 %10072 }
 0x51b   :  { %v10075_v53 = vunpack.i.h.bf16 %v10073_v8  ;;  %v10074_v2 = vunpack.i.l.bf16 %v10073_v8 }
 0x51d   :  { %v3400_v42 = vsel %vm737_vm6, %v10074_v2, %v10075_v53  ;;  %v3740_v2 = vld [vmem:[%s14096_s5 + $0xa0] sm:$0xff] }
 0x51e   :  { %3422 = vmatpush.msra.mxu2 %v3400_v42 }
 0x51f   :  { %9607 = vmatmul.msk.f32.vlgmr.msra.gmra.mxu2 %vm54_vm2, %v9606_v9 }
 0x53a   :  { %v3287_v11 = vpop.permute.xlu2 %3286 }
 0x53b   :  { %v3289_v60 = vsel %vm2230_vm14, %v10065_v45, %v3287_v11  ;;  %v12287_v45 = vld [vmem:[%s14096_s5] sm:$0xff]  ;;  %v3738_v11 = vld [vmem:[%s14096_s5 + $0x90] sm:$0xff] }
 0x542   :  { %v3342_v48 = vpop.permute.xlu2 %3341 }
 0x54a   :  { %v10083_v40 = vpop.permute.xlu2 %10082 }
 0x54b   :  { %v10085_v38 = vunpack.i.h.bf16 %v10083_v40  ;;  %v10084_v51 = vunpack.i.l.bf16 %v10083_v40 }
 0x54d   :  { %v3556_v13 = vsel %vm2500_vm1, %v10084_v51, %v10085_v38 }
 0x552   :  { %v3234_v22 = vpop.permute.xlu0 %3233 }
 0x553   :  { %v3236_v1 = vsel %vm2176_vm13, %v10060_v14, %v3234_v22  ;;  %v3736_v22 = vld [vmem:[%s14096_s5 + $0x80] sm:$0xff] }
 0x554   :  { %v10078_v30 = vpop.permute.xlu1 %10077  ;;  %3277 = vmatpush.msra.mxu3 %v3236_v1 }
 0x555   :  { %v10080_v54 = vunpack.i.h.bf16 %v10078_v30  ;;  %v10079_v58 = vunpack.i.l.bf16 %v10078_v30  ;;  %9600 = vmatmul.msk.f32.vlgmr.msra.gmra.mxu3 %vm54_vm2, %v9598_v46  ;;  %v3739_v46 = vld [vmem:[%s14096_s5 + $0x98] sm:$0xff] }
 0x556   :  { %3330 = vmatpush.msrb.mxu3 %v3289_v60 }
 0x557   :  { %v3502_v0 = vsel %vm1024_vm7, %v10079_v58, %v10080_v54 }
 0x558   :  { %3523 = vmatpush.msrb.mxu2 %v3502_v0 }
 0x559   :  { %9613 = vmatmul.msk.f32.vlgmr.msrb.gmra.mxu2 %vm54_vm2, %v9612_v12 }
 0x55a   :  { %v10068_v47 = vpop.permute.xlu0 %10067 }
 0x55b   :  { %v10070_v25 = vunpack.i.h.bf16 %v10068_v47  ;;  %v10069_v21 = vunpack.i.l.bf16 %v10068_v47 }
 0x55c   :  { %v10093_v61 = vpop.permute.xlu1 %10092 }
 0x55d   :  { %9602 = vmatmul.msk.f32.vlgmr.msrb.gmra.mxu3 %vm54_vm2, %v9597_v26  ;;  %v3343_v24 = vsel %vm2286_vm15, %v10069_v21, %v10070_v25  ;;  %v3344_v35 = vsel %vm2286_vm15, %v10070_v25, %v3342_v48  ;;  %v10095_v20 = vunpack.i.h.bf16 %v10093_v61  ;;  %v10094_v52 = vunpack.i.l.bf16 %v10093_v61  ;;  %v3737_v48 = vld [vmem:[%s14096_s5 + $0x88] sm:$0xff] }
 0x55e   :  { %3365 = vmatpush.msra.mxu0 %v3343_v24  ;;  %3385 = vmatpush.msra.mxu1 %v3344_v35 }
 0x55f   :  { %9604 = vmatmul.msk.f32.vlgmr.msra.gmra.mxu0 %vm54_vm2, %v9603_v32  ;;  %9605 = vmatmul.msk.f32.vlgmr.msra.gmra.mxu1 %vm54_vm2, %v9603_v32  ;;  %v3664_v16 = vsel %vm14117_vm11, %v10094_v52, %v10095_v20 }
 0x560   :  { %3469 = vmatpush.msrb.mxu0 %v12095_v29  ;;  %3489 = vmatpush.msrb.mxu1 %v12113_v28  ;;  %v12249_v28 = vld [vmem:[%s14096_s5 + $0x30] sm:$0xff] }
 0x562   :  { %3577 = vmatpush.msra.mxu0 %v3556_v13  ;;  %3597 = vmatpush.msra.mxu1 %v10085_v38  ;;  %v3399_v63 = vpop.permute.xlu0 %3398  ;;  %v3712_v13 = vld [vmem:[%s14093_s2] sm:$0x3] }
 0x563   :  { %v3401_v33 = vsel %vm737_vm6, %v10075_v53, %v3399_v63  ;;  %v3741_v53 = vld [vmem:[%s14096_s5 + $0xa8] sm:$0xff] }
 0x564   :  { %3442 = vmatpush.msra.mxu3 %v3401_v33 }
 0x565   :  { %9608 = vmatmul.msk.f32.vlgmr.msra.gmra.mxu3 %vm54_vm2, %v9606_v9 }
 0x566   :  { %3543 = vmatpush.msrb.mxu3 %v10080_v54 }
 0x567   :  { %9610 = vmatmul.msk.f32.vlgmr.msrb.gmra.mxu0 %vm54_vm2, %v9609_v15  ;;  %9611 = vmatmul.msk.f32.vlgmr.msrb.gmra.mxu1 %vm54_vm2, %v9609_v15 }
 0x568   :  { %3685 = vmatpush.msrb.mxu0 %v3664_v16  ;;  %3705 = vmatpush.msrb.mxu1 %v10095_v20  ;;  %v3714_v16 = vperm.slane %v3712_v13, 0 }
 0x56a   :  { %v10088_v55 = vpop.permute.xlu0 %10087 }
 0x56b   :  { %v10090_v17 = vunpack.i.h.bf16 %v10088_v55  ;;  %v10089_v18 = vunpack.i.l.bf16 %v10088_v55 }
 0x56d   :  { %9614 = vmatmul.msk.f32.vlgmr.msrb.gmra.mxu3 %vm54_vm2, %v9612_v12  ;;  %v3610_v27 = vsel %vm14118_vm0, %v10089_v18, %v10090_v17 }
 0x56e   :  { %3651 = vmatpush.msra.mxu3 %v10090_v17  ;;  %3631 = vmatpush.msra.mxu2 %v3610_v27 }
 0x56f   :  { %9616 = vmatmul.msk.f32.vlgmr.msra.gmra.mxu0 %vm54_vm2, %v9615_v7  ;;  %9619 = vmatmul.msk.f32.vlgmr.msra.gmra.mxu2 %vm54_vm2, %v9618_v31 }
 0x570   :  { %9617 = vmatmul.msk.f32.vlgmr.msra.gmra.mxu1 %vm54_vm2, %v9615_v7  ;;  %3756 = vmatpush.msrb.mxu2 %v12195_v4 }
 0x571   :  { %3783 = vmatpush.msrb.mxu3 %v3744_v37 }
 0x572   :  { %3757 = vmatpush.msrb.mxu2 %v12201_v49 }
 0x573   :  { %3784 = vmatpush.msrb.mxu3 %v3743_v5 }
 0x574   :  { %3758 = vmatpush.msrb.mxu2 %v12206_v39 }
 0x575   :  { %9620 = vmatmul.msk.f32.vlgmr.msra.gmra.mxu3 %vm54_vm2, %v9618_v31 }
 0x576   :  { %3759 = vmatpush.msrb.mxu2 %v12212_v62  ;;  %3785 = vmatpush.msrb.mxu3 %v3742_v34 }
 0x577   :  { %9622 = vmatmul.msk.f32.vlgmr.msrb.gmra.mxu0 %vm54_vm2, %v9621_v56 }
 0x578   :  { %9623 = vmatmul.msk.f32.vlgmr.msrb.gmra.mxu1 %vm54_vm2, %v9621_v56  ;;  %3760 = vmatpush.msrb.mxu2 %v12219_v36 }
 0x579   :  { %3786 = vmatpush.msrb.mxu3 %v3741_v53 }
 0x57a   :  { %3761 = vmatpush.msrb.mxu2 %v12224_v10 }
 0x57b   :  { %3787 = vmatpush.msrb.mxu3 %v3740_v2 }
 0x57c   :  { %3762 = vmatpush.msrb.mxu2 %v12231_v57  ;;  %v3259_v14 = vpop.f32.mrf.mxu1 }
 0x57d   :  { %3788 = vmatpush.msrb.mxu3 %v3739_v46 }
 0x57e   :  { %3763 = vmatpush.msrb.mxu2 %v12237_v23 }
 0x57f   :  { %3789 = vmatpush.msrb.mxu3 %v3738_v11 }
 0x580   :  { %3764 = vmatpush.msrb.mxu2 %v12243_v6 }
 0x581   :  { %3790 = vmatpush.msrb.mxu3 %v3737_v48 }
 0x582   :  { %3765 = vmatpush.msrb.mxu2 %v12249_v28 }
 0x583   :  { %3791 = vmatpush.msrb.mxu3 %v3736_v22 }
 0x584   :  { %3766 = vmatpush.msrb.mxu2 %v12255_v59 }
 0x586   :  { %3767 = vmatpush.msrb.mxu2 %v12261_v41 }
 0x588   :  { %3768 = vmatpush.msrb.mxu2 %v12267_v43 }
 0x58a   :  { %3769 = vmatpush.msrb.mxu2 %v12273_v3 }
 0x58c   :  { %3770 = vmatpush.msrb.mxu2 %v12279_v19 }
 0x58e   :  { %3771 = vmatpush.msrb.mxu2 %v12287_v45 }
 0x590   :  { %4228 = vmatpush.msra.mxu2 %v3744_v37 }
 0x592   :  { %4229 = vmatpush.msra.mxu2 %v3743_v5 }
 0x594   :  { %v3312_v8 = vpop.f32.mrf.mxu1  ;;  %4230 = vmatpush.msra.mxu2 %v3742_v34 }
 0x595   :  { %v3313_v60 = vadd.f32 %v3312_v8, %v3259_v14  ;;  %v3715_v14 = vperm.slane %v3712_v13, 1  ;;  %v3751_v8 = vpop.permute.xlu2 %3750 }
 0x596   :  { %4231 = vmatpush.msra.mxu2 %v3741_v53 }
 0x598   :  { %4232 = vmatpush.msra.mxu2 %v3740_v2 }
 0x59a   :  { %4233 = vmatpush.msra.mxu2 %v3739_v46 }
 0x59c   :  { %4234 = vmatpush.msra.mxu2 %v3738_v11 }
 0x59e   :  { %4235 = vmatpush.msra.mxu2 %v3737_v48 }
 0x5a0   :  { %4236 = vmatpush.msra.mxu2 %v3736_v22 }
 0x5a2   :  { %v3424_v1 = vpop.f32.mrf.mxu2 }
 0x5d8   :  { %v3279_v42 = vpop.f32.mrf.mxu3 }
 0x5dc   :  { %v3367_v26 = vpop.f32.mrf.mxu0  ;;  %v3387_v9 = vpop.f32.mrf.mxu1 }
 0x5dd   :  { %v3390_v12 = vadd.f32 %v3367_v26, %v3313_v60  ;;  %v3525_v25 = vpop.f32.mrf.mxu2 }
 0x5df   :  { %v3447_v47 = vadd.f32 %v3424_v1, %v3390_v12 }
 0x5e0   :  { %v3332_v30 = vpop.f32.mrf.mxu3 }
 0x5e1   :  { %v3333_v0 = vadd.f32 %v3332_v30, %v3279_v42 }
 0x5e3   :  { %v3391_v21 = vadd.f32 %v3387_v9, %v3333_v0 }
 0x5e4   :  { %v3471_v54 = vpop.f32.mrf.mxu0  ;;  %v3491_v58 = vpop.f32.mrf.mxu1 }
 0x5e5   :  { %v3494_v38 = vadd.f32 %v3471_v54, %v3447_v47 }
 0x5e7   :  { %v3548_v35 = vadd.f32 %v3525_v25, %v3494_v38 }
 0x5e8   :  { %v3444_v40 = vpop.f32.mrf.mxu3 }
 0x5e9   :  { %v3448_v32 = vadd.f32 %v3444_v40, %v3391_v21 }
 0x5eb   :  { %v3495_v63 = vadd.f32 %v3491_v58, %v3448_v32 }
 0x5ec   :  { %v3579_v51 = vpop.f32.mrf.mxu0 }
 0x5ed   :  { %v3599_v24 = vpop.f32.mrf.mxu1  ;;  %v3602_v20 = vadd.f32 %v3579_v51, %v3548_v35 }
 0x5f0   :  { %v3545_v61 = vpop.f32.mrf.mxu3 }
 0x5f1   :  { %v3549_v33 = vadd.f32 %v3545_v61, %v3495_v63 }
 0x5f2   :  { %v3633_v52 = vpop.f32.mrf.mxu2 }
 0x5f3   :  { %v3656_v15 = vadd.f32 %v3633_v52, %v3602_v20  ;;  %v3603_v18 = vadd.f32 %v3599_v24, %v3549_v33 }
 0x5f4   :  { %v3687_v55 = vpop.f32.mrf.mxu0 }
 0x5f5   :  { %v3710_v17 = vadd.f32 %v3687_v55, %v3656_v15  ;;  %v3707_v27 = vpop.f32.mrf.mxu1 }
 0x5f7   :  { %v3718_v7 = vmul.f32 %v3714_v16, %v3710_v17 }
 0x5f8   :  { %v3653_v31 = vpop.f32.mrf.mxu3 }
 0x5f9   :  { %v3657_v56 = vadd.f32 %v3653_v31, %v3603_v18  ;;  %3772 = vmatmul.f32.vlgmr.msrb.gmra.mxu2 %v3718_v7 }
 0x5fb   :  { %v3711_v37 = vadd.f32 %v3707_v27, %v3657_v56 }
 0x5fd   :  { %v3719_v5 = vmul.f32 %v3715_v14, %v3711_v37  ;;  %v12324_v14 = vld [vmem:[%s14097_s3] ss:$0 sm:$0xff]  ;;  %s10486_s3 = smov 6  }
 0x5ff   :  { %9625 = vmatmul.msk.f32.vlgmr.msrb.gmra.mxu3 %vm2158_vm12, %v3719_v5 }
 0x601   :  { %9647 = vmatmul.msk.f32.vlgmr.msra.gmra.mxu2 %vm2158_vm12, %v12109_v50 }
 0x67c   :  { %v3773_v34 = vpop.f32.mrf.mxu2 }
 0x67d   :  { %v3774_v53 = vadd.f32 %v3773_v34, %v3751_v8 }
 0x682   :  { %v3793_v2 = vpop.f32.mrf.mxu3 }
 0x683   :  { %v3794_v42 = vadd.f32 %v3793_v2, %v3774_v53  ;;  %v9645_v53 = vld [vmem:[%s14092_s11 + $0x18] sm:$0xff]  ;;  %v9649_v2 = vld [vmem:[%s14094_s13 + $0x8] sm:$0xff] }
 0x685   :  { %v3797_v46 = vmul.f32 0.70710677, %v3794_v42  ;;  %v3796_v27 = vmul.f32 0.5, %v3794_v42  ;;  %v9635_v42 = vld [vmem:[%s14090_s10 + $0xf8] sm:$0xff] }
 0x687   :  { %v3798_v26 = vmul.f32 %v3797_v46, %v3797_v46 }
 0x689   :  { %v3799_v9 = vmin.f32 %v3798_v26, 16.0 }
 0x68b   :  { %v3800_v11 = vmul.f32 2.1237322e-06, %v3799_v9  ;;  %v3811_v48 = vmul.f32 3.8918573e-05, %v3799_v9 }
 0x68d   :  { %v3801_v22 = vadd.f32 0.00028619796, %v3800_v11  ;;  %v3812_v1 = vadd.f32 0.001143296, %v3811_v48 }
 0x68f   :  { %v3802_v30 = vmul.f32 %v3801_v22, %v3799_v9  ;;  %v3813_v60 = vmul.f32 %v3812_v1, %v3799_v9  ;;  %v9627_v1 = vld [vmem:[%s14090_s10 + $0xd8] sm:$0xff] }
 0x691   :  { %v3814_v54 = vadd.f32 0.014752088, %v3813_v60  ;;  %v3803_v58 = vadd.f32 0.0036580483, %v3802_v30 }
 0x693   :  { %v3815_v12 = vmul.f32 %v3814_v54, %v3799_v9  ;;  %v3804_v40 = vmul.f32 %v3803_v58, %v3799_v9 }
 0x695   :  { %v3816_v0 = vadd.f32 0.112945676, %v3815_v12  ;;  %v3805_v25 = vadd.f32 0.05243302, %v3804_v40 }
 0x697   :  { %v3817_v50 = vmul.f32 %v3816_v0, %v3799_v9  ;;  %v3806_v51 = vmul.f32 %v3805_v25, %v3799_v9  ;;  %v9628_v25 = vld [vmem:[%s14090_s10 + $0xe0] sm:$0xff] }
 0x699   :  { %v3818_v47 = vadd.f32 0.4994258, %v3817_v50  ;;  %v3807_v32 = vadd.f32 0.18741608, %v3806_v51 }
 0x69b   :  { %v3819_v21 = vmul.f32 %v3818_v47, %v3799_v9  ;;  %v3808_v35 = vmul.f32 %v3807_v32, %v3799_v9 }
 0x69d   :  { %v3820_v38 = vadd.f32 1.0, %v3819_v21  ;;  %v3809_v20 = vadd.f32 1.1283791, %v3808_v35  ;;  %v9633_v21 = vld [vmem:[%s14090_s10 + $0xf0] sm:$0xff] }
 0x69f   :  { %10420 = vrcp.f32 %v3820_v38  ;;  %v3832_v63 = vand.u32 2147483648, %v3820_v38  ;;  %v3830_v33 = vand.u32 2147483647, %v3820_v38  ;;  %vm3826_vm8 = vweird.f32 %v3820_v38 }
 0x6a0   :  { %v3810_v55 = vmul.f32 %v3809_v20, %v3797_v46  ;;  %v4290_v20 = vld [vmem:[%s14098_s6 + $0x78] sm:$0xff] }
 0x6a1   :  { %v3833_v16 = vor.u32 1.1754944e-38, %v3832_v63  ;;  %vm3831_vm10 = vcmp.eq.f32.partialorder %v3830_v33, 8.507059e+37  ;;  %v4287_v33 = vld [vmem:[%s14098_s6 + $0x60] sm:$0xff] }
 0x6a5   :  { %v10421_v24 = vpop.eup %10420 }
 0x6a6   :  { %v3822_v61 = vmul.f32 %v10421_v24, %v3820_v38  ;;  %vm3827_vm5 = vweird.f32 %v10421_v24 }
 0x6a7   :  { %vm3828_vm9 = vmor %vm3826_vm8, %vm3827_vm5  ;;  %vm3887_vm5 = vcmask 56320   ;;  %vm3857_vm8 = vcmask 48128  }
 0x6a8   :  { %v3823_v13 = vsub.f32 1.0, %v3822_v61  ;;  %v9631_v61 = vld [vmem:[%s14090_s10 + $0xe8] sm:$0xff] }
 0x6aa   :  { %v3824_v52 = vmul.f32 %v10421_v24, %v3823_v13 }
 0x6ac   :  { %v3825_v15 = vadd.f32 %v10421_v24, %v3824_v52 }
 0x6ae   :  { %v3829_v17 = vsel %vm3828_vm9, %v10421_v24, %v3825_v15  ;;  %vm3919_vm9 = vcmask 39936   ;;  %v9641_v24 = vld [vmem:[%s14090_s10 + $0x110] sm:$0xff]  ;;  %v4288_v15 = vld [vmem:[%s14098_s6 + $0x68] sm:$0xff] }
 0x6af   :  { %v3834_v18 = vsel %vm3831_vm10, %v3833_v16, %v3829_v17  ;;  %v4286_v17 = vld [vmem:[%s14098_s6 + $0x58] sm:$0xff] }
 0x6b0   :  { %v3835_v7 = vmul.f32 %v3834_v18, %v3810_v55  ;;  %v4285_v55 = vld [vmem:[%s14098_s6 + $0x50] sm:$0xff] }
 0x6b2   :  { %v9626_v31 = vclamps-f32 %v3835_v7, 1.0  ;;  %v4283_v7 = vld [vmem:[%s14098_s6 + $0x40] sm:$0xff] }
 0x6b4   :  { %v3838_v56 = vadd.f32 1.0, %v9626_v31  ;;  %v4284_v31 = vld [vmem:[%s14098_s6 + $0x48] sm:$0xff] }
 0x6b6   :  { %v3839_v37 = vmul.f32 %v3838_v56, %v3796_v27 }
 0x6b8   :  { %v3843_v5 = vmul.f32 %v12324_v14, %v3839_v37 }
 0x6ba   :  { %3844 = vst.msk [vmem:[#allocation2 + $0x8] sm:$0xff] %vm2158_vm12, %v3843_v5 }
 0x6c1   :  { %v3846_v34 = vld [vmem:[#allocation2 + $0x8] sm:$0xff] }
 0x6c2   :  { %4035 = vrot.lane.b32.xlu2 %v3846_v34, %s10483_s4  ;;  %3998 = vmatpush.msra.mxu3 %v3846_v34  ;;  %v10101_v8 = vpack.i.bf16 %v3846_v34, %v12098_v44  ;;  %s14125_s4 = smov 109  }
 0x6c3   :  { %9636 = vmatmul.msk.f32.vlgmr.msra.gmra.mxu3 %vm54_vm2, %v9635_v42 }
 0x6c4   :  { %10102 = vrot.lane.b32.xlu1 %v10101_v8, %s10472_s25  ;;  %10097 = vrot.lane.b32.xlu0 %v10101_v8, %s10484_s8 }
 0x6ca   :  { %4006 = vrot.lane.b32.xlu2 %v3846_v34, %s10473_s26 }
 0x6cc   :  { %10112 = vrot.lane.b32.xlu1 %v10101_v8, %s10485_s29  ;;  %10107 = vrot.lane.b32.xlu0 %v10101_v8, %s10486_s3 }
 0x6d2   :  { %4124 = vperm.xlu2 %10014, %v9645_v53  }
 0x6d4   :  { %4093 = vrot.lane.b32.xlu1 %v3846_v34, %s10487_s19  ;;  %4064 = vrot.lane.b32.xlu0 %v3846_v34, %s10488_s27 }
 0x6dc   :  { %4247 = vperm.xlu0 %9893, %v9649_v2  }
 0x71c   :  { %v4036_v54 = vpop.permute.xlu2 %4035 }
 0x724   :  { %v4007_v32 = vpop.permute.xlu2 %4006 }
 0x72c   :  { %v4125_v53 = vpop.permute.xlu2 %4124 }
 0x736   :  { %v10103_v46 = vpop.permute.xlu1 %10102  ;;  %v10098_v26 = vpop.permute.xlu0 %10097 }
 0x737   :  { %v10105_v9 = vunpack.i.h.bf16 %v10103_v46  ;;  %v10104_v11 = vunpack.i.l.bf16 %v10103_v46  ;;  %v10100_v48 = vunpack.i.h.bf16 %v10098_v26  ;;  %v10099_v22 = vunpack.i.l.bf16 %v10098_v26 }
 0x739   :  { %v3888_v30 = vsel %vm3887_vm5, %v10099_v22, %v10100_v48  ;;  %v3952_v60 = vsel %vm737_vm6, %v10104_v11, %v10105_v9 }
 0x73a   :  { %3908 = vmatpush.msra.mxu1 %v3888_v30 }
 0x73b   :  { %9630 = vmatmul.msk.f32.vlgmr.msra.gmra.mxu1 %vm54_vm2, %v9627_v1 }
 0x73c   :  { %3972 = vmatpush.msrb.mxu1 %v3952_v60 }
 0x73e   :  { %4056 = vmatpush.msra.mxu1 %v4036_v54  ;;  %v10113_v58 = vpop.permute.xlu1 %10112  ;;  %v10108_v12 = vpop.permute.xlu0 %10107 }
 0x73f   :  { %v10115_v0 = vunpack.i.h.bf16 %v10113_v58  ;;  %v10114_v40 = vunpack.i.l.bf16 %v10113_v58  ;;  %v10110_v50 = vunpack.i.h.bf16 %v10108_v12  ;;  %v10109_v47 = vunpack.i.l.bf16 %v10108_v12 }
 0x741   :  { %v3858_v38 = vsel %vm3857_vm8, %v10109_v47, %v10110_v50  ;;  %v3920_v51 = vsel %vm3919_vm9, %v10114_v40, %v10115_v0 }
 0x742   :  { %3878 = vmatpush.msra.mxu0 %v3858_v38 }
 0x743   :  { %9629 = vmatmul.msk.f32.vlgmr.msra.gmra.mxu0 %vm54_vm2, %v9628_v25  ;;  %9634 = vmatmul.msk.f32.vlgmr.msrb.gmra.mxu1 %vm54_vm2, %v9633_v21 }
 0x744   :  { %3940 = vmatpush.msrb.mxu0 %v3920_v51  ;;  %4201 = vmatpush.msrb.mxu1 %v12195_v4  ;;  %v9639_v4 = vld [vmem:[%s14090_s10 + $0x108] sm:$0xff] }
 0x746   :  { %4027 = vmatpush.msra.mxu0 %v4007_v32  ;;  %4202 = vmatpush.msrb.mxu1 %v12201_v49  ;;  %v4065_v35 = vpop.permute.xlu0 %4064  ;;  %v4094_v13 = vpop.permute.xlu1 %4093  ;;  %v9637_v49 = vld [vmem:[%s14090_s10 + $0x100] sm:$0xff] }
 0x747   :  { %4085 = vmatpush.msrb.mxu3 %v4065_v35  ;;  %v4000_v52 = vpop.f32.mrf.mxu3 }
 0x748   :  { %4203 = vmatpush.msrb.mxu1 %v12206_v39  ;;  %9642 = vmatmul.msk.f32.vlgmr.msrb.gmra.mxu3 %vm54_vm2, %v9641_v24  ;;  %v9643_v39 = vld [vmem:[%s14090_s10 + $0x118] sm:$0xff] }
 0x74a   :  { %4204 = vmatpush.msrb.mxu1 %v12212_v62 }
 0x74b   :  { %9632 = vmatmul.msk.f32.vlgmr.msrb.gmra.mxu0 %vm54_vm2, %v9631_v61  ;;  %9640 = vmatmul.msk.f32.vlgmr.msra.gmra.mxu1 %vm54_vm2, %v9639_v4  ;;  %v4281_v4 = vld [vmem:[%s14098_s6 + $0x30] sm:$0xff] }
 0x74c   :  { %4114 = vmatpush.msrb.mxu0 %v4094_v13  ;;  %4205 = vmatpush.msrb.mxu1 %v12219_v36  ;;  %v4282_v13 = vld [vmem:[%s14098_s6 + $0x38] sm:$0xff] }
 0x74e   :  { %4206 = vmatpush.msrb.mxu1 %v12224_v10 }
 0x750   :  { %4207 = vmatpush.msrb.mxu1 %v12231_v57 }
 0x752   :  { %4208 = vmatpush.msrb.mxu1 %v12237_v23  ;;  %v4238_v23 = vpop.f32.mrf.mxu2 }
 0x753   :  { %9638 = vmatmul.msk.f32.vlgmr.msra.gmra.mxu0 %vm54_vm2, %v9637_v49  ;;  %v4279_v49 = vld [vmem:[%s14098_s6 + $0x20] sm:$0xff] }
 0x754   :  { %4209 = vmatpush.msrb.mxu1 %v12243_v6 }
 0x756   :  { %4210 = vmatpush.msrb.mxu1 %v12249_v28 }
 0x758   :  { %4211 = vmatpush.msrb.mxu1 %v12255_v59  ;;  %v9648_v59 = vld [vmem:[%s14095_s12 + $0x8] sm:$0xff] }
 0x75a   :  { %4212 = vmatpush.msrb.mxu1 %v12261_v41 }
 0x75b   :  { %9644 = vmatmul.msk.f32.vlgmr.msrb.gmra.mxu0 %vm54_vm2, %v9643_v39  ;;  %v4280_v39 = vld [vmem:[%s14098_s6 + $0x28] sm:$0xff] }
 0x75c   :  { %4213 = vmatpush.msrb.mxu1 %v12267_v43 }
 0x75e   :  { %4214 = vmatpush.msrb.mxu1 %v12273_v3 }
 0x760   :  { %4215 = vmatpush.msrb.mxu1 %v12279_v19  ;;  %v4292_v19 = vld [vmem:[%s14098_s6 + $0x88] sm:$0xff] }
 0x762   :  { %4216 = vmatpush.msrb.mxu1 %v12287_v45  ;;  %v4289_v45 = vld [vmem:[%s14098_s6 + $0x70] sm:$0xff] }
 0x763   :  { %4217 = vmatmul.f32.vlgmr.msrb.gmra.mxu1 %v12095_v29  ;;  %v4291_v29 = vld [vmem:[%s14098_s6 + $0x80] sm:$0xff] }
 0x764   :  { %4303 = vmatpush.msra.mxu0 %v4291_v29 }
 0x766   :  { %4304 = vmatpush.msra.mxu0 %v4289_v45 }
 0x768   :  { %4305 = vmatpush.msra.mxu0 %v4287_v33 }
 0x76a   :  { %4306 = vmatpush.msra.mxu0 %v4285_v55 }
 0x76c   :  { %4307 = vmatpush.msra.mxu0 %v4283_v7 }
 0x76e   :  { %4308 = vmatpush.msra.mxu0 %v4281_v4 }
 0x770   :  { %4309 = vmatpush.msra.mxu0 %v4279_v49 }
 0x7b8   :  { %v3910_v62 = vpop.f32.mrf.mxu1 }
 0x7c0   :  { %v3974_v36 = vpop.f32.mrf.mxu1  ;;  %v3880_v57 = vpop.f32.mrf.mxu0 }
 0x7c1   :  { %v3911_v43 = vadd.f32 %v3910_v62, %v3880_v57  ;;  %v4277_v62 = vld [vmem:[%s14098_s6 + $0x10] sm:$0xff] }
 0x7c2   :  { %4310 = vmatpush.msra.mxu0 %v4277_v62 }
 0x7c8   :  { %v4058_v10 = vpop.f32.mrf.mxu1  ;;  %v3942_v41 = vpop.f32.mrf.mxu0 }
 0x7c9   :  { %v3945_v3 = vadd.f32 %v3942_v41, %v3911_v43 }
 0x7cb   :  { %v3977_v63 = vadd.f32 %v3974_v36, %v3945_v3  ;;  %v4087_v37 = vpop.f32.mrf.mxu3  ;;  %v4278_v36 = vld [vmem:[%s14098_s6 + $0x18] sm:$0xff] }
 0x7cd   :  { %v4003_v18 = vadd.f32 %v4000_v52, %v3977_v63 }
 0x7d0   :  { %v4029_v16 = vpop.f32.mrf.mxu0 }
 0x7d1   :  { %v4032_v27 = vadd.f32 %v4029_v16, %v4003_v18 }
 0x7d3   :  { %v4061_v56 = vadd.f32 %v4058_v10, %v4032_v27 }
 0x7d5   :  { %v4090_v34 = vadd.f32 %v4087_v37, %v4061_v56  ;;  %v9680_v37 = vld [vmem:[%s14092_s11 + $0x20] sm:$0xff] }
 0x7d8   :  { %v4116_v5 = vpop.f32.mrf.mxu0 }
 0x7d9   :  { %v4119_v8 = vadd.f32 %v4116_v5, %v4090_v34  ;;  %v12477_v5 = vld [vmem:[#allocation2] sm:$0xff] }
 0x7db   :  { %v4127_v2 = vadd.f32 %v4125_v53, %v4119_v8 }
 0x7dd   :  { %v4129_v42 = vmul.f32 0.70710677, %v4127_v2  ;;  %v4128_v52 = vmul.f32 0.5, %v4127_v2 }
 0x7df   :  { %v4130_v46 = vmul.f32 %v4129_v42, %v4129_v42 }
 0x7e0   :  { %v4218_v6 = vpop.f32.mrf.mxu1 }
 0x7e1   :  { %v4239_v28 = vadd.f32 %v4238_v23, %v4218_v6  ;;  %v4131_v26 = vmin.f32 %v4130_v46, 16.0  ;;  %v4275_v23 = vld [vmem:[%s14098_s6] sm:$0xff]  ;;  %v4276_v6 = vld [vmem:[%s14098_s6 + $0x8] sm:$0xff] }
 0x7e2   :  { %4311 = vmatpush.msra.mxu0 %v4275_v23 }
 0x7e3   :  { %4268 = vmatpush.msra.mxu3 %v4239_v28  ;;  %v4143_v9 = vmul.f32 3.8918573e-05, %v4131_v26  ;;  %v4132_v58 = vmul.f32 2.1237322e-06, %v4131_v26 }
 0x7e4   :  { %9650 = vmatmul.msk.f32.vlgmr.msra.gmra.mxu3 %vm54_vm2, %v9648_v59 }
 0x7e5   :  { %4323 = vmatpush.msrb.mxu3 %v4292_v19  ;;  %v4144_v11 = vadd.f32 0.001143296, %v4143_v9  ;;  %v4133_v0 = vadd.f32 0.00028619796, %v4132_v58  ;;  %v9665_v9 = vld [vmem:[%s14090_s10 + $0x140] sm:$0xff] }
 0x7e7   :  { %4324 = vmatpush.msrb.mxu3 %v4290_v20  ;;  %v4145_v48 = vmul.f32 %v4144_v11, %v4131_v26  ;;  %v4134_v50 = vmul.f32 %v4133_v0, %v4131_v26 }
 0x7e9   :  { %4325 = vmatpush.msrb.mxu3 %v4288_v15  ;;  %v4146_v22 = vadd.f32 0.014752088, %v4145_v48  ;;  %v4135_v47 = vadd.f32 0.0036580483, %v4134_v50  ;;  %v4248_v15 = vpop.permute.xlu0 %4247 }
 0x7eb   :  { %4326 = vmatpush.msrb.mxu3 %v4286_v17  ;;  %v4147_v1 = vmul.f32 %v4146_v22, %v4131_v26  ;;  %v4136_v25 = vmul.f32 %v4135_v47, %v4131_v26 }
 0x7ed   :  { %4327 = vmatpush.msrb.mxu3 %v4284_v31  ;;  %v4148_v30 = vadd.f32 0.112945676, %v4147_v1  ;;  %v4137_v38 = vadd.f32 0.05243302, %v4136_v25  ;;  %v9653_v25 = vld [vmem:[%s14090_s10 + $0x120] sm:$0xff] }
 0x7ef   :  { %v4149_v60 = vmul.f32 %v4148_v30, %v4131_v26  ;;  %v4138_v32 = vmul.f32 %v4137_v38, %v4131_v26  ;;  %4328 = vmatpush.msrb.mxu3 %v4282_v13 }
 0x7f1   :  { %v4150_v54 = vadd.f32 0.4994258, %v4149_v60  ;;  %v4139_v35 = vadd.f32 0.18741608, %v4138_v32  ;;  %4329 = vmatpush.msrb.mxu3 %v4280_v39  ;;  %v9654_v60 = vld [vmem:[%s14090_s10 + $0x128] sm:$0xff]  ;;  %v9662_v39 = vld [vmem:[%s14090_s10 + $0x138] sm:$0xff] }
 0x7f3   :  { %v4151_v12 = vmul.f32 %v4150_v54, %v4131_v26  ;;  %v4140_v10 = vmul.f32 %v4139_v35, %v4131_v26  ;;  %4330 = vmatpush.msrb.mxu3 %v4278_v36 }
 0x7f5   :  { %v4152_v40 = vadd.f32 1.0, %v4151_v12  ;;  %4331 = vmatpush.msrb.mxu3 %v4276_v6  ;;  %v4141_v41 = vadd.f32 1.1283791, %v4140_v10 }
 0x7f7   :  { %10422 = vrcp.f32 %v4152_v40  ;;  %v4164_v28 = vand.u32 2147483648, %v4152_v40  ;;  %vm4158_vm5 = vweird.f32 %v4152_v40  ;;  %v4162_v59 = vand.u32 2147483647, %v4152_v40 }
 0x7f8   :  { %v4142_v19 = vmul.f32 %v4141_v41, %v4129_v42  ;;  %v9659_v42 = vld [vmem:[%s14090_s10 + $0x130] sm:$0xff] }
 0x7f9   :  { %v4165_v3 = vor.u32 1.1754944e-38, %v4164_v28  ;;  %vm4163_vm9 = vcmp.eq.f32.partialorder %v4162_v59, 8.507059e+37 }
 0x7fd   :  { %v10423_v21 = vpop.eup %10422 }
 0x7fe   :  { %v4154_v51 = vmul.f32 %v10423_v21, %v4152_v40  ;;  %vm4159_vm10 = vweird.f32 %v10423_v21 }
 0x7ff   :  { %vm4160_vm8 = vmor %vm4158_vm5, %vm4159_vm10 }
 0x800   :  { %v4155_v24 = vsub.f32 1.0, %v4154_v51 }
 0x802   :  { %v4156_v61 = vmul.f32 %v10423_v21, %v4155_v24 }
 0x804   :  { %v4157_v57 = vadd.f32 %v10423_v21, %v4156_v61 }
 0x806   :  { %v4161_v43 = vsel %vm4160_vm8, %v10423_v21, %v4157_v57 }
 0x807   :  { %v4166_v29 = vsel %vm4163_vm9, %v4165_v3, %v4161_v43  ;;  %v9668_v3 = vld [vmem:[%s14090_s10 + $0x148] sm:$0xff] }
 0x808   :  { %v4167_v45 = vmul.f32 %v4166_v29, %v4142_v19 }
 0x80a   :  { %v9646_v63 = vclamps-f32 %v4167_v45, 1.0  ;;  %v9671_v45 = vld [vmem:[%s14090_s10 + $0x150] sm:$0xff] }
 0x80c   :  { %v4170_v20 = vadd.f32 1.0, %v9646_v63  ;;  %v9674_v63 = vld [vmem:[%s14090_s10 + $0x158] sm:$0xff] }
 0x80e   :  { %v4171_v33 = vmul.f32 %v4170_v20, %v4128_v52  ;;  %v9677_v20 = vld [vmem:[%s14090_s10 + $0x160] sm:$0xff] }
 0x810   :  { %v4172_v17 = vmul.f32 %v12324_v14, %v4171_v33 }
 0x867   :  { %v4270_v16 = vpop.f32.mrf.mxu3 }
 0x868   :  { %v4271_v55 = vadd.f32 %v4270_v16, %v4248_v15 }
 0x86a   :  { %v4273_v18 = vmul.f32 %v12324_v14, %v4271_v55 }
 0x86c   :  { %v4274_v7 = vadd.f32 %v4273_v18, %v4172_v17 }
 0x86e   :  { %9651 = vmatmul.msk.f32.vlgmr.msra.gmra.mxu0 %vm2158_vm12, %v4274_v7  ;;  %9652 = vmatmul.msk.f32.vlgmr.msrb.gmra.mxu3 %vm2158_vm12, %v4274_v7 }
 0x8eb   :  { %v12453_v31 = vpop.f32.mrf.mxu0 }
 0x8ec   :  { %v10126_v27 = vpack.i.bf16 %v12453_v31, %v12098_v44 }
 0x8ee   :  { %10127 = vrot.lane.b32.xlu2 %v10126_v27, %s10479_s0  ;;  %10122 = vrot.lane.b32.xlu0 %v10126_v27, %s10477_s21 }
 0x8ef   :  { %10117 = vrot.lane.b32.xlu1 %v10126_v27, %s10478_s22 }
 0x8f1   :  { %v12460_v56 = vpop.f32.mrf.mxu3 }
 0x8f2   :  { %4338 = vst.msk [vmem:[#allocation2 + $0x10] sm:$0xff] %vm2158_vm12, %v12460_v56 }
 0x8f9   :  { %v4341_v14 = vld [vmem:[#allocation2 + $0x10] sm:$0xff] }
 0x8fa   :  { %4353 = vrot.lane.b32.xlu2 %v4341_v14, %s10478_s22  ;;  %4461 = vrot.lane.b32.xlu0 %v4341_v14, %s10479_s0  ;;  %v10136_v44 = vpack.i.bf16 %v4341_v14, %v12453_v31 }
 0x8fb   :  { %4406 = vrot.lane.b32.xlu1 %v4341_v14, %s10477_s21 }
 0x902   :  { %4518 = vrot.lane.b32.xlu2 %v4341_v14, %s10472_s25  ;;  %10137 = vrot.lane.b32.xlu0 %v10136_v44, %s10473_s26 }
 0x903   :  { %10132 = vrot.lane.b32.xlu1 %v10126_v27, %s10472_s25 }
 0x90a   :  { %10147 = vrot.lane.b32.xlu2 %v10136_v44, %s10482_s17  ;;  %10152 = vrot.lane.b32.xlu0 %v10136_v44, %s10481_s16 }
 0x90b   :  { %10142 = vrot.lane.b32.xlu1 %v10136_v44, %s10480_s15 }
 0x912   :  { %4948 = vrot.lane.b32.xlu0 %v12477_v5, %s10478_s22 }
 0x913   :  { %4836 = vperm.xlu1 %10055, %v9680_v37  }
 0x91a   :  { %5056 = vrot.lane.b32.xlu0 %v12477_v5, %s10479_s0 }
 0x948   :  { %v10128_v34 = vpop.permute.xlu2 %10127 }
 0x949   :  { %v10130_v8 = vunpack.i.h.bf16 %v10128_v34  ;;  %v10129_v53 = vunpack.i.l.bf16 %v10128_v34 }
 0x94b   :  { %v4463_v2 = vsel %vm2286_vm15, %v10129_v53, %v10130_v8 }
 0x94c   :  { %4485 = vmatpush.msra.mxu1 %v4463_v2 }
 0x94d   :  { %9660 = vmatmul.msk.f32.vlgmr.msra.gmra.mxu1 %vm54_vm2, %v9659_v42 }
 0x94e   :  { %4589 = vmatpush.msrb.mxu1 %v12453_v31 }
 0x954   :  { %v4354_v46 = vpop.permute.xlu2 %4353 }
 0x955   :  { %9666 = vmatmul.msk.f32.vlgmr.msrb.gmra.mxu1 %vm54_vm2, %v9665_v9 }
 0x95c   :  { %v4519_v0 = vpop.permute.xlu2 %4518 }
 0x960   :  { %v10123_v26 = vpop.permute.xlu0 %10122 }
 0x961   :  { %v10125_v11 = vunpack.i.h.bf16 %v10123_v26  ;;  %v10124_v48 = vunpack.i.l.bf16 %v10123_v26  ;;  %v10118_v22 = vpop.permute.xlu1 %10117 }
 0x962   :  { %v10120_v1 = vunpack.i.h.bf16 %v10118_v22  ;;  %v10119_v30 = vunpack.i.l.bf16 %v10118_v22 }
 0x963   :  { %v4408_v12 = vsel %vm2230_vm14, %v10124_v48, %v10125_v11 }
 0x964   :  { %v4355_v54 = vsel %vm2176_vm13, %v10119_v30, %v10120_v1  ;;  %v4356_v58 = vsel %vm2176_vm13, %v10120_v1, %v4354_v46  ;;  %v10148_v38 = vpop.permute.xlu2 %10147 }
 0x965   :  { %4377 = vmatpush.msrb.mxu2 %v4355_v54  ;;  %4397 = vmatpush.msrb.mxu0 %v4356_v58  ;;  %v10150_v13 = vunpack.i.h.bf16 %v10148_v38  ;;  %v10149_v49 = vunpack.i.l.bf16 %v10148_v38 }
 0x966   :  { %9655 = vmatmul.msk.f32.vlgmr.msrb.gmra.mxu2 %vm54_vm2, %v9654_v60  ;;  %9656 = vmatmul.msk.f32.vlgmr.msrb.gmra.mxu0 %vm54_vm2, %v9654_v60 }
 0x967   :  { %4430 = vmatpush.msra.mxu2 %v4408_v12  ;;  %v4730_v57 = vsel %vm14118_vm0, %v10149_v49, %v10150_v13 }
 0x96c   :  { %v4462_v40 = vpop.permute.xlu0 %4461 }
 0x96d   :  { %v4464_v50 = vsel %vm2286_vm15, %v10130_v8, %v4462_v40  ;;  %v4407_v47 = vpop.permute.xlu1 %4406 }
 0x96e   :  { %v4409_v21 = vsel %vm2230_vm14, %v10125_v11, %v4407_v47  ;;  %4505 = vmatpush.msra.mxu0 %v4464_v50  ;;  %9657 = vmatmul.msk.f32.vlgmr.msra.gmra.mxu2 %vm54_vm2, %v9653_v25 }
 0x96f   :  { %4450 = vmatpush.msra.mxu3 %v4409_v21  ;;  %9661 = vmatmul.msk.f32.vlgmr.msra.gmra.mxu0 %vm54_vm2, %v9659_v42 }
 0x970   :  { %4609 = vmatpush.msrb.mxu0 %v4341_v14  ;;  %9658 = vmatmul.msk.f32.vlgmr.msra.gmra.mxu3 %vm54_vm2, %v9653_v25 }
 0x974   :  { %v10138_v51 = vpop.permute.xlu0 %10137 }
 0x975   :  { %v10140_v32 = vunpack.i.h.bf16 %v10138_v51  ;;  %v10139_v24 = vunpack.i.l.bf16 %v10138_v51  ;;  %v10133_v35 = vpop.permute.xlu1 %10132 }
 0x976   :  { %v10135_v61 = vunpack.i.h.bf16 %v10133_v35  ;;  %v10134_v4 = vunpack.i.l.bf16 %v10133_v35 }
 0x977   :  { %v4622_v10 = vsel %vm1024_vm7, %v10139_v24, %v10140_v32  ;;  %9667 = vmatmul.msk.f32.vlgmr.msrb.gmra.mxu0 %vm54_vm2, %v9665_v9 }
 0x978   :  { %v4520_v62 = vsel %vm737_vm6, %v10134_v4, %v10135_v61  ;;  %v4521_v36 = vsel %vm737_vm6, %v10135_v61, %v4519_v0 }
 0x979   :  { %4542 = vmatpush.msrb.mxu2 %v4520_v62  ;;  %4562 = vmatpush.msrb.mxu3 %v4521_v36 }
 0x97a   :  { %9663 = vmatmul.msk.f32.vlgmr.msrb.gmra.mxu2 %vm54_vm2, %v9662_v39  ;;  %9664 = vmatmul.msk.f32.vlgmr.msrb.gmra.mxu3 %vm54_vm2, %v9662_v39 }
 0x97b   :  { %4643 = vmatpush.msra.mxu2 %v4622_v10  ;;  %4663 = vmatpush.msra.mxu3 %v10140_v32 }
 0x97c   :  { %v10153_v23 = vpop.permute.xlu0 %10152 }
 0x97d   :  { %4751 = vmatpush.msrb.mxu2 %v4730_v57  ;;  %4771 = vmatpush.msrb.mxu3 %v10150_v13  ;;  %v10155_v6 = vunpack.i.h.bf16 %v10153_v23  ;;  %v10154_v28 = vunpack.i.l.bf16 %v10153_v23  ;;  %v10143_v59 = vpop.permute.xlu1 %10142 }
 0x97e   :  { %v10145_v41 = vunpack.i.h.bf16 %v10143_v59  ;;  %v10144_v43 = vunpack.i.l.bf16 %v10143_v59 }
 0x97f   :  { %v4784_v19 = vsel %vm14117_vm11, %v10154_v28, %v10155_v6 }
 0x980   :  { %4717 = vmatpush.msra.mxu0 %v10145_v41  ;;  %v4676_v29 = vsel %vm2500_vm1, %v10144_v43, %v10145_v41 }
 0x981   :  { %4697 = vmatpush.msra.mxu1 %v4676_v29  ;;  %9673 = vmatmul.msk.f32.vlgmr.msra.gmra.mxu0 %vm54_vm2, %v9671_v45 }
 0x982   :  { %4825 = vmatpush.msrb.mxu0 %v10155_v6  ;;  %9669 = vmatmul.msk.f32.vlgmr.msra.gmra.mxu2 %vm54_vm2, %v9668_v3 }
 0x983   :  { %9670 = vmatmul.msk.f32.vlgmr.msra.gmra.mxu3 %vm54_vm2, %v9668_v3  ;;  %4805 = vmatpush.msrb.mxu1 %v4784_v19 }
 0x984   :  { %9672 = vmatmul.msk.f32.vlgmr.msra.gmra.mxu1 %vm54_vm2, %v9671_v45 }
 0x985   :  { %v4837_v21 = vpop.permute.xlu1 %4836 }
 0x989   :  { %9679 = vmatmul.msk.f32.vlgmr.msrb.gmra.mxu0 %vm54_vm2, %v9677_v20 }
 0x98a   :  { %9675 = vmatmul.msk.f32.vlgmr.msrb.gmra.mxu2 %vm54_vm2, %v9674_v63 }
 0x98b   :  { %9676 = vmatmul.msk.f32.vlgmr.msrb.gmra.mxu3 %vm54_vm2, %v9674_v63 }
 0x98c   :  { %9678 = vmatmul.msk.f32.vlgmr.msrb.gmra.mxu1 %vm54_vm2, %v9677_v20 }
 0x9ca   :  { %v4487_v15 = vpop.f32.mrf.mxu1 }
 0x9d2   :  { %v4591_v18 = vpop.f32.mrf.mxu1 }
 0x9e3   :  { %v4399_v52 = vpop.f32.mrf.mxu0 }
 0x9e9   :  { %v4379_v33 = vpop.f32.mrf.mxu2 }
 0x9ec   :  { %v4507_v16 = vpop.f32.mrf.mxu0 }
 0x9f1   :  { %v4432_v55 = vpop.f32.mrf.mxu2 }
 0x9f2   :  { %v4433_v14 = vadd.f32 %v4432_v55, %v4379_v33 }
 0x9f3   :  { %v4452_v17 = vpop.f32.mrf.mxu3 }
 0x9f4   :  { %v4611_v7 = vpop.f32.mrf.mxu0  ;;  %v4453_v27 = vadd.f32 %v4452_v17, %v4399_v52  ;;  %v4510_v8 = vadd.f32 %v4487_v15, %v4433_v14 }
 0x9f6   :  { %v4511_v34 = vadd.f32 %v4507_v16, %v4453_v27 }
 0x9fd   :  { %v4544_v44 = vpop.f32.mrf.mxu2  ;;  %v4564_v37 = vpop.f32.mrf.mxu3 }
 0x9fe   :  { %v4567_v53 = vadd.f32 %v4544_v44, %v4510_v8  ;;  %v4568_v2 = vadd.f32 %v4564_v37, %v4511_v34  ;;  %v4719_v46 = vpop.f32.mrf.mxu0 }
 0xa00   :  { %v4614_v11 = vadd.f32 %v4591_v18, %v4567_v53  ;;  %v4615_v48 = vadd.f32 %v4611_v7, %v4568_v2 }
 0xa01   :  { %v4699_v42 = vpop.f32.mrf.mxu1 }
 0xa05   :  { %v4645_v26 = vpop.f32.mrf.mxu2 }
 0xa06   :  { %v4665_v9 = vpop.f32.mrf.mxu3  ;;  %v4668_v22 = vadd.f32 %v4645_v26, %v4614_v11  ;;  %v4827_v58 = vpop.f32.mrf.mxu0 }
 0xa07   :  { %v4669_v1 = vadd.f32 %v4665_v9, %v4615_v48 }
 0xa08   :  { %v4722_v30 = vadd.f32 %v4699_v42, %v4668_v22 }
 0xa09   :  { %v4723_v60 = vadd.f32 %v4719_v46, %v4669_v1  ;;  %v4807_v54 = vpop.f32.mrf.mxu1 }
 0xa0d   :  { %v4753_v12 = vpop.f32.mrf.mxu2 }
 0xa0e   :  { %v4773_v0 = vpop.f32.mrf.mxu3  ;;  %v4776_v40 = vadd.f32 %v4753_v12, %v4722_v30 }
 0xa0f   :  { %v4777_v50 = vadd.f32 %v4773_v0, %v4723_v60 }
 0xa10   :  { %v4830_v47 = vadd.f32 %v4807_v54, %v4776_v40 }
 0xa11   :  { %v4831_v25 = vadd.f32 %v4827_v58, %v4777_v50 }
 0xa12   :  { %v12541_v38 = vadd.f32 %v4837_v21, %v4830_v47 }
 0xa13   :  { %v12543_v51 = vadd.f32 %v4837_v21, %v4831_v25 }
 0xa14   :  { %v12546_v32 = vmul.f32 0.70710677, %v12541_v38 }
 0xa15   :  { %v12549_v24 = vmul.f32 0.70710677, %v12543_v51 }
 0xa16   :  { %v4845_v35 = vmul.f32 %v12546_v32, %v12546_v32 }
 0xa17   :  { %v4885_v61 = vmul.f32 %v12549_v24, %v12549_v24 }
 0xa18   :  { %v4846_v4 = vmin.f32 %v4845_v35, 16.0 }
 0xa19   :  { %v4886_v13 = vmin.f32 %v4885_v61, 16.0 }
 0xa1a   :  { %v4847_v49 = vmul.f32 2.1237322e-06, %v4846_v4  ;;  %v4858_v39 = vmul.f32 3.8918573e-05, %v4846_v4 }
 0xa1b   :  { %v4887_v62 = vmul.f32 2.1237322e-06, %v4886_v13  ;;  %v4898_v36 = vmul.f32 3.8918573e-05, %v4886_v13 }
 0xa1c   :  { %v4848_v10 = vadd.f32 0.00028619796, %v4847_v49  ;;  %v4859_v57 = vadd.f32 0.001143296, %v4858_v39 }
 0xa1d   :  { %v4888_v23 = vadd.f32 0.00028619796, %v4887_v62  ;;  %v4899_v6 = vadd.f32 0.001143296, %v4898_v36 }
 0xa1e   :  { %v4849_v28 = vmul.f32 %v4848_v10, %v4846_v4  ;;  %v4860_v59 = vmul.f32 %v4859_v57, %v4846_v4 }
 0xa1f   :  { %v4889_v41 = vmul.f32 %v4888_v23, %v4886_v13  ;;  %v4900_v43 = vmul.f32 %v4899_v6, %v4886_v13  ;;  %v4336_v6 = vld [vmem:[%s14093_s2] sm:$0x3] }
 0xa20   :  { %v4850_v3 = vadd.f32 0.0036580483, %v4849_v28  ;;  %v4861_v29 = vadd.f32 0.014752088, %v4860_v59 }
 0xa21   :  { %v4901_v19 = vadd.f32 0.014752088, %v4900_v43  ;;  %v4890_v63 = vadd.f32 0.0036580483, %v4889_v41  ;;  %v12561_v43 = vperm.slane %v4336_v6, 1 }
 0xa22   :  { %v4862_v45 = vmul.f32 %v4861_v29, %v4846_v4  ;;  %v4851_v52 = vmul.f32 %v4850_v3, %v4846_v4 }
 0xa23   :  { %v4902_v20 = vmul.f32 %v4901_v19, %v4886_v13  ;;  %v4891_v55 = vmul.f32 %v4890_v63, %v4886_v13  ;;  %v4841_v19 = vmul.f32 0.5, %v12541_v38  ;;  %v12566_v63 = vperm.slane %v4336_v6, 0  ;;  %v9710_v38 = vld [vmem:[%s14092_s11 + $0x28] sm:$0xff] }
 0xa24   :  { %v4863_v33 = vadd.f32 0.112945676, %v4862_v45  ;;  %v4852_v18 = vadd.f32 0.05243302, %v4851_v52 }
 0xa25   :  { %v4903_v15 = vadd.f32 0.112945676, %v4902_v20  ;;  %v4892_v44 = vadd.f32 0.05243302, %v4891_v55 }
 0xa26   :  { %v4864_v16 = vmul.f32 %v4863_v33, %v4846_v4  ;;  %v4853_v34 = vmul.f32 %v4852_v18, %v4846_v4  ;;  %v9714_v33 = vld [vmem:[%s14094_s13 + $0x10] sm:$0xff] }
 0xa27   :  { %v4904_v17 = vmul.f32 %v4903_v15, %v4886_v13  ;;  %v4893_v2 = vmul.f32 %v4892_v44, %v4886_v13  ;;  %v4949_v15 = vpop.permute.xlu0 %4948 }
 0xa28   :  { %v4865_v7 = vadd.f32 0.4994258, %v4864_v16  ;;  %v4854_v42 = vadd.f32 0.18741608, %v4853_v34 }
 0xa29   :  { %v4905_v27 = vadd.f32 0.4994258, %v4904_v17  ;;  %v4894_v46 = vadd.f32 0.18741608, %v4893_v2  ;;  %v9684_v17 = vld [vmem:[%s14090_s10 + $0x170] sm:$0xff] }
 0xa2a   :  { %v4866_v14 = vmul.f32 %v4865_v7, %v4846_v4  ;;  %v4855_v9 = vmul.f32 %v4854_v42, %v4846_v4 }
 0xa2b   :  { %v4906_v37 = vmul.f32 %v4905_v27, %v4886_v13  ;;  %v4895_v22 = vmul.f32 %v4894_v46, %v4886_v13  ;;  %v9692_v46 = vld [vmem:[%s14090_s10 + $0x180] sm:$0xff] }
 0xa2c   :  { %v4867_v8 = vadd.f32 1.0, %v4866_v14  ;;  %v4856_v60 = vadd.f32 1.1283791, %v4855_v9 }
 0xa2d   :  { %v4907_v53 = vadd.f32 1.0, %v4906_v37  ;;  %v4896_v50 = vadd.f32 1.1283791, %v4895_v22  ;;  %v9683_v37 = vld [vmem:[%s14090_s10 + $0x168] sm:$0xff] }
 0xa2e   :  { %10424 = vrcp.f32 %v4867_v8  ;;  %v4879_v54 = vand.u32 2147483648, %v4867_v8  ;;  %v4877_v0 = vand.u32 2147483647, %v4867_v8  ;;  %vm4873_vm8 = vweird.f32 %v4867_v8 }
 0xa2f   :  { %10426 = vrcp.f32 %v4907_v53  ;;  %v4919_v40 = vand.u32 2147483648, %v4907_v53  ;;  %v4917_v25 = vand.u32 2147483647, %v4907_v53  ;;  %vm4913_vm4 = vweird.f32 %v4907_v53 }
 0xa30   :  { %v4880_v35 = vor.u32 1.1754944e-38, %v4879_v54  ;;  %v4857_v4 = vmul.f32 %v4856_v60, %v12546_v32  ;;  %vm4878_vm3 = vcmp.eq.f32.partialorder %v4877_v0, 8.507059e+37  ;;  %v4897_v62 = vmul.f32 %v4896_v50, %v12549_v24 }
 0xa31   :  { %v4920_v49 = vor.u32 1.1754944e-38, %v4919_v40  ;;  %vm4918_vm0 = vcmp.eq.f32.partialorder %v4917_v25, 8.507059e+37  ;;  %v4842_v32 = vmul.f32 0.5, %v12543_v51  ;;  %v9695_v25 = vld [vmem:[%s14090_s10 + $0x188] sm:$0xff] }
 0xa34   :  { %v10425_v26 = vpop.eup %10424 }
 0xa35   :  { %v10427_v11 = vpop.eup %10426  ;;  %v4869_v48 = vmul.f32 %v10425_v26, %v4867_v8  ;;  %vm4874_vm10 = vweird.f32 %v10425_v26  ;;  %v5057_v8 = vpop.permute.xlu0 %5056 }
 0xa36   :  { %v4909_v1 = vmul.f32 %v10427_v11, %v4907_v53  ;;  %vm4914_vm5 = vweird.f32 %v10427_v11  ;;  %vm4875_vm9 = vmor %vm4873_vm8, %vm4874_vm10 }
 0xa37   :  { %v4870_v30 = vsub.f32 1.0, %v4869_v48  ;;  %vm4915_vm11 = vmor %vm4913_vm4, %vm4914_vm5  ;;  %vm14120_vm4 = vcmask 957440  }
 0xa38   :  { %v4910_v58 = vsub.f32 1.0, %v4909_v1 }
 0xa39   :  { %v4871_v12 = vmul.f32 %v10425_v26, %v4870_v30  ;;  %v9689_v30 = vld [vmem:[%s14090_s10 + $0x178] sm:$0xff] }
 0xa3a   :  { %v4911_v47 = vmul.f32 %v10427_v11, %v4910_v58  ;;  %v9698_v58 = vld [vmem:[%s14090_s10 + $0x190] sm:$0xff] }
 0xa3b   :  { %v4872_v21 = vadd.f32 %v10425_v26, %v4871_v12 }
 0xa3c   :  { %v4912_v61 = vadd.f32 %v10427_v11, %v4911_v47 }
 0xa3d   :  { %v4876_v13 = vsel %vm4875_vm9, %v10425_v26, %v4872_v21  ;;  %v9704_v21 = vld [vmem:[%s14090_s10 + $0x1a0] sm:$0xff] }
 0xa3e   :  { %v4881_v39 = vsel %vm4878_vm3, %v4880_v35, %v4876_v13  ;;  %v4916_v36 = vsel %vm4915_vm11, %v10427_v11, %v4912_v61  ;;  %vm14119_vm3 = vcmask 965632  }
 0xa3f   :  { %v4921_v10 = vsel %vm4918_vm0, %v4920_v49, %v4916_v36  ;;  %v4882_v57 = vmul.f32 %v4881_v39, %v4857_v4  ;;  %v9701_v49 = vld [vmem:[%s14090_s10 + $0x198] sm:$0xff]  ;;  %v9713_v36 = vld [vmem:[%s14095_s12 + $0x10] sm:$0xff] }
 0xa40   :  { %v4922_v23 = vmul.f32 %v4921_v10, %v4897_v62  ;;  %v9707_v10 = vld [vmem:[%s14090_s10 + $0x1a8] sm:$0xff] }
 0xa41   :  { %v9681_v59 = vclamps-f32 %v4882_v57, 1.0 }
 0xa42   :  { %v9682_v28 = vclamps-f32 %v4922_v23, 1.0 }
 0xa43   :  { %v4925_v29 = vadd.f32 1.0, %v9681_v59 }
 0xa44   :  { %v4926_v41 = vadd.f32 1.0, %v9682_v28 }
 0xa45   :  { %v4927_v45 = vmul.f32 %v4925_v29, %v4841_v19  ;;  %v5664_v19 = vld [vmem:[%s14099_s7 + $0x270] sm:$0xff] }
 0xa46   :  { %v4928_v3 = vmul.f32 %v4926_v41, %v4842_v32 }
 0xa47   :  { %v4934_v20 = vmul.f32 %v12566_v63, %v4927_v45 }
 0xa48   :  { %v4935_v24 = vmul.f32 %v12561_v43, %v4928_v3 }
 0xa4a   :  { %4937 = vst.msk [vmem:[#allocation2 + $0x10] sm:$0xff] %vm2158_vm12, %v4935_v24  ;;  %v5670_v24 = vld [vmem:[%s14099_s7 + $0x2a0] sm:$0xff] }
 0xa51   :  { %v4940_v52 = vld [vmem:[#allocation2 + $0x10] sm:$0xff] }
 0xa52   :  { %5273 = vrot.lane.b32.xlu0 %v4940_v52, %s10480_s15  ;;  %v10161_v51 = vpack.i.bf16 %v4940_v52, %v4934_v20 }
 0xa54   :  { %10162 = vrot.lane.b32.xlu1 %v10161_v51, %s10479_s0  ;;  %10157 = vrot.lane.b32.xlu2 %v10161_v51, %s10478_s22 }
 0xa5a   :  { %5271 = vrot.lane.b32.xlu0 %v4934_v20, %s10480_s15 }
 0xa5c   :  { %5001 = vrot.lane.b32.xlu1 %v12477_v5, %s10477_s21  ;;  %10167 = vrot.lane.b32.xlu2 %v10161_v51, %s10477_s21 }
 0xa62   :  { %5327 = vrot.lane.b32.xlu0 %v4940_v52, %s10482_s17 }
 0xa64   :  { %5113 = vrot.lane.b32.xlu1 %v12477_v5, %s10472_s25  ;;  %10172 = vrot.lane.b32.xlu2 %v10161_v51, %s10472_s25 }
 0xa6a   :  { %5435 = vperm.xlu0 %9893, %v9710_v38  }
 0xa6c   :  { %5381 = vrot.lane.b32.xlu1 %v4940_v52, %s10481_s16  ;;  %5219 = vrot.lane.b32.xlu2 %v4940_v52, %s10473_s26 }
 0xa74   :  { %5379 = vrot.lane.b32.xlu1 %v4934_v20, %s10481_s16  ;;  %5217 = vrot.lane.b32.xlu2 %v4934_v20, %s10473_s26 }
 0xa7c   :  { %5536 = vperm.xlu1 %10055, %v9714_v33   ;;  %5325 = vrot.lane.b32.xlu2 %v4934_v20, %s10482_s17 }
 0xaae   :  { %v10158_v5 = vpop.permute.xlu2 %10157 }
 0xaaf   :  { %v10160_v16 = vunpack.i.h.bf16 %v10158_v5  ;;  %v10159_v55 = vunpack.i.l.bf16 %v10158_v5  ;;  %v5652_v5 = vld [vmem:[%s14099_s7 + $0x210] sm:$0xff] }
 0xab1   :  { %v4954_v18 = vsel %vm2176_vm13, %v4949_v15, %v10159_v55  ;;  %v4955_v7 = vsel %vm2176_vm13, %v10159_v55, %v10160_v16  ;;  %v5730_v15 = vld [vmem:[%s14099_s7 + $0x480] sm:$0xff]  ;;  %v5724_v55 = vld [vmem:[%s14099_s7 + $0x450] sm:$0xff] }
 0xab2   :  { %4976 = vmatpush.msra.mxu2 %v4954_v18  ;;  %4996 = vmatpush.msra.mxu3 %v4955_v7  ;;  %v5646_v16 = vld [vmem:[%s14099_s7 + $0x1e0] sm:$0xff] }
 0xab3   :  { %9686 = vmatmul.msk.f32.vlgmr.msra.gmra.mxu3 %vm54_vm2, %v9684_v17  ;;  %9685 = vmatmul.msk.f32.vlgmr.msra.gmra.mxu2 %vm54_vm2, %v9684_v17 }
 0xab6   :  { %v10168_v27 = vpop.permute.xlu2 %10167 }
 0xab7   :  { %v10170_v14 = vunpack.i.h.bf16 %v10168_v27  ;;  %v10169_v44 = vunpack.i.l.bf16 %v10168_v27 }
 0xab9   :  { %v5008_v34 = vsel %vm2230_vm14, %v10169_v44, %v10170_v14  ;;  %v5640_v14 = vld [vmem:[%s14099_s7 + $0x1b0] sm:$0xff] }
 0xaba   :  { %5049 = vmatpush.msra.mxu0 %v5008_v34  ;;  %v5634_v34 = vld [vmem:[%s14099_s7 + $0x180] sm:$0xff] }
 0xabb   :  { %9688 = vmatmul.msk.f32.vlgmr.msra.gmra.mxu0 %vm54_vm2, %v9683_v37 }
 0xabe   :  { %v10173_v53 = vpop.permute.xlu2 %10172 }
 0xabf   :  { %v10175_v2 = vunpack.i.h.bf16 %v10173_v53  ;;  %v10174_v42 = vunpack.i.l.bf16 %v10173_v53  ;;  %v5677_v53 = vld [vmem:[%s14099_s7 + $0x2d8] sm:$0xff] }
 0xac1   :  { %v5120_v26 = vsel %vm737_vm6, %v10174_v42, %v10175_v2 }
 0xac2   :  { %5161 = vmatpush.msrb.mxu0 %v5120_v26  ;;  %v5628_v26 = vld [vmem:[%s14099_s7 + $0x150] sm:$0xff] }
 0xac3   :  { %9694 = vmatmul.msk.f32.vlgmr.msrb.gmra.mxu0 %vm54_vm2, %v9692_v46 }
 0xac4   :  { %v5274_v9 = vpop.permute.xlu0 %5273 }
 0xac6   :  { %v10163_v11 = vpop.permute.xlu1 %10162  ;;  %v5220_v48 = vpop.permute.xlu2 %5219 }
 0xac7   :  { %v10165_v22 = vunpack.i.h.bf16 %v10163_v11  ;;  %v10164_v1 = vunpack.i.l.bf16 %v10163_v11  ;;  %5262 = vmatpush.msra.mxu0 %v5220_v48  ;;  %v5671_v11 = vld [vmem:[%s14099_s7 + $0x2a8] sm:$0xff] }
 0xac9   :  { %v5062_v60 = vsel %vm2286_vm15, %v5057_v8, %v10164_v1  ;;  %v5063_v54 = vsel %vm2286_vm15, %v10164_v1, %v10165_v22  ;;  %v5712_v8 = vld [vmem:[%s14099_s7 + $0x3f0] sm:$0xff]  ;;  %v5622_v22 = vld [vmem:[%s14099_s7 + $0x120] sm:$0xff] }
 0xaca   :  { %5084 = vmatpush.msrb.mxu2 %v5062_v60  ;;  %5104 = vmatpush.msrb.mxu3 %v5063_v54  ;;  %v5700_v1 = vld [vmem:[%s14099_s7 + $0x390] sm:$0xff] }
 0xacb   :  { %9691 = vmatmul.msk.f32.vlgmr.msrb.gmra.mxu3 %vm54_vm2, %v9689_v30  ;;  %9690 = vmatmul.msk.f32.vlgmr.msrb.gmra.mxu2 %vm54_vm2, %v9689_v30  ;;  %v5665_v30 = vld [vmem:[%s14099_s7 + $0x278] sm:$0xff] }
 0xacc   :  { %5188 = vmatpush.msra.mxu2 %v4934_v20  ;;  %5208 = vmatpush.msra.mxu3 %v4940_v52  ;;  %v5272_v12 = vpop.permute.xlu0 %5271  ;;  %v5658_v20 = vld [vmem:[%s14099_s7 + $0x240] sm:$0xff] }
 0xacd   :  { %v5275_v0 = vsel %vm2500_vm1, %v5272_v12, %v5274_v9  ;;  %9700 = vmatmul.msk.f32.vlgmr.msra.gmra.mxu0 %vm54_vm2, %v9698_v58  ;;  %v5694_v12 = vld [vmem:[%s14099_s7 + $0x360] sm:$0xff] }
 0xace   :  { %5316 = vmatpush.msrb.mxu3 %v5274_v9  ;;  %v5002_v40 = vpop.permute.xlu1 %5001  ;;  %v5218_v50 = vpop.permute.xlu2 %5217  ;;  %5296 = vmatpush.msrb.mxu2 %v5275_v0  ;;  %v5706_v9 = vld [vmem:[%s14099_s7 + $0x3c0] sm:$0xff]  ;;  %v5659_v0 = vld [vmem:[%s14099_s7 + $0x248] sm:$0xff] }
 0xacf   :  { %v5007_v47 = vsel %vm2230_vm14, %v5002_v40, %v10169_v44  ;;  %v5221_v39 = vsel %vm1024_vm7, %v5218_v50, %v5220_v48  ;;  %v5718_v44 = vld [vmem:[%s14099_s7 + $0x420] sm:$0xff] }
 0xad0   :  { %5029 = vmatpush.msra.mxu1 %v5007_v47  ;;  %v5610_v47 = vld [vmem:[%s14099_s7 + $0xc0] sm:$0xff] }
 0xad1   :  { %9687 = vmatmul.msk.f32.vlgmr.msra.gmra.mxu1 %vm54_vm2, %v9683_v37 }
 0xad3   :  { %9697 = vmatmul.msk.f32.vlgmr.msra.gmra.mxu3 %vm54_vm2, %v9695_v25  ;;  %9696 = vmatmul.msk.f32.vlgmr.msra.gmra.mxu2 %vm54_vm2, %v9695_v25  ;;  %v5688_v25 = vld [vmem:[%s14099_s7 + $0x330] sm:$0xff] }
 0xad4   :  { %v5328_v35 = vpop.permute.xlu0 %5327 }
 0xad5   :  { %5370 = vmatpush.msrb.mxu0 %v5328_v35 }
 0xad6   :  { %v5114_v61 = vpop.permute.xlu1 %5113  ;;  %9706 = vmatmul.msk.f32.vlgmr.msrb.gmra.mxu0 %vm54_vm2, %v9704_v21  ;;  %v5326_v13 = vpop.permute.xlu2 %5325 }
 0xad7   :  { %v5119_v4 = vsel %vm737_vm6, %v5114_v61, %v10174_v42  ;;  %5577 = vmatpush.msra.mxu0 %v12460_v56  ;;  %v5329_v62 = vsel %vm14119_vm3, %v5326_v13, %v5328_v35 }
 0xad8   :  { %5141 = vmatpush.msrb.mxu1 %v5119_v4  ;;  %v5731_v4 = vld [vmem:[%s14099_s7 + $0x488] sm:$0xff] }
 0xad9   :  { %9693 = vmatmul.msk.f32.vlgmr.msrb.gmra.mxu1 %vm54_vm2, %v9692_v46  ;;  %5806 = vmatpush.msrb.mxu0 %v5731_v4  ;;  %v5726_v4 = vld [vmem:[%s14099_s7 + $0x460] sm:$0xff] }
 0xada   :  { %5242 = vmatpush.msra.mxu1 %v5221_v39  ;;  %v5682_v39 = vld [vmem:[%s14099_s7 + $0x300] sm:$0xff] }
 0xadb   :  { %9703 = vmatmul.msk.f32.vlgmr.msrb.gmra.mxu3 %vm54_vm2, %v9701_v49  ;;  %9702 = vmatmul.msk.f32.vlgmr.msrb.gmra.mxu2 %vm54_vm2, %v9701_v49  ;;  %v5604_v49 = vld [vmem:[%s14099_s7 + $0x90] sm:$0xff] }
 0xadc   :  { %5350 = vmatpush.msrb.mxu1 %v5329_v62  ;;  %v5647_v62 = vld [vmem:[%s14099_s7 + $0x1e8] sm:$0xff] }
 0xade   :  { %v5382_v56 = vpop.permute.xlu1 %5381  ;;  %9716 = vmatmul.msk.f32.vlgmr.msra.gmra.mxu0 %vm54_vm2, %v9713_v36 }
 0xadf   :  { %5424 = vmatpush.msra.mxu3 %v5382_v56 }
 0xae1   :  { %9699 = vmatmul.msk.f32.vlgmr.msra.gmra.mxu1 %vm54_vm2, %v9698_v58  ;;  %5766 = vmatpush.msrb.mxu3 %v5730_v15  ;;  %v5616_v58 = vld [vmem:[%s14099_s7 + $0xf0] sm:$0xff] }
 0xae2   :  { %5557 = vmatpush.msra.mxu1 %v12453_v31  ;;  %v5676_v31 = vld [vmem:[%s14099_s7 + $0x2d0] sm:$0xff] }
 0xae3   :  { %9709 = vmatmul.msk.f32.vlgmr.msra.gmra.mxu3 %vm54_vm2, %v9707_v10 }
 0xae4   :  { %5767 = vmatpush.msrb.mxu3 %v5724_v55  ;;  %v5679_v55 = vld [vmem:[%s14099_s7 + $0x2e8] sm:$0xff] }
 0xae6   :  { %v5380_v57 = vpop.permute.xlu1 %5379  ;;  %5768 = vmatpush.msrb.mxu3 %v5718_v44  ;;  %v5673_v44 = vld [vmem:[%s14099_s7 + $0x2b8] sm:$0xff] }
 0xae7   :  { %v5383_v23 = vsel %vm14120_vm4, %v5380_v57, %v5382_v56  ;;  %v5725_v56 = vld [vmem:[%s14099_s7 + $0x458] sm:$0xff]  ;;  %v5436_v57 = vpop.permute.xlu0 %5435 }
 0xae8   :  { %5404 = vmatpush.msra.mxu2 %v5383_v23  ;;  %5769 = vmatpush.msrb.mxu3 %v5712_v8 }
 0xae9   :  { %9705 = vmatmul.msk.f32.vlgmr.msrb.gmra.mxu1 %vm54_vm2, %v9704_v21  ;;  %9708 = vmatmul.msk.f32.vlgmr.msra.gmra.mxu2 %vm54_vm2, %v9707_v10  ;;  %v5653_v21 = vld [vmem:[%s14099_s7 + $0x218] sm:$0xff]  ;;  %v5678_v10 = vld [vmem:[%s14099_s7 + $0x2e0] sm:$0xff] }
 0xaea   :  { %5739 = vmatpush.msrb.mxu2 %v5676_v31  ;;  %5779 = vmatpush.msrb.mxu1 %v5677_v53  ;;  %v5672_v31 = vld [vmem:[%s14099_s7 + $0x2b0] sm:$0xff] }
 0xaeb   :  { %5770 = vmatpush.msrb.mxu3 %v5706_v9  ;;  %5807 = vmatpush.msrb.mxu0 %v5725_v56  ;;  %v5689_v9 = vld [vmem:[%s14099_s7 + $0x338] sm:$0xff]  ;;  %v5624_v56 = vld [vmem:[%s14099_s7 + $0x130] sm:$0xff] }
 0xaec   :  { %5740 = vmatpush.msrb.mxu2 %v5670_v24  ;;  %5780 = vmatpush.msrb.mxu1 %v5671_v11  ;;  %v5713_v24 = vld [vmem:[%s14099_s7 + $0x3f8] sm:$0xff] }
 0xaed   :  { %5771 = vmatpush.msrb.mxu3 %v5700_v1  ;;  %v5661_v1 = vld [vmem:[%s14099_s7 + $0x258] sm:$0xff] }
 0xaee   :  { %5741 = vmatpush.msrb.mxu2 %v5664_v19  ;;  %5781 = vmatpush.msrb.mxu1 %v5665_v30 }
 0xaef   :  { %5772 = vmatpush.msrb.mxu3 %v5694_v12 }
 0xaf0   :  { %5742 = vmatpush.msrb.mxu2 %v5658_v20  ;;  %5782 = vmatpush.msrb.mxu1 %v5659_v0  ;;  %v5666_v20 = vld [vmem:[%s14099_s7 + $0x280] sm:$0xff]  ;;  %v5636_v0 = vld [vmem:[%s14099_s7 + $0x190] sm:$0xff] }
 0xaf1   :  { %9715 = vmatmul.msk.f32.vlgmr.msra.gmra.mxu1 %vm54_vm2, %v9713_v36  ;;  %5773 = vmatpush.msrb.mxu3 %v5688_v25  ;;  %v5599_v25 = vld [vmem:[%s14099_s7 + $0x68] sm:$0xff] }
 0xaf2   :  { %5743 = vmatpush.msrb.mxu2 %v5652_v5  ;;  %5783 = vmatpush.msrb.mxu1 %v5653_v21 }
 0xaf3   :  { %5774 = vmatpush.msrb.mxu3 %v5682_v39  ;;  %v5649_v39 = vld [vmem:[%s14099_s7 + $0x1f8] sm:$0xff] }
 0xaf4   :  { %5744 = vmatpush.msrb.mxu2 %v5646_v16  ;;  %5784 = vmatpush.msrb.mxu1 %v5647_v62  ;;  %v5660_v16 = vld [vmem:[%s14099_s7 + $0x250] sm:$0xff]  ;;  %v5593_v62 = vld [vmem:[%s14099_s7 + $0x38] sm:$0xff] }
 0xaf5   :  { %5819 = vmatpush.msra.mxu3 %v5678_v10  ;;  %v5720_v10 = vld [vmem:[%s14099_s7 + $0x430] sm:$0xff] }
 0xaf6   :  { %5745 = vmatpush.msrb.mxu2 %v5640_v14  ;;  %v5654_v14 = vld [vmem:[%s14099_s7 + $0x220] sm:$0xff] }
 0xaf7   :  { %5820 = vmatpush.msra.mxu3 %v5672_v31  ;;  %v5714_v31 = vld [vmem:[%s14099_s7 + $0x400] sm:$0xff] }
 0xaf8   :  { %5746 = vmatpush.msrb.mxu2 %v5634_v34  ;;  %v5695_v34 = vld [vmem:[%s14099_s7 + $0x368] sm:$0xff] }
 0xaf9   :  { %5821 = vmatpush.msra.mxu3 %v5666_v20  ;;  %v5733_v20 = vld [vmem:[%s14099_s7 + $0x498] sm:$0xff] }
 0xafa   :  { %5747 = vmatpush.msrb.mxu2 %v5628_v26  ;;  %v5611_v26 = vld [vmem:[%s14099_s7 + $0xc8] sm:$0xff] }
 0xafb   :  { %5822 = vmatpush.msra.mxu3 %v5660_v16 }
 0xafc   :  { %5748 = vmatpush.msrb.mxu2 %v5622_v22  ;;  %v5642_v22 = vld [vmem:[%s14099_s7 + $0x1c0] sm:$0xff] }
 0xafd   :  { %5823 = vmatpush.msra.mxu3 %v5654_v14 }
 0xafe   :  { %5749 = vmatpush.msrb.mxu2 %v5616_v58 }
 0xb00   :  { %5750 = vmatpush.msrb.mxu2 %v5610_v47 }
 0xb02   :  { %5751 = vmatpush.msrb.mxu2 %v5604_v49 }
 0xb36   :  { %v4998_v6 = vpop.f32.mrf.mxu3  ;;  %v4978_v59 = vpop.f32.mrf.mxu2 }
 0xb38   :  { %v5051_v28 = vpop.f32.mrf.mxu0 }
 0xb39   :  { %v5052_v45 = vadd.f32 %v5051_v28, %v4998_v6  ;;  %v5598_v6 = vld [vmem:[%s14099_s7 + $0x60] sm:$0xff]  ;;  %v5641_v28 = vld [vmem:[%s14099_s7 + $0x1b8] sm:$0xff] }
 0xb3a   :  { %5752 = vmatpush.msrb.mxu2 %v5598_v6  ;;  %5785 = vmatpush.msrb.mxu1 %v5641_v28  ;;  %v5587_v28 = vld [vmem:[%s14099_s7 + $0x8] sm:$0xff] }
 0xb40   :  { %v5163_v3 = vpop.f32.mrf.mxu0 }
 0xb4a   :  { %v5264_v7 = vpop.f32.mrf.mxu0 }
 0xb4e   :  { %v5031_v32 = vpop.f32.mrf.mxu1  ;;  %v5106_v41 = vpop.f32.mrf.mxu3 }
 0xb4f   :  { %v5086_v29 = vpop.f32.mrf.mxu2  ;;  %v5032_v52 = vadd.f32 %v5031_v32, %v4978_v59  ;;  %v5110_v51 = vadd.f32 %v5106_v41, %v5052_v45  ;;  %v5719_v59 = vld [vmem:[%s14099_s7 + $0x428] sm:$0xff] }
 0xb50   :  { %5808 = vmatpush.msrb.mxu0 %v5719_v59 }
 0xb51   :  { %v5109_v17 = vadd.f32 %v5086_v29, %v5032_v52  ;;  %v5167_v18 = vadd.f32 %v5163_v3, %v5110_v51  ;;  %v5592_v3 = vld [vmem:[%s14099_s7 + $0x30] sm:$0xff]  ;;  %v5635_v29 = vld [vmem:[%s14099_s7 + $0x188] sm:$0xff]  ;;  %v5586_v51 = vld [vmem:[%s14099_s7] sm:$0xff] }
 0xb52   :  { %5753 = vmatpush.msrb.mxu2 %v5592_v3  ;;  %5786 = vmatpush.msrb.mxu1 %v5635_v29 }
 0xb53   :  { %v5372_v40 = vpop.f32.mrf.mxu0  ;;  %5809 = vmatpush.msrb.mxu0 %v5713_v24 }
 0xb54   :  { %5754 = vmatpush.msrb.mxu2 %v5586_v51  ;;  %v5612_v51 = vld [vmem:[%s14099_s7 + $0xd0] sm:$0xff] }
 0xb56   :  { %v5143_v38 = vpop.f32.mrf.mxu1  ;;  %v5210_v33 = vpop.f32.mrf.mxu3  ;;  %5859 = vmatpush.msra.mxu2 %v5679_v55 }
 0xb57   :  { %v5190_v27 = vpop.f32.mrf.mxu2  ;;  %v5214_v37 = vadd.f32 %v5210_v33, %v5167_v18  ;;  %v5166_v2 = vadd.f32 %v5143_v38, %v5109_v17  ;;  %v5629_v38 = vld [vmem:[%s14099_s7 + $0x158] sm:$0xff]  ;;  %v5707_v33 = vld [vmem:[%s14099_s7 + $0x3c8] sm:$0xff] }
 0xb58   :  { %5787 = vmatpush.msrb.mxu1 %v5629_v38  ;;  %5810 = vmatpush.msrb.mxu0 %v5707_v33  ;;  %v5623_v17 = vld [vmem:[%s14099_s7 + $0x128] sm:$0xff]  ;;  %v5701_v18 = vld [vmem:[%s14099_s7 + $0x398] sm:$0xff]  ;;  %v5708_v38 = vld [vmem:[%s14099_s7 + $0x3d0] sm:$0xff] }
 0xb59   :  { %v5268_v48 = vadd.f32 %v5264_v7, %v5214_v37  ;;  %v5213_v60 = vadd.f32 %v5190_v27, %v5166_v2  ;;  %v5617_v37 = vld [vmem:[%s14099_s7 + $0xf8] sm:$0xff]  ;;  %5860 = vmatpush.msra.mxu2 %v5673_v44  ;;  %v5648_v2 = vld [vmem:[%s14099_s7 + $0x1f0] sm:$0xff]  ;;  %v5631_v33 = vld [vmem:[%s14099_s7 + $0x168] sm:$0xff] }
 0xb5a   :  { %5788 = vmatpush.msrb.mxu1 %v5623_v17  ;;  %5811 = vmatpush.msrb.mxu0 %v5701_v18  ;;  %v5606_v17 = vld [vmem:[%s14099_s7 + $0xa0] sm:$0xff] }
 0xb5b   :  { %5824 = vmatpush.msra.mxu3 %v5648_v2  ;;  %v5702_v18 = vld [vmem:[%s14099_s7 + $0x3a0] sm:$0xff]  ;;  %v5696_v2 = vld [vmem:[%s14099_s7 + $0x370] sm:$0xff] }
 0xb5c   :  { %5789 = vmatpush.msrb.mxu1 %v5617_v37  ;;  %5812 = vmatpush.msrb.mxu0 %v5695_v34  ;;  %v5625_v37 = vld [vmem:[%s14099_s7 + $0x138] sm:$0xff] }
 0xb5d   :  { %5825 = vmatpush.msra.mxu3 %v5642_v22  ;;  %v5721_v34 = vld [vmem:[%s14099_s7 + $0x438] sm:$0xff]  ;;  %v5594_v22 = vld [vmem:[%s14099_s7 + $0x40] sm:$0xff] }
 0xb5e   :  { %v5244_v42 = vpop.f32.mrf.mxu1  ;;  %v5318_v46 = vpop.f32.mrf.mxu3  ;;  %5790 = vmatpush.msrb.mxu1 %v5611_v26  ;;  %5813 = vmatpush.msrb.mxu0 %v5689_v9  ;;  %v5715_v9 = vld [vmem:[%s14099_s7 + $0x408] sm:$0xff] }
 0xb5f   :  { %v5322_v54 = vadd.f32 %v5318_v46, %v5268_v48  ;;  %v5298_v50 = vpop.f32.mrf.mxu2  ;;  %v5267_v35 = vadd.f32 %v5244_v42, %v5213_v60  ;;  %v5667_v46 = vld [vmem:[%s14099_s7 + $0x288] sm:$0xff]  ;;  %v5605_v60 = vld [vmem:[%s14099_s7 + $0x98] sm:$0xff]  ;;  %5826 = vmatpush.msra.mxu3 %v5636_v0  ;;  %v5684_v0 = vld [vmem:[%s14099_s7 + $0x310] sm:$0xff] }
 0xb60   :  { %5861 = vmatpush.msra.mxu2 %v5667_v46  ;;  %5791 = vmatpush.msrb.mxu1 %v5605_v60  ;;  %v5619_v46 = vld [vmem:[%s14099_s7 + $0x108] sm:$0xff] }
 0xb61   :  { %v5376_v61 = vadd.f32 %v5372_v40, %v5322_v54  ;;  %v5321_v32 = vadd.f32 %v5298_v50, %v5267_v35  ;;  %v5683_v54 = vld [vmem:[%s14099_s7 + $0x308] sm:$0xff]  ;;  %v5732_v40 = vld [vmem:[%s14099_s7 + $0x490] sm:$0xff] }
 0xb62   :  { %5862 = vmatpush.msra.mxu2 %v5661_v1  ;;  %v5655_v50 = vld [vmem:[%s14099_s7 + $0x228] sm:$0xff]  ;;  %5814 = vmatpush.msrb.mxu0 %v5683_v54  ;;  %v5690_v1 = vld [vmem:[%s14099_s7 + $0x340] sm:$0xff] }
 0xb63   :  { %5792 = vmatpush.msrb.mxu1 %v5599_v25  ;;  %v5703_v25 = vld [vmem:[%s14099_s7 + $0x3a8] sm:$0xff] }
 0xb64   :  { %5846 = vmatpush.msra.mxu0 %v5732_v40  ;;  %5863 = vmatpush.msra.mxu2 %v5655_v50  ;;  %v5607_v40 = vld [vmem:[%s14099_s7 + $0xa8] sm:$0xff] }
 0xb65   :  { %5793 = vmatpush.msrb.mxu1 %v5593_v62 }
 0xb66   :  { %v5426_v13 = vpop.f32.mrf.mxu3  ;;  %v5352_v23 = vpop.f32.mrf.mxu1  ;;  %5847 = vmatpush.msra.mxu0 %v5726_v4  ;;  %5864 = vmatpush.msra.mxu2 %v5649_v39  ;;  %v5691_v39 = vld [vmem:[%s14099_s7 + $0x348] sm:$0xff] }
 0xb67   :  { %v5430_v36 = vadd.f32 %v5426_v13, %v5376_v61  ;;  %v5375_v19 = vadd.f32 %v5352_v23, %v5321_v32  ;;  %v5630_v61 = vld [vmem:[%s14099_s7 + $0x160] sm:$0xff]  ;;  %5794 = vmatpush.msrb.mxu1 %v5587_v28 }
 0xb68   :  { %5827 = vmatpush.msra.mxu3 %v5630_v61  ;;  %5848 = vmatpush.msra.mxu0 %v5720_v10  ;;  %v5618_v32 = vld [vmem:[%s14099_s7 + $0x100] sm:$0xff]  ;;  %v5589_v10 = vld [vmem:[%s14099_s7 + $0x18] sm:$0xff] }
 0xb69   :  { %v12757_v41 = vadd.f32 %v5436_v57, %v5430_v36  ;;  %5886 = vmatpush.msra.mxu1 %v5733_v20 }
 0xb6a   :  { %5828 = vmatpush.msra.mxu3 %v5624_v56  ;;  %5849 = vmatpush.msra.mxu0 %v5714_v31 }
 0xb6b   :  { %v12772_v45 = vmul.f32 0.70710677, %v12757_v41 }
 0xb6c   :  { %v5406_v52 = vpop.f32.mrf.mxu2  ;;  %5829 = vmatpush.msra.mxu3 %v5618_v32  ;;  %5850 = vmatpush.msra.mxu0 %v5708_v38 }
 0xb6d   :  { %v5484_v5 = vmul.f32 %v12772_v45, %v12772_v45  ;;  %v5429_v15 = vadd.f32 %v5406_v52, %v5375_v19  ;;  %v5637_v19 = vld [vmem:[%s14099_s7 + $0x198] sm:$0xff] }
 0xb6e   :  { %5830 = vmatpush.msra.mxu3 %v5612_v51  ;;  %5851 = vmatpush.msra.mxu0 %v5702_v18 }
 0xb6f   :  { %v12800_v7 = vmin.f32 %v5484_v5, 16.0  ;;  %v12802_v27 = vadd.f32 %v5436_v57, %v5429_v15  ;;  %v5643_v57 = vld [vmem:[%s14099_s7 + $0x1c8] sm:$0xff] }
 0xb70   :  { %5865 = vmatpush.msra.mxu2 %v5643_v57  ;;  %v5727_v15 = vld [vmem:[%s14099_s7 + $0x468] sm:$0xff]  ;;  %5831 = vmatpush.msra.mxu3 %v5606_v17  ;;  %v5685_v57 = vld [vmem:[%s14099_s7 + $0x318] sm:$0xff] }
 0xb71   :  { %v5486_v8 = vmul.f32 2.1237322e-06, %v12800_v7  ;;  %v5497_v53 = vmul.f32 3.8918573e-05, %v12800_v7  ;;  %v12822_v42 = vmul.f32 0.70710677, %v12802_v27  ;;  %5887 = vmatpush.msra.mxu1 %v5727_v15  ;;  %5852 = vmatpush.msra.mxu0 %v5696_v2 }
 0xb72   :  { %5866 = vmatpush.msra.mxu2 %v5637_v19 }
 0xb73   :  { %v5487_v11 = vadd.f32 0.00028619796, %v5486_v8  ;;  %v5498_v48 = vadd.f32 0.001143296, %v5497_v53  ;;  %v5444_v30 = vmul.f32 %v12822_v42, %v12822_v42  ;;  %v5600_v53 = vld [vmem:[%s14099_s7 + $0x70] sm:$0xff]  ;;  %5888 = vmatpush.msra.mxu1 %v5721_v34  ;;  %5853 = vmatpush.msra.mxu0 %v5690_v1  ;;  %v5559_v1 = vpop.f32.mrf.mxu1 }
 0xb74   :  { %5867 = vmatpush.msra.mxu2 %v5631_v33  ;;  %5832 = vmatpush.msra.mxu3 %v5600_v53 }
 0xb75   :  { %v5488_v58 = vmul.f32 %v5487_v11, %v12800_v7  ;;  %v5499_v12 = vmul.f32 %v5498_v48, %v12800_v7  ;;  %v12858_v47 = vmin.f32 %v5444_v30, 16.0  ;;  %v5613_v30 = vld [vmem:[%s14099_s7 + $0xd8] sm:$0xff]  ;;  %5889 = vmatpush.msra.mxu1 %v5715_v9  ;;  %5854 = vmatpush.msra.mxu0 %v5684_v0  ;;  %v5728_v0 = vld [vmem:[%s14099_s7 + $0x470] sm:$0xff] }
 0xb76   :  { %5868 = vmatpush.msra.mxu2 %v5625_v37  ;;  %5833 = vmatpush.msra.mxu3 %v5594_v22  ;;  %v5537_v37 = vpop.permute.xlu1 %5536 }
 0xb77   :  { %v5489_v21 = vadd.f32 0.0036580483, %v5488_v58  ;;  %v5500_v35 = vadd.f32 0.014752088, %v5499_v12  ;;  %v5446_v13 = vmul.f32 2.1237322e-06, %v12858_v47 }
 0xb78   :  { %v5457_v49 = vmul.f32 3.8918573e-05, %v12858_v47  ;;  %5869 = vmatpush.msra.mxu2 %v5619_v46  ;;  %v5709_v58 = vld [vmem:[%s14099_s7 + $0x3d8] sm:$0xff]  ;;  %v5588_v12 = vld [vmem:[%s14099_s7 + $0x10] sm:$0xff] }
 0xb79   :  { %v5501_v36 = vmul.f32 %v5500_v35, %v12800_v7  ;;  %v5447_v23 = vadd.f32 0.00028619796, %v5446_v13  ;;  %v5490_v3 = vmul.f32 %v5489_v21, %v12800_v7  ;;  %5890 = vmatpush.msra.mxu1 %v5709_v58  ;;  %5834 = vmatpush.msra.mxu3 %v5588_v12  ;;  %v5601_v35 = vld [vmem:[%s14099_s7 + $0x78] sm:$0xff]  ;;  %v5560_v12 = vadd.f32 %v5559_v1, %v5537_v37 }
 0xb7a   :  { %v5458_v6 = vadd.f32 0.001143296, %v5457_v49  ;;  %5870 = vmatpush.msra.mxu2 %v5613_v30  ;;  %v5697_v13 = vld [vmem:[%s14099_s7 + $0x378] sm:$0xff]  ;;  %v5595_v49 = vld [vmem:[%s14099_s7 + $0x48] sm:$0xff] }
 0xb7b   :  { %v5502_v59 = vadd.f32 0.112945676, %v5501_v36  ;;  %v5448_v29 = vmul.f32 %v5447_v23, %v12858_v47  ;;  %v5491_v14 = vadd.f32 0.05243302, %v5490_v3  ;;  %5891 = vmatpush.msra.mxu1 %v5703_v25 }
 0xb7c   :  { %v5459_v24 = vmul.f32 %v5458_v6, %v12858_v47  ;;  %5871 = vmatpush.msra.mxu2 %v5607_v40 }
 0xb7d   :  { %v5503_v52 = vmul.f32 %v5502_v59, %v12800_v7  ;;  %v5449_v55 = vadd.f32 0.0036580483, %v5448_v29  ;;  %v5492_v60 = vmul.f32 %v5491_v14, %v12800_v7  ;;  %5892 = vmatpush.msra.mxu1 %v5697_v13  ;;  %v5681_v13 = vld [vmem:[%s14099_s7 + $0x2f8] sm:$0xff] }
 0xb7e   :  { %v5460_v5 = vadd.f32 0.014752088, %v5459_v24  ;;  %5872 = vmatpush.msra.mxu2 %v5601_v35 }
 0xb7f   :  { %v5504_v16 = vadd.f32 0.4994258, %v5503_v52  ;;  %v5450_v48 = vmul.f32 %v5449_v55, %v12858_v47  ;;  %v5493_v61 = vadd.f32 0.18741608, %v5492_v60  ;;  %5893 = vmatpush.msra.mxu1 %v5691_v39  ;;  %v5579_v55 = vpop.f32.mrf.mxu0  ;;  %v5710_v39 = vld [vmem:[%s14099_s7 + $0x3e0] sm:$0xff] }
 0xb80   :  { %v5461_v44 = vmul.f32 %v5460_v5, %v12858_v47  ;;  %5873 = vmatpush.msra.mxu2 %v5595_v49  ;;  %v5656_v49 = vld [vmem:[%s14099_s7 + $0x230] sm:$0xff] }
 0xb81   :  { %v5505_v8 = vmul.f32 %v5504_v16, %v12800_v7  ;;  %v5451_v21 = vadd.f32 0.05243302, %v5450_v48  ;;  %v5494_v23 = vmul.f32 %v5493_v61, %v12800_v7  ;;  %5894 = vmatpush.msra.mxu1 %v5685_v57  ;;  %v5662_v61 = vld [vmem:[%s14099_s7 + $0x260] sm:$0xff]  ;;  %v5669_v57 = vld [vmem:[%s14099_s7 + $0x298] sm:$0xff] }
 0xb82   :  { %v5462_v26 = vadd.f32 0.112945676, %v5461_v44  ;;  %5874 = vmatpush.msra.mxu2 %v5589_v10  ;;  %v5704_v10 = vld [vmem:[%s14099_s7 + $0x3b0] sm:$0xff] }
 0xb83   :  { %v12944_v11 = vadd.f32 1.0, %v5505_v8  ;;  %v5452_v56 = vmul.f32 %v5451_v21, %v12858_v47  ;;  %v5495_v31 = vadd.f32 1.1283791, %v5494_v23  ;;  %v5580_v8 = vadd.f32 %v5579_v55, %v5537_v37  ;;  %v5723_v23 = vld [vmem:[%s14099_s7 + $0x448] sm:$0xff]  ;;  %v5614_v55 = vld [vmem:[%s14099_s7 + $0xe0] sm:$0xff] }
 0xb84   :  { %v5463_v54 = vmul.f32 %v5462_v26, %v12858_v47  ;;  %v5582_v21 = vmul.f32 %v5560_v12, %v12566_v63  ;;  %v5602_v37 = vld [vmem:[%s14099_s7 + $0x80] sm:$0xff] }
 0xb85   :  { %10428 = vrcp.f32 %v12944_v11  ;;  %v5518_v59 = vand.u32 2147483648, %v12944_v11  ;;  %v5453_v32 = vadd.f32 0.18741608, %v5452_v56  ;;  %v5516_v29 = vand.u32 2147483647, %v12944_v11  ;;  %v5650_v56 = vld [vmem:[%s14099_s7 + $0x200] sm:$0xff] }
 0xb86   :  { %v5464_v50 = vadd.f32 0.4994258, %v5463_v54  ;;  %vm5512_vm14 = vweird.f32 %v12944_v11  ;;  %v5496_v51 = vmul.f32 %v5495_v31, %v12772_v45  ;;  %v5583_v48 = vmul.f32 %v5580_v8, %v12561_v43  ;;  %v5638_v31 = vld [vmem:[%s14099_s7 + $0x1a0] sm:$0xff]  ;;  %v5596_v8 = vld [vmem:[%s14099_s7 + $0x50] sm:$0xff] }
 0xb87   :  { %v5519_v7 = vor.u32 1.1754944e-38, %v5518_v59  ;;  %v5454_v20 = vmul.f32 %v5453_v32, %v12858_v47  ;;  %vm5517_vm0 = vcmp.eq.f32.partialorder %v5516_v29, 8.507059e+37  ;;  %v5440_v54 = vmul.f32 0.5, %v12802_v27  ;;  %v5668_v27 = vld [vmem:[%s14099_s7 + $0x290] sm:$0xff]  ;;  %v5663_v59 = vld [vmem:[%s14099_s7 + $0x268] sm:$0xff]  ;;  %v5717_v32 = vld [vmem:[%s14099_s7 + $0x418] sm:$0xff] }
 0xb88   :  { %v5465_v4 = vmul.f32 %v5464_v50, %v12858_v47  ;;  %v5441_v47 = vmul.f32 0.5, %v12757_v41  ;;  %v5680_v41 = vld [vmem:[%s14099_s7 + $0x2f0] sm:$0xff]  ;;  %v5722_v50 = vld [vmem:[%s14099_s7 + $0x440] sm:$0xff]  ;;  %v5657_v29 = vld [vmem:[%s14099_s7 + $0x238] sm:$0xff] }
 0xb89   :  { %v5455_v17 = vadd.f32 1.1283791, %v5454_v20  ;;  %v5651_v20 = vld [vmem:[%s14099_s7 + $0x208] sm:$0xff] }
 0xb8a   :  { %v5466_v62 = vadd.f32 1.0, %v5465_v4  ;;  %v5716_v4 = vld [vmem:[%s14099_s7 + $0x410] sm:$0xff] }
 0xb8b   :  { %v10429_v36 = vpop.eup %10428  ;;  %v5456_v2 = vmul.f32 %v5455_v17, %v12822_v42  ;;  %v5734_v42 = vld [vmem:[%s14099_s7 + $0x4a0] sm:$0xff]  ;;  %v5633_v17 = vld [vmem:[%s14099_s7 + $0x178] sm:$0xff] }
 0xb8c   :  { %v5508_v6 = vmul.f32 %v10429_v36, %v12944_v11  ;;  %10430 = vrcp.f32 %v5466_v62  ;;  %vm5513_vm13 = vweird.f32 %v10429_v36  ;;  %v5478_v16 = vand.u32 2147483648, %v5466_v62 }
 0xb8d   :  { %vm5514_vm15 = vmor %vm5512_vm14, %vm5513_vm13  ;;  %v5476_v14 = vand.u32 2147483647, %v5466_v62  ;;  %vm5472_vm11 = vweird.f32 %v5466_v62  ;;  %vm14131_vm13 = vcmask 154624  }
 0xb8e   :  { %v5509_v28 = vsub.f32 1.0, %v5508_v6  ;;  %v5479_v45 = vor.u32 1.1754944e-38, %v5478_v16  ;;  %v5644_v6 = vld [vmem:[%s14099_s7 + $0x1d0] sm:$0xff]  ;;  %v5693_v16 = vld [vmem:[%s14099_s7 + $0x358] sm:$0xff]  ;;  %vm14132_vm14 = vmmov %vm14131_vm13 }
 0xb8f   :  { %vm5477_vm5 = vcmp.eq.f32.partialorder %v5476_v14, 8.507059e+37  ;;  %v5608_v14 = vld [vmem:[%s14099_s7 + $0xb0] sm:$0xff] }
 0xb90   :  { %v5510_v3 = vmul.f32 %v10429_v36, %v5509_v28  ;;  %v5698_v28 = vld [vmem:[%s14099_s7 + $0x380] sm:$0xff] }
 0xb92   :  { %v10431_v24 = vpop.eup %10430  ;;  %v5511_v19 = vadd.f32 %v10429_v36, %v5510_v3  ;;  %v5692_v3 = vld [vmem:[%s14099_s7 + $0x350] sm:$0xff] }
 0xb93   :  { %v5468_v52 = vmul.f32 %v10431_v24, %v5466_v62  ;;  %vm5473_vm1 = vweird.f32 %v10431_v24  ;;  %v5675_v62 = vld [vmem:[%s14099_s7 + $0x2c8] sm:$0xff] }
 0xb94   :  { %v5515_v38 = vsel %vm5514_vm15, %v10429_v36, %v5511_v19  ;;  %vm5474_vm10 = vmor %vm5472_vm11, %vm5473_vm1  ;;  %v5729_v36 = vld [vmem:[%s14099_s7 + $0x478] sm:$0xff]  ;;  %v5632_v19 = vld [vmem:[%s14099_s7 + $0x170] sm:$0xff] }
 0xb95   :  { %v5520_v33 = vsel %vm5517_vm0, %v5519_v7, %v5515_v38  ;;  %v5469_v5 = vsub.f32 1.0, %v5468_v52  ;;  %v5686_v7 = vld [vmem:[%s14099_s7 + $0x320] sm:$0xff]  ;;  %v5705_v52 = vld [vmem:[%s14099_s7 + $0x3b8] sm:$0xff]  ;;  %vm14133_vm15 = vmmov %vm14131_vm13  ;;  %vm14134_vm0 = vcmask 138240  }
 0xb96   :  { %v5521_v15 = vmul.f32 %v5520_v33, %v5496_v51  ;;  %v5626_v51 = vld [vmem:[%s14099_s7 + $0x140] sm:$0xff]  ;;  %v5645_v38 = vld [vmem:[%s14099_s7 + $0x1d8] sm:$0xff]  ;;  %v5699_v33 = vld [vmem:[%s14099_s7 + $0x388] sm:$0xff] }
 0xb97   :  { %v5470_v18 = vmul.f32 %v10431_v24, %v5469_v5  ;;  %v5620_v5 = vld [vmem:[%s14099_s7 + $0x110] sm:$0xff]  ;;  %vm14135_vm1 = vmmov %vm14134_vm0 }
 0xb98   :  { %v9712_v44 = vclamps-f32 %v5521_v15, 1.0  ;;  %v5639_v15 = vld [vmem:[%s14099_s7 + $0x1a8] sm:$0xff]  ;;  %vm14136_vm11 = vmmov %vm14131_vm13 }
 0xb99   :  { %v5471_v34 = vadd.f32 %v10431_v24, %v5470_v18  ;;  %v5687_v18 = vld [vmem:[%s14099_s7 + $0x328] sm:$0xff] }
 0xb9a   :  { %v5525_v53 = vadd.f32 1.0, %v9712_v44  ;;  %v5627_v44 = vld [vmem:[%s14099_s7 + $0x148] sm:$0xff] }
 0xb9b   :  { %v5475_v46 = vsel %vm5474_vm10, %v10431_v24, %v5471_v34  ;;  %v5711_v24 = vld [vmem:[%s14099_s7 + $0x3e8] sm:$0xff]  ;;  %v5621_v34 = vld [vmem:[%s14099_s7 + $0x118] sm:$0xff]  ;;  %vm14137_vm10 = vmmov %vm14136_vm11 }
 0xb9c   :  { %v5527_v26 = vmul.f32 %v5525_v53, %v5441_v47  ;;  %v5480_v9 = vsel %vm5477_vm5, %v5479_v45, %v5475_v46  ;;  %v5615_v47 = vld [vmem:[%s14099_s7 + $0xe8] sm:$0xff]  ;;  %v5590_v53 = vld [vmem:[%s14099_s7 + $0x20] sm:$0xff]  ;;  %v5609_v45 = vld [vmem:[%s14099_s7 + $0xb8] sm:$0xff] }
 0xb9d   :  { %v5481_v11 = vmul.f32 %v5480_v9, %v5456_v2  ;;  %v5603_v2 = vld [vmem:[%s14099_s7 + $0x88] sm:$0xff]  ;;  %v5597_v46 = vld [vmem:[%s14099_s7 + $0x58] sm:$0xff]  ;;  %vm14138_vm5 = vmmov %vm14134_vm0 }
 0xb9e   :  { %v5529_v22 = vmul.f32 %v5527_v26, %v12561_v43  ;;  %v5674_v43 = vld [vmem:[%s14099_s7 + $0x2c0] sm:$0xff]  ;;  %v5591_v26 = vld [vmem:[%s14099_s7 + $0x28] sm:$0xff] }
 0xb9f   :  { %v9711_v30 = vclamps-f32 %v5481_v11, 1.0 }
 0xba0   :  { %v13005_v60 = vadd.f32 %v5583_v48, %v5529_v22 }
 0xba1   :  { %v5524_v58 = vadd.f32 1.0, %v9711_v30 }
 0xba2   :  { %9717 = vmatmul.msk.f32.vlgmr.msrb.gmra.mxu3 %vm2158_vm12, %v13005_v60  ;;  %9718 = vmatmul.msk.f32.vlgmr.msrb.gmra.mxu0 %vm2158_vm12, %v13005_v60 }
 0xba3   :  { %v5526_v40 = vmul.f32 %v5524_v58, %v5440_v54  ;;  %5899 = vmatpush.msrb.mxu0 %v5680_v41  ;;  %5926 = vmatpush.msrb.mxu3 %v5734_v42  ;;  %v10465_v41 = vld [vmem:[#allocation2] sm:$0xff] }
 0xba5   :  { %v5528_v25 = vmul.f32 %v5526_v40, %v12566_v63  ;;  %5900 = vmatpush.msrb.mxu0 %v5674_v43  ;;  %5927 = vmatpush.msrb.mxu3 %v5728_v0  ;;  %v5735_v63 = vld [vmem:[%s14099_s7 + $0x4a8] sm:$0xff]  ;;  %s14121_s7 = smov 19  }
 0xba7   :  { %v13032_v35 = vadd.f32 %v5582_v21, %v5528_v25  ;;  %5901 = vmatpush.msrb.mxu0 %v5668_v27  ;;  %5928 = vmatpush.msrb.mxu3 %v5722_v50 }
 0xba9   :  { %5755 = vmatmul.f32.vlgmr.msrb.gmra.mxu2 %v13032_v35  ;;  %5795 = vmatmul.f32.vlgmr.msrb.gmra.mxu1 %v13032_v35 }
 0xbaa   :  { %5902 = vmatpush.msrb.mxu0 %v5662_v61  ;;  %5929 = vmatpush.msrb.mxu3 %v5716_v4 }
 0xbab   :  { %5939 = vmatpush.msrb.mxu1 %v5681_v13  ;;  %5966 = vmatpush.msrb.mxu2 %v5735_v63 }
 0xbac   :  { %5835 = vmatmul.f32.vlgmr.msra.gmra.mxu3 %v13032_v35  ;;  %9719 = vmatmul.msk.f32.vlgmr.msra.gmra.mxu0 %vm2158_vm12, %v13005_v60 }
 0xbad   :  { %5903 = vmatpush.msrb.mxu0 %v5656_v49  ;;  %5930 = vmatpush.msrb.mxu3 %v5710_v39 }
 0xbae   :  { %5940 = vmatpush.msrb.mxu1 %v5675_v62  ;;  %5967 = vmatpush.msrb.mxu2 %v5729_v36 }
 0xbaf   :  { %5904 = vmatpush.msrb.mxu0 %v5650_v56  ;;  %5931 = vmatpush.msrb.mxu3 %v5704_v10 }
 0xbb0   :  { %5941 = vmatpush.msrb.mxu1 %v5669_v57  ;;  %5968 = vmatpush.msrb.mxu2 %v5723_v23  ;;  %v9786_v57 = vld [vmem:[%s14092_s11 + $0x30] sm:$0xff] }
 0xbb1   :  { %5905 = vmatpush.msrb.mxu0 %v5644_v6  ;;  %5932 = vmatpush.msrb.mxu3 %v5698_v28 }
 0xbb2   :  { %5942 = vmatpush.msrb.mxu1 %v5663_v59  ;;  %5969 = vmatpush.msrb.mxu2 %v5717_v32  ;;  %v9724_v59 = vld [vmem:[%s14090_s10 + $0x1b8] sm:$0xff] }
 0xbb3   :  { %5875 = vmatmul.f32.vlgmr.msra.gmra.mxu2 %v13032_v35  ;;  %9720 = vmatmul.msk.f32.vlgmr.msra.gmra.mxu1 %vm2158_vm12, %v13005_v60 }
 0xbb4   :  { %5906 = vmatpush.msrb.mxu0 %v5638_v31  ;;  %5933 = vmatpush.msrb.mxu3 %v5692_v3 }
 0xbb5   :  { %5943 = vmatpush.msrb.mxu1 %v5657_v29  ;;  %5970 = vmatpush.msrb.mxu2 %v5711_v24 }
 0xbb6   :  { %5907 = vmatpush.msrb.mxu0 %v5632_v19  ;;  %5934 = vmatpush.msrb.mxu3 %v5686_v7 }
 0xbb7   :  { %5944 = vmatpush.msrb.mxu1 %v5651_v20  ;;  %5971 = vmatpush.msrb.mxu2 %v5705_v52 }
 0xbb8   :  { %9721 = vmatmul.msk.f32.vlgmr.msrb.gmra.mxu3 %vm2158_vm12, %v13005_v60  ;;  %5908 = vmatpush.msrb.mxu0 %v5626_v51 }
 0xbb9   :  { %5945 = vmatpush.msrb.mxu1 %v5645_v38  ;;  %5972 = vmatpush.msrb.mxu2 %v5699_v33 }
 0xbba   :  { %5909 = vmatpush.msrb.mxu0 %v5620_v5 }
 0xbbb   :  { %5946 = vmatpush.msrb.mxu1 %v5639_v15  ;;  %5973 = vmatpush.msrb.mxu2 %v5693_v16 }
 0xbbc   :  { %5910 = vmatpush.msrb.mxu0 %v5614_v55 }
 0xbbd   :  { %5947 = vmatpush.msrb.mxu1 %v5633_v17  ;;  %5974 = vmatpush.msrb.mxu2 %v5687_v18 }
 0xbbe   :  { %9722 = vmatmul.msk.f32.vlgmr.msrb.gmra.mxu2 %vm2158_vm12, %v13005_v60  ;;  %5911 = vmatpush.msrb.mxu0 %v5608_v14  ;;  %vm14126_vm12 = vcmask 146432  }
 0xbbf   :  { %5948 = vmatpush.msrb.mxu1 %v5627_v44  ;;  %vm14127_vm8 = vmmov %vm14126_vm12 }
 0xbc0   :  { %5912 = vmatpush.msrb.mxu0 %v5602_v37  ;;  %vm14128_vm9 = vmmov %vm14127_vm8 }
 0xbc1   :  { %5949 = vmatpush.msrb.mxu1 %v5621_v34  ;;  %vm14129_vm3 = vmmov %vm14127_vm8 }
 0xbc2   :  { %5913 = vmatpush.msrb.mxu0 %v5596_v8  ;;  %vm14130_vm4 = vmmov %vm14129_vm3 }
 0xbc3   :  { %5950 = vmatpush.msrb.mxu1 %v5615_v47 }
 0xbc4   :  { %5914 = vmatpush.msrb.mxu0 %v5590_v53 }
 0xbc5   :  { %5951 = vmatpush.msrb.mxu1 %v5609_v45  ;;  %5915 = vmatmul.f32.vlgmr.msrb.gmra.mxu0 %v13032_v35 }
 0xbc7   :  { %5952 = vmatpush.msrb.mxu1 %v5603_v2 }
 0xbc9   :  { %5953 = vmatpush.msrb.mxu1 %v5597_v46 }
 0xbcb   :  { %5954 = vmatpush.msrb.mxu1 %v5591_v26 }
 0xbcc   :  { %5955 = vmatmul.f32.vlgmr.msrb.gmra.mxu1 %v13032_v35 }
 0xc1f   :  { %v5816_v9 = vpop.f32.mrf.mxu0 }
 0xc25   :  { %v5776_v11 = vpop.f32.mrf.mxu3 }
 0xc26   :  { %v5796_v48 = vpop.f32.mrf.mxu1 }
 0xc27   :  { %v13183_v54 = vadd.f32 %v5816_v9, %v5796_v48 }
 0xc29   :  { %v5856_v30 = vpop.f32.mrf.mxu0 }
 0xc2c   :  { %v5756_v22 = vpop.f32.mrf.mxu2 }
 0xc2d   :  { %v13180_v1 = vadd.f32 %v5776_v11, %v5756_v22  ;;  %v9723_v11 = vld [vmem:[%s14090_s10 + $0x1b0] sm:$0xff] }
 0xc2f   :  { %v5836_v60 = vpop.f32.mrf.mxu3  ;;  %v10176_v42 = vpack.i.bf16 %v13180_v1, %v10465_v41  ;;  %v10191_v27 = vpack.i.bf16 %v13183_v54, %v13180_v1 }
 0xc30   :  { %v13185_v58 = vadd.f32 %v5856_v30, %v5836_v60  ;;  %v5896_v43 = vpop.f32.mrf.mxu1 }
 0xc31   :  { %10177 = vrot.lane.b32.xlu2 %v10176_v42, %s10470_s23 }
 0xc32   :  { %v10181_v12 = vpack.i.bf16 %v13185_v58, %v13183_v54  ;;  %v10211_v35 = vpack.i.bf16 %v13185_v58, %v10465_v41 }
 0xc34   :  { %10182 = vrot.lane.b32.xlu0 %v10181_v12, %s10470_s23 }
 0xc36   :  { %v5876_v0 = vpop.f32.mrf.mxu2 }
 0xc37   :  { %v13191_v40 = vadd.f32 %v5896_v43, %v5876_v0 }
 0xc39   :  { %10192 = vrot.lane.b32.xlu2 %v10191_v27, %s14121_s7  ;;  %v10196_v50 = vpack.i.bf16 %v13191_v40, %v13185_v58  ;;  %v10256_v10 = vpack.i.bf16 %v13191_v40, %v13180_v1 }
 0xc3b   :  { %v5936_v25 = vpop.f32.mrf.mxu3 }
 0xc3c   :  { %10197 = vrot.lane.b32.xlu0 %v10196_v50, %s14121_s7 }
 0xc41   :  { %10207 = vrot.lane.b32.xlu2 %v10191_v27, %s14122_s24  ;;  %v5976_v13 = vpop.f32.mrf.mxu2 }
 0xc42   :  { %v5916_v21 = vpop.f32.mrf.mxu0 }
 0xc43   :  { %v13201_v61 = vadd.f32 %v5936_v25, %v5916_v21 }
 0xc44   :  { %10212 = vrot.lane.b32.xlu0 %v10211_v35, %s14122_s24  ;;  %v9737_v35 = vld [vmem:[%s14090_s10 + $0x1c0] sm:$0xff] }
 0xc45   :  { %v10186_v4 = vpack.i.bf16 %v13201_v61, %v13191_v40  ;;  %v10201_v39 = vpack.i.bf16 %v13201_v61, %v10465_v41 }
 0xc47   :  { %10187 = vrot.lane.b32.xlu1 %v10186_v4, %s10470_s23 }
 0xc49   :  { %v5956_v63 = vpop.f32.mrf.mxu1  ;;  %10222 = vrot.lane.b32.xlu2 %v10191_v27, %s10472_s25 }
 0xc4a   :  { %v13208_v49 = vadd.f32 %v5976_v13, %v5956_v63 }
 0xc4c   :  { %5985 = vst.msk [vmem:[#allocation2 + $0x30] sm:$0xff] %vm54_vm2, %v13208_v49  ;;  %10227 = vrot.lane.b32.xlu0 %v10196_v50, %s10472_s25 }
 0xc4f   :  { %10202 = vrot.lane.b32.xlu1 %v10201_v39, %s14121_s7 }
 0xc53   :  { %v13215_v62 = vld [vmem:[#allocation2 + $0x30] sm:$0xff] }
 0xc54   :  { %6476 = vrot.lane.b32.xlu2 %v13215_v62, %s10472_s25  ;;  %10237 = vrot.lane.b32.xlu0 %v10181_v12, %s10473_s26  ;;  %v10246_v36 = vpack.i.bf16 %v13215_v62, %v13180_v1  ;;  %v10261_v56 = vpack.i.bf16 %v13215_v62, %v13201_v61 }
 0xc57   :  { %10217 = vrot.lane.b32.xlu1 %v10186_v4, %s14122_s24 }
 0xc5c   :  { %10247 = vrot.lane.b32.xlu2 %v10246_v36, %s10473_s26  ;;  %10252 = vrot.lane.b32.xlu0 %v10181_v12, %s14123_s28 }
 0xc5f   :  { %10232 = vrot.lane.b32.xlu1 %v10201_v39, %s10472_s25 }
 0xc64   :  { %10262 = vrot.lane.b32.xlu2 %v10261_v56, %s14123_s28  ;;  %10267 = vrot.lane.b32.xlu0 %v10181_v12, %s14124_s20 }
 0xc67   :  { %10242 = vrot.lane.b32.xlu1 %v10186_v4, %s10473_s26 }
 0xc6c   :  { %10277 = vrot.lane.b32.xlu2 %v10246_v36, %s14124_s20  ;;  %10282 = vrot.lane.b32.xlu0 %v10181_v12, %s14125_s4 }
 0xc6f   :  { %10257 = vrot.lane.b32.xlu1 %v10256_v10, %s14123_s28 }
 0xc74   :  { %7222 = vrot.lane.b32.xlu2 %v13201_v61, %s14125_s4  ;;  %7224 = vrot.lane.b32.xlu0 %v13215_v62, %s14125_s4 }
 0xc77   :  { %10272 = vrot.lane.b32.xlu1 %v10186_v4, %s14124_s20 }
 0xc7f   :  { %10287 = vrot.lane.b32.xlu1 %v10256_v10, %s14125_s4 }
 0xc87   :  { %7370 = vperm.xlu1 %10055, %v9786_v57  }
 0xc8b   :  { %v10178_v23 = vpop.permute.xlu2 %10177 }
 0xc8c   :  { %v10180_v6 = vunpack.i.h.bf16 %v10178_v23  ;;  %v10179_v28 = vunpack.i.l.bf16 %v10178_v23 }
 0xc8e   :  { %v6014_v32 = vsel %vm14126_vm12, %v10179_v28, %v10180_v6  ;;  %vm14139_vm12 = vmmov %vm14134_vm0 }
 0xc8f   :  { %6043 = vmatpush.msra.mxu3 %v6014_v32  ;;  %v9744_v32 = vld [vmem:[%s14090_s10 + $0x1c8] sm:$0xff] }
 0xc90   :  { %9725 = vmatmul.msk.f32.vlgmr.msra.gmra.mxu3 %vm54_vm2, %v9724_v59 }
 0xc93   :  { %v10193_v7 = vpop.permute.xlu2 %10192 }
 0xc94   :  { %v10195_v55 = vunpack.i.h.bf16 %v10193_v7  ;;  %v10194_v17 = vunpack.i.l.bf16 %v10193_v7 }
 0xc96   :  { %v6161_v47 = vsel %vm14132_vm14, %v10194_v17, %v10195_v55 }
 0xc9b   :  { %v10208_v52 = vpop.permute.xlu2 %10207 }
 0xc9c   :  { %v10210_v18 = vunpack.i.h.bf16 %v10208_v52  ;;  %v10209_v14 = vunpack.i.l.bf16 %v10208_v52 }
 0xc9e   :  { %v6309_v45 = vsel %vm14134_vm0, %v10209_v14, %v10210_v18 }
 0xca3   :  { %v10223_v41 = vpop.permute.xlu2 %10222 }
 0xca4   :  { %v10225_v25 = vunpack.i.h.bf16 %v10223_v41  ;;  %v10224_v21 = vunpack.i.l.bf16 %v10223_v41 }
 0xca6   :  { %v10183_v31 = vpop.permute.xlu0 %10182  ;;  %v6479_v39 = vsel %vm737_vm6, %v10224_v21, %v10225_v25 }
 0xca7   :  { %v10185_v3 = vunpack.i.h.bf16 %v10183_v31  ;;  %v10184_v29 = vunpack.i.l.bf16 %v10183_v31 }
 0xca9   :  { %v6015_v24 = vsel %vm14127_vm8, %v10180_v6, %v10184_v29  ;;  %v6016_v19 = vsel %vm14128_vm9, %v10184_v29, %v10185_v3  ;;  %vm14140_vm8 = vmmov %vm14134_vm0  ;;  %vm14141_vm9 = vcmask 908288  }
 0xcaa   :  { %6063 = vmatpush.msra.mxu0 %v6015_v24  ;;  %6083 = vmatpush.msrb.mxu3 %v6016_v19 }
 0xcab   :  { %9727 = vmatmul.msk.f32.vlgmr.msrb.gmra.mxu3 %vm54_vm2, %v9724_v59  ;;  %9726 = vmatmul.msk.f32.vlgmr.msra.gmra.mxu0 %vm54_vm2, %v9724_v59 }
 0xcae   :  { %v10198_v20 = vpop.permute.xlu0 %10197  ;;  %v6477_v6 = vpop.permute.xlu2 %6476 }
 0xcaf   :  { %v10200_v33 = vunpack.i.h.bf16 %v10198_v20  ;;  %v10199_v5 = vunpack.i.l.bf16 %v10198_v20  ;;  %v9751_v20 = vld [vmem:[%s14090_s10 + $0x1d0] sm:$0xff] }
 0xcb1   :  { %v6163_v8 = vsel %vm14131_vm13, %v10199_v5, %v10200_v33  ;;  %v6162_v53 = vsel %vm14133_vm15, %v10195_v55, %v10199_v5  ;;  %vm14146_vm15 = vcmask 900096  }
 0xcb2   :  { %vm14147_vm0 = vmmov %vm14146_vm15 }
 0xcb6   :  { %v10213_v51 = vpop.permute.xlu0 %10212  ;;  %v10248_v29 = vpop.permute.xlu2 %10247 }
 0xcb7   :  { %v10214_v44 = vunpack.i.l.bf16 %v10213_v51  ;;  %v10215_v48 = vunpack.i.h.bf16 %v10213_v51 }
 0xcb9   :  { %v10188_v38 = vpop.permute.xlu1 %10187  ;;  %v6308_v2 = vsel %vm14135_vm1, %v10214_v44, %v10209_v14  ;;  %v6310_v42 = vsel %vm14138_vm5, %v10210_v18, %v10215_v48  ;;  %v10250_v14 = vunpack.i.h.bf16 %v10248_v29  ;;  %vm14148_vm1 = vmmov %vm14147_vm0 }
 0xcba   :  { %v10190_v15 = vunpack.i.h.bf16 %v10188_v38  ;;  %v10189_v16 = vunpack.i.l.bf16 %v10188_v38  ;;  %vm14151_vm5 = vmmov %vm14147_vm0 }
 0xcbc   :  { %6143 = vmatpush.msra.mxu3 %v10190_v15  ;;  %v6017_v37 = vsel %vm14129_vm3, %v10185_v3, %v10189_v16  ;;  %v6018_v34 = vsel %vm14130_vm4, %v10189_v16, %v10190_v15  ;;  %vm14142_vm3 = vmmov %vm14141_vm9 }
 0xcbd   :  { %6103 = vmatpush.msra.mxu2 %v6017_v37  ;;  %6123 = vmatpush.msrb.mxu0 %v6018_v34  ;;  %vm14143_vm4 = vmmov %vm14142_vm3 }
 0xcbe   :  { %9730 = vmatmul.msk.f32.vlgmr.msra.gmra.mxu3 %vm54_vm2, %v9724_v59  ;;  %9728 = vmatmul.msk.f32.vlgmr.msra.gmra.mxu2 %vm54_vm2, %v9724_v59  ;;  %v10228_v60 = vpop.permute.xlu0 %10227  ;;  %v10263_v34 = vpop.permute.xlu2 %10262  ;;  %vm14144_vm13 = vmmov %vm14142_vm3 }
 0xcbf   :  { %6249 = vmatpush.msrb.mxu3 %v6163_v8  ;;  %9729 = vmatmul.msk.f32.vlgmr.msrb.gmra.mxu0 %vm54_vm2, %v9724_v59  ;;  %v10230_v43 = vunpack.i.h.bf16 %v10228_v60  ;;  %v10229_v0 = vunpack.i.l.bf16 %v10228_v60  ;;  %vm14145_vm14 = vmmov %vm14142_vm3 }
 0xcc0   :  { %6209 = vmatpush.msrb.mxu2 %v6161_v47  ;;  %6229 = vmatpush.msra.mxu0 %v6162_v53  ;;  %v9758_v53 = vld [vmem:[%s14090_s10 + $0x1d8] sm:$0xff] }
 0xcc1   :  { %6357 = vmatpush.msra.mxu3 %v6309_v45  ;;  %v10203_v46 = vpop.permute.xlu1 %10202  ;;  %v6481_v63 = vsel %vm737_vm6, %v10229_v0, %v10230_v43  ;;  %v6480_v36 = vsel %vm737_vm6, %v10225_v25, %v10229_v0  ;;  %v10265_v45 = vunpack.i.h.bf16 %v10263_v34 }
 0xcc2   :  { %6337 = vmatpush.msrb.mxu0 %v6308_v2  ;;  %v10205_v26 = vunpack.i.h.bf16 %v10203_v46  ;;  %v10204_v9 = vunpack.i.l.bf16 %v10203_v46  ;;  %v10264_v2 = vunpack.i.l.bf16 %v10263_v34 }
 0xcc4   :  { %6289 = vmatpush.msra.mxu2 %v10205_v26  ;;  %v6160_v22 = vsel %vm14136_vm11, %v10204_v9, %v10194_v17  ;;  %v6164_v30 = vsel %vm14137_vm10, %v10200_v33, %v10205_v26  ;;  %vm14149_vm11 = vmmov %vm14147_vm0  ;;  %vm14150_vm10 = vcmask 891904  }
 0xcc5   :  { %6189 = vmatpush.msra.mxu1 %v6160_v22 }
 0xcc6   :  { %9734 = vmatmul.msk.f32.vlgmr.msrb.gmra.mxu3 %vm54_vm2, %v9723_v11  ;;  %9731 = vmatmul.msk.f32.vlgmr.msra.gmra.mxu1 %vm54_vm2, %v9723_v11  ;;  %v10238_v31 = vpop.permute.xlu0 %10237  ;;  %v10278_v22 = vpop.permute.xlu2 %10277 }
 0xcc7   :  { %9732 = vmatmul.msk.f32.vlgmr.msrb.gmra.mxu2 %vm54_vm2, %v9723_v11  ;;  %9733 = vmatmul.msk.f32.vlgmr.msra.gmra.mxu0 %vm54_vm2, %v9723_v11  ;;  %v10239_v7 = vunpack.i.l.bf16 %v10238_v31  ;;  %v10240_v52 = vunpack.i.h.bf16 %v10238_v31 }
 0xcc8   :  { %6269 = vmatpush.msrb.mxu1 %v6164_v30 }
 0xcc9   :  { %v10218_v12 = vpop.permute.xlu1 %10217  ;;  %v6765_v5 = vsel %vm1024_vm7, %v10239_v7, %v10240_v52 }
 0xcca   :  { %6377 = vmatpush.msra.mxu1 %v6310_v42  ;;  %v10220_v27 = vunpack.i.h.bf16 %v10218_v12  ;;  %v10219_v50 = vunpack.i.l.bf16 %v10218_v12  ;;  %v9765_v42 = vld [vmem:[%s14090_s10 + $0x1e0] sm:$0xff] }
 0xccc   :  { %6437 = vmatpush.msrb.mxu3 %v10220_v27  ;;  %v6311_v4 = vsel %vm14139_vm12, %v10215_v48, %v10219_v50  ;;  %v6312_v13 = vsel %vm14140_vm8, %v10219_v50, %v10220_v27  ;;  %v6922_v48 = vsel %vm14145_vm14, %v10264_v2, %v10265_v45  ;;  %vm14152_vm12 = vmmov %vm14150_vm10 }
 0xccd   :  { %6397 = vmatpush.msrb.mxu2 %v6311_v4  ;;  %6417 = vmatpush.msra.mxu0 %v6312_v13  ;;  %vm14153_vm8 = vmmov %vm14150_vm10 }
 0xcce   :  { %9739 = vmatmul.msk.f32.vlgmr.msra.gmra.mxu3 %vm54_vm2, %v9737_v35  ;;  %9735 = vmatmul.msk.f32.vlgmr.msrb.gmra.mxu1 %vm54_vm2, %v9723_v11  ;;  %v10253_v38 = vpop.permute.xlu0 %10252 }
 0xccf   :  { %6568 = vmatpush.msra.mxu3 %v6481_v63  ;;  %9736 = vmatmul.msk.f32.vlgmr.msra.gmra.mxu2 %vm54_vm2, %v9723_v11  ;;  %v10255_v55 = vunpack.i.h.bf16 %v10253_v38  ;;  %v10254_v17 = vunpack.i.l.bf16 %v10253_v38 }
 0xcd0   :  { %9738 = vmatmul.msk.f32.vlgmr.msrb.gmra.mxu0 %vm54_vm2, %v9737_v35  ;;  %6528 = vmatpush.msra.mxu2 %v6479_v39  ;;  %v10280_v39 = vunpack.i.h.bf16 %v10278_v22 }
 0xcd1   :  { %6548 = vmatpush.msrb.mxu0 %v6480_v36  ;;  %v10233_v56 = vpop.permute.xlu1 %10232  ;;  %v6919_v44 = vsel %vm14141_vm9, %v10254_v17, %v10255_v55  ;;  %vm14154_vm9 = vmmov %vm14153_vm8 }
 0xcd2   :  { %v10235_v10 = vunpack.i.h.bf16 %v10233_v56  ;;  %v10234_v57 = vunpack.i.l.bf16 %v10233_v56 }
 0xcd4   :  { %v6478_v23 = vsel %vm737_vm6, %v10234_v57, %v10224_v21  ;;  %v6482_v28 = vsel %vm737_vm6, %v10230_v43, %v10235_v10  ;;  %v6483_v59 = vsel %vm737_vm6, %v10235_v10, %v6477_v6  ;;  %v10279_v43 = vunpack.i.l.bf16 %v10278_v22 }
 0xcd5   :  { %6508 = vmatpush.msrb.mxu1 %v6478_v23  ;;  %v9772_v23 = vld [vmem:[%s14090_s10 + $0x1e8] sm:$0xff] }
 0xcd6   :  { %9743 = vmatmul.msk.f32.vlgmr.msrb.gmra.mxu3 %vm54_vm2, %v9737_v35  ;;  %9740 = vmatmul.msk.f32.vlgmr.msra.gmra.mxu1 %vm54_vm2, %v9737_v35  ;;  %v10268_v46 = vpop.permute.xlu0 %10267 }
 0xcd7   :  { %6659 = vmatpush.msrb.mxu3 %v13183_v54  ;;  %9741 = vmatmul.msk.f32.vlgmr.msrb.gmra.mxu2 %vm54_vm2, %v9737_v35  ;;  %v10269_v41 = vunpack.i.l.bf16 %v10268_v46  ;;  %v10270_v12 = vunpack.i.h.bf16 %v10268_v46 }
 0xcd8   :  { %9742 = vmatmul.msk.f32.vlgmr.msra.gmra.mxu0 %vm54_vm2, %v9737_v35  ;;  %6588 = vmatpush.msra.mxu1 %v6482_v28  ;;  %v7223_v28 = vpop.permute.xlu2 %7222 }
 0xcd9   :  { %6608 = vmatpush.msrb.mxu2 %v6483_v59  ;;  %6639 = vmatpush.msra.mxu0 %v13180_v1  ;;  %v10243_v3 = vpop.permute.xlu1 %10242  ;;  %v7072_v50 = vsel %vm14147_vm0, %v10279_v43, %v10269_v41  ;;  %v7073_v25 = vsel %vm14148_vm1, %v10269_v41, %v10270_v12 }
 0xcda   :  { %v10245_v24 = vunpack.i.h.bf16 %v10243_v3  ;;  %v10244_v19 = vunpack.i.l.bf16 %v10243_v3  ;;  %v9779_v3 = vld [vmem:[%s14090_s10 + $0x1f0] sm:$0xff] }
 0xcdc   :  { %v6767_v51 = vsel %vm1024_vm7, %v10244_v19, %v10245_v24  ;;  %v6766_v15 = vsel %vm1024_vm7, %v10240_v52, %v10244_v19  ;;  %v6768_v37 = vsel %vm1024_vm7, %v10245_v24, %v10250_v14 }
 0xcde   :  { %9748 = vmatmul.msk.f32.vlgmr.msra.gmra.mxu3 %vm54_vm2, %v9744_v32  ;;  %9745 = vmatmul.msk.f32.vlgmr.msrb.gmra.mxu1 %vm54_vm2, %v9744_v32  ;;  %v10283_v27 = vpop.permute.xlu0 %10282 }
 0xcdf   :  { %6739 = vmatpush.msra.mxu3 %v13215_v62  ;;  %9746 = vmatmul.msk.f32.vlgmr.msra.gmra.mxu2 %vm54_vm2, %v9744_v32  ;;  %v10249_v62 = vunpack.i.l.bf16 %v10248_v29  ;;  %v10285_v4 = vunpack.i.h.bf16 %v10283_v27  ;;  %v10284_v13 = vunpack.i.l.bf16 %v10283_v27 }
 0xce0   :  { %9747 = vmatmul.msk.f32.vlgmr.msrb.gmra.mxu0 %vm54_vm2, %v9744_v32  ;;  %6679 = vmatpush.msrb.mxu1 %v13185_v58 }
 0xce1   :  { %6699 = vmatpush.msra.mxu2 %v13191_v40  ;;  %6719 = vmatpush.msrb.mxu0 %v13201_v61  ;;  %v6764_v33 = vsel %vm1024_vm7, %v10249_v62, %v10239_v7  ;;  %v10258_v16 = vpop.permute.xlu1 %10257  ;;  %v7227_v36 = vsel %vm14150_vm10, %v10284_v13, %v10285_v4 }
 0xce2   :  { %v10259_v18 = vunpack.i.l.bf16 %v10258_v16  ;;  %v10260_v47 = vunpack.i.h.bf16 %v10258_v16 }
 0xce4   :  { %v6918_v8 = vsel %vm14142_vm3, %v10259_v18, %v10254_v17  ;;  %v6920_v9 = vsel %vm14143_vm4, %v10255_v55, %v10260_v47  ;;  %v6921_v11 = vsel %vm14144_vm13, %v10260_v47, %v10264_v2  ;;  %vm14155_vm3 = vmmov %vm14153_vm8 }
 0xce6   :  { %9753 = vmatmul.msk.f32.vlgmr.msrb.gmra.mxu3 %vm54_vm2, %v9751_v20  ;;  %9749 = vmatmul.msk.f32.vlgmr.msra.gmra.mxu1 %vm54_vm2, %v9744_v32  ;;  %v7225_v6 = vpop.permute.xlu0 %7224 }
 0xce7   :  { %6853 = vmatpush.msrb.mxu3 %v6767_v51  ;;  %9750 = vmatmul.msk.f32.vlgmr.msrb.gmra.mxu2 %vm54_vm2, %v9744_v32  ;;  %v7230_v32 = vsel %vm14154_vm9, %v7223_v28, %v7225_v6 }
 0xce8   :  { %9752 = vmatmul.msk.f32.vlgmr.msra.gmra.mxu0 %vm54_vm2, %v9751_v20  ;;  %6793 = vmatpush.msra.mxu1 %v6764_v33 }
 0xce9   :  { %6813 = vmatpush.msrb.mxu2 %v6765_v5  ;;  %6833 = vmatpush.msra.mxu0 %v6766_v15  ;;  %v10273_v26 = vpop.permute.xlu1 %10272 }
 0xcea   :  { %v10275_v30 = vunpack.i.h.bf16 %v10273_v26  ;;  %v10274_v60 = vunpack.i.l.bf16 %v10273_v26 }
 0xcec   :  { %v7075_v0 = vsel %vm14146_vm15, %v10274_v60, %v10275_v30  ;;  %v7074_v21 = vsel %vm14149_vm11, %v10270_v12, %v10274_v60  ;;  %v7076_v56 = vsel %vm14151_vm5, %v10275_v30, %v10280_v39 }
 0xcee   :  { %9757 = vmatmul.msk.f32.vlgmr.msra.gmra.mxu3 %vm54_vm2, %v9751_v20  ;;  %9754 = vmatmul.msk.f32.vlgmr.msrb.gmra.mxu1 %vm54_vm2, %v9751_v20 }
 0xcef   :  { %6967 = vmatpush.msra.mxu3 %v6919_v44  ;;  %9755 = vmatmul.msk.f32.vlgmr.msra.gmra.mxu2 %vm54_vm2, %v9751_v20 }
 0xcf0   :  { %9756 = vmatmul.msk.f32.vlgmr.msrb.gmra.mxu0 %vm54_vm2, %v9751_v20  ;;  %6873 = vmatpush.msrb.mxu1 %v6768_v37 }
 0xcf1   :  { %6893 = vmatpush.msra.mxu2 %v10250_v14  ;;  %6947 = vmatpush.msrb.mxu0 %v6918_v8  ;;  %v10288_v35 = vpop.permute.xlu1 %10287 }
 0xcf2   :  { %v10289_v63 = vunpack.i.l.bf16 %v10288_v35  ;;  %v10290_v57 = vunpack.i.h.bf16 %v10288_v35 }
 0xcf4   :  { %v7226_v10 = vsel %vm14152_vm12, %v10289_v63, %v10284_v13  ;;  %v7228_v59 = vsel %vm14153_vm8, %v10285_v4, %v10290_v57  ;;  %v7229_v31 = vsel %vm14155_vm3, %v10290_v57, %v7223_v28 }
 0xcf6   :  { %9762 = vmatmul.msk.f32.vlgmr.msrb.gmra.mxu3 %vm54_vm2, %v9758_v53  ;;  %9759 = vmatmul.msk.f32.vlgmr.msra.gmra.mxu1 %vm54_vm2, %v9758_v53 }
 0xcf7   :  { %7047 = vmatpush.msrb.mxu3 %v10265_v45  ;;  %9760 = vmatmul.msk.f32.vlgmr.msrb.gmra.mxu2 %vm54_vm2, %v9758_v53 }
 0xcf8   :  { %9761 = vmatmul.msk.f32.vlgmr.msra.gmra.mxu0 %vm54_vm2, %v9758_v53  ;;  %6987 = vmatpush.msra.mxu1 %v6920_v9 }
 0xcf9   :  { %7007 = vmatpush.msrb.mxu2 %v6921_v11  ;;  %7027 = vmatpush.msra.mxu0 %v6922_v48 }
 0xcfe   :  { %9767 = vmatmul.msk.f32.vlgmr.msra.gmra.mxu3 %vm54_vm2, %v9765_v42  ;;  %9763 = vmatmul.msk.f32.vlgmr.msrb.gmra.mxu1 %vm54_vm2, %v9758_v53 }
 0xcff   :  { %7161 = vmatpush.msra.mxu3 %v7075_v0  ;;  %9764 = vmatmul.msk.f32.vlgmr.msra.gmra.mxu2 %vm54_vm2, %v9758_v53 }
 0xd00   :  { %9766 = vmatmul.msk.f32.vlgmr.msrb.gmra.mxu0 %vm54_vm2, %v9765_v42  ;;  %7101 = vmatpush.msrb.mxu1 %v7072_v50 }
 0xd01   :  { %7121 = vmatpush.msra.mxu2 %v7073_v25  ;;  %7141 = vmatpush.msrb.mxu0 %v7074_v21 }
 0xd06   :  { %9771 = vmatmul.msk.f32.vlgmr.msrb.gmra.mxu3 %vm54_vm2, %v9765_v42  ;;  %9768 = vmatmul.msk.f32.vlgmr.msra.gmra.mxu1 %vm54_vm2, %v9765_v42 }
 0xd07   :  { %7275 = vmatpush.msrb.mxu3 %v7227_v36  ;;  %9769 = vmatmul.msk.f32.vlgmr.msrb.gmra.mxu2 %vm54_vm2, %v9765_v42 }
 0xd08   :  { %9770 = vmatmul.msk.f32.vlgmr.msra.gmra.mxu0 %vm54_vm2, %v9765_v42  ;;  %7181 = vmatpush.msra.mxu1 %v7076_v56 }
 0xd09   :  { %7201 = vmatpush.msrb.mxu2 %v10280_v39  ;;  %7255 = vmatpush.msra.mxu0 %v7226_v10 }
 0xd0e   :  { %9776 = vmatmul.msk.f32.vlgmr.msra.gmra.mxu3 %vm54_vm2, %v9772_v23  ;;  %9773 = vmatmul.msk.f32.vlgmr.msrb.gmra.mxu1 %vm54_vm2, %v9772_v23 }
 0xd0f   :  { %7355 = vmatpush.msra.mxu3 %v7225_v6  ;;  %9774 = vmatmul.msk.f32.vlgmr.msra.gmra.mxu2 %vm54_vm2, %v9772_v23 }
 0xd10   :  { %9775 = vmatmul.msk.f32.vlgmr.msrb.gmra.mxu0 %vm54_vm2, %v9772_v23  ;;  %7295 = vmatpush.msrb.mxu1 %v7228_v59 }
 0xd11   :  { %7315 = vmatpush.msra.mxu2 %v7229_v31  ;;  %7335 = vmatpush.msrb.mxu0 %v7230_v32 }
 0xd13   :  { %v6045_v29 = vpop.f32.mrf.mxu3 }
 0xd16   :  { %9781 = vmatmul.msk.f32.vlgmr.msrb.gmra.mxu3 %vm54_vm2, %v9779_v3  ;;  %9777 = vmatmul.msk.f32.vlgmr.msra.gmra.mxu1 %vm54_vm2, %v9772_v23 }
 0xd17   :  { %9778 = vmatmul.msk.f32.vlgmr.msrb.gmra.mxu2 %vm54_vm2, %v9772_v23 }
 0xd18   :  { %9780 = vmatmul.msk.f32.vlgmr.msra.gmra.mxu0 %vm54_vm2, %v9779_v3 }
 0xd1e   :  { %9785 = vmatmul.msk.f32.vlgmr.msra.gmra.mxu3 %vm54_vm2, %v9779_v3  ;;  %9782 = vmatmul.msk.f32.vlgmr.msrb.gmra.mxu1 %vm54_vm2, %v9779_v3 }
 0xd1f   :  { %9783 = vmatmul.msk.f32.vlgmr.msra.gmra.mxu2 %vm54_vm2, %v9779_v3 }
 0xd20   :  { %9784 = vmatmul.msk.f32.vlgmr.msrb.gmra.mxu0 %vm54_vm2, %v9779_v3 }
 0xd28   :  { %v6065_v24 = vpop.f32.mrf.mxu0 }
 0xd2e   :  { %v6085_v19 = vpop.f32.mrf.mxu3 }
 0xd3c   :  { %v6125_v7 = vpop.f32.mrf.mxu0 }
 0xd41   :  { %v6145_v20 = vpop.f32.mrf.mxu3  ;;  %v6105_v52 = vpop.f32.mrf.mxu2 }
 0xd43   :  { %v6191_v62 = vpop.f32.mrf.mxu1 }
 0xd44   :  { %v6231_v51 = vpop.f32.mrf.mxu0  ;;  %v6192_v10 = vadd.f32 %v6191_v62, %v6045_v29 }
 0xd45   :  { %v6232_v3 = vadd.f32 %v6231_v51, %v6085_v19 }
 0xd49   :  { %v6251_v38 = vpop.f32.mrf.mxu3 }
 0xd4a   :  { %v6211_v33 = vpop.f32.mrf.mxu2  ;;  %v6252_v11 = vadd.f32 %v6251_v38, %v6105_v52 }
 0xd4b   :  { %v6271_v5 = vpop.f32.mrf.mxu1  ;;  %v6212_v59 = vadd.f32 %v6211_v33, %v6065_v24 }
 0xd4d   :  { %v6339_v15 = vpop.f32.mrf.mxu0 }
 0xd4e   :  { %v6442_v23 = vadd.f32 %v6339_v15, %v6192_v10 }
 0xd51   :  { %v6359_v16 = vpop.f32.mrf.mxu3 }
 0xd52   :  { %v6291_v55 = vpop.f32.mrf.mxu2 }
 0xd53   :  { %v6379_v17 = vpop.f32.mrf.mxu1  ;;  %v6292_v9 = vadd.f32 %v6291_v55, %v6145_v20  ;;  %v6443_v20 = vadd.f32 %v6359_v16, %v6212_v59 }
 0xd54   :  { %v6444_v38 = vadd.f32 %v6379_v17, %v6232_v3  ;;  %v13385_v17 = vpop.permute.xlu1 %7370 }
 0xd55   :  { %v6419_v18 = vpop.f32.mrf.mxu0 }
 0xd59   :  { %v6439_v14 = vpop.f32.mrf.mxu3 }
 0xd5a   :  { %v6399_v44 = vpop.f32.mrf.mxu2  ;;  %v6447_v22 = vadd.f32 %v6439_v14, %v6292_v9 }
 0xd5b   :  { %v6510_v37 = vpop.f32.mrf.mxu1  ;;  %v6445_v30 = vadd.f32 %v6399_v44, %v6252_v11  ;;  %v6272_v44 = vadd.f32 %v6271_v5, %v6125_v7 }
 0xd5c   :  { %v6613_v32 = vadd.f32 %v6510_v37, %v6442_v23 }
 0xd5d   :  { %v6550_v34 = vpop.f32.mrf.mxu0  ;;  %v6446_v9 = vadd.f32 %v6419_v18, %v6272_v44 }
 0xd61   :  { %v6570_v8 = vpop.f32.mrf.mxu3 }
 0xd62   :  { %v6530_v47 = vpop.f32.mrf.mxu2  ;;  %v6616_v41 = vadd.f32 %v6570_v8, %v6445_v30 }
 0xd63   :  { %v6590_v53 = vpop.f32.mrf.mxu1  ;;  %v6614_v55 = vadd.f32 %v6530_v47, %v6443_v20 }
 0xd64   :  { %v6617_v24 = vadd.f32 %v6590_v53, %v6446_v9 }
 0xd65   :  { %v6641_v45 = vpop.f32.mrf.mxu0 }
 0xd66   :  { %v6744_v52 = vadd.f32 %v6641_v45, %v6613_v32 }
 0xd69   :  { %v6661_v2 = vpop.f32.mrf.mxu3 }
 0xd6a   :  { %v6610_v46 = vpop.f32.mrf.mxu2  ;;  %v6745_v29 = vadd.f32 %v6661_v2, %v6614_v55 }
 0xd6b   :  { %v6681_v26 = vpop.f32.mrf.mxu1  ;;  %v6618_v60 = vadd.f32 %v6610_v46, %v6447_v22  ;;  %v6615_v46 = vadd.f32 %v6550_v34, %v6444_v38 }
 0xd6d   :  { %v6721_v48 = vpop.f32.mrf.mxu0  ;;  %v6746_v11 = vadd.f32 %v6681_v26, %v6615_v46 }
 0xd6e   :  { %v6748_v47 = vadd.f32 %v6721_v48, %v6617_v24 }
 0xd71   :  { %v6741_v42 = vpop.f32.mrf.mxu3 }
 0xd72   :  { %v13373_v12 = vadd.f32 %v6741_v42, %v6618_v60  ;;  %v6701_v43 = vpop.f32.mrf.mxu2 }
 0xd73   :  { %v6747_v0 = vadd.f32 %v6701_v43, %v6616_v41  ;;  %v6795_v27 = vpop.f32.mrf.mxu1 }
 0xd74   :  { %v6898_v14 = vadd.f32 %v6795_v27, %v6744_v52 }
 0xd75   :  { %v6835_v50 = vpop.f32.mrf.mxu0 }
 0xd76   :  { %v6900_v19 = vadd.f32 %v6835_v50, %v6746_v11 }
 0xd79   :  { %v6855_v25 = vpop.f32.mrf.mxu3 }
 0xd7a   :  { %v13375_v21 = vadd.f32 %v6855_v25, %v6747_v0  ;;  %v6815_v35 = vpop.f32.mrf.mxu2 }
 0xd7b   :  { %v6875_v4 = vpop.f32.mrf.mxu1  ;;  %v6899_v22 = vadd.f32 %v6815_v35, %v6745_v29 }
 0xd7c   :  { %v6902_v45 = vadd.f32 %v6875_v4, %v6748_v47 }
 0xd7d   :  { %v6949_v13 = vpop.f32.mrf.mxu0 }
 0xd7e   :  { %v7052_v62 = vadd.f32 %v6949_v13, %v6898_v14 }
 0xd81   :  { %v6969_v63 = vpop.f32.mrf.mxu3 }
 0xd82   :  { %v13377_v39 = vpop.f32.mrf.mxu2  ;;  %v7053_v51 = vadd.f32 %v6969_v63, %v6899_v22 }
 0xd83   :  { %v6989_v36 = vpop.f32.mrf.mxu1 }
 0xd84   :  { %v7054_v7 = vadd.f32 %v6989_v36, %v6900_v19 }
 0xd85   :  { %v7029_v56 = vpop.f32.mrf.mxu0 }
 0xd86   :  { %v7056_v60 = vadd.f32 %v7029_v56, %v6902_v45 }
 0xd89   :  { %v13379_v57 = vpop.f32.mrf.mxu3 }
 0xd8a   :  { %v13381_v6 = vpop.f32.mrf.mxu2 }
 0xd8b   :  { %v7103_v28 = vpop.f32.mrf.mxu1 }
 0xd8c   :  { %v7206_v30 = vadd.f32 %v7103_v28, %v7052_v62 }
 0xd8d   :  { %v7143_v31 = vpop.f32.mrf.mxu0 }
 0xd8e   :  { %v7208_v2 = vadd.f32 %v7143_v31, %v7054_v7 }
 0xd91   :  { %v13383_v8 = vpop.f32.mrf.mxu3 }
 0xd92   :  { %v7123_v33 = vpop.f32.mrf.mxu2 }
 0xd93   :  { %v7183_v15 = vpop.f32.mrf.mxu1  ;;  %v7207_v5 = vadd.f32 %v7123_v33, %v7053_v51 }
 0xd94   :  { %v7210_v0 = vadd.f32 %v7183_v15, %v7056_v60 }
 0xd95   :  { %v7257_v37 = vpop.f32.mrf.mxu0 }
 0xd96   :  { %v7360_v16 = vadd.f32 %v7257_v37, %v7206_v30 }
 0xd98   :  { %v13388_v34 = vadd.f32 %v13385_v17, %v7360_v16 }
 0xd99   :  { %v7277_v18 = vpop.f32.mrf.mxu3 }
 0xd9a   :  { %v13391_v26 = vmul.f32 0.70710677, %v13388_v34  ;;  %v7361_v53 = vadd.f32 %v7277_v18, %v7207_v5  ;;  %v7203_v24 = vpop.f32.mrf.mxu2  ;;  %v6903_v5 = vadd.f32 %v13377_v39, %v13373_v12  ;;  %v7055_v12 = vadd.f32 %v13381_v6, %v13375_v21 }
 0xd9b   :  { %v7297_v41 = vpop.f32.mrf.mxu1 }
 0xd9c   :  { %v7391_v42 = vmul.f32 %v13391_v26, %v13391_v26  ;;  %v13396_v43 = vadd.f32 %v13385_v17, %v7361_v53  ;;  %v7362_v48 = vadd.f32 %v7297_v41, %v7208_v2 }
 0xd9d   :  { %v7337_v27 = vpop.f32.mrf.mxu0 }
 0xd9e   :  { %v13398_v50 = vmin.f32 %v7391_v42, 16.0  ;;  %v13401_v25 = vmul.f32 0.70710677, %v13396_v43  ;;  %v13404_v35 = vadd.f32 %v13385_v17, %v7362_v48  ;;  %v7364_v4 = vadd.f32 %v7337_v27, %v7210_v0 }
 0xd9f   :  { %v7057_v48 = vadd.f32 %v13379_v57, %v6903_v5 }
 0xda0   :  { %v7393_v13 = vmul.f32 2.1237322e-06, %v13398_v50  ;;  %v7404_v63 = vmul.f32 3.8918573e-05, %v13398_v50  ;;  %v7431_v36 = vmul.f32 %v13401_v25, %v13401_v25  ;;  %v13411_v56 = vmul.f32 0.70710677, %v13404_v35 }
 0xda1   :  { %v13414_v10 = vadd.f32 %v13385_v17, %v7364_v4 }
 0xda2   :  { %v7394_v23 = vadd.f32 0.00028619796, %v7393_v13  ;;  %v7405_v28 = vadd.f32 0.001143296, %v7404_v63  ;;  %v13416_v59 = vmin.f32 %v7431_v36, 16.0  ;;  %v7471_v32 = vmul.f32 %v13411_v56, %v13411_v56 }
 0xda3   :  { %v13421_v31 = vmul.f32 0.70710677, %v13414_v10 }
 0xda4   :  { %v7395_v3 = vmul.f32 %v7394_v23, %v13398_v50  ;;  %v7406_v20 = vmul.f32 %v7405_v28, %v13398_v50  ;;  %v7433_v52 = vmul.f32 2.1237322e-06, %v13416_v59  ;;  %v7444_v38 = vmul.f32 3.8918573e-05, %v13416_v59 }
 0xda5   :  { %v13427_v55 = vmin.f32 %v7471_v32, 16.0  ;;  %v7551_v14 = vmul.f32 %v13421_v31, %v13421_v31 }
 0xda6   :  { %v7396_v44 = vadd.f32 0.0036580483, %v7395_v3  ;;  %v7407_v46 = vadd.f32 0.014752088, %v7406_v20  ;;  %v7434_v29 = vadd.f32 0.00028619796, %v7433_v52  ;;  %v7357_v3 = vpop.f32.mrf.mxu3  ;;  %v7209_v20 = vadd.f32 %v13383_v8, %v7055_v12 }
 0xda7   :  { %v7445_v62 = vadd.f32 0.001143296, %v7444_v38  ;;  %v7473_v9 = vmul.f32 2.1237322e-06, %v13427_v55  ;;  %v7484_v15 = vmul.f32 3.8918573e-05, %v13427_v55  ;;  %v7211_v38 = vadd.f32 %v7203_v24, %v7057_v48 }
 0xda8   :  { %v7397_v11 = vmul.f32 %v7396_v44, %v13398_v50  ;;  %v7408_v22 = vmul.f32 %v7407_v46, %v13398_v50  ;;  %v7435_v30 = vmul.f32 %v7434_v29, %v13416_v59  ;;  %v13436_v33 = vmin.f32 %v7551_v14, 16.0 }
 0xda9   :  { %v7446_v37 = vmul.f32 %v7445_v62, %v13416_v59  ;;  %v7474_v19 = vadd.f32 0.00028619796, %v7473_v9  ;;  %v7485_v51 = vadd.f32 0.001143296, %v7484_v15  ;;  %v7365_v9 = vadd.f32 %v7357_v3, %v7211_v38  ;;  %v7317_v15 = vpop.f32.mrf.mxu2 }
 0xdaa   :  { %v7398_v16 = vadd.f32 0.05243302, %v7397_v11  ;;  %v7409_v47 = vadd.f32 0.112945676, %v7408_v22  ;;  %v7436_v7 = vadd.f32 0.0036580483, %v7435_v30 }
 0xdab   :  { %v7447_v45 = vadd.f32 0.014752088, %v7446_v37  ;;  %v7475_v18 = vmul.f32 %v7474_v19, %v13427_v55  ;;  %v7486_v2 = vmul.f32 %v7485_v51, %v13427_v55  ;;  %v7553_v42 = vmul.f32 2.1237322e-06, %v13436_v33 }
 0xdac   :  { %v7399_v53 = vmul.f32 %v7398_v16, %v13398_v50  ;;  %v7410_v60 = vmul.f32 %v7409_v47, %v13398_v50  ;;  %v7437_v41 = vmul.f32 %v7436_v7, %v13416_v59  ;;  %v7564_v24 = vmul.f32 3.8918573e-05, %v13436_v33  ;;  %v13473_v7 = vld [vmem:[%s14089_s1] sm:$0x3f] }
 0xdad   :  { %v7448_v0 = vmul.f32 %v7447_v45, %v13416_v59  ;;  %v7476_v27 = vadd.f32 0.0036580483, %v7475_v18  ;;  %v7487_v4 = vadd.f32 0.014752088, %v7486_v2  ;;  %v7554_v32 = vadd.f32 0.00028619796, %v7553_v42 }
 0xdae   :  { %v7400_v39 = vadd.f32 0.18741608, %v7399_v53  ;;  %v7411_v13 = vadd.f32 0.4994258, %v7410_v60  ;;  %v7438_v63 = vadd.f32 0.05243302, %v7437_v41  ;;  %v7363_v51 = vadd.f32 %v7317_v15, %v7209_v20 }
 0xdaf   :  { %v7449_v36 = vadd.f32 0.112945676, %v7448_v0  ;;  %v7477_v23 = vmul.f32 %v7476_v27, %v13427_v55  ;;  %v7488_v28 = vmul.f32 %v7487_v4, %v13427_v55  ;;  %v7555_v44 = vmul.f32 %v7554_v32, %v13436_v33 }
 0xdb0   :  { %v7412_v57 = vmul.f32 %v7411_v13, %v13398_v50  ;;  %v7439_v52 = vmul.f32 %v7438_v63, %v13416_v59  ;;  %v7401_v46 = vmul.f32 %v7400_v39, %v13398_v50  ;;  %v13468_v47 = vadd.f32 %v13385_v17, %v7365_v9 }
 0xdb1   :  { %v7450_v14 = vmul.f32 %v7449_v36, %v13416_v59  ;;  %v7478_v21 = vadd.f32 0.05243302, %v7477_v23  ;;  %v7489_v6 = vadd.f32 0.112945676, %v7488_v28  ;;  %v7556_v30 = vadd.f32 0.0036580483, %v7555_v44 }
 0xdb2   :  { %v13459_v29 = vadd.f32 1.0, %v7412_v57  ;;  %v7440_v62 = vadd.f32 0.18741608, %v7439_v52  ;;  %v7402_v5 = vadd.f32 1.1283791, %v7401_v46  ;;  %v13479_v2 = vmul.f32 0.5, %v13388_v34 }
 0xdb3   :  { %v7451_v11 = vadd.f32 0.4994258, %v7450_v14  ;;  %v7479_v8 = vmul.f32 %v7478_v21, %v13427_v55  ;;  %v7490_v22 = vmul.f32 %v7489_v6, %v13427_v55  ;;  %v7557_v18 = vmul.f32 %v7556_v30, %v13436_v33 }
 0xdb4   :  { %10432 = vrcp.f32 %v13459_v29  ;;  %v7441_v50 = vmul.f32 %v7440_v62, %v13416_v59  ;;  %v7423_v53 = vand.u32 2147483647, %v13459_v29  ;;  %v7565_v60 = vadd.f32 0.001143296, %v7564_v24 }
 0xdb5   :  { %v7452_v37 = vmul.f32 %v7451_v11, %v13416_v59  ;;  %v7480_v19 = vadd.f32 0.18741608, %v7479_v8  ;;  %v7491_v16 = vadd.f32 0.4994258, %v7490_v22  ;;  %v7425_v41 = vand.u32 2147483648, %v13459_v29 }
 0xdb6   :  { %v13487_v48 = vadd.f32 %v13385_v17, %v7363_v51  ;;  %v13490_v27 = vperm.slane %v13473_v7, 0  ;;  %v7442_v34 = vadd.f32 1.1283791, %v7441_v50  ;;  %v13495_v12 = vmul.f32 0.70710677, %v13468_v47 }
 0xdb7   :  { %v13475_v45 = vadd.f32 1.0, %v7452_v37  ;;  %v7492_v59 = vmul.f32 %v7491_v16, %v13427_v55  ;;  %v7481_v42 = vmul.f32 %v7480_v19, %v13427_v55  ;;  %v7403_v39 = vmul.f32 %v7402_v5, %v13391_v26 }
 0xdb8   :  { %v7558_v63 = vadd.f32 0.05243302, %v7557_v18  ;;  %v7566_v55 = vmul.f32 %v7565_v60, %v13436_v33  ;;  %vm7419_vm4 = vweird.f32 %v13459_v29  ;;  %vm13501_vm13 = vcmp.eq.f32.partialorder %v7423_v53, 8.507059e+37 }
 0xdb9   :  { %10434 = vrcp.f32 %v13475_v45  ;;  %v13492_v4 = vadd.f32 1.0, %v7492_v59  ;;  %v7463_v36 = vand.u32 2147483647, %v13475_v45  ;;  %v7426_v28 = vor.u32 1.1754944e-38, %v7425_v41 }
 0xdba   :  { %v10433_v0 = vpop.eup %10432  ;;  %v7465_v32 = vand.u32 2147483648, %v13475_v45  ;;  %v7482_v26 = vadd.f32 1.1283791, %v7481_v42  ;;  %v7443_v3 = vmul.f32 %v7442_v34, %v13401_v25  ;;  %v7567_v20 = vadd.f32 0.014752088, %v7566_v55 }
 0xdbb   :  { %v7415_v13 = vmul.f32 %v10433_v0, %v13459_v29  ;;  %10436 = vrcp.f32 %v13492_v4  ;;  %v7591_v57 = vmul.f32 %v13495_v12, %v13495_v12  ;;  %v13512_v52 = vmul.f32 0.70710677, %v13487_v48 }
 0xdbc   :  { %vm7420_vm14 = vweird.f32 %v10433_v0  ;;  %vm7459_vm15 = vweird.f32 %v13475_v45  ;;  %v7559_v21 = vmul.f32 %v7558_v63, %v13436_v33  ;;  %vm13517_vm0 = vcmp.eq.f32.partialorder %v7463_v36, 8.507059e+37 }
 0xdbd   :  { %v7416_v23 = vsub.f32 1.0, %v7415_v13  ;;  %v7568_v25 = vmul.f32 %v7567_v20, %v13436_v33  ;;  %v13522_v46 = vmin.f32 %v7591_v57, 16.0  ;;  %v7466_v9 = vor.u32 1.1754944e-38, %v7465_v32  ;;  %vm7421_vm1 = vmor %vm7419_vm4, %vm7420_vm14 }
 0xdbe   :  { %v7483_v15 = vmul.f32 %v7482_v26, %v13411_v56  ;;  %v7503_v11 = vand.u32 2147483647, %v13492_v4  ;;  %v7511_v37 = vmul.f32 %v13512_v52, %v13512_v52  ;;  %vm7499_vm11 = vweird.f32 %v13492_v4 }
 0xdbf   :  { %v10435_v38 = vpop.eup %10434  ;;  %v7417_v14 = vmul.f32 %v10433_v0, %v7416_v23  ;;  %v7569_v30 = vadd.f32 0.112945676, %v7568_v25  ;;  %v7593_v24 = vmul.f32 2.1237322e-06, %v13522_v46  ;;  %v7505_v56 = vand.u32 2147483648, %v13492_v4 }
 0xdc0   :  { %v7455_v6 = vmul.f32 %v10435_v38, %v13475_v45  ;;  %vm7460_vm10 = vweird.f32 %v10435_v38  ;;  %vm13537_vm5 = vcmp.eq.f32.partialorder %v7503_v11, 8.507059e+37  ;;  %v7604_v59 = vmul.f32 3.8918573e-05, %v13522_v46 }
 0xdc1   :  { %v7418_v62 = vadd.f32 %v10433_v0, %v7417_v14  ;;  %v10437_v8 = vpop.eup %10436  ;;  %v7570_v29 = vmul.f32 %v7569_v30, %v13436_v33  ;;  %v7594_v42 = vadd.f32 0.00028619796, %v7593_v24  ;;  %vm7461_vm12 = vmor %vm7459_vm15, %vm7460_vm10  ;;  %v7506_v26 = vor.u32 1.1754944e-38, %v7505_v56 }
 0xdc2   :  { %v7456_v22 = vsub.f32 1.0, %v7455_v6  ;;  %v7495_v51 = vmul.f32 %v10437_v8, %v13492_v4  ;;  %vm7500_vm8 = vweird.f32 %v10437_v8  ;;  %v7605_v63 = vadd.f32 0.001143296, %v7604_v59 }
 0xdc3   :  { %v7422_v19 = vsel %vm7421_vm1, %v10433_v0, %v7418_v62  ;;  %v7571_v41 = vadd.f32 0.4994258, %v7570_v29  ;;  %v13542_v0 = vmin.f32 %v7511_v37, 16.0  ;;  %vm7501_vm9 = vmor %vm7499_vm11, %vm7500_vm8  ;;  %v7595_v57 = vmul.f32 %v7594_v42, %v13522_v46 }
 0xdc4   :  { %v7427_v50 = vsel %vm13501_vm13, %v7426_v28, %v7422_v19  ;;  %v7457_v16 = vmul.f32 %v10435_v38, %v7456_v22  ;;  %v7496_v18 = vsub.f32 1.0, %v7495_v51  ;;  %v13566_v24 = vperm.slane %v13473_v7, 1 }
 0xdc5   :  { %v7428_v5 = vmul.f32 %v7427_v50, %v7403_v39  ;;  %v7572_v55 = vmul.f32 %v7571_v41, %v13436_v33  ;;  %v7513_v17 = vmul.f32 2.1237322e-06, %v13542_v0  ;;  %v7524_v36 = vmul.f32 3.8918573e-05, %v13542_v0 }
 0xdc6   :  { %v7458_v60 = vadd.f32 %v10435_v38, %v7457_v16  ;;  %v7497_v13 = vmul.f32 %v10437_v8, %v7496_v18  ;;  %v13575_v16 = vperm.slane %v13473_v7, 2 }
 0xdc7   :  { %v9787_v34 = vclamps-f32 %v7428_v5, 1.0  ;;  %v13553_v45 = vadd.f32 1.0, %v7572_v55  ;;  %v7514_v25 = vadd.f32 0.00028619796, %v7513_v17  ;;  %v7525_v62 = vadd.f32 0.001143296, %v7524_v36 }
 0xdc8   :  { %v7462_v39 = vsel %vm7461_vm12, %v10435_v38, %v7458_v60  ;;  %v7498_v32 = vadd.f32 %v10437_v8, %v7497_v13  ;;  %v7606_v38 = vmul.f32 %v7605_v63, %v13522_v46 }
 0xdc9   :  { %v7631_v23 = vadd.f32 1.0, %v9787_v34  ;;  %v7467_v28 = vsel %vm13517_vm0, %v7466_v9, %v7462_v39  ;;  %v7560_v9 = vadd.f32 0.18741608, %v7559_v21  ;;  %10438 = vrcp.f32 %v13553_v45 }
 0xdca   :  { %v7468_v20 = vmul.f32 %v7467_v28, %v7443_v3  ;;  %v7502_v6 = vsel %vm7501_vm9, %v10437_v8, %v7498_v32  ;;  %v7380_v3 = vmul.f32 0.5, %v13396_v43  ;;  %v7607_v8 = vadd.f32 0.014752088, %v7606_v38 }
 0xdcb   :  { %v7637_v14 = vmul.f32 %v7631_v23, %v13479_v2  ;;  %v7507_v44 = vsel %vm13537_vm5, %v7506_v26, %v7502_v6  ;;  %v7596_v2 = vadd.f32 0.0036580483, %v7595_v57  ;;  %v7515_v19 = vmul.f32 %v7514_v25, %v13542_v0 }
 0xdcc   :  { %v9788_v11 = vclamps-f32 %v7468_v20, 1.0  ;;  %v7508_v22 = vmul.f32 %v7507_v44, %v7483_v15  ;;  %v7526_v21 = vmul.f32 %v7525_v62, %v13542_v0  ;;  %v7561_v56 = vmul.f32 %v7560_v9, %v13436_v33  ;;  %v13597_v20 = vld [vmem:[#allocation2] sm:$0xff] }
 0xdcd   :  { %v13562_v4 = vmul.f32 %v13490_v27, %v7637_v14  ;;  %v7608_v50 = vmul.f32 %v7607_v8, %v13522_v46  ;;  %v7381_v43 = vmul.f32 0.5, %v13404_v35  ;;  %v7597_v53 = vmul.f32 %v7596_v2, %v13522_v46 }
 0xdce   :  { %v7632_v30 = vadd.f32 1.0, %v9788_v11  ;;  %v9789_v37 = vclamps-f32 %v7508_v22, 1.0  ;;  %v7527_v29 = vadd.f32 0.014752088, %v7526_v21  ;;  %v7516_v33 = vadd.f32 0.0036580483, %v7515_v19 }
 0xdcf   :  { %7662 = vst [vmem:[#allocation2 + $0x8] sm:$0xff] %v13562_v4  ;;  %v10439_v5 = vpop.eup %10438  ;;  %v7609_v59 = vadd.f32 0.112945676, %v7608_v50  ;;  %v7562_v42 = vadd.f32 1.1283791, %v7561_v56  ;;  %v7585_v55 = vand.u32 2147483648, %v13553_v45  ;;  %vm7579_vm4 = vweird.f32 %v13553_v45 }
 0xdd0   :  { %v7638_v51 = vmul.f32 %v7632_v30, %v7380_v3  ;;  %v7633_v15 = vadd.f32 1.0, %v9789_v37  ;;  %v7575_v41 = vmul.f32 %v10439_v5, %v13553_v45  ;;  %v7583_v35 = vand.u32 2147483647, %v13553_v45 }
 0xdd1   :  { %v7610_v34 = vmul.f32 %v7609_v59, %v13522_v46  ;;  %v7528_v13 = vmul.f32 %v7527_v29, %v13542_v0  ;;  %v7598_v36 = vadd.f32 0.05243302, %v7597_v53  ;;  %vm7580_vm3 = vweird.f32 %v10439_v5 }
 0xdd2   :  { %v13578_v18 = vmul.f32 %v13566_v24, %v7638_v51  ;;  %v7639_v60 = vmul.f32 %v7633_v15, %v7381_v43  ;;  %v7576_v39 = vsub.f32 1.0, %v7575_v41  ;;  %v7517_v26 = vmul.f32 %v7516_v33, %v13542_v0  ;;  %vm7581_vm13 = vmor %vm7579_vm4, %vm7580_vm3 }
 0xdd3   :  { %v7611_v23 = vadd.f32 0.4994258, %v7610_v34  ;;  %v7529_v28 = vadd.f32 0.112945676, %v7528_v13  ;;  %v7586_v25 = vor.u32 1.1754944e-38, %v7585_v55  ;;  %v7599_v62 = vmul.f32 %v7598_v36, %v13522_v46 }
 0xdd4   :  { %7663 = vst [vmem:[#allocation2 + $0x10] sm:$0xff] %v13578_v18  ;;  %v13587_v63 = vmul.f32 %v13575_v16, %v7639_v60  ;;  %v13592_v17 = vpack.i.bf16 %v13578_v18, %v13562_v4  ;;  %v7577_v32 = vmul.f32 %v10439_v5, %v7576_v39  ;;  %v7563_v9 = vmul.f32 %v7562_v42, %v13421_v31 }
 0xdd5   :  { %v7612_v38 = vmul.f32 %v7611_v23, %v13522_v46  ;;  %v7530_v14 = vmul.f32 %v7529_v28, %v13542_v0  ;;  %vm7584_vm14 = vcmp.eq.f32.partialorder %v7583_v35, 8.507059e+37  ;;  %v7518_v22 = vadd.f32 0.05243302, %v7517_v26 }
 0xdd6   :  { %10292 = vrot.lane.b32.xlu2 %v13592_v17, %s10470_s23  ;;  %v13601_v57 = vpack.i.bf16 %v13587_v63, %v13597_v20  ;;  %v7578_v6 = vadd.f32 %v10439_v5, %v7577_v32  ;;  %v7600_v45 = vadd.f32 0.18741608, %v7599_v62  ;;  %v7383_v51 = vmul.f32 0.5, %v13414_v10 }
 0xdd7   :  { %v7613_v11 = vadd.f32 1.0, %v7612_v38  ;;  %v7531_v44 = vadd.f32 0.4994258, %v7530_v14  ;;  %v7519_v19 = vmul.f32 %v7518_v22, %v13542_v0  ;;  %v13616_v31 = vperm.slane %v13473_v7, 4 }
 0xdd8   :  { %10297 = vrot.lane.b32.xlu0 %v13601_v57, %s10470_s23  ;;  %v7582_v3 = vsel %vm7581_vm13, %v10439_v5, %v7578_v6  ;;  %v7601_v43 = vmul.f32 %v7600_v45, %v13522_v46  ;;  %v7382_v45 = vmul.f32 0.5, %v13487_v48  ;;  %vm14162_vm9 = vcmask 146432  }
 0xdd9   :  { %v7587_v30 = vsel %vm7584_vm14, %v7586_v25, %v7582_v3  ;;  %10440 = vrcp.f32 %v7613_v11  ;;  %v7532_v8 = vmul.f32 %v7531_v44, %v13542_v0  ;;  %v7520_v5 = vadd.f32 0.18741608, %v7519_v19  ;;  %vm14163_vm3 = vmmov %vm14162_vm9 }
 0xdda   :  { %v7588_v2 = vmul.f32 %v7587_v30, %v7563_v9  ;;  %v7602_v60 = vadd.f32 1.1283791, %v7601_v43  ;;  %v7625_v41 = vand.u32 2147483648, %v7613_v11  ;;  %v7623_v10 = vand.u32 2147483647, %v7613_v11  ;;  %vm14164_vm4 = vmmov %vm14163_vm3 }
 0xddb   :  { %v7533_v21 = vadd.f32 1.0, %v7532_v8  ;;  %v7521_v35 = vmul.f32 %v7520_v5, %v13542_v0  ;;  %vm7619_vm0 = vweird.f32 %v7613_v11  ;;  %v13631_v9 = vperm.slane %v13473_v7, 5  ;;  %vm14165_vm13 = vmmov %vm14163_vm3 }
 0xddc   :  { %v9791_v37 = vclamps-f32 %v7588_v2, 1.0  ;;  %v7603_v13 = vmul.f32 %v7602_v60, %v13495_v12  ;;  %v7626_v39 = vor.u32 1.1754944e-38, %v7625_v41  ;;  %vm7624_vm11 = vcmp.eq.f32.partialorder %v7623_v10, 8.507059e+37  ;;  %v9864_v60 = vld [vmem:[%s14094_s13 + $0x18] sm:$0xff]  ;;  %vm14166_vm14 = vmmov %vm14163_vm3 }
 0xddd   :  { %10442 = vrcp.f32 %v7533_v21  ;;  %v7522_v23 = vadd.f32 1.1283791, %v7521_v35  ;;  %v7545_v28 = vand.u32 2147483648, %v7533_v21  ;;  %v7543_v38 = vand.u32 2147483647, %v7533_v21 }
 0xdde   :  { %10307 = vrot.lane.b32.xlu2 %v13592_v17, %s14121_s7  ;;  %v7635_v56 = vadd.f32 1.0, %v9791_v37  ;;  %vm7539_vm5 = vweird.f32 %v7533_v21 }
 0xddf   :  { %v10441_v50 = vpop.eup %10440  ;;  %v7546_v25 = vor.u32 1.1754944e-38, %v7545_v28  ;;  %v7523_v12 = vmul.f32 %v7522_v23, %v13512_v52  ;;  %vm7544_vm8 = vcmp.eq.f32.partialorder %v7543_v38, 8.507059e+37 }
 0xde0   :  { %v7641_v15 = vmul.f32 %v7635_v56, %v7383_v51  ;;  %v7615_v29 = vmul.f32 %v10441_v50, %v7613_v11  ;;  %vm7620_vm15 = vweird.f32 %v10441_v50  ;;  %v7384_v11 = vmul.f32 0.5, %v13468_v47 }
 0xde1   :  { %vm7621_vm1 = vmor %vm7619_vm0, %vm7620_vm15  ;;  %vm14167_vm15 = vcmask 154624  }
 0xde2   :  { %v13620_v53 = vmul.f32 %v13616_v31, %v7641_v15  ;;  %v7616_v59 = vsub.f32 1.0, %v7615_v29  ;;  %v9856_v29 = vld [vmem:[%s14092_s11 + $0x38] sm:$0xff]  ;;  %vm14168_vm0 = vmmov %vm14167_vm15 }
 0xde3   :  { %v10443_v33 = vpop.eup %10442 }
 0xde4   :  { %v7617_v42 = vmul.f32 %v10441_v50, %v7616_v59  ;;  %v7535_v34 = vmul.f32 %v10443_v33, %v7533_v21  ;;  %vm7540_vm10 = vweird.f32 %v10443_v33  ;;  %v9794_v59 = vld [vmem:[%s14090_s10 + $0x200] sm:$0xff] }
 0xde5   :  { %vm7541_vm12 = vmor %vm7539_vm5, %vm7540_vm10 }
 0xde6   :  { %10322 = vrot.lane.b32.xlu2 %v13592_v17, %s14122_s24  ;;  %v7618_v46 = vadd.f32 %v10441_v50, %v7617_v42  ;;  %v7536_v55 = vsub.f32 1.0, %v7535_v34  ;;  %vm14171_vm10 = vmmov %vm14168_vm0 }
 0xde7   :  { %vm14172_vm5 = vmmov %vm14168_vm0 }
 0xde8   :  { %v7622_v36 = vsel %vm7621_vm1, %v10441_v50, %v7618_v46  ;;  %v7537_v26 = vmul.f32 %v10443_v33, %v7536_v55  ;;  %vm14169_vm1 = vmmov %vm14168_vm0 }
 0xde9   :  { %v7627_v32 = vsel %vm7624_vm11, %v7626_v39, %v7622_v36  ;;  %vm14170_vm11 = vcmask 138240  }
 0xdea   :  { %v7628_v0 = vmul.f32 %v7627_v32, %v7603_v13  ;;  %v7538_v14 = vadd.f32 %v10443_v33, %v7537_v26 }
 0xdec   :  { %v9792_v6 = vclamps-f32 %v7628_v0, 1.0  ;;  %v7542_v62 = vsel %vm7541_vm12, %v10443_v33, %v7538_v14  ;;  %vm14173_vm12 = vmmov %vm14170_vm11 }
 0xded   :  { %v7547_v3 = vsel %vm7544_vm8, %v7546_v25, %v7542_v62  ;;  %vm14174_vm8 = vmmov %vm14170_vm11 }
 0xdee   :  { %10337 = vrot.lane.b32.xlu2 %v13592_v17, %s10472_s25  ;;  %v7636_v44 = vadd.f32 1.0, %v9792_v6  ;;  %v7548_v22 = vmul.f32 %v7547_v3, %v7523_v12  ;;  %v13636_v17 = vperm.slane %v13473_v7, 3  ;;  %v10316_v7 = vpack.i.bf16 %v13620_v53, %v13597_v20 }
 0xdef   :  { %v10351_v20 = vpack.i.bf16 %v13587_v63, %v13578_v18 }
 0xdf0   :  { %v7642_v30 = vmul.f32 %v7636_v44, %v7384_v11  ;;  %v9790_v2 = vclamps-f32 %v7548_v22, 1.0 }
 0xdf2   :  { %v7661_v8 = vmul.f32 %v13631_v9, %v7642_v30  ;;  %v7634_v37 = vadd.f32 1.0, %v9790_v2 }
 0xdf4   :  { %7667 = vst.msk [vmem:[#allocation2 + $0x30] sm:$0xff] %vm54_vm2, %v7661_v8  ;;  %v7640_v52 = vmul.f32 %v7634_v37, %v7382_v45  ;;  %v9793_v45 = vld [vmem:[%s14090_s10 + $0x1f8] sm:$0xff] }
 0xdf6   :  { %v13640_v47 = vmul.f32 %v13636_v17, %v7640_v52 }
 0xdf8   :  { %v10301_v19 = vpack.i.bf16 %v13620_v53, %v13640_v47  ;;  %v10311_v21 = vpack.i.bf16 %v13640_v47, %v13587_v63 }
 0xdfa   :  { %10302 = vrot.lane.b32.xlu1 %v10301_v19, %s10470_s23  ;;  %10312 = vrot.lane.b32.xlu0 %v10311_v21, %s14121_s7 }
 0xdfb   :  { %v13648_v48 = vld [vmem:[#allocation2 + $0x30] sm:$0xff] }
 0xdfc   :  { %8158 = vrot.lane.b32.xlu2 %v13648_v48, %s10472_s25  ;;  %v10361_v51 = vpack.i.bf16 %v13648_v48, %v13562_v4  ;;  %v10376_v56 = vpack.i.bf16 %v13648_v48, %v13620_v53 }
 0xe02   :  { %10317 = vrot.lane.b32.xlu1 %v10316_v7, %s14121_s7  ;;  %10327 = vrot.lane.b32.xlu0 %v13601_v57, %s14122_s24  ;;  %v10371_v57 = vpack.i.bf16 %v13640_v47, %v13562_v4 }
 0xe04   :  { %10362 = vrot.lane.b32.xlu2 %v10361_v51, %s10473_s26 }
 0xe0a   :  { %10332 = vrot.lane.b32.xlu1 %v10301_v19, %s14122_s24  ;;  %10342 = vrot.lane.b32.xlu0 %v10311_v21, %s10472_s25 }
 0xe0c   :  { %10377 = vrot.lane.b32.xlu2 %v10376_v56, %s14123_s28 }
 0xe12   :  { %10347 = vrot.lane.b32.xlu1 %v10316_v7, %s10472_s25  ;;  %10352 = vrot.lane.b32.xlu0 %v10351_v20, %s10473_s26 }
 0xe14   :  { %10392 = vrot.lane.b32.xlu2 %v10361_v51, %s14124_s20 }
 0xe1a   :  { %10357 = vrot.lane.b32.xlu1 %v10301_v19, %s10473_s26  ;;  %10367 = vrot.lane.b32.xlu0 %v10351_v20, %s14123_s28 }
 0xe1c   :  { %10407 = vrot.lane.b32.xlu2 %v10376_v56, %s14125_s4 }
 0xe22   :  { %10372 = vrot.lane.b32.xlu1 %v10371_v57, %s14123_s28  ;;  %10382 = vrot.lane.b32.xlu0 %v10351_v20, %s14124_s20 }
 0xe2a   :  { %10387 = vrot.lane.b32.xlu1 %v10301_v19, %s14124_s20  ;;  %10397 = vrot.lane.b32.xlu0 %v10351_v20, %s14125_s4 }
 0xe30   :  { %v10293_v50 = vpop.permute.xlu2 %10292 }
 0xe31   :  { %v10295_v43 = vunpack.i.h.bf16 %v10293_v50  ;;  %v10294_v15 = vunpack.i.l.bf16 %v10293_v50 }
 0xe32   :  { %10402 = vrot.lane.b32.xlu1 %v10371_v57, %s14125_s4  ;;  %9052 = vperm.xlu0 %9893, %v9856_v29  }
 0xe33   :  { %v7697_v5 = vsel %vm14162_vm9, %v10294_v15, %v10295_v43  ;;  %vm14175_vm9 = vmmov %vm14174_vm8 }
 0xe34   :  { %7745 = vmatpush.msrb.mxu2 %v7697_v5  ;;  %v9807_v5 = vld [vmem:[%s14090_s10 + $0x208] sm:$0xff] }
 0xe35   :  { %9796 = vmatmul.msk.f32.vlgmr.msrb.gmra.mxu2 %vm54_vm2, %v9794_v59 }
 0xe38   :  { %v10308_v34 = vpop.permute.xlu2 %10307 }
 0xe39   :  { %v10310_v13 = vunpack.i.h.bf16 %v10308_v34  ;;  %v10309_v39 = vunpack.i.l.bf16 %v10308_v34 }
 0xe3a   :  { %9337 = vperm.xlu1 %10055, %v9864_v60  }
 0xe3b   :  { %v7843_v62 = vsel %vm14169_vm1, %v10309_v39, %v10310_v13 }
 0xe40   :  { %v10323_v46 = vpop.permute.xlu2 %10322 }
 0xe41   :  { %v10325_v38 = vunpack.i.h.bf16 %v10323_v46  ;;  %v10324_v0 = vunpack.i.l.bf16 %v10323_v46 }
 0xe43   :  { %v7991_v11 = vsel %vm14170_vm11, %v10324_v0, %v10325_v38 }
 0xe48   :  { %v10338_v7 = vpop.permute.xlu2 %10337 }
 0xe49   :  { %v10339_v29 = vunpack.i.l.bf16 %v10338_v7 }
 0xe4a   :  { %v10298_v41 = vpop.permute.xlu0 %10297 }
 0xe4b   :  { %v10300_v33 = vunpack.i.h.bf16 %v10298_v41  ;;  %v10299_v42 = vunpack.i.l.bf16 %v10298_v41 }
 0xe4d   :  { %v7696_v10 = vsel %vm14163_vm3, %v10299_v42, %v10294_v15  ;;  %v7698_v35 = vsel %vm14164_vm4, %v10295_v43, %v10300_v33  ;;  %v10340_v15 = vunpack.i.h.bf16 %v10338_v7  ;;  %vm14176_vm3 = vmmov %vm14174_vm8 }
 0xe4e   :  { %7725 = vmatpush.msra.mxu1 %v7696_v10  ;;  %7765 = vmatpush.msra.mxu0 %v7698_v35 }
 0xe4f   :  { %9795 = vmatmul.msk.f32.vlgmr.msra.gmra.mxu1 %vm54_vm2, %v9794_v59  ;;  %9797 = vmatmul.msk.f32.vlgmr.msra.gmra.mxu0 %vm54_vm2, %v9794_v59  ;;  %v8161_v42 = vsel %vm737_vm6, %v10339_v29, %v10340_v15 }
 0xe56   :  { %v8159_v46 = vpop.permute.xlu2 %8158 }
 0xe6c   :  { %v10303_v55 = vpop.permute.xlu1 %10302  ;;  %v10313_v36 = vpop.permute.xlu0 %10312 }
 0xe6d   :  { %v10305_v23 = vunpack.i.h.bf16 %v10303_v55  ;;  %v10304_v28 = vunpack.i.l.bf16 %v10303_v55  ;;  %v10315_v32 = vunpack.i.h.bf16 %v10313_v36  ;;  %v10314_v26 = vunpack.i.l.bf16 %v10313_v36  ;;  %v9814_v36 = vld [vmem:[%s14090_s10 + $0x210] sm:$0xff] }
 0xe6f   :  { %7825 = vmatpush.msra.mxu2 %v10305_v23  ;;  %v7699_v14 = vsel %vm14165_vm13, %v10300_v33, %v10304_v28  ;;  %v7700_v6 = vsel %vm14166_vm14, %v10304_v28, %v10305_v23  ;;  %v7844_v25 = vsel %vm14167_vm15, %v10310_v13, %v10314_v26  ;;  %v7845_v12 = vsel %vm14168_vm0, %v10314_v26, %v10315_v32 }
 0xe70   :  { %7785 = vmatpush.msrb.mxu3 %v7699_v14  ;;  %7805 = vmatpush.msrb.mxu1 %v7700_v6  ;;  %vm14182_vm15 = vcmask 900096  }
 0xe71   :  { %9800 = vmatmul.msk.f32.vlgmr.msra.gmra.mxu2 %vm54_vm2, %v9794_v59  ;;  %9798 = vmatmul.msk.f32.vlgmr.msrb.gmra.mxu3 %vm54_vm2, %v9794_v59  ;;  %vm14183_vm0 = vmmov %vm14182_vm15 }
 0xe72   :  { %7891 = vmatpush.msra.mxu3 %v7843_v62  ;;  %7911 = vmatpush.msra.mxu1 %v7844_v25  ;;  %vm14184_vm1 = vmmov %vm14183_vm0 }
 0xe73   :  { %7931 = vmatpush.msrb.mxu2 %v7845_v12  ;;  %9799 = vmatmul.msk.f32.vlgmr.msrb.gmra.mxu1 %vm54_vm2, %v9794_v59  ;;  %vm14185_vm11 = vmmov %vm14183_vm0 }
 0xe74   :  { %v10318_v44 = vpop.permute.xlu1 %10317  ;;  %v10328_v3 = vpop.permute.xlu0 %10327 }
 0xe75   :  { %8039 = vmatpush.msra.mxu2 %v7991_v11  ;;  %v10320_v22 = vunpack.i.h.bf16 %v10318_v44  ;;  %v10319_v30 = vunpack.i.l.bf16 %v10318_v44  ;;  %v10330_v2 = vunpack.i.h.bf16 %v10328_v3  ;;  %v10329_v8 = vunpack.i.l.bf16 %v10328_v3 }
 0xe77   :  { %7971 = vmatpush.msrb.mxu3 %v10320_v22  ;;  %v7842_v37 = vsel %vm14171_vm10, %v10319_v30, %v10309_v39  ;;  %v7846_v52 = vsel %vm14172_vm5, %v10315_v32, %v10320_v22  ;;  %v7990_v19 = vsel %vm14173_vm12, %v10329_v8, %v10324_v0  ;;  %v7992_v21 = vsel %vm14174_vm8, %v10325_v38, %v10330_v2  ;;  %v9821_v0 = vld [vmem:[%s14090_s10 + $0x218] sm:$0xff]  ;;  %vm14187_vm5 = vmmov %vm14183_vm0 }
 0xe78   :  { %7871 = vmatpush.msrb.mxu0 %v7842_v37  ;;  %8019 = vmatpush.msrb.mxu1 %v7990_v19  ;;  %vm14186_vm10 = vcmask 891904  }
 0xe79   :  { %9804 = vmatmul.msk.f32.vlgmr.msrb.gmra.mxu2 %vm54_vm2, %v9793_v45  ;;  %9801 = vmatmul.msk.f32.vlgmr.msrb.gmra.mxu0 %vm54_vm2, %v9793_v45  ;;  %vm14188_vm12 = vmmov %vm14186_vm10 }
 0xe7a   :  { %9802 = vmatmul.msk.f32.vlgmr.msra.gmra.mxu3 %vm54_vm2, %v9793_v45  ;;  %7951 = vmatpush.msra.mxu0 %v7846_v52  ;;  %vm14189_vm8 = vmmov %vm14186_vm10 }
 0xe7b   :  { %9803 = vmatmul.msk.f32.vlgmr.msra.gmra.mxu1 %vm54_vm2, %v9793_v45 }
 0xe7c   :  { %8059 = vmatpush.msrb.mxu0 %v7992_v21  ;;  %v10333_v51 = vpop.permute.xlu1 %10332  ;;  %v10343_v56 = vpop.permute.xlu0 %10342 }
 0xe7d   :  { %v10335_v20 = vunpack.i.h.bf16 %v10333_v51  ;;  %v10334_v57 = vunpack.i.l.bf16 %v10333_v51  ;;  %v10345_v50 = vunpack.i.h.bf16 %v10343_v56  ;;  %v10344_v43 = vunpack.i.l.bf16 %v10343_v56 }
 0xe7f   :  { %8119 = vmatpush.msrb.mxu2 %v10335_v20  ;;  %v7993_v59 = vsel %vm14175_vm9, %v10330_v2, %v10334_v57  ;;  %v7994_v60 = vsel %vm14176_vm3, %v10334_v57, %v10335_v20  ;;  %v8163_v41 = vsel %vm737_vm6, %v10344_v43, %v10345_v50  ;;  %v8162_v33 = vsel %vm737_vm6, %v10340_v15, %v10344_v43  ;;  %vm14190_vm9 = vmmov %vm14189_vm8 }
 0xe80   :  { %8079 = vmatpush.msra.mxu3 %v7993_v59  ;;  %8099 = vmatpush.msra.mxu1 %v7994_v60  ;;  %vm14191_vm3 = vmmov %vm14189_vm8 }
 0xe81   :  { %9809 = vmatmul.msk.f32.vlgmr.msra.gmra.mxu2 %vm54_vm2, %v9807_v5  ;;  %9805 = vmatmul.msk.f32.vlgmr.msra.gmra.mxu0 %vm54_vm2, %v9793_v45 }
 0xe82   :  { %9806 = vmatmul.msk.f32.vlgmr.msrb.gmra.mxu3 %vm54_vm2, %v9793_v45  ;;  %8250 = vmatpush.msra.mxu2 %v8163_v41  ;;  %v9828_v45 = vld [vmem:[%s14090_s10 + $0x220] sm:$0xff] }
 0xe83   :  { %8210 = vmatpush.msrb.mxu3 %v8161_v42  ;;  %9808 = vmatmul.msk.f32.vlgmr.msrb.gmra.mxu1 %vm54_vm2, %v9807_v5 }
 0xe84   :  { %8230 = vmatpush.msrb.mxu1 %v8162_v33  ;;  %v10348_v10 = vpop.permute.xlu1 %10347  ;;  %v10353_v23 = vpop.permute.xlu0 %10352 }
 0xe85   :  { %v10350_v35 = vunpack.i.h.bf16 %v10348_v10  ;;  %v10349_v34 = vunpack.i.l.bf16 %v10348_v10  ;;  %v10355_v26 = vunpack.i.h.bf16 %v10353_v23  ;;  %v10354_v38 = vunpack.i.l.bf16 %v10353_v23 }
 0xe87   :  { %v8160_v13 = vsel %vm737_vm6, %v10349_v34, %v10339_v29  ;;  %v8164_v39 = vsel %vm737_vm6, %v10345_v50, %v10350_v35  ;;  %v8165_v55 = vsel %vm737_vm6, %v10350_v35, %v8159_v46  ;;  %vm14177_vm6 = vcmask 908288   ;;  %v9835_v29 = vld [vmem:[%s14090_s10 + $0x228] sm:$0xff] }
 0xe88   :  { %8190 = vmatpush.msra.mxu0 %v8160_v13  ;;  %vm14178_vm4 = vmmov %vm14177_vm6 }
 0xe89   :  { %9813 = vmatmul.msk.f32.vlgmr.msrb.gmra.mxu2 %vm54_vm2, %v9807_v5  ;;  %9810 = vmatmul.msk.f32.vlgmr.msrb.gmra.mxu0 %vm54_vm2, %v9807_v5  ;;  %vm14180_vm13 = vmmov %vm14178_vm4 }
 0xe8a   :  { %8341 = vmatpush.msrb.mxu2 %v13578_v18  ;;  %9811 = vmatmul.msk.f32.vlgmr.msra.gmra.mxu3 %vm54_vm2, %v9807_v5  ;;  %vm14181_vm14 = vmmov %vm14178_vm4 }
 0xe8b   :  { %8270 = vmatpush.msrb.mxu0 %v8164_v39  ;;  %8290 = vmatpush.msra.mxu3 %v8165_v55 }
 0xe8c   :  { %9812 = vmatmul.msk.f32.vlgmr.msra.gmra.mxu1 %vm54_vm2, %v9807_v5  ;;  %v10358_v28 = vpop.permute.xlu1 %10357 }
 0xe8d   :  { %8321 = vmatpush.msra.mxu1 %v13562_v4  ;;  %v10363_v4 = vpop.permute.xlu2 %10362  ;;  %v10360_v18 = vunpack.i.h.bf16 %v10358_v28  ;;  %v10359_v32 = vunpack.i.l.bf16 %v10358_v28 }
 0xe8e   :  { %v10365_v11 = vunpack.i.h.bf16 %v10363_v4 }
 0xe8f   :  { %v8448_v6 = vsel %vm1024_vm7, %v10355_v26, %v10359_v32 }
 0xe90   :  { %v8450_v22 = vsel %vm1024_vm7, %v10360_v18, %v10365_v11 }
 0xe91   :  { %9818 = vmatmul.msk.f32.vlgmr.msra.gmra.mxu2 %vm54_vm2, %v9814_v36  ;;  %9815 = vmatmul.msk.f32.vlgmr.msra.gmra.mxu0 %vm54_vm2, %v9814_v36 }
 0xe92   :  { %8421 = vmatpush.msra.mxu2 %v13648_v48  ;;  %9816 = vmatmul.msk.f32.vlgmr.msrb.gmra.mxu3 %vm54_vm2, %v9814_v36  ;;  %v10364_v48 = vunpack.i.l.bf16 %v10363_v4  ;;  %v9842_v4 = vld [vmem:[%s14090_s10 + $0x230] sm:$0xff] }
 0xe93   :  { %8361 = vmatpush.msra.mxu0 %v13587_v63  ;;  %8381 = vmatpush.msrb.mxu3 %v13640_v47  ;;  %v8449_v63 = vsel %vm1024_vm7, %v10359_v32, %v10360_v18  ;;  %v10368_v47 = vpop.permute.xlu0 %10367 }
 0xe94   :  { %9817 = vmatmul.msk.f32.vlgmr.msrb.gmra.mxu1 %vm54_vm2, %v9814_v36  ;;  %v8446_v14 = vsel %vm1024_vm7, %v10364_v48, %v10354_v38  ;;  %v10370_v25 = vunpack.i.h.bf16 %v10368_v47  ;;  %v10369_v12 = vunpack.i.l.bf16 %v10368_v47  ;;  %v10373_v62 = vpop.permute.xlu1 %10372  ;;  %v9849_v48 = vld [vmem:[%s14090_s10 + $0x238] sm:$0xff] }
 0xe95   :  { %8401 = vmatpush.msrb.mxu1 %v13620_v53  ;;  %v8447_v53 = vsel %vm1024_vm7, %v10354_v38, %v10355_v26  ;;  %v10374_v44 = vunpack.i.l.bf16 %v10373_v62  ;;  %v10378_v30 = vpop.permute.xlu2 %10377  ;;  %v10375_v8 = vunpack.i.h.bf16 %v10373_v62  ;;  %vm14179_vm7 = vmmov %vm14178_vm4 }
 0xe96   :  { %v8601_v3 = vsel %vm14177_vm6, %v10369_v12, %v10370_v25  ;;  %v10380_v37 = vunpack.i.h.bf16 %v10378_v30  ;;  %v10379_v52 = vunpack.i.l.bf16 %v10378_v30 }
 0xe97   :  { %v8600_v2 = vsel %vm14178_vm4, %v10374_v44, %v10369_v12  ;;  %v8602_v7 = vsel %vm14179_vm7, %v10370_v25, %v10375_v8 }
 0xe98   :  { %v8603_v51 = vsel %vm14180_vm13, %v10375_v8, %v10379_v52  ;;  %v8604_v56 = vsel %vm14181_vm14, %v10379_v52, %v10380_v37 }
 0xe99   :  { %9823 = vmatmul.msk.f32.vlgmr.msrb.gmra.mxu2 %vm54_vm2, %v9821_v0  ;;  %9819 = vmatmul.msk.f32.vlgmr.msrb.gmra.mxu0 %vm54_vm2, %v9814_v36 }
 0xe9a   :  { %8535 = vmatpush.msrb.mxu2 %v8449_v63  ;;  %9820 = vmatmul.msk.f32.vlgmr.msra.gmra.mxu3 %vm54_vm2, %v9814_v36 }
 0xe9b   :  { %8475 = vmatpush.msrb.mxu0 %v8446_v14  ;;  %8495 = vmatpush.msra.mxu3 %v8447_v53  ;;  %v10383_v19 = vpop.permute.xlu0 %10382 }
 0xe9c   :  { %9822 = vmatmul.msk.f32.vlgmr.msra.gmra.mxu1 %vm54_vm2, %v9821_v0  ;;  %v10388_v21 = vpop.permute.xlu1 %10387  ;;  %v10385_v43 = vunpack.i.h.bf16 %v10383_v19  ;;  %v10384_v15 = vunpack.i.l.bf16 %v10383_v19 }
 0xe9d   :  { %8515 = vmatpush.msra.mxu1 %v8448_v6  ;;  %v10393_v20 = vpop.permute.xlu2 %10392  ;;  %v10390_v57 = vunpack.i.h.bf16 %v10388_v21  ;;  %v10389_v50 = vunpack.i.l.bf16 %v10388_v21 }
 0xe9e   :  { %v10394_v5 = vunpack.i.l.bf16 %v10393_v20  ;;  %v8755_v33 = vsel %vm14184_vm1, %v10384_v15, %v10385_v43  ;;  %v10395_v46 = vunpack.i.h.bf16 %v10393_v20 }
 0xe9f   :  { %v8757_v59 = vsel %vm14182_vm15, %v10389_v50, %v10390_v57  ;;  %v8756_v42 = vsel %vm14185_vm11, %v10385_v43, %v10389_v50 }
 0xea0   :  { %v8754_v41 = vsel %vm14183_vm0, %v10394_v5, %v10384_v15  ;;  %v8758_v55 = vsel %vm14187_vm5, %v10390_v57, %v10395_v46 }
 0xea1   :  { %9827 = vmatmul.msk.f32.vlgmr.msra.gmra.mxu2 %vm54_vm2, %v9821_v0  ;;  %9824 = vmatmul.msk.f32.vlgmr.msra.gmra.mxu0 %vm54_vm2, %v9821_v0 }
 0xea2   :  { %8649 = vmatpush.msra.mxu2 %v8601_v3  ;;  %9825 = vmatmul.msk.f32.vlgmr.msrb.gmra.mxu3 %vm54_vm2, %v9821_v0 }
 0xea3   :  { %8555 = vmatpush.msra.mxu0 %v8450_v22  ;;  %8575 = vmatpush.msrb.mxu3 %v10365_v11  ;;  %v10398_v60 = vpop.permute.xlu0 %10397 }
 0xea4   :  { %9826 = vmatmul.msk.f32.vlgmr.msrb.gmra.mxu1 %vm54_vm2, %v9821_v0  ;;  %v10400_v10 = vunpack.i.h.bf16 %v10398_v60  ;;  %v10399_v35 = vunpack.i.l.bf16 %v10398_v60  ;;  %v10403_v34 = vpop.permute.xlu1 %10402 }
 0xea5   :  { %8629 = vmatpush.msrb.mxu1 %v8600_v2  ;;  %v10404_v13 = vunpack.i.l.bf16 %v10403_v34  ;;  %v10408_v23 = vpop.permute.xlu2 %10407  ;;  %v10405_v28 = vunpack.i.h.bf16 %v10403_v34 }
 0xea6   :  { %v8909_v39 = vsel %vm14186_vm10, %v10399_v35, %v10400_v10  ;;  %v10410_v18 = vunpack.i.h.bf16 %v10408_v23  ;;  %v10409_v32 = vunpack.i.l.bf16 %v10408_v23 }
 0xea7   :  { %v8908_v36 = vsel %vm14188_vm12, %v10404_v13, %v10399_v35  ;;  %v8910_v26 = vsel %vm14189_vm8, %v10400_v10, %v10405_v28 }
 0xea8   :  { %v8911_v38 = vsel %vm14190_vm9, %v10405_v28, %v10409_v32  ;;  %v8912_v0 = vsel %vm14191_vm3, %v10409_v32, %v10410_v18 }
 0xea9   :  { %9832 = vmatmul.msk.f32.vlgmr.msrb.gmra.mxu2 %vm54_vm2, %v9828_v45  ;;  %9829 = vmatmul.msk.f32.vlgmr.msrb.gmra.mxu0 %vm54_vm2, %v9828_v45 }
 0xeaa   :  { %8729 = vmatpush.msrb.mxu2 %v10380_v37  ;;  %9830 = vmatmul.msk.f32.vlgmr.msra.gmra.mxu3 %vm54_vm2, %v9828_v45 }
 0xeab   :  { %8669 = vmatpush.msrb.mxu0 %v8602_v7  ;;  %8689 = vmatpush.msra.mxu3 %v8603_v51 }
 0xeac   :  { %9831 = vmatmul.msk.f32.vlgmr.msra.gmra.mxu1 %vm54_vm2, %v9828_v45 }
 0xead   :  { %8709 = vmatpush.msra.mxu1 %v8604_v56 }
 0xeb1   :  { %9837 = vmatmul.msk.f32.vlgmr.msra.gmra.mxu2 %vm54_vm2, %v9835_v29  ;;  %9833 = vmatmul.msk.f32.vlgmr.msra.gmra.mxu0 %vm54_vm2, %v9828_v45 }
 0xeb2   :  { %8843 = vmatpush.msra.mxu2 %v8757_v59  ;;  %9834 = vmatmul.msk.f32.vlgmr.msrb.gmra.mxu3 %vm54_vm2, %v9828_v45 }
 0xeb3   :  { %8783 = vmatpush.msra.mxu0 %v8754_v41  ;;  %8803 = vmatpush.msrb.mxu3 %v8755_v33 }
 0xeb4   :  { %9836 = vmatmul.msk.f32.vlgmr.msrb.gmra.mxu1 %vm54_vm2, %v9835_v29 }
 0xeb5   :  { %8823 = vmatpush.msrb.mxu1 %v8756_v42 }
 0xeb9   :  { %9841 = vmatmul.msk.f32.vlgmr.msrb.gmra.mxu2 %vm54_vm2, %v9835_v29  ;;  %9838 = vmatmul.msk.f32.vlgmr.msrb.gmra.mxu0 %vm54_vm2, %v9835_v29 }
 0xeba   :  { %8957 = vmatpush.msrb.mxu2 %v8909_v39  ;;  %9839 = vmatmul.msk.f32.vlgmr.msra.gmra.mxu3 %vm54_vm2, %v9835_v29 }
 0xebb   :  { %8863 = vmatpush.msrb.mxu0 %v8758_v55  ;;  %8883 = vmatpush.msra.mxu3 %v10395_v46 }
 0xebc   :  { %9840 = vmatmul.msk.f32.vlgmr.msra.gmra.mxu1 %vm54_vm2, %v9835_v29 }
 0xebd   :  { %8937 = vmatpush.msra.mxu1 %v8908_v36 }
 0xec1   :  { %9846 = vmatmul.msk.f32.vlgmr.msra.gmra.mxu2 %vm54_vm2, %v9842_v4  ;;  %9843 = vmatmul.msk.f32.vlgmr.msra.gmra.mxu0 %vm54_vm2, %v9842_v4 }
 0xec2   :  { %9037 = vmatpush.msra.mxu2 %v10410_v18  ;;  %9844 = vmatmul.msk.f32.vlgmr.msrb.gmra.mxu3 %vm54_vm2, %v9842_v4 }
 0xec3   :  { %8977 = vmatpush.msra.mxu0 %v8910_v26  ;;  %8997 = vmatpush.msrb.mxu3 %v8911_v38 }
 0xec4   :  { %9845 = vmatmul.msk.f32.vlgmr.msrb.gmra.mxu1 %vm54_vm2, %v9842_v4 }
 0xec5   :  { %9017 = vmatpush.msrb.mxu1 %v8912_v0 }
 0xec9   :  { %9851 = vmatmul.msk.f32.vlgmr.msrb.gmra.mxu2 %vm54_vm2, %v9849_v48  ;;  %9847 = vmatmul.msk.f32.vlgmr.msrb.gmra.mxu0 %vm54_vm2, %v9842_v4 }
 0xeca   :  { %9418 = vmatpush.msrb.mxu2 %v13191_v40  ;;  %9848 = vmatmul.msk.f32.vlgmr.msra.gmra.mxu3 %vm54_vm2, %v9842_v4 }
 0xecb   :  { %9358 = vmatpush.msrb.mxu0 %v13180_v1  ;;  %9378 = vmatpush.msra.mxu3 %v13183_v54  ;;  %v9863_v1 = vld [vmem:[%s14095_s12 + $0x18] sm:$0xff] }
 0xecc   :  { %9850 = vmatmul.msk.f32.vlgmr.msra.gmra.mxu1 %vm54_vm2, %v9849_v48  ;;  %v7727_v54 = vpop.f32.mrf.mxu1  ;;  %v7767_v40 = vpop.f32.mrf.mxu0 }
 0xecd   :  { %9398 = vmatpush.msra.mxu1 %v13185_v58  ;;  %v7747_v58 = vpop.f32.mrf.mxu2 }
 0xed1   :  { %9855 = vmatmul.msk.f32.vlgmr.msra.gmra.mxu2 %vm54_vm2, %v9849_v48  ;;  %9852 = vmatmul.msk.f32.vlgmr.msra.gmra.mxu0 %vm54_vm2, %v9849_v48 }
 0xed2   :  { %9853 = vmatmul.msk.f32.vlgmr.msrb.gmra.mxu3 %vm54_vm2, %v9849_v48  ;;  %9438 = vmatpush.msra.mxu0 %v13201_v61 }
 0xed3   :  { %9458 = vmatpush.msrb.mxu3 %v13208_v49 }
 0xed4   :  { %9854 = vmatmul.msk.f32.vlgmr.msrb.gmra.mxu1 %vm54_vm2, %v9849_v48 }
 0xed9   :  { %9868 = vmatmul.msk.f32.vlgmr.msrb.gmra.mxu2 %vm54_vm2, %v9863_v1  ;;  %9865 = vmatmul.msk.f32.vlgmr.msrb.gmra.mxu0 %vm54_vm2, %v9863_v1 }
 0xeda   :  { %9866 = vmatmul.msk.f32.vlgmr.msra.gmra.mxu3 %vm54_vm2, %v9863_v1 }
 0xedc   :  { %9867 = vmatmul.msk.f32.vlgmr.msra.gmra.mxu1 %vm54_vm2, %v9863_v1 }
 0xee1   :  { %9869 = vmatmul.msk.f32.vlgmr.msra.gmra.mxu0 %vm54_vm2, %v9863_v1 }
 0xee2   :  { %9870 = vmatmul.msk.f32.vlgmr.msrb.gmra.mxu3 %vm54_vm2, %v9863_v1 }
 0xef0   :  { %v7807_v61 = vpop.f32.mrf.mxu1 }
 0xef4   :  { %v7827_v49 = vpop.f32.mrf.mxu2  ;;  %v7787_v63 = vpop.f32.mrf.mxu3 }
 0xef6   :  { %v7873_v47 = vpop.f32.mrf.mxu0 }
 0xef7   :  { %v7874_v14 = vadd.f32 %v7873_v47, %v7727_v54 }
 0xef8   :  { %v7913_v53 = vpop.f32.mrf.mxu1 }
 0xef9   :  { %v7914_v6 = vadd.f32 %v7913_v53, %v7767_v40 }
 0xefc   :  { %v7933_v25 = vpop.f32.mrf.mxu2 }
 0xefd   :  { %v7934_v12 = vadd.f32 %v7933_v25, %v7787_v63  ;;  %v7893_v62 = vpop.f32.mrf.mxu3 }
 0xefe   :  { %v7953_v11 = vpop.f32.mrf.mxu0  ;;  %v7894_v26 = vadd.f32 %v7893_v62, %v7747_v58 }
 0xeff   :  { %v7954_v44 = vadd.f32 %v7953_v11, %v7807_v61 }
 0xf00   :  { %v8021_v3 = vpop.f32.mrf.mxu1 }
 0xf01   :  { %v8124_v4 = vadd.f32 %v8021_v3, %v7874_v14 }
 0xf04   :  { %v8041_v22 = vpop.f32.mrf.mxu2 }
 0xf05   :  { %v7973_v30 = vpop.f32.mrf.mxu3  ;;  %v8125_v0 = vadd.f32 %v8041_v22, %v7894_v26 }
 0xf06   :  { %v7974_v2 = vadd.f32 %v7973_v30, %v7827_v49  ;;  %v8061_v8 = vpop.f32.mrf.mxu0 }
 0xf07   :  { %v8126_v54 = vadd.f32 %v8061_v8, %v7914_v6 }
 0xf09   :  { %v8101_v45 = vpop.f32.mrf.mxu1 }
 0xf0a   :  { %v8128_v37 = vadd.f32 %v8101_v45, %v7954_v44  ;;  %v13841_v45 = vpop.permute.xlu0 %9052 }
 0xf0c   :  { %v8121_v52 = vpop.f32.mrf.mxu2 }
 0xf0d   :  { %v13829_v19 = vadd.f32 %v8121_v52, %v7974_v2  ;;  %v8081_v21 = vpop.f32.mrf.mxu3 }
 0xf0e   :  { %v8127_v7 = vadd.f32 %v8081_v21, %v7934_v12  ;;  %v8192_v51 = vpop.f32.mrf.mxu0 }
 0xf0f   :  { %v8295_v38 = vadd.f32 %v8192_v51, %v8124_v4 }
 0xf11   :  { %v8232_v56 = vpop.f32.mrf.mxu1 }
 0xf12   :  { %v8297_v63 = vadd.f32 %v8232_v56, %v8126_v54 }
 0xf14   :  { %v8252_v20 = vpop.f32.mrf.mxu2 }
 0xf15   :  { %v13831_v57 = vadd.f32 %v8252_v20, %v8127_v7  ;;  %v8212_v50 = vpop.f32.mrf.mxu3 }
 0xf16   :  { %v8272_v43 = vpop.f32.mrf.mxu0  ;;  %v8296_v40 = vadd.f32 %v8212_v50, %v8125_v0 }
 0xf17   :  { %v8299_v14 = vadd.f32 %v8272_v43, %v8128_v37 }
 0xf19   :  { %v8323_v15 = vpop.f32.mrf.mxu1 }
 0xf1a   :  { %v8426_v1 = vadd.f32 %v8323_v15, %v8295_v38 }
 0xf1c   :  { %v8343_v29 = vpop.f32.mrf.mxu2 }
 0xf1d   :  { %v8292_v5 = vpop.f32.mrf.mxu3  ;;  %v8427_v47 = vadd.f32 %v8343_v29, %v8296_v40 }
 0xf1e   :  { %v8363_v59 = vpop.f32.mrf.mxu0  ;;  %v8300_v43 = vadd.f32 %v8292_v5, %v13829_v19 }
 0xf1f   :  { %v8428_v12 = vadd.f32 %v8363_v59, %v8297_v63 }
 0xf21   :  { %v8403_v60 = vpop.f32.mrf.mxu1 }
 0xf22   :  { %v8430_v22 = vadd.f32 %v8403_v60, %v8299_v14 }
 0xf24   :  { %v8423_v41 = vpop.f32.mrf.mxu2 }
 0xf25   :  { %v13833_v33 = vpop.f32.mrf.mxu3 }
 0xf26   :  { %v8477_v42 = vpop.f32.mrf.mxu0 }
 0xf27   :  { %v8580_v61 = vadd.f32 %v8477_v42, %v8426_v1  ;;  %v8431_v42 = vadd.f32 %v8423_v41, %v8300_v43  ;;  %v8429_v41 = vadd.f32 %v13833_v33, %v13831_v57 }
 0xf29   :  { %v8517_v10 = vpop.f32.mrf.mxu1 }
 0xf2a   :  { %v8582_v30 = vadd.f32 %v8517_v10, %v8428_v12 }
 0xf2c   :  { %v13835_v35 = vpop.f32.mrf.mxu2 }
 0xf2d   :  { %v8497_v34 = vpop.f32.mrf.mxu3 }
 0xf2e   :  { %v8557_v46 = vpop.f32.mrf.mxu0  ;;  %v8581_v11 = vadd.f32 %v8497_v34, %v8427_v47 }
 0xf2f   :  { %v8584_v52 = vadd.f32 %v8557_v46, %v8430_v22 }
 0xf31   :  { %v8631_v13 = vpop.f32.mrf.mxu1 }
 0xf32   :  { %v8734_v53 = vadd.f32 %v8631_v13, %v8580_v61 }
 0xf34   :  { %v8651_v39 = vpop.f32.mrf.mxu2 }
 0xf35   :  { %v8577_v55 = vpop.f32.mrf.mxu3  ;;  %v8735_v58 = vadd.f32 %v8651_v39, %v8581_v11 }
 0xf36   :  { %v8671_v36 = vpop.f32.mrf.mxu0  ;;  %v8585_v19 = vadd.f32 %v8577_v55, %v8431_v42 }
 0xf37   :  { %v8736_v6 = vadd.f32 %v8671_v36, %v8582_v30 }
 0xf39   :  { %v8711_v23 = vpop.f32.mrf.mxu1 }
 0xf3a   :  { %v8738_v20 = vadd.f32 %v8711_v23, %v8584_v52 }
 0xf3c   :  { %v8731_v28 = vpop.f32.mrf.mxu2 }
 0xf3d   :  { %v13837_v18 = vpop.f32.mrf.mxu3  ;;  %v8739_v38 = vadd.f32 %v8731_v28, %v8585_v19 }
 0xf3e   :  { %v8785_v32 = vpop.f32.mrf.mxu0 }
 0xf3f   :  { %v8888_v44 = vadd.f32 %v8785_v32, %v8734_v53 }
 0xf41   :  { %v8825_v48 = vpop.f32.mrf.mxu1 }
 0xf42   :  { %v8890_v51 = vadd.f32 %v8825_v48, %v8736_v6  ;;  %v8583_v48 = vadd.f32 %v13835_v35, %v8429_v41 }
 0xf44   :  { %v13839_v49 = vpop.f32.mrf.mxu2  ;;  %v8737_v47 = vadd.f32 %v13837_v18, %v8583_v48 }
 0xf45   :  { %v8805_v3 = vpop.f32.mrf.mxu3 }
 0xf46   :  { %v8865_v25 = vpop.f32.mrf.mxu0  ;;  %v8889_v8 = vadd.f32 %v8805_v3, %v8735_v58  ;;  %v8891_v18 = vadd.f32 %v13839_v49, %v8737_v47 }
 0xf47   :  { %v8892_v59 = vadd.f32 %v8865_v25, %v8738_v20 }
 0xf49   :  { %v8939_v62 = vpop.f32.mrf.mxu1 }
 0xf4a   :  { %v9042_v2 = vadd.f32 %v8939_v62, %v8888_v44 }
 0xf4c   :  { %v13844_v21 = vadd.f32 %v13841_v45, %v9042_v2  ;;  %v8959_v7 = vpop.f32.mrf.mxu2 }
 0xf4d   :  { %v9043_v56 = vadd.f32 %v8959_v7, %v8889_v8  ;;  %v8885_v32 = vpop.f32.mrf.mxu3 }
 0xf4e   :  { %v13847_v37 = vmul.f32 0.70710677, %v13844_v21  ;;  %v8979_v50 = vpop.f32.mrf.mxu0  ;;  %v8893_v61 = vadd.f32 %v8885_v32, %v8739_v38 }
 0xf4f   :  { %v13851_v15 = vadd.f32 %v13841_v45, %v9043_v56  ;;  %v9044_v29 = vadd.f32 %v8979_v50, %v8890_v51 }
 0xf50   :  { %v9073_v60 = vmul.f32 %v13847_v37, %v13847_v37 }
 0xf51   :  { %v13856_v10 = vmul.f32 0.70710677, %v13851_v15  ;;  %v13859_v34 = vadd.f32 %v13841_v45, %v9044_v29  ;;  %v9019_v46 = vpop.f32.mrf.mxu1 }
 0xf52   :  { %v13861_v13 = vmin.f32 %v9073_v60, 16.0  ;;  %v9046_v39 = vadd.f32 %v9019_v46, %v8892_v59 }
 0xf53   :  { %v9113_v5 = vmul.f32 %v13856_v10, %v13856_v10  ;;  %v13866_v36 = vmul.f32 0.70710677, %v13859_v34 }
 0xf54   :  { %v9075_v23 = vmul.f32 2.1237322e-06, %v13861_v13  ;;  %v9086_v4 = vmul.f32 3.8918573e-05, %v13861_v13  ;;  %v13873_v26 = vadd.f32 %v13841_v45, %v9046_v39  ;;  %v9039_v40 = vpop.f32.mrf.mxu2 }
 0xf55   :  { %v13875_v0 = vmin.f32 %v9113_v5, 16.0  ;;  %v9153_v55 = vmul.f32 %v13866_v36, %v13866_v36  ;;  %v9047_v14 = vadd.f32 %v9039_v40, %v8893_v61 }
 0xf56   :  { %v9076_v1 = vadd.f32 0.00028619796, %v9075_v23  ;;  %v9087_v54 = vadd.f32 0.001143296, %v9086_v4  ;;  %v13888_v25 = vmul.f32 0.70710677, %v13873_v26 }
 0xf57   :  { %v9115_v57 = vmul.f32 2.1237322e-06, %v13875_v0  ;;  %v9126_v33 = vmul.f32 3.8918573e-05, %v13875_v0  ;;  %v13882_v63 = vmin.f32 %v9153_v55, 16.0  ;;  %v13903_v50 = vadd.f32 %v13841_v45, %v9047_v14 }
 0xf58   :  { %v9077_v28 = vmul.f32 %v9076_v1, %v13861_v13  ;;  %v9088_v53 = vmul.f32 %v9087_v54, %v13861_v13  ;;  %v9233_v58 = vmul.f32 %v13888_v25, %v13888_v25 }
 0xf59   :  { %v9116_v35 = vadd.f32 0.00028619796, %v9115_v57  ;;  %v9127_v12 = vadd.f32 0.001143296, %v9126_v33  ;;  %v9155_v11 = vmul.f32 2.1237322e-06, %v13882_v63 }
 0xf5a   :  { %v9078_v44 = vadd.f32 0.0036580483, %v9077_v28  ;;  %v9089_v3 = vadd.f32 0.014752088, %v9088_v53  ;;  %v9166_v30 = vmul.f32 3.8918573e-05, %v13882_v63 }
 0xf5b   :  { %v9117_v62 = vmul.f32 %v9116_v35, %v13875_v0  ;;  %v9128_v22 = vmul.f32 %v9127_v12, %v13875_v0  ;;  %v9156_v2 = vadd.f32 0.00028619796, %v9155_v11  ;;  %v13899_v7 = vmin.f32 %v9233_v58, 16.0 }
 0xf5c   :  { %v9079_v6 = vmul.f32 %v9078_v44, %v13861_v13  ;;  %v9090_v8 = vmul.f32 %v9089_v3, %v13861_v13  ;;  %v9167_v52 = vadd.f32 0.001143296, %v9166_v30  ;;  %v13920_v12 = vmul.f32 0.70710677, %v13903_v50  ;;  %v8999_v30 = vpop.f32.mrf.mxu3 }
 0xf5d   :  { %v9118_v51 = vadd.f32 0.0036580483, %v9117_v62  ;;  %v9129_v56 = vadd.f32 0.014752088, %v9128_v22  ;;  %v9157_v20 = vmul.f32 %v9156_v2, %v13882_v63  ;;  %v9235_v59 = vmul.f32 2.1237322e-06, %v13899_v7 }
 0xf5e   :  { %v9080_v49 = vadd.f32 0.05243302, %v9079_v6  ;;  %v9091_v43 = vadd.f32 0.112945676, %v9090_v8  ;;  %v9168_v29 = vmul.f32 %v9167_v52, %v13882_v63  ;;  %v9246_v39 = vmul.f32 3.8918573e-05, %v13899_v7 }
 0xf5f   :  { %v9119_v60 = vmul.f32 %v9118_v51, %v13875_v0  ;;  %v9130_v42 = vmul.f32 %v9129_v56, %v13875_v0  ;;  %v9158_v46 = vadd.f32 0.0036580483, %v9157_v20  ;;  %v9236_v23 = vadd.f32 0.00028619796, %v9235_v59  ;;  %v9360_v59 = vpop.f32.mrf.mxu0 }
 0xf60   :  { %v9081_v19 = vmul.f32 %v9080_v49, %v13861_v13  ;;  %v9092_v5 = vmul.f32 %v9091_v43, %v13861_v13  ;;  %v9169_v41 = vadd.f32 0.014752088, %v9168_v29  ;;  %v9247_v55 = vadd.f32 0.001143296, %v9246_v39 }
 0xf61   :  { %v9120_v4 = vadd.f32 0.05243302, %v9119_v60  ;;  %v9131_v32 = vadd.f32 0.112945676, %v9130_v42  ;;  %v9159_v38 = vmul.f32 %v9158_v46, %v13882_v63  ;;  %v9237_v40 = vmul.f32 %v9236_v23, %v13899_v7 }
 0xf62   :  { %v9082_v48 = vadd.f32 0.18741608, %v9081_v19  ;;  %v9093_v1 = vadd.f32 0.4994258, %v9092_v5  ;;  %v9170_v54 = vmul.f32 %v9169_v41, %v13882_v63  ;;  %v9248_v47 = vmul.f32 %v9247_v55, %v13899_v7 }
 0xf63   :  { %v9121_v57 = vmul.f32 %v9120_v4, %v13875_v0  ;;  %v9132_v33 = vmul.f32 %v9131_v32, %v13875_v0  ;;  %v9160_v61 = vadd.f32 0.05243302, %v9159_v38  ;;  %v9238_v35 = vadd.f32 0.0036580483, %v9237_v40 }
 0xf64   :  { %v9094_v28 = vmul.f32 %v9093_v1, %v13861_v13  ;;  %v9171_v53 = vadd.f32 0.112945676, %v9170_v54  ;;  %v9083_v11 = vmul.f32 %v9082_v48, %v13861_v13  ;;  %v9249_v3 = vadd.f32 0.014752088, %v9248_v47 }
 0xf65   :  { %v9122_v14 = vadd.f32 0.18741608, %v9121_v57  ;;  %v9133_v44 = vadd.f32 0.4994258, %v9132_v33  ;;  %v9161_v62 = vmul.f32 %v9160_v61, %v13882_v63  ;;  %v9239_v2 = vmul.f32 %v9238_v35, %v13899_v7 }
 0xf66   :  { %v13923_v58 = vadd.f32 1.0, %v9094_v28  ;;  %v9172_v22 = vmul.f32 %v9171_v53, %v13882_v63  ;;  %v9045_v8 = vadd.f32 %v8999_v30, %v8891_v18  ;;  %v9084_v52 = vadd.f32 1.1283791, %v9083_v11  ;;  %v13946_v18 = vpop.permute.xlu1 %9337 }
 0xf67   :  { %v9134_v6 = vmul.f32 %v9133_v44, %v13875_v0  ;;  %v9123_v13 = vmul.f32 %v9122_v14, %v13875_v0  ;;  %v9250_v56 = vmul.f32 %v9249_v3, %v13899_v7  ;;  %v9162_v20 = vadd.f32 0.18741608, %v9161_v62 }
 0xf68   :  { %10444 = vrcp.f32 %v13923_v58  ;;  %v9173_v49 = vadd.f32 0.4994258, %v9172_v22  ;;  %v9240_v43 = vadd.f32 0.05243302, %v9239_v2  ;;  %v9273_v29 = vmul.f32 %v13920_v12, %v13920_v12 }
 0xf69   :  { %v13931_v51 = vadd.f32 1.0, %v9134_v6  ;;  %v13937_v60 = vmul.f32 0.5, %v13844_v21  ;;  %v13940_v42 = vmul.f32 0.5, %v13851_v15  ;;  %v13944_v0 = vmul.f32 0.5, %v13859_v34 }
 0xf6a   :  { %v9105_v46 = vand.u32 2147483647, %v13923_v58  ;;  %v9107_v39 = vand.u32 2147483648, %v13923_v58  ;;  %v9174_v19 = vmul.f32 %v9173_v49, %v13882_v63  ;;  %v13952_v5 = vadd.f32 %v13841_v45, %v9045_v8 }
 0xf6b   :  { %10446 = vrcp.f32 %v13931_v51  ;;  %v9124_v21 = vadd.f32 1.1283791, %v9123_v13  ;;  %v9241_v15 = vmul.f32 %v9240_v43, %v13899_v7  ;;  %v9251_v41 = vadd.f32 0.112945676, %v9250_v56 }
 0xf6c   :  { %v13956_v23 = vadd.f32 %v9360_v59, %v13946_v18  ;;  %v9085_v4 = vmul.f32 %v9084_v52, %v13847_v37  ;;  %v9163_v32 = vmul.f32 %v9162_v20, %v13882_v63  ;;  %v13960_v38 = vadd.f32 1.0, %v9174_v19 }
 0xf6d   :  { %v13962_v55 = vmin.f32 %v9273_v29, 16.0  ;;  %vm9101_vm6 = vweird.f32 %v13923_v58  ;;  %v9145_v45 = vand.u32 2147483647, %v13931_v51  ;;  %v9252_v1 = vmul.f32 %v9251_v41, %v13899_v7 }
 0xf6e   :  { %v10445_v34 = vpop.eup %10444  ;;  %vm13968_vm4 = vcmp.eq.f32.partialorder %v9105_v46, 8.507059e+37  ;;  %v9108_v40 = vor.u32 1.1754944e-38, %v9107_v39  ;;  %v9147_v37 = vand.u32 2147483648, %v13931_v51  ;;  %10448 = vrcp.f32 %v13960_v38 }
 0xf6f   :  { %v9097_v48 = vmul.f32 %v10445_v34, %v13923_v58  ;;  %v9125_v33 = vmul.f32 %v9124_v21, %v13856_v10  ;;  %v9242_v61 = vadd.f32 0.18741608, %v9241_v15  ;;  %v9253_v47 = vadd.f32 0.4994258, %v9252_v1 }
 0xf70   :  { %vm9141_vm7 = vweird.f32 %v13931_v51  ;;  %v9164_v53 = vadd.f32 1.1283791, %v9163_v32  ;;  %v9275_v35 = vmul.f32 2.1237322e-06, %v13962_v55  ;;  %vm9102_vm13 = vweird.f32 %v10445_v34 }
 0xf71   :  { %v10447_v63 = vpop.eup %10446  ;;  %v9098_v57 = vsub.f32 1.0, %v9097_v48  ;;  %vm13978_vm14 = vcmp.eq.f32.partialorder %v9145_v45, 8.507059e+37  ;;  %v9254_v44 = vmul.f32 %v9253_v47, %v13899_v7  ;;  %v9148_v30 = vor.u32 1.1754944e-38, %v9147_v37  ;;  %vm9103_vm0 = vmor %vm9101_vm6, %vm9102_vm13 }
 0xf72   :  { %v9137_v28 = vmul.f32 %v10447_v63, %v13931_v51  ;;  %v9286_v10 = vmul.f32 3.8918573e-05, %v13962_v55  ;;  %v13985_v62 = vmul.f32 0.70710677, %v13952_v5  ;;  %vm9142_vm15 = vweird.f32 %v10447_v63 }
 0xf73   :  { %v9099_v11 = vmul.f32 %v10445_v34, %v9098_v57  ;;  %v9243_v2 = vmul.f32 %v9242_v61, %v13899_v7  ;;  %v13988_v6 = vadd.f32 1.0, %v9254_v44  ;;  %v9276_v13 = vadd.f32 0.00028619796, %v9275_v35  ;;  %vm9143_vm1 = vmor %vm9141_vm7, %vm9142_vm15 }
 0xf74   :  { %v9138_v3 = vsub.f32 1.0, %v9137_v28  ;;  %v10449_v8 = vpop.eup %10448  ;;  %v9287_v56 = vadd.f32 0.001143296, %v9286_v10  ;;  %v9193_v20 = vmul.f32 %v13985_v62, %v13985_v62  ;;  %v9165_v43 = vmul.f32 %v9164_v53, %v13866_v36 }
 0xf75   :  { %v9100_v22 = vadd.f32 %v10445_v34, %v9099_v11  ;;  %v9177_v29 = vmul.f32 %v10449_v8, %v13960_v38  ;;  %10450 = vrcp.f32 %v13988_v6  ;;  %v9185_v58 = vand.u32 2147483647, %v13960_v38 }
 0xf76   :  { %v9139_v52 = vmul.f32 %v10447_v63, %v9138_v3  ;;  %v9187_v46 = vand.u32 2147483648, %v13960_v38  ;;  %vm9181_vm11 = vweird.f32 %v13960_v38  ;;  %v9244_v36 = vadd.f32 1.1283791, %v9243_v2 }
 0xf77   :  { %v9104_v49 = vsel %vm9103_vm0, %v10445_v34, %v9100_v22  ;;  %v9178_v19 = vsub.f32 1.0, %v9177_v29  ;;  %v9277_v15 = vmul.f32 %v9276_v13, %v13962_v55  ;;  %v9288_v41 = vmul.f32 %v9287_v56, %v13962_v55  ;;  %v9400_v29 = vpop.f32.mrf.mxu1 }
 0xf78   :  { %v9109_v7 = vsel %vm13968_vm4, %v9108_v40, %v9104_v49  ;;  %v9140_v59 = vadd.f32 %v10447_v63, %v9139_v52  ;;  %v14007_v34 = vmin.f32 %v9193_v20, 16.0  ;;  %vm9182_vm10 = vweird.f32 %v10449_v8 }
 0xf79   :  { %v9110_v39 = vmul.f32 %v9109_v7, %v9085_v4  ;;  %v9179_v4 = vmul.f32 %v10449_v8, %v9178_v19  ;;  %vm14011_vm5 = vcmp.eq.f32.partialorder %v9185_v58, 8.507059e+37  ;;  %v9188_v45 = vor.u32 1.1754944e-38, %v9187_v46  ;;  %vm9183_vm12 = vmor %vm9181_vm11, %vm9182_vm10 }
 0xf7a   :  { %v9144_v21 = vsel %vm9143_vm1, %v10447_v63, %v9140_v59  ;;  %v9289_v1 = vadd.f32 0.014752088, %v9288_v41  ;;  %v9195_v54 = vmul.f32 2.1237322e-06, %v14007_v34  ;;  %v9206_v61 = vmul.f32 3.8918573e-05, %v14007_v34 }
 0xf7b   :  { %v9857_v32 = vclamps-f32 %v9110_v39, 1.0  ;;  %v9149_v48 = vsel %vm13978_vm14, %v9148_v30, %v9144_v21  ;;  %v10451_v40 = vpop.eup %10450  ;;  %v9180_v57 = vadd.f32 %v10449_v8, %v9179_v4  ;;  %v9245_v47 = vmul.f32 %v9244_v36, %v13888_v25 }
 0xf7c   :  { %v9150_v63 = vmul.f32 %v9149_v48, %v9125_v33  ;;  %v9257_v28 = vmul.f32 %v10451_v40, %v13988_v6  ;;  %v9278_v53 = vadd.f32 0.0036580483, %v9277_v15  ;;  %v9463_v35 = vmul.f32 %v13956_v23, %v13490_v27  ;;  %v9380_v15 = vpop.f32.mrf.mxu3 }
 0xf7d   :  { %v9313_v37 = vadd.f32 1.0, %v9857_v32  ;;  %v9184_v14 = vsel %vm9183_vm12, %v10449_v8, %v9180_v57  ;;  %v9290_v44 = vmul.f32 %v9289_v1, %v13962_v55  ;;  %v9196_v33 = vadd.f32 0.00028619796, %v9195_v54 }
 0xf7e   :  { %v9189_v3 = vsel %vm14011_vm5, %v9188_v45, %v9184_v14  ;;  %v9258_v30 = vsub.f32 1.0, %v9257_v28  ;;  %v9265_v38 = vand.u32 2147483647, %v13988_v6  ;;  %v9267_v25 = vand.u32 2147483648, %v13988_v6 }
 0xf7f   :  { %v9319_v11 = vmul.f32 %v9313_v37, %v13937_v60  ;;  %v9858_v10 = vclamps-f32 %v9150_v63, 1.0  ;;  %v9190_v22 = vmul.f32 %v9189_v3, %v9165_v43  ;;  %v9291_v2 = vadd.f32 0.112945676, %v9290_v44 }
 0xf80   :  { %v9207_v52 = vadd.f32 0.001143296, %v9206_v61  ;;  %v9259_v13 = vmul.f32 %v10451_v40, %v9258_v30  ;;  %vm9262_vm8 = vweird.f32 %v10451_v40  ;;  %v9279_v60 = vmul.f32 %v9278_v53, %v13962_v55  ;;  %v9440_v61 = vpop.f32.mrf.mxu0 }
 0xf81   :  { %v9325_v23 = vmul.f32 %v9319_v11, %v13490_v27  ;;  %v9859_v8 = vclamps-f32 %v9190_v22, 1.0  ;;  %v9292_v56 = vmul.f32 %v9291_v2, %v13962_v55  ;;  %v9197_v20 = vmul.f32 %v9196_v33, %v14007_v34 }
 0xf82   :  { %v9208_v49 = vmul.f32 %v9207_v52, %v14007_v34  ;;  %v9260_v7 = vadd.f32 %v10451_v40, %v9259_v13  ;;  %vm9261_vm9 = vweird.f32 %v13988_v6  ;;  %v9268_v43 = vor.u32 1.1754944e-38, %v9267_v25 }
 0xf83   :  { %v9469_v59 = vadd.f32 %v9463_v35, %v9325_v23  ;;  %v9314_v58 = vadd.f32 1.0, %v9858_v10  ;;  %v9315_v46 = vadd.f32 1.0, %v9859_v8  ;;  %vm9263_vm3 = vmor %vm9261_vm9, %vm9262_vm8  ;;  %v9293_v39 = vadd.f32 0.4994258, %v9292_v56 }
 0xf84   :  { %v9209_v19 = vadd.f32 0.014752088, %v9208_v49  ;;  %v9264_v27 = vsel %vm9263_vm3, %v10451_v40, %v9260_v7  ;;  %vm9266_vm6 = vcmp.eq.f32.partialorder %v9265_v38, 8.507059e+37  ;;  %v9280_v36 = vadd.f32 0.05243302, %v9279_v60 }
 0xf85   :  { %9475 = vst [vmem:[%s14100_s14] sm:$0xff] %v9469_v59  ;;  %v9401_v21 = vadd.f32 %v9400_v29, %v13946_v18  ;;  %v9321_v6 = vmul.f32 %v9315_v46, %v13944_v0  ;;  %v9269_v41 = vsel %vm9266_vm6, %v9268_v43, %v9264_v27  ;;  %v9294_v32 = vmul.f32 %v9293_v39, %v13962_v55 }
 0xf86   :  { %v9198_v48 = vadd.f32 0.0036580483, %v9197_v20  ;;  %v9270_v4 = vmul.f32 %v9269_v41, %v9245_v47  ;;  %v9210_v51 = vmul.f32 %v9209_v19, %v14007_v34  ;;  %v9320_v45 = vmul.f32 %v9314_v58, %v13940_v42 }
 0xf87   :  { %v9295_v1 = vadd.f32 1.0, %v9294_v32  ;;  %v9327_v54 = vmul.f32 %v9321_v6, %v13575_v16  ;;  %v9381_v40 = vadd.f32 %v9380_v15, %v13946_v18  ;;  %v9281_v63 = vmul.f32 %v9280_v36, %v13962_v55  ;;  %v9460_v36 = vpop.f32.mrf.mxu3 }
 0xf88   :  { %v9861_v37 = vclamps-f32 %v9270_v4, 1.0  ;;  %v9211_v57 = vadd.f32 0.112945676, %v9210_v51  ;;  %v9465_v0 = vmul.f32 %v9401_v21, %v13575_v16  ;;  %v9199_v28 = vmul.f32 %v9198_v48, %v14007_v34 }
 0xf89   :  { %10452 = vrcp.f32 %v9295_v1  ;;  %v9065_v47 = vmul.f32 0.5, %v13873_v26  ;;  %v9326_v11 = vmul.f32 %v9320_v45, %v13566_v24  ;;  %v9464_v14 = vmul.f32 %v9381_v40, %v13566_v24 }
 0xf8a   :  { %v9317_v53 = vadd.f32 1.0, %v9861_v37  ;;  %v9212_v42 = vmul.f32 %v9211_v57, %v14007_v34  ;;  %v9471_v35 = vadd.f32 %v9465_v0, %v9327_v54  ;;  %v9441_v44 = vadd.f32 %v9440_v61, %v13946_v18  ;;  %v9420_v0 = vpop.f32.mrf.mxu2 }
 0xf8b   :  { %v9282_v3 = vadd.f32 0.18741608, %v9281_v63  ;;  %v9200_v16 = vadd.f32 0.05243302, %v9199_v28  ;;  %v9470_v38 = vadd.f32 %v9464_v14, %v9326_v11  ;;  %v9307_v8 = vand.u32 2147483648, %v9295_v1 }
 0xf8c   :  { %v9323_v33 = vmul.f32 %v9317_v53, %v9065_v47  ;;  %v9213_v30 = vadd.f32 0.4994258, %v9212_v42  ;;  %9477 = vst [vmem:[%s14100_s14 + $0x10] sm:$0xff] %v9471_v35  ;;  %v9467_v10 = vmul.f32 %v9441_v44, %v13616_v31  ;;  %v9305_v49 = vand.u32 2147483647, %v9295_v1 }
 0xf8d   :  { %9476 = vst [vmem:[%s14100_s14 + $0x8] sm:$0xff] %v9470_v38  ;;  %v9283_v22 = vmul.f32 %v9282_v3, %v13962_v55  ;;  %v9201_v13 = vmul.f32 %v9200_v16, %v14007_v34  ;;  %vm9301_vm7 = vweird.f32 %v9295_v1  ;;  %v9308_v55 = vor.u32 1.1754944e-38, %v9307_v8 }
 0xf8e   :  { %v9214_v26 = vmul.f32 %v9213_v30, %v14007_v34  ;;  %v9329_v24 = vmul.f32 %v9323_v33, %v13616_v31  ;;  %vm9306_vm14 = vcmp.eq.f32.partialorder %v9305_v49, 8.507059e+37  ;;  %v9066_v48 = vmul.f32 0.5, %v13903_v50 }
 0xf8f   :  { %v10453_v25 = vpop.eup %10452  ;;  %v9284_v56 = vadd.f32 1.1283791, %v9283_v22  ;;  %v9202_v29 = vadd.f32 0.18741608, %v9201_v13  ;;  %v9064_v28 = vmul.f32 0.5, %v13952_v5 }
 0xf90   :  { %v9297_v2 = vmul.f32 %v10453_v25, %v9295_v1  ;;  %v9215_v52 = vadd.f32 1.0, %v9214_v26  ;;  %v9473_v60 = vadd.f32 %v9467_v10, %v9329_v24  ;;  %vm9302_vm4 = vweird.f32 %v10453_v25 }
 0xf91   :  { %vm9303_vm13 = vmor %vm9301_vm7, %vm9302_vm4  ;;  %v9285_v43 = vmul.f32 %v9284_v56, %v13920_v12  ;;  %v9203_v46 = vmul.f32 %v9202_v29, %v14007_v34  ;;  %v9461_v12 = vadd.f32 %v9460_v36, %v13946_v18 }
 0xf92   :  { %v9298_v23 = vsub.f32 1.0, %v9297_v2  ;;  %10454 = vrcp.f32 %v9215_v52  ;;  %9479 = vst [vmem:[%s14100_s14 + $0x20] sm:$0xff] %v9473_v60  ;;  %v9227_v15 = vand.u32 2147483648, %v9215_v52  ;;  %v9225_v32 = vand.u32 2147483647, %v9215_v52 }
 0xf93   :  { %v9204_v6 = vadd.f32 1.1283791, %v9203_v46  ;;  %vm9221_vm0 = vweird.f32 %v9215_v52  ;;  %v9468_v63 = vmul.f32 %v9461_v12, %v13631_v9 }
 0xf94   :  { %v9299_v20 = vmul.f32 %v10453_v25, %v9298_v23  ;;  %v9228_v34 = vor.u32 1.1754944e-38, %v9227_v15  ;;  %vm9226_vm11 = vcmp.eq.f32.partialorder %v9225_v32, 8.507059e+37 }
 0xf95   :  { %v9205_v1 = vmul.f32 %v9204_v6, %v13985_v62  ;;  %v9421_v62 = vadd.f32 %v9420_v0, %v13946_v18 }
 0xf96   :  { %v9300_v31 = vadd.f32 %v10453_v25, %v9299_v20 }
 0xf97   :  { %v9466_v35 = vmul.f32 %v9421_v62, %v13636_v17 }
 0xf98   :  { %v10455_v7 = vpop.eup %10454  ;;  %v9304_v59 = vsel %vm9303_vm13, %v10453_v25, %v9300_v31 }
 0xf99   :  { %v9309_v58 = vsel %vm9306_vm14, %v9308_v55, %v9304_v59  ;;  %v9217_v39 = vmul.f32 %v10455_v7, %v9215_v52  ;;  %vm9222_vm15 = vweird.f32 %v10455_v7 }
 0xf9a   :  { %v9310_v19 = vmul.f32 %v9309_v58, %v9285_v43  ;;  %vm9223_vm1 = vmor %vm9221_vm0, %vm9222_vm15 }
 0xf9b   :  { %v9218_v27 = vsub.f32 1.0, %v9217_v39 }
 0xf9c   :  { %v9862_v21 = vclamps-f32 %v9310_v19, 1.0 }
 0xf9d   :  { %v9219_v41 = vmul.f32 %v10455_v7, %v9218_v27 }
 0xf9e   :  { %v9318_v4 = vadd.f32 1.0, %v9862_v21 }
 0xf9f   :  { %v9220_v51 = vadd.f32 %v10455_v7, %v9219_v41 }
 0xfa0   :  { %v9324_v45 = vmul.f32 %v9318_v4, %v9066_v48 }
 0xfa1   :  { %v9224_v54 = vsel %vm9223_vm1, %v10455_v7, %v9220_v51 }
 0xfa2   :  { %v9229_v40 = vsel %vm9226_vm11, %v9228_v34, %v9224_v54  ;;  %v9330_v37 = vmul.f32 %v9324_v45, %v13631_v9 }
 0xfa3   :  { %v9230_v57 = vmul.f32 %v9229_v40, %v9205_v1 }
 0xfa4   :  { %v9474_v50 = vadd.f32 %v9468_v63, %v9330_v37 }
 0xfa5   :  { %v9860_v61 = vclamps-f32 %v9230_v57, 1.0 }
 0xfa6   :  { %9480 = vst.msk [vmem:[%s14100_s14 + $0x28] sm:$0xff] %vm54_vm2, %v9474_v50 }
 0xfa7   :  { %v9316_v47 = vadd.f32 1.0, %v9860_v61 }
 0xfa9   :  { %v9322_v53 = vmul.f32 %v9316_v47, %v9064_v28 }
 0xfab   :  { %v9328_v42 = vmul.f32 %v9322_v53, %v13636_v17 }
 0xfad   :  { %v9472_v9 = vadd.f32 %v9466_v35, %v9328_v42 }
 0xfaf   :  { %9478 = vst [vmem:[%s14100_s14 + $0x18] sm:$0xff] %v9472_v9 }

</bundles_post_ra>
